<compile_context>
chip_gen: v5e
topology: v5e:2x2
jax: 0.10.0
libtpu: 0.0.40
codegen_flags: <defaults>
</compile_context>

<pallas_src>
import functools

import jax
import jax.numpy as jnp
from jax.experimental import pallas as pl
from jax.experimental.pallas import tpu as pltpu


# ----------------------------- Pallas kernels ------------------------------

def linear_kernel(z_ref, w_ref, b_ref, o_ref):
    # z: (B, Z), w: (Z, F), b: (1, F), o: (B, F)
    acc = jnp.dot(z_ref[...], w_ref[...], preferred_element_type=jnp.float32)
    o_ref[...] = (acc + b_ref[0, :][None, :]).astype(o_ref.dtype)


def fused_block_kernel(x_ref, scale_ref, shift_ref, w_ref, b_ref,
                       y_ref, stats_ref, pa_ref, *,
                       R, W, Cin, Cout, pre_act, post_act, multi_tile):
    """Fused: prev-layer BN-apply (+LeakyReLU) -> zero pad -> 3x3 conv -> bias
    (-> tanh) -> write conv output tile + per-channel [sum, sumsq].

    x_ref:     (H, W, Cin)   raw (pre-activation) packed input, full array.
    scale/shift_ref: (1, Cin)  per packed-channel affine of the previous BN.
    w_ref:     (3, 3, Cin, Cout)  packed block-diagonal weights.
    b_ref:     (1, Cout)
    y_ref:     (R, W, Cout)   output row tile.
    stats_ref: (1, 2, Cout)   per-tile partial [sum, sum of squares].
    pa_ref:    VMEM scratch (R+2, W+2, Cin): padded, activated input rows.
    """
    i = pl.program_id(0)
    r0 = i * R
    scale = scale_ref[0, :]
    shift = shift_ref[0, :]

    def act_in(v):
        a = v * scale + shift
        if pre_act == "leaky":
            a = jnp.where(a >= 0, a, 0.2 * a)
        return a

    # Zero scratch: covers the 1-pixel zero border and the halo rows at the
    # image boundary (no stale VMEM is ever read).
    pa_ref[...] = jnp.zeros_like(pa_ref)
    # Interior rows of this tile.
    pa_ref[1:R + 1, 1:W + 1, :] = act_in(x_ref[pl.ds(r0, R), :, :])
    if multi_tile:
        # Halo rows (recomputed activation on 1 row each -- negligible).
        @pl.when(i > 0)
        def _():
            pa_ref[0, 1:W + 1, :] = act_in(x_ref[r0 - 1, :, :])

        @pl.when(i < pl.num_programs(0) - 1)
        def _():
            pa_ref[R + 1, 1:W + 1, :] = act_in(x_ref[r0 + R, :, :])

    # 3x3 same-padding conv: 9 accumulated MXU matmuls, acc <= (128, Cout).
    acc = jnp.zeros((R * W, Cout), jnp.float32)
    for dy in range(3):
        for dx in range(3):
            xs = pa_ref[dy:dy + R, dx:dx + W, :].reshape(R * W, Cin)
            acc = acc + jnp.dot(xs, w_ref[dy, dx],
                                preferred_element_type=jnp.float32)
    acc = acc + b_ref[0, :][None, :]
    if post_act == "tanh":
        acc = jnp.tanh(acc)

    y_ref[...] = acc.reshape(R, W, Cout)
    s1 = jnp.sum(acc, axis=0, keepdims=True)           # (1, Cout)
    s2 = jnp.sum(acc * acc, axis=0, keepdims=True)     # (1, Cout)
    stats_ref[...] = jnp.concatenate([s1, s2], axis=0).reshape(1, 2, Cout)


# ------------------------------ wrappers ------------------------------------

def linear(z, w, b):
    B, Z = z.shape
    F = w.shape[1]
    return pl.pallas_call(
        linear_kernel,
        out_shape=jax.ShapeDtypeStruct((B, F), jnp.float32),
        grid=(1,),
        in_specs=[pl.BlockSpec((B, Z), lambda i: (0, 0)),
                  pl.BlockSpec((Z, F), lambda i: (0, 0)),
                  pl.BlockSpec((1, F), lambda i: (0, 0))],
        out_specs=pl.BlockSpec((B, F), lambda i: (0, 0)),
    )(z, w, b.reshape(1, F))


def fused_conv_block(x, scale, shift, w_packed, b_packed, *, pre_act, post_act):
    """x: (H, W, Cin) packed NHWC (batch folded into lanes), raw prev output.
    Returns (conv_out (H, W, Cout), stats (num_tiles, 2, Cout))."""
    H, W, Cin = x.shape
    Cout = w_packed.shape[-1]
    # Row tile: keep the accumulator (R*W, Cout) at <= 128 rows (<= 16 vregs).
    R = min(H, max(1, 128 // W))
    while H % R:
        R -= 1
    nt = H // R

    kern = functools.partial(
        fused_block_kernel, R=R, W=W, Cin=Cin, Cout=Cout,
        pre_act=pre_act, post_act=post_act, multi_tile=(nt > 1))

    y, stats = pl.pallas_call(
        kern,
        out_shape=(jax.ShapeDtypeStruct((H, W, Cout), jnp.float32),
                   jax.ShapeDtypeStruct((nt, 2, Cout), jnp.float32)),
        grid=(nt,),
        in_specs=[pl.BlockSpec((H, W, Cin), lambda i: (0, 0, 0)),   # resident
                  pl.BlockSpec((1, Cin), lambda i: (0, 0)),
                  pl.BlockSpec((1, Cin), lambda i: (0, 0)),
                  pl.BlockSpec((3, 3, Cin, Cout), lambda i: (0, 0, 0, 0)),
                  pl.BlockSpec((1, Cout), lambda i: (0, 0))],
        out_specs=(pl.BlockSpec((R, W, Cout), lambda i: (i, 0, 0)),
                   pl.BlockSpec((1, 2, Cout), lambda i: (i, 0, 0))),
        scratch_shapes=[pltpu.VMEM((R + 2, W + 2, Cin), jnp.float32)],
        compiler_params=pltpu.CompilerParams(
            dimension_semantics=("parallel",)),
    )(x, scale.reshape(1, Cin), shift.reshape(1, Cin), w_packed,
      b_packed.reshape(1, Cout))
    return y, stats


# ------------------------- glue (tiny XLA helpers) ---------------------------

def pack_weights(w, B):
    # (3, 3, Cin, Cout) -> block-diagonal (3, 3, B*Cin, B*Cout)
    kh, kw, ci, co = w.shape
    wp = jnp.zeros((kh, kw, B * ci, B * co), w.dtype)
    for b in range(B):
        wp = wp.at[:, :, b * ci:(b + 1) * ci, b * co:(b + 1) * co].set(w)
    return wp


def upsample2(x):
    # nearest-neighbour 2x on packed (H, W, Cp) -- matches F.interpolate(x2)
    return jnp.repeat(jnp.repeat(x, 2, axis=0), 2, axis=1)


def bn_scale_shift_from_stats(stats, gamma, beta, eps, B, count):
    # stats: (nt, 2, B*C) partial [sum, sumsq] over the packed conv output.
    s = jnp.sum(stats, axis=0)                      # (2, B*C)
    C = gamma.shape[0]
    sum1 = s[0].reshape(B, C).sum(0)
    sum2 = s[1].reshape(B, C).sum(0)
    mean = sum1 / count
    var = sum2 / count - mean * mean                # biased batch variance
    scale = gamma * jax.lax.rsqrt(var + eps)
    shift = beta - mean * scale
    return jnp.tile(scale, B), jnp.tile(shift, B)


# ------------------------------ forward -------------------------------------

def generator_big_forward(z, params, *, init_size, in_channel):
    B = z.shape[0]
    C = 64

    # l1: Linear(zdim, 64*init^2)  (Pallas MXU matmul)
    lin = linear(z, params["l1_w"], params["l1_b"])          # (B, 64*init^2)
    x0 = lin.reshape(B, C, init_size, init_size)             # like .view (NCHW)
    # pack batch into lanes: (init, init, B*64), packed channel = b*64 + c
    xp = jnp.transpose(x0, (2, 3, 0, 1)).reshape(init_size, init_size, B * C)

    # conv_blocks0: BatchNorm2d(64), eps=1e-5, batch stats (tiny -> XLA glue).
    xr = xp.reshape(init_size * init_size, B, C)
    m0 = jnp.mean(xr, axis=(0, 1))
    v0 = jnp.mean(jnp.square(xr - m0), axis=(0, 1))
    s0 = params["bn0_g"] * jax.lax.rsqrt(v0 + 1e-5)
    t0 = params["bn0_b"] - m0 * s0
    scale_p, shift_p = jnp.tile(s0, B), jnp.tile(t0, B)

    # conv_blocks1..5: upsample x2 -> [BN-apply(+leaky) + pad + conv + stats]
    y = xp
    pre_act = "none"                      # BN0 has no LeakyReLU after it
    for i in range(1, 6):
        u = upsample2(y)                  # replication commutes with BN/leaky
        wp = pack_weights(params[f"conv{i}_w"], B)
        bp = jnp.tile(params[f"conv{i}_b"], B)
        y, stats = fused_conv_block(u, scale_p, shift_p, wp, bp,
                                    pre_act=pre_act, post_act="none")
        count = B * u.shape[0] * u.shape[1]
        scale_p, shift_p = bn_scale_shift_from_stats(
            stats, params[f"bn{i}_g"], params[f"bn{i}_b"], 0.8, B, count)
        pre_act = "leaky"

    # conv_blocks6: [BN5-apply + leaky + pad + conv + tanh + stats] in Pallas,
    # final BatchNorm2d(in_channel, affine=False) + unpack in XLA (12 KiB).
    wp6 = pack_weights(params["conv6_w"], B)
    bp6 = jnp.tile(params["conv6_b"], B)
    t, stats6 = fused_conv_block(y, scale_p, shift_p, wp6, bp6,
                                 pre_act="leaky", post_act="tanh")
    H = t.shape[0]
    s6 = jnp.sum(stats6, axis=0)                          # (2, B*in_channel)
    sum1 = s6[0].reshape(B, in_channel).sum(0)
    sum2 = s6[1].reshape(B, in_channel).sum(0)
    cnt = B * H * H
    mean = sum1 / cnt
    var = sum2 / cnt - mean * mean
    sc = jax.lax.rsqrt(var + 1e-5)
    sh = -mean * sc
    out_p = t * jnp.tile(sc, B) + jnp.tile(sh, B)         # (H, W, B*in_channel)
    img = out_p.reshape(H, H, B, in_channel)
    return jnp.transpose(img, (2, 3, 0, 1))               # NCHW


# ------------------------- pure-JAX reference --------------------------------

def reference_forward(z, p, *, init_size, in_channel):
    B = z.shape[0]
    hi = jax.lax.Precision.HIGHEST
    x = jnp.dot(z, p["l1_w"], precision=hi) + p["l1_b"]
    x = x.reshape(B, 64, init_size, init_size).transpose(0, 2, 3, 1)  # NHWC

    def bn(x, g, b, eps):
        m = jnp.mean(x, axis=(0, 1, 2))
        v = jnp.mean(jnp.square(x - m), axis=(0, 1, 2))
        return (x - m) * jax.lax.rsqrt(v + eps) * g + b

    def conv(x, w, b):
        y = jax.lax.conv_general_dilated(
            x, w, window_strides=(1, 1), padding="SAME",
            dimension_numbers=("NHWC", "HWIO", "NHWC"), precision=hi)
        return y + b

    x = bn(x, p["bn0_g"], p["bn0_b"], 1e-5)
    for i in range(1, 6):
        x = jnp.repeat(jnp.repeat(x, 2, axis=1), 2, axis=2)
        x = conv(x, p[f"conv{i}_w"], p[f"conv{i}_b"])
        x = bn(x, p[f"bn{i}_g"], p[f"bn{i}_b"], 0.8)
        x = jnp.where(x >= 0, x, 0.2 * x)
    x = conv(x, p["conv6_w"], p["conv6_b"])
    x = jnp.tanh(x)
    x = bn(x, jnp.ones((in_channel,), jnp.float32),
           jnp.zeros((in_channel,), jnp.float32), 1e-5)
    return x.transpose(0, 3, 1, 2)


# ------------------------------ params ---------------------------------------

def init_params(key, zdim, in_channel, img_sz):
    init_size = img_sz // 2 ** 5
    feat = 64 * init_size ** 2
    keys = jax.random.split(key, 16)
    p = {}
    p["l1_w"] = 0.05 * jax.random.normal(keys[0], (zdim, feat), jnp.float32)
    p["l1_b"] = 0.05 * jax.random.normal(keys[1], (feat,), jnp.float32)
    p["bn0_g"] = jnp.ones((64,), jnp.float32)
    p["bn0_b"] = jnp.zeros((64,), jnp.float32)
    k = 2
    for i in range(1, 6):
        p[f"conv{i}_w"] = 0.05 * jax.random.normal(keys[k], (3, 3, 64, 64),
                                                   jnp.float32); k += 1
        p[f"conv{i}_b"] = 0.05 * jax.random.normal(keys[k], (64,),
                                                   jnp.float32); k += 1
        p[f"bn{i}_g"] = jnp.ones((64,), jnp.float32)
        p[f"bn{i}_b"] = jnp.zeros((64,), jnp.float32)
    p["conv6_w"] = 0.05 * jax.random.normal(keys[k], (3, 3, 64, in_channel),
                                            jnp.float32); k += 1
    p["conv6_b"] = 0.05 * jax.random.normal(keys[k], (in_channel,), jnp.float32)
    return p


# -------------------------------- main ---------------------------------------

if __name__ == "__main__":
    zdim, in_channel, img_sz, batch = 32, 3, 32, 2
    init_size = img_sz // 2 ** 5          # = 1

    root = jax.random.PRNGKey(0)
    k_params, k_z = jax.random.split(root)
    params = init_params(k_params, zdim, in_channel, img_sz)
    z = jax.random.normal(k_z, (batch, zdim), jnp.float32)

    fwd = jax.jit(functools.partial(generator_big_forward,
                                    init_size=init_size,
                                    in_channel=in_channel))
    img = fwd(z, params)
    jax.block_until_ready(img)
    assert img.shape == (batch, in_channel, img_sz, img_sz), img.shape
    assert img.dtype == jnp.float32

    ref = jax.jit(functools.partial(reference_forward,
                                    init_size=init_size,
                                    in_channel=in_channel))(z, params)
    jax.block_until_ready(ref)
    err = float(jnp.max(jnp.abs(img - ref)))
    assert err < 1e-2, f"max abs diff vs pure-JAX reference: {err}"
    print("KERNEL_OK")
</pallas_src>

<mosaic_0001>
module attributes {stable_mosaic.version = 11 : i64} {
  func.func @linear_kernel(%arg0: i32, %arg1: memref<2x32xf32, #tpu.memory_space<vmem>>, %arg2: memref<32x64xf32, #tpu.memory_space<vmem>>, %arg3: memref<1x64xf32, #tpu.memory_space<vmem>>, %arg4: memref<2x64xf32, #tpu.memory_space<vmem>>) attributes {dimension_semantics = [#tpu.dimension_semantics<arbitrary>], iteration_bounds = array<i64: 1>, scalar_prefetch = 0 : i64, scratch_operands = 0 : i64, tpu.core_type = #tpu.core_type<tc>, window_params = [{pipeline_mode = #tpu.pipeline_mode<synchronous>, transform_indices = @transform_0, window_bounds = array<i64: 2, 32>}, {pipeline_mode = #tpu.pipeline_mode<synchronous>, transform_indices = @transform_1, window_bounds = array<i64: 32, 64>}, {pipeline_mode = #tpu.pipeline_mode<synchronous>, transform_indices = @transform_2, window_bounds = array<i64: 1, 64>}, {pipeline_mode = #tpu.pipeline_mode<synchronous>, transform_indices = @transform_3, window_bounds = array<i64: 2, 64>}]} {
    %c0 = arith.constant 0 : index
    %c0_0 = arith.constant 0 : index
    %0 = vector.load %arg1[%c0, %c0_0] : memref<2x32xf32, #tpu.memory_space<vmem>>, vector<2x32xf32>
    %c0_1 = arith.constant 0 : index
    %c0_2 = arith.constant 0 : index
    %1 = vector.load %arg2[%c0_1, %c0_2] : memref<32x64xf32, #tpu.memory_space<vmem>>, vector<32x64xf32>
    %cst = arith.constant dense<0.000000e+00> : vector<2x64xf32>
    %2 = tpu.matmul %0, %1, %cst {dimension_numbers = #tpu.dot_dimension_numbers<[1], [0], [0], [1], [0, 0, 1, 1], [], []>} : vector<2x32xf32>, vector<32x64xf32>, vector<2x64xf32> -> vector<2x64xf32>
    %c0_3 = arith.constant 0 : index
    %c0_4 = arith.constant 0 : index
    %3 = vector.load %arg3[%c0_3, %c0_4] : memref<1x64xf32, #tpu.memory_space<vmem>>, vector<1x64xf32>
    %4 = vector.shape_cast %3 : vector<1x64xf32> to vector<64xf32>
    %5 = vector.shape_cast %4 : vector<64xf32> to vector<1x64xf32>
    %6 = vector.broadcast %5 : vector<1x64xf32> to vector<2x64xf32>
    %7 = arith.addf %2, %6 : vector<2x64xf32>
    %c0_5 = arith.constant 0 : index
    %c0_6 = arith.constant 0 : index
    %8 = vector.load %arg4[%c0_5, %c0_6] : memref<2x64xf32, #tpu.memory_space<vmem>>, vector<2x64xf32>
    tpu.vector_store %arg4[%c0_5, %c0_6], %7 {strides = array<i32>} : memref<2x64xf32, #tpu.memory_space<vmem>>, vector<2x64xf32>,
    return
  }
  func.func @transform_0(%arg0: i32) -> (i32, i32) {
    %c0_i32 = arith.constant 0 : i32
    %c0_i32_0 = arith.constant 0 : i32
    %c0_i32_1 = arith.constant 0 : i32
    return %c0_i32, %c0_i32_0 : i32, i32
  }
  func.func @transform_1(%arg0: i32) -> (i32, i32) {
    %c0_i32 = arith.constant 0 : i32
    %c0_i32_0 = arith.constant 0 : i32
    %c0_i32_1 = arith.constant 0 : i32
    return %c0_i32, %c0_i32_0 : i32, i32
  }
  func.func @transform_2(%arg0: i32) -> (i32, i32) {
    %c0_i32 = arith.constant 0 : i32
    %c0_i32_0 = arith.constant 0 : i32
    %c0_i32_1 = arith.constant 0 : i32
    return %c0_i32, %c0_i32_0 : i32, i32
  }
  func.func @transform_3(%arg0: i32) -> (i32, i32) {
    %c0_i32 = arith.constant 0 : i32
    %c0_i32_0 = arith.constant 0 : i32
    %c0_i32_1 = arith.constant 0 : i32
    return %c0_i32, %c0_i32_0 : i32, i32
  }
}

module attributes {stable_mosaic.version = 11 : i64} {
  func.func @fused_block_kernel(%arg0: i32, %arg1: memref<2x2x128xf32, #tpu.memory_space<vmem>>, %arg2: memref<1x128xf32, #tpu.memory_space<vmem>>, %arg3: memref<1x128xf32, #tpu.memory_space<vmem>>, %arg4: memref<3x3x128x128xf32, #tpu.memory_space<vmem>>, %arg5: memref<1x128xf32, #tpu.memory_space<vmem>>, %arg6: memref<2x2x128xf32, #tpu.memory_space<vmem>>, %arg7: memref<1x2x128xf32, #tpu.memory_space<vmem>>, %arg8: memref<4x4x128xf32, #tpu.memory_space<vmem>>) attributes {dimension_semantics = [#tpu.dimension_semantics<parallel>], iteration_bounds = array<i64: 1>, scalar_prefetch = 0 : i64, scratch_operands = 1 : i64, tpu.core_type = #tpu.core_type<tc>, window_params = [{pipeline_mode = #tpu.pipeline_mode<synchronous>, transform_indices = @transform_0, window_bounds = array<i64: 2, 2, 128>}, {pipeline_mode = #tpu.pipeline_mode<synchronous>, transform_indices = @transform_1, window_bounds = array<i64: 1, 128>}, {pipeline_mode = #tpu.pipeline_mode<synchronous>, transform_indices = @transform_2, window_bounds = array<i64: 1, 128>}, {pipeline_mode = #tpu.pipeline_mode<synchronous>, transform_indices = @transform_3, window_bounds = array<i64: 3, 3, 128, 128>}, {pipeline_mode = #tpu.pipeline_mode<synchronous>, transform_indices = @transform_4, window_bounds = array<i64: 1, 128>}, {transform_indices = @transform_5, window_bounds = array<i64: 2, 2, 128>}, {transform_indices = @transform_6, window_bounds = array<i64: 1, 2, 128>}]} {
    %c2_i32 = arith.constant 2 : i32
    %0 = arith.muli %arg0, %c2_i32 : i32
    %c0 = arith.constant 0 : index
    %c0_0 = arith.constant 0 : index
    %1 = vector.load %arg2[%c0, %c0_0] : memref<1x128xf32, #tpu.memory_space<vmem>>, vector<1x128xf32>
    %2 = vector.shape_cast %1 : vector<1x128xf32> to vector<128xf32>
    %c0_1 = arith.constant 0 : index
    %c0_2 = arith.constant 0 : index
    %3 = vector.load %arg3[%c0_1, %c0_2] : memref<1x128xf32, #tpu.memory_space<vmem>>, vector<1x128xf32>
    %4 = vector.shape_cast %3 : vector<1x128xf32> to vector<128xf32>
    %cst = arith.constant 0.000000e+00 : f32
    %5 = vector.broadcast %cst : f32 to vector<4x4x128xf32>
    %c0_3 = arith.constant 0 : index
    %c0_4 = arith.constant 0 : index
    %c0_5 = arith.constant 0 : index
    %6 = vector.load %arg8[%c0_3, %c0_4, %c0_5] : memref<4x4x128xf32, #tpu.memory_space<vmem>>, vector<4x4x128xf32>
    tpu.vector_store %arg8[%c0_3, %c0_4, %c0_5], %5 {strides = array<i32>} : memref<4x4x128xf32, #tpu.memory_space<vmem>>, vector<4x4x128xf32>,
    %7 = arith.index_cast %0 : i32 to index
    %c0_6 = arith.constant 0 : index
    %c0_7 = arith.constant 0 : index
    %8 = vector.load %arg1[%7, %c0_6, %c0_7] : memref<2x2x128xf32, #tpu.memory_space<vmem>>, vector<2x2x128xf32>
    %9 = vector.shape_cast %2 : vector<128xf32> to vector<1x1x128xf32>
    %10 = vector.broadcast %9 : vector<1x1x128xf32> to vector<2x2x128xf32>
    %11 = arith.mulf %8, %10 : vector<2x2x128xf32>
    %12 = vector.shape_cast %4 : vector<128xf32> to vector<1x1x128xf32>
    %13 = vector.broadcast %12 : vector<1x1x128xf32> to vector<2x2x128xf32>
    %14 = arith.addf %11, %13 : vector<2x2x128xf32>
    %c1 = arith.constant 1 : index
    %c1_8 = arith.constant 1 : index
    %c0_9 = arith.constant 0 : index
    %15 = vector.load %arg8[%c1, %c1_8, %c0_9] : memref<4x4x128xf32, #tpu.memory_space<vmem>>, vector<2x2x128xf32>
    tpu.vector_store %arg8[%c1, %c1_8, %c0_9], %14 {strides = array<i32>} : memref<4x4x128xf32, #tpu.memory_space<vmem>>, vector<2x2x128xf32>,
    %cst_10 = arith.constant 0.000000e+00 : f32
    %16 = vector.broadcast %cst_10 : f32 to vector<4x128xf32>
    %c0_11 = arith.constant 0 : index
    %c0_12 = arith.constant 0 : index
    %c0_13 = arith.constant 0 : index
    %17 = vector.load %arg8[%c0_11, %c0_12, %c0_13] : memref<4x4x128xf32, #tpu.memory_space<vmem>>, vector<2x2x128xf32>
    %18 = vector.shape_cast %17 : vector<2x2x128xf32> to vector<4x128xf32>
    %c0_14 = arith.constant 0 : index
    %c0_15 = arith.constant 0 : index
    %c0_16 = arith.constant 0 : index
    %c0_17 = arith.constant 0 : index
    %19 = vector.load %arg4[%c0_14, %c0_15, %c0_16, %c0_17] : memref<3x3x128x128xf32, #tpu.memory_space<vmem>>, vector<1x1x128x128xf32>
    %20 = vector.shape_cast %19 : vector<1x1x128x128xf32> to vector<128x128xf32>
    %cst_18 = arith.constant dense<0.000000e+00> : vector<4x128xf32>
    %21 = tpu.matmul %18, %20, %cst_18 {dimension_numbers = #tpu.dot_dimension_numbers<[1], [0], [0], [1], [0, 0, 1, 1], [], []>} : vector<4x128xf32>, vector<128x128xf32>, vector<4x128xf32> -> vector<4x128xf32>
    %22 = arith.addf %16, %21 : vector<4x128xf32>
    %c0_19 = arith.constant 0 : index
    %c1_20 = arith.constant 1 : index
    %c0_21 = arith.constant 0 : index
    %23 = vector.load %arg8[%c0_19, %c1_20, %c0_21] : memref<4x4x128xf32, #tpu.memory_space<vmem>>, vector<2x2x128xf32>
    %24 = vector.shape_cast %23 : vector<2x2x128xf32> to vector<4x128xf32>
    %c0_22 = arith.constant 0 : index
    %c1_23 = arith.constant 1 : index
    %c0_24 = arith.constant 0 : index
    %c0_25 = arith.constant 0 : index
    %25 = vector.load %arg4[%c0_22, %c1_23, %c0_24, %c0_25] : memref<3x3x128x128xf32, #tpu.memory_space<vmem>>, vector<1x1x128x128xf32>
    %26 = vector.shape_cast %25 : vector<1x1x128x128xf32> to vector<128x128xf32>
    %cst_26 = arith.constant dense<0.000000e+00> : vector<4x128xf32>
    %27 = tpu.matmul %24, %26, %cst_26 {dimension_numbers = #tpu.dot_dimension_numbers<[1], [0], [0], [1], [0, 0, 1, 1], [], []>} : vector<4x128xf32>, vector<128x128xf32>, vector<4x128xf32> -> vector<4x128xf32>
    %28 = arith.addf %22, %27 : vector<4x128xf32>
    %c0_27 = arith.constant 0 : index
    %c2 = arith.constant 2 : index
    %c0_28 = arith.constant 0 : index
    %29 = vector.load %arg8[%c0_27, %c2, %c0_28] : memref<4x4x128xf32, #tpu.memory_space<vmem>>, vector<2x2x128xf32>
    %30 = vector.shape_cast %29 : vector<2x2x128xf32> to vector<4x128xf32>
    %c0_29 = arith.constant 0 : index
    %c2_30 = arith.constant 2 : index
    %c0_31 = arith.constant 0 : index
    %c0_32 = arith.constant 0 : index
    %31 = vector.load %arg4[%c0_29, %c2_30, %c0_31, %c0_32] : memref<3x3x128x128xf32, #tpu.memory_space<vmem>>, vector<1x1x128x128xf32>
    %32 = vector.shape_cast %31 : vector<1x1x128x128xf32> to vector<128x128xf32>
    %cst_33 = arith.constant dense<0.000000e+00> : vector<4x128xf32>
    %33 = tpu.matmul %30, %32, %cst_33 {dimension_numbers = #tpu.dot_dimension_numbers<[1], [0], [0], [1], [0, 0, 1, 1], [], []>} : vector<4x128xf32>, vector<128x128xf32>, vector<4x128xf32> -> vector<4x128xf32>
    %34 = arith.addf %28, %33 : vector<4x128xf32>
    %c1_34 = arith.constant 1 : index
    %c0_35 = arith.constant 0 : index
    %c0_36 = arith.constant 0 : index
    %35 = vector.load %arg8[%c1_34, %c0_35, %c0_36] : memref<4x4x128xf32, #tpu.memory_space<vmem>>, vector<2x2x128xf32>
    %36 = vector.shape_cast %35 : vector<2x2x128xf32> to vector<4x128xf32>
    %c1_37 = arith.constant 1 : index
    %c0_38 = arith.constant 0 : index
    %c0_39 = arith.constant 0 : index
    %c0_40 = arith.constant 0 : index
    %37 = vector.load %arg4[%c1_37, %c0_38, %c0_39, %c0_40] : memref<3x3x128x128xf32, #tpu.memory_space<vmem>>, vector<1x1x128x128xf32>
    %38 = vector.shape_cast %37 : vector<1x1x128x128xf32> to vector<128x128xf32>
    %cst_41 = arith.constant dense<0.000000e+00> : vector<4x128xf32>
    %39 = tpu.matmul %36, %38, %cst_41 {dimension_numbers = #tpu.dot_dimension_numbers<[1], [0], [0], [1], [0, 0, 1, 1], [], []>} : vector<4x128xf32>, vector<128x128xf32>, vector<4x128xf32> -> vector<4x128xf32>
    %40 = arith.addf %34, %39 : vector<4x128xf32>
    %c1_42 = arith.constant 1 : index
    %c1_43 = arith.constant 1 : index
    %c0_44 = arith.constant 0 : index
    %41 = vector.load %arg8[%c1_42, %c1_43, %c0_44] : memref<4x4x128xf32, #tpu.memory_space<vmem>>, vector<2x2x128xf32>
    %42 = vector.shape_cast %41 : vector<2x2x128xf32> to vector<4x128xf32>
    %c1_45 = arith.constant 1 : index
    %c1_46 = arith.constant 1 : index
    %c0_47 = arith.constant 0 : index
    %c0_48 = arith.constant 0 : index
    %43 = vector.load %arg4[%c1_45, %c1_46, %c0_47, %c0_48] : memref<3x3x128x128xf32, #tpu.memory_space<vmem>>, vector<1x1x128x128xf32>
    %44 = vector.shape_cast %43 : vector<1x1x128x128xf32> to vector<128x128xf32>
    %cst_49 = arith.constant dense<0.000000e+00> : vector<4x128xf32>
    %45 = tpu.matmul %42, %44, %cst_49 {dimension_numbers = #tpu.dot_dimension_numbers<[1], [0], [0], [1], [0, 0, 1, 1], [], []>} : vector<4x128xf32>, vector<128x128xf32>, vector<4x128xf32> -> vector<4x128xf32>
    %46 = arith.addf %40, %45 : vector<4x128xf32>
    %c1_50 = arith.constant 1 : index
    %c2_51 = arith.constant 2 : index
    %c0_52 = arith.constant 0 : index
    %47 = vector.load %arg8[%c1_50, %c2_51, %c0_52] : memref<4x4x128xf32, #tpu.memory_space<vmem>>, vector<2x2x128xf32>
    %48 = vector.shape_cast %47 : vector<2x2x128xf32> to vector<4x128xf32>
    %c1_53 = arith.constant 1 : index
    %c2_54 = arith.constant 2 : index
    %c0_55 = arith.constant 0 : index
    %c0_56 = arith.constant 0 : index
    %49 = vector.load %arg4[%c1_53, %c2_54, %c0_55, %c0_56] : memref<3x3x128x128xf32, #tpu.memory_space<vmem>>, vector<1x1x128x128xf32>
    %50 = vector.shape_cast %49 : vector<1x1x128x128xf32> to vector<128x128xf32>
    %cst_57 = arith.constant dense<0.000000e+00> : vector<4x128xf32>
    %51 = tpu.matmul %48, %50, %cst_57 {dimension_numbers = #tpu.dot_dimension_numbers<[1], [0], [0], [1], [0, 0, 1, 1], [], []>} : vector<4x128xf32>, vector<128x128xf32>, vector<4x128xf32> -> vector<4x128xf32>
    %52 = arith.addf %46, %51 : vector<4x128xf32>
    %c2_58 = arith.constant 2 : index
    %c0_59 = arith.constant 0 : index
    %c0_60 = arith.constant 0 : index
    %53 = vector.load %arg8[%c2_58, %c0_59, %c0_60] : memref<4x4x128xf32, #tpu.memory_space<vmem>>, vector<2x2x128xf32>
    %54 = vector.shape_cast %53 : vector<2x2x128xf32> to vector<4x128xf32>
    %c2_61 = arith.constant 2 : index
    %c0_62 = arith.constant 0 : index
    %c0_63 = arith.constant 0 : index
    %c0_64 = arith.constant 0 : index
    %55 = vector.load %arg4[%c2_61, %c0_62, %c0_63, %c0_64] : memref<3x3x128x128xf32, #tpu.memory_space<vmem>>, vector<1x1x128x128xf32>
    %56 = vector.shape_cast %55 : vector<1x1x128x128xf32> to vector<128x128xf32>
    %cst_65 = arith.constant dense<0.000000e+00> : vector<4x128xf32>
    %57 = tpu.matmul %54, %56, %cst_65 {dimension_numbers = #tpu.dot_dimension_numbers<[1], [0], [0], [1], [0, 0, 1, 1], [], []>} : vector<4x128xf32>, vector<128x128xf32>, vector<4x128xf32> -> vector<4x128xf32>
    %58 = arith.addf %52, %57 : vector<4x128xf32>
    %c2_66 = arith.constant 2 : index
    %c1_67 = arith.constant 1 : index
    %c0_68 = arith.constant 0 : index
    %59 = vector.load %arg8[%c2_66, %c1_67, %c0_68] : memref<4x4x128xf32, #tpu.memory_space<vmem>>, vector<2x2x128xf32>
    %60 = vector.shape_cast %59 : vector<2x2x128xf32> to vector<4x128xf32>
    %c2_69 = arith.constant 2 : index
    %c1_70 = arith.constant 1 : index
    %c0_71 = arith.constant 0 : index
    %c0_72 = arith.constant 0 : index
    %61 = vector.load %arg4[%c2_69, %c1_70, %c0_71, %c0_72] : memref<3x3x128x128xf32, #tpu.memory_space<vmem>>, vector<1x1x128x128xf32>
    %62 = vector.shape_cast %61 : vector<1x1x128x128xf32> to vector<128x128xf32>
    %cst_73 = arith.constant dense<0.000000e+00> : vector<4x128xf32>
    %63 = tpu.matmul %60, %62, %cst_73 {dimension_numbers = #tpu.dot_dimension_numbers<[1], [0], [0], [1], [0, 0, 1, 1], [], []>} : vector<4x128xf32>, vector<128x128xf32>, vector<4x128xf32> -> vector<4x128xf32>
    %64 = arith.addf %58, %63 : vector<4x128xf32>
    %c2_74 = arith.constant 2 : index
    %c2_75 = arith.constant 2 : index
    %c0_76 = arith.constant 0 : index
    %65 = vector.load %arg8[%c2_74, %c2_75, %c0_76] : memref<4x4x128xf32, #tpu.memory_space<vmem>>, vector<2x2x128xf32>
    %66 = vector.shape_cast %65 : vector<2x2x128xf32> to vector<4x128xf32>
    %c2_77 = arith.constant 2 : index
    %c2_78 = arith.constant 2 : index
    %c0_79 = arith.constant 0 : index
    %c0_80 = arith.constant 0 : index
    %67 = vector.load %arg4[%c2_77, %c2_78, %c0_79, %c0_80] : memref<3x3x128x128xf32, #tpu.memory_space<vmem>>, vector<1x1x128x128xf32>
    %68 = vector.shape_cast %67 : vector<1x1x128x128xf32> to vector<128x128xf32>
    %cst_81 = arith.constant dense<0.000000e+00> : vector<4x128xf32>
    %69 = tpu.matmul %66, %68, %cst_81 {dimension_numbers = #tpu.dot_dimension_numbers<[1], [0], [0], [1], [0, 0, 1, 1], [], []>} : vector<4x128xf32>, vector<128x128xf32>, vector<4x128xf32> -> vector<4x128xf32>
    %70 = arith.addf %64, %69 : vector<4x128xf32>
    %c0_82 = arith.constant 0 : index
    %c0_83 = arith.constant 0 : index
    %71 = vector.load %arg5[%c0_82, %c0_83] : memref<1x128xf32, #tpu.memory_space<vmem>>, vector<1x128xf32>
    %72 = vector.shape_cast %71 : vector<1x128xf32> to vector<128xf32>
    %73 = vector.shape_cast %72 : vector<128xf32> to vector<1x128xf32>
    %74 = vector.broadcast %73 : vector<1x128xf32> to vector<4x128xf32>
    %75 = arith.addf %70, %74 : vector<4x128xf32>
    %76 = vector.shape_cast %75 : vector<4x128xf32> to vector<2x2x128xf32>
    %c0_84 = arith.constant 0 : index
    %c0_85 = arith.constant 0 : index
    %c0_86 = arith.constant 0 : index
    %77 = vector.load %arg6[%c0_84, %c0_85, %c0_86] : memref<2x2x128xf32, #tpu.memory_space<vmem>>, vector<2x2x128xf32>
    tpu.vector_store %arg6[%c0_84, %c0_85, %c0_86], %76 {strides = array<i32>} : memref<2x2x128xf32, #tpu.memory_space<vmem>>, vector<2x2x128xf32>,
    %cst_87 = arith.constant dense<0.000000e+00> : vector<128xf32>
    %78 = vector.multi_reduction <add>, %75, %cst_87 [0] : vector<4x128xf32> to vector<128xf32>
    %79 = vector.shape_cast %78 : vector<128xf32> to vector<1x128xf32>
    %80 = arith.mulf %75, %75 : vector<4x128xf32>
    %cst_88 = arith.constant dense<0.000000e+00> : vector<128xf32>
    %81 = vector.multi_reduction <add>, %80, %cst_88 [0] : vector<4x128xf32> to vector<128xf32>
    %82 = vector.shape_cast %81 : vector<128xf32> to vector<1x128xf32>
    %83 = tpu.concatenate %79, %82 in 0 : vector<1x128xf32>, vector<1x128xf32> -> vector<2x128xf32>
    %84 = vector.shape_cast %83 : vector<2x128xf32> to vector<1x2x128xf32>
    %c0_89 = arith.constant 0 : index
    %c0_90 = arith.constant 0 : index
    %c0_91 = arith.constant 0 : index
    %85 = vector.load %arg7[%c0_89, %c0_90, %c0_91] : memref<1x2x128xf32, #tpu.memory_space<vmem>>, vector<1x2x128xf32>
    tpu.vector_store %arg7[%c0_89, %c0_90, %c0_91], %84 {strides = array<i32>} : memref<1x2x128xf32, #tpu.memory_space<vmem>>, vector<1x2x128xf32>,
    return
  }
  func.func @transform_0(%arg0: i32) -> (i32, i32, i32) {
    %c0_i32 = arith.constant 0 : i32
    %c0_i32_0 = arith.constant 0 : i32
    %c0_i32_1 = arith.constant 0 : i32
    %c0_i32_2 = arith.constant 0 : i32
    return %c0_i32, %c0_i32_0, %c0_i32_1 : i32, i32, i32
  }
  func.func @transform_1(%arg0: i32) -> (i32, i32) {
    %c0_i32 = arith.constant 0 : i32
    %c0_i32_0 = arith.constant 0 : i32
    %c0_i32_1 = arith.constant 0 : i32
    return %c0_i32, %c0_i32_0 : i32, i32
  }
  func.func @transform_2(%arg0: i32) -> (i32, i32) {
    %c0_i32 = arith.constant 0 : i32
    %c0_i32_0 = arith.constant 0 : i32
    %c0_i32_1 = arith.constant 0 : i32
    return %c0_i32, %c0_i32_0 : i32, i32
  }
  func.func @transform_3(%arg0: i32) -> (i32, i32, i32, i32) {
    %c0_i32 = arith.constant 0 : i32
    %c0_i32_0 = arith.constant 0 : i32
    %c0_i32_1 = arith.constant 0 : i32
    %c0_i32_2 = arith.constant 0 : i32
    %c0_i32_3 = arith.constant 0 : i32
    return %c0_i32, %c0_i32_0, %c0_i32_1, %c0_i32_2 : i32, i32, i32, i32
  }
  func.func @transform_4(%arg0: i32) -> (i32, i32) {
    %c0_i32 = arith.constant 0 : i32
    %c0_i32_0 = arith.constant 0 : i32
    %c0_i32_1 = arith.constant 0 : i32
    return %c0_i32, %c0_i32_0 : i32, i32
  }
  func.func @transform_5(%arg0: i32) -> (i32, i32, i32) {
    %c0_i32 = arith.constant 0 : i32
    %c0_i32_0 = arith.constant 0 : i32
    %c0_i32_1 = arith.constant 0 : i32
    return %arg0, %c0_i32, %c0_i32_0 : i32, i32, i32
  }
  func.func @transform_6(%arg0: i32) -> (i32, i32, i32) {
    %c0_i32 = arith.constant 0 : i32
    %c0_i32_0 = arith.constant 0 : i32
    %c0_i32_1 = arith.constant 0 : i32
    return %arg0, %c0_i32, %c0_i32_0 : i32, i32, i32
  }
}

module attributes {stable_mosaic.version = 11 : i64} {
  func.func @fused_block_kernel(%arg0: i32, %arg1: memref<4x4x128xf32, #tpu.memory_space<vmem>>, %arg2: memref<1x128xf32, #tpu.memory_space<vmem>>, %arg3: memref<1x128xf32, #tpu.memory_space<vmem>>, %arg4: memref<3x3x128x128xf32, #tpu.memory_space<vmem>>, %arg5: memref<1x128xf32, #tpu.memory_space<vmem>>, %arg6: memref<4x4x128xf32, #tpu.memory_space<vmem>>, %arg7: memref<1x2x128xf32, #tpu.memory_space<vmem>>, %arg8: memref<6x6x128xf32, #tpu.memory_space<vmem>>) attributes {dimension_semantics = [#tpu.dimension_semantics<parallel>], iteration_bounds = array<i64: 1>, scalar_prefetch = 0 : i64, scratch_operands = 1 : i64, tpu.core_type = #tpu.core_type<tc>, window_params = [{pipeline_mode = #tpu.pipeline_mode<synchronous>, transform_indices = @transform_0, window_bounds = array<i64: 4, 4, 128>}, {pipeline_mode = #tpu.pipeline_mode<synchronous>, transform_indices = @transform_1, window_bounds = array<i64: 1, 128>}, {pipeline_mode = #tpu.pipeline_mode<synchronous>, transform_indices = @transform_2, window_bounds = array<i64: 1, 128>}, {pipeline_mode = #tpu.pipeline_mode<synchronous>, transform_indices = @transform_3, window_bounds = array<i64: 3, 3, 128, 128>}, {pipeline_mode = #tpu.pipeline_mode<synchronous>, transform_indices = @transform_4, window_bounds = array<i64: 1, 128>}, {transform_indices = @transform_5, window_bounds = array<i64: 4, 4, 128>}, {transform_indices = @transform_6, window_bounds = array<i64: 1, 2, 128>}]} {
    %c4_i32 = arith.constant 4 : i32
    %0 = arith.muli %arg0, %c4_i32 : i32
    %c0 = arith.constant 0 : index
    %c0_0 = arith.constant 0 : index
    %1 = vector.load %arg2[%c0, %c0_0] : memref<1x128xf32, #tpu.memory_space<vmem>>, vector<1x128xf32>
    %2 = vector.shape_cast %1 : vector<1x128xf32> to vector<128xf32>
    %c0_1 = arith.constant 0 : index
    %c0_2 = arith.constant 0 : index
    %3 = vector.load %arg3[%c0_1, %c0_2] : memref<1x128xf32, #tpu.memory_space<vmem>>, vector<1x128xf32>
    %4 = vector.shape_cast %3 : vector<1x128xf32> to vector<128xf32>
    %cst = arith.constant 0.000000e+00 : f32
    %5 = vector.broadcast %cst : f32 to vector<6x6x128xf32>
    %c0_3 = arith.constant 0 : index
    %c0_4 = arith.constant 0 : index
    %c0_5 = arith.constant 0 : index
    %6 = vector.load %arg8[%c0_3, %c0_4, %c0_5] : memref<6x6x128xf32, #tpu.memory_space<vmem>>, vector<6x6x128xf32>
    tpu.vector_store %arg8[%c0_3, %c0_4, %c0_5], %5 {strides = array<i32>} : memref<6x6x128xf32, #tpu.memory_space<vmem>>, vector<6x6x128xf32>,
    %7 = arith.index_cast %0 : i32 to index
    %c0_6 = arith.constant 0 : index
    %c0_7 = arith.constant 0 : index
    %8 = vector.load %arg1[%7, %c0_6, %c0_7] : memref<4x4x128xf32, #tpu.memory_space<vmem>>, vector<4x4x128xf32>
    %9 = vector.shape_cast %2 : vector<128xf32> to vector<1x1x128xf32>
    %10 = vector.broadcast %9 : vector<1x1x128xf32> to vector<4x4x128xf32>
    %11 = arith.mulf %8, %10 : vector<4x4x128xf32>
    %12 = vector.shape_cast %4 : vector<128xf32> to vector<1x1x128xf32>
    %13 = vector.broadcast %12 : vector<1x1x128xf32> to vector<4x4x128xf32>
    %14 = arith.addf %11, %13 : vector<4x4x128xf32>
    %cst_8 = arith.constant 0.000000e+00 : f32
    %15 = vector.broadcast %cst_8 : f32 to vector<4x4x128xf32>
    %16 = arith.cmpf oge, %14, %15 : vector<4x4x128xf32>
    %cst_9 = arith.constant 2.000000e-01 : f32
    %17 = vector.broadcast %cst_9 : f32 to vector<4x4x128xf32>
    %18 = arith.mulf %17, %14 : vector<4x4x128xf32>
    %19 = arith.select %16, %14, %18 : vector<4x4x128xi1>, vector<4x4x128xf32>
    %c1 = arith.constant 1 : index
    %c1_10 = arith.constant 1 : index
    %c0_11 = arith.constant 0 : index
    %20 = vector.load %arg8[%c1, %c1_10, %c0_11] : memref<6x6x128xf32, #tpu.memory_space<vmem>>, vector<4x4x128xf32>
    tpu.vector_store %arg8[%c1, %c1_10, %c0_11], %19 {strides = array<i32>} : memref<6x6x128xf32, #tpu.memory_space<vmem>>, vector<4x4x128xf32>,
    %cst_12 = arith.constant 0.000000e+00 : f32
    %21 = vector.broadcast %cst_12 : f32 to vector<16x128xf32>
    %c0_13 = arith.constant 0 : index
    %c0_14 = arith.constant 0 : index
    %c0_15 = arith.constant 0 : index
    %22 = vector.load %arg8[%c0_13, %c0_14, %c0_15] : memref<6x6x128xf32, #tpu.memory_space<vmem>>, vector<4x4x128xf32>
    %23 = vector.shape_cast %22 : vector<4x4x128xf32> to vector<16x128xf32>
    %c0_16 = arith.constant 0 : index
    %c0_17 = arith.constant 0 : index
    %c0_18 = arith.constant 0 : index
    %c0_19 = arith.constant 0 : index
    %24 = vector.load %arg4[%c0_16, %c0_17, %c0_18, %c0_19] : memref<3x3x128x128xf32, #tpu.memory_space<vmem>>, vector<1x1x128x128xf32>
    %25 = vector.shape_cast %24 : vector<1x1x128x128xf32> to vector<128x128xf32>
    %cst_20 = arith.constant dense<0.000000e+00> : vector<16x128xf32>
    %26 = tpu.matmul %23, %25, %cst_20 {dimension_numbers = #tpu.dot_dimension_numbers<[1], [0], [0], [1], [0, 0, 1, 1], [], []>} : vector<16x128xf32>, vector<128x128xf32>, vector<16x128xf32> -> vector<16x128xf32>
    %27 = arith.addf %21, %26 : vector<16x128xf32>
    %c0_21 = arith.constant 0 : index
    %c1_22 = arith.constant 1 : index
    %c0_23 = arith.constant 0 : index
    %28 = vector.load %arg8[%c0_21, %c1_22, %c0_23] : memref<6x6x128xf32, #tpu.memory_space<vmem>>, vector<4x4x128xf32>
    %29 = vector.shape_cast %28 : vector<4x4x128xf32> to vector<16x128xf32>
    %c0_24 = arith.constant 0 : index
    %c1_25 = arith.constant 1 : index
    %c0_26 = arith.constant 0 : index
    %c0_27 = arith.constant 0 : index
    %30 = vector.load %arg4[%c0_24, %c1_25, %c0_26, %c0_27] : memref<3x3x128x128xf32, #tpu.memory_space<vmem>>, vector<1x1x128x128xf32>
    %31 = vector.shape_cast %30 : vector<1x1x128x128xf32> to vector<128x128xf32>
    %cst_28 = arith.constant dense<0.000000e+00> : vector<16x128xf32>
    %32 = tpu.matmul %29, %31, %cst_28 {dimension_numbers = #tpu.dot_dimension_numbers<[1], [0], [0], [1], [0, 0, 1, 1], [], []>} : vector<16x128xf32>, vector<128x128xf32>, vector<16x128xf32> -> vector<16x128xf32>
    %33 = arith.addf %27, %32 : vector<16x128xf32>
    %c0_29 = arith.constant 0 : index
    %c2 = arith.constant 2 : index
    %c0_30 = arith.constant 0 : index
    %34 = vector.load %arg8[%c0_29, %c2, %c0_30] : memref<6x6x128xf32, #tpu.memory_space<vmem>>, vector<4x4x128xf32>
    %35 = vector.shape_cast %34 : vector<4x4x128xf32> to vector<16x128xf32>
    %c0_31 = arith.constant 0 : index
    %c2_32 = arith.constant 2 : index
    %c0_33 = arith.constant 0 : index
    %c0_34 = arith.constant 0 : index
    %36 = vector.load %arg4[%c0_31, %c2_32, %c0_33, %c0_34] : memref<3x3x128x128xf32, #tpu.memory_space<vmem>>, vector<1x1x128x128xf32>
    %37 = vector.shape_cast %36 : vector<1x1x128x128xf32> to vector<128x128xf32>
    %cst_35 = arith.constant dense<0.000000e+00> : vector<16x128xf32>
    %38 = tpu.matmul %35, %37, %cst_35 {dimension_numbers = #tpu.dot_dimension_numbers<[1], [0], [0], [1], [0, 0, 1, 1], [], []>} : vector<16x128xf32>, vector<128x128xf32>, vector<16x128xf32> -> vector<16x128xf32>
    %39 = arith.addf %33, %38 : vector<16x128xf32>
    %c1_36 = arith.constant 1 : index
    %c0_37 = arith.constant 0 : index
    %c0_38 = arith.constant 0 : index
    %40 = vector.load %arg8[%c1_36, %c0_37, %c0_38] : memref<6x6x128xf32, #tpu.memory_space<vmem>>, vector<4x4x128xf32>
    %41 = vector.shape_cast %40 : vector<4x4x128xf32> to vector<16x128xf32>
    %c1_39 = arith.constant 1 : index
    %c0_40 = arith.constant 0 : index
    %c0_41 = arith.constant 0 : index
    %c0_42 = arith.constant 0 : index
    %42 = vector.load %arg4[%c1_39, %c0_40, %c0_41, %c0_42] : memref<3x3x128x128xf32, #tpu.memory_space<vmem>>, vector<1x1x128x128xf32>
    %43 = vector.shape_cast %42 : vector<1x1x128x128xf32> to vector<128x128xf32>
    %cst_43 = arith.constant dense<0.000000e+00> : vector<16x128xf32>
    %44 = tpu.matmul %41, %43, %cst_43 {dimension_numbers = #tpu.dot_dimension_numbers<[1], [0], [0], [1], [0, 0, 1, 1], [], []>} : vector<16x128xf32>, vector<128x128xf32>, vector<16x128xf32> -> vector<16x128xf32>
    %45 = arith.addf %39, %44 : vector<16x128xf32>
    %c1_44 = arith.constant 1 : index
    %c1_45 = arith.constant 1 : index
    %c0_46 = arith.constant 0 : index
    %46 = vector.load %arg8[%c1_44, %c1_45, %c0_46] : memref<6x6x128xf32, #tpu.memory_space<vmem>>, vector<4x4x128xf32>
    %47 = vector.shape_cast %46 : vector<4x4x128xf32> to vector<16x128xf32>
    %c1_47 = arith.constant 1 : index
    %c1_48 = arith.constant 1 : index
    %c0_49 = arith.constant 0 : index
    %c0_50 = arith.constant 0 : index
    %48 = vector.load %arg4[%c1_47, %c1_48, %c0_49, %c0_50] : memref<3x3x128x128xf32, #tpu.memory_space<vmem>>, vector<1x1x128x128xf32>
    %49 = vector.shape_cast %48 : vector<1x1x128x128xf32> to vector<128x128xf32>
    %cst_51 = arith.constant dense<0.000000e+00> : vector<16x128xf32>
    %50 = tpu.matmul %47, %49, %cst_51 {dimension_numbers = #tpu.dot_dimension_numbers<[1], [0], [0], [1], [0, 0, 1, 1], [], []>} : vector<16x128xf32>, vector<128x128xf32>, vector<16x128xf32> -> vector<16x128xf32>
    %51 = arith.addf %45, %50 : vector<16x128xf32>
    %c1_52 = arith.constant 1 : index
    %c2_53 = arith.constant 2 : index
    %c0_54 = arith.constant 0 : index
    %52 = vector.load %arg8[%c1_52, %c2_53, %c0_54] : memref<6x6x128xf32, #tpu.memory_space<vmem>>, vector<4x4x128xf32>
    %53 = vector.shape_cast %52 : vector<4x4x128xf32> to vector<16x128xf32>
    %c1_55 = arith.constant 1 : index
    %c2_56 = arith.constant 2 : index
    %c0_57 = arith.constant 0 : index
    %c0_58 = arith.constant 0 : index
    %54 = vector.load %arg4[%c1_55, %c2_56, %c0_57, %c0_58] : memref<3x3x128x128xf32, #tpu.memory_space<vmem>>, vector<1x1x128x128xf32>
    %55 = vector.shape_cast %54 : vector<1x1x128x128xf32> to vector<128x128xf32>
    %cst_59 = arith.constant dense<0.000000e+00> : vector<16x128xf32>
    %56 = tpu.matmul %53, %55, %cst_59 {dimension_numbers = #tpu.dot_dimension_numbers<[1], [0], [0], [1], [0, 0, 1, 1], [], []>} : vector<16x128xf32>, vector<128x128xf32>, vector<16x128xf32> -> vector<16x128xf32>
    %57 = arith.addf %51, %56 : vector<16x128xf32>
    %c2_60 = arith.constant 2 : index
    %c0_61 = arith.constant 0 : index
    %c0_62 = arith.constant 0 : index
    %58 = vector.load %arg8[%c2_60, %c0_61, %c0_62] : memref<6x6x128xf32, #tpu.memory_space<vmem>>, vector<4x4x128xf32>
    %59 = vector.shape_cast %58 : vector<4x4x128xf32> to vector<16x128xf32>
    %c2_63 = arith.constant 2 : index
    %c0_64 = arith.constant 0 : index
    %c0_65 = arith.constant 0 : index
    %c0_66 = arith.constant 0 : index
    %60 = vector.load %arg4[%c2_63, %c0_64, %c0_65, %c0_66] : memref<3x3x128x128xf32, #tpu.memory_space<vmem>>, vector<1x1x128x128xf32>
    %61 = vector.shape_cast %60 : vector<1x1x128x128xf32> to vector<128x128xf32>
    %cst_67 = arith.constant dense<0.000000e+00> : vector<16x128xf32>
    %62 = tpu.matmul %59, %61, %cst_67 {dimension_numbers = #tpu.dot_dimension_numbers<[1], [0], [0], [1], [0, 0, 1, 1], [], []>} : vector<16x128xf32>, vector<128x128xf32>, vector<16x128xf32> -> vector<16x128xf32>
    %63 = arith.addf %57, %62 : vector<16x128xf32>
    %c2_68 = arith.constant 2 : index
    %c1_69 = arith.constant 1 : index
    %c0_70 = arith.constant 0 : index
    %64 = vector.load %arg8[%c2_68, %c1_69, %c0_70] : memref<6x6x128xf32, #tpu.memory_space<vmem>>, vector<4x4x128xf32>
    %65 = vector.shape_cast %64 : vector<4x4x128xf32> to vector<16x128xf32>
    %c2_71 = arith.constant 2 : index
    %c1_72 = arith.constant 1 : index
    %c0_73 = arith.constant 0 : index
    %c0_74 = arith.constant 0 : index
    %66 = vector.load %arg4[%c2_71, %c1_72, %c0_73, %c0_74] : memref<3x3x128x128xf32, #tpu.memory_space<vmem>>, vector<1x1x128x128xf32>
    %67 = vector.shape_cast %66 : vector<1x1x128x128xf32> to vector<128x128xf32>
    %cst_75 = arith.constant dense<0.000000e+00> : vector<16x128xf32>
    %68 = tpu.matmul %65, %67, %cst_75 {dimension_numbers = #tpu.dot_dimension_numbers<[1], [0], [0], [1], [0, 0, 1, 1], [], []>} : vector<16x128xf32>, vector<128x128xf32>, vector<16x128xf32> -> vector<16x128xf32>
    %69 = arith.addf %63, %68 : vector<16x128xf32>
    %c2_76 = arith.constant 2 : index
    %c2_77 = arith.constant 2 : index
    %c0_78 = arith.constant 0 : index
    %70 = vector.load %arg8[%c2_76, %c2_77, %c0_78] : memref<6x6x128xf32, #tpu.memory_space<vmem>>, vector<4x4x128xf32>
    %71 = vector.shape_cast %70 : vector<4x4x128xf32> to vector<16x128xf32>
    %c2_79 = arith.constant 2 : index
    %c2_80 = arith.constant 2 : index
    %c0_81 = arith.constant 0 : index
    %c0_82 = arith.constant 0 : index
    %72 = vector.load %arg4[%c2_79, %c2_80, %c0_81, %c0_82] : memref<3x3x128x128xf32, #tpu.memory_space<vmem>>, vector<1x1x128x128xf32>
    %73 = vector.shape_cast %72 : vector<1x1x128x128xf32> to vector<128x128xf32>
    %cst_83 = arith.constant dense<0.000000e+00> : vector<16x128xf32>
    %74 = tpu.matmul %71, %73, %cst_83 {dimension_numbers = #tpu.dot_dimension_numbers<[1], [0], [0], [1], [0, 0, 1, 1], [], []>} : vector<16x128xf32>, vector<128x128xf32>, vector<16x128xf32> -> vector<16x128xf32>
    %75 = arith.addf %69, %74 : vector<16x128xf32>
    %c0_84 = arith.constant 0 : index
    %c0_85 = arith.constant 0 : index
    %76 = vector.load %arg5[%c0_84, %c0_85] : memref<1x128xf32, #tpu.memory_space<vmem>>, vector<1x128xf32>
    %77 = vector.shape_cast %76 : vector<1x128xf32> to vector<128xf32>
    %78 = vector.shape_cast %77 : vector<128xf32> to vector<1x128xf32>
    %79 = vector.broadcast %78 : vector<1x128xf32> to vector<16x128xf32>
    %80 = arith.addf %75, %79 : vector<16x128xf32>
    %81 = vector.shape_cast %80 : vector<16x128xf32> to vector<4x4x128xf32>
    %c0_86 = arith.constant 0 : index
    %c0_87 = arith.constant 0 : index
    %c0_88 = arith.constant 0 : index
    %82 = vector.load %arg6[%c0_86, %c0_87, %c0_88] : memref<4x4x128xf32, #tpu.memory_space<vmem>>, vector<4x4x128xf32>
    tpu.vector_store %arg6[%c0_86, %c0_87, %c0_88], %81 {strides = array<i32>} : memref<4x4x128xf32, #tpu.memory_space<vmem>>, vector<4x4x128xf32>,
    %cst_89 = arith.constant dense<0.000000e+00> : vector<128xf32>
    %83 = vector.multi_reduction <add>, %80, %cst_89 [0] : vector<16x128xf32> to vector<128xf32>
    %84 = vector.shape_cast %83 : vector<128xf32> to vector<1x128xf32>
    %85 = arith.mulf %80, %80 : vector<16x128xf32>
    %cst_90 = arith.constant dense<0.000000e+00> : vector<128xf32>
    %86 = vector.multi_reduction <add>, %85, %cst_90 [0] : vector<16x128xf32> to vector<128xf32>
    %87 = vector.shape_cast %86 : vector<128xf32> to vector<1x128xf32>
    %88 = tpu.concatenate %84, %87 in 0 : vector<1x128xf32>, vector<1x128xf32> -> vector<2x128xf32>
    %89 = vector.shape_cast %88 : vector<2x128xf32> to vector<1x2x128xf32>
    %c0_91 = arith.constant 0 : index
    %c0_92 = arith.constant 0 : index
    %c0_93 = arith.constant 0 : index
    %90 = vector.load %arg7[%c0_91, %c0_92, %c0_93] : memref<1x2x128xf32, #tpu.memory_space<vmem>>, vector<1x2x128xf32>
    tpu.vector_store %arg7[%c0_91, %c0_92, %c0_93], %89 {strides = array<i32>} : memref<1x2x128xf32, #tpu.memory_space<vmem>>, vector<1x2x128xf32>,
    return
  }
  func.func @transform_0(%arg0: i32) -> (i32, i32, i32) {
    %c0_i32 = arith.constant 0 : i32
    %c0_i32_0 = arith.constant 0 : i32
    %c0_i32_1 = arith.constant 0 : i32
    %c0_i32_2 = arith.constant 0 : i32
    return %c0_i32, %c0_i32_0, %c0_i32_1 : i32, i32, i32
  }
  func.func @transform_1(%arg0: i32) -> (i32, i32) {
    %c0_i32 = arith.constant 0 : i32
    %c0_i32_0 = arith.constant 0 : i32
    %c0_i32_1 = arith.constant 0 : i32
    return %c0_i32, %c0_i32_0 : i32, i32
  }
  func.func @transform_2(%arg0: i32) -> (i32, i32) {
    %c0_i32 = arith.constant 0 : i32
    %c0_i32_0 = arith.constant 0 : i32
    %c0_i32_1 = arith.constant 0 : i32
    return %c0_i32, %c0_i32_0 : i32, i32
  }
  func.func @transform_3(%arg0: i32) -> (i32, i32, i32, i32) {
    %c0_i32 = arith.constant 0 : i32
    %c0_i32_0 = arith.constant 0 : i32
    %c0_i32_1 = arith.constant 0 : i32
    %c0_i32_2 = arith.constant 0 : i32
    %c0_i32_3 = arith.constant 0 : i32
    return %c0_i32, %c0_i32_0, %c0_i32_1, %c0_i32_2 : i32, i32, i32, i32
  }
  func.func @transform_4(%arg0: i32) -> (i32, i32) {
    %c0_i32 = arith.constant 0 : i32
    %c0_i32_0 = arith.constant 0 : i32
    %c0_i32_1 = arith.constant 0 : i32
    return %c0_i32, %c0_i32_0 : i32, i32
  }
  func.func @transform_5(%arg0: i32) -> (i32, i32, i32) {
    %c0_i32 = arith.constant 0 : i32
    %c0_i32_0 = arith.constant 0 : i32
    %c0_i32_1 = arith.constant 0 : i32
    return %arg0, %c0_i32, %c0_i32_0 : i32, i32, i32
  }
  func.func @transform_6(%arg0: i32) -> (i32, i32, i32) {
    %c0_i32 = arith.constant 0 : i32
    %c0_i32_0 = arith.constant 0 : i32
    %c0_i32_1 = arith.constant 0 : i32
    return %arg0, %c0_i32, %c0_i32_0 : i32, i32, i32
  }
}

module attributes {stable_mosaic.version = 11 : i64} {
  func.func @fused_block_kernel(%arg0: i32, %arg1: memref<8x8x128xf32, #tpu.memory_space<vmem>>, %arg2: memref<1x128xf32, #tpu.memory_space<vmem>>, %arg3: memref<1x128xf32, #tpu.memory_space<vmem>>, %arg4: memref<3x3x128x128xf32, #tpu.memory_space<vmem>>, %arg5: memref<1x128xf32, #tpu.memory_space<vmem>>, %arg6: memref<8x8x128xf32, #tpu.memory_space<vmem>>, %arg7: memref<1x2x128xf32, #tpu.memory_space<vmem>>, %arg8: memref<10x10x128xf32, #tpu.memory_space<vmem>>) attributes {dimension_semantics = [#tpu.dimension_semantics<parallel>], iteration_bounds = array<i64: 1>, scalar_prefetch = 0 : i64, scratch_operands = 1 : i64, tpu.core_type = #tpu.core_type<tc>, window_params = [{pipeline_mode = #tpu.pipeline_mode<synchronous>, transform_indices = @transform_0, window_bounds = array<i64: 8, 8, 128>}, {pipeline_mode = #tpu.pipeline_mode<synchronous>, transform_indices = @transform_1, window_bounds = array<i64: 1, 128>}, {pipeline_mode = #tpu.pipeline_mode<synchronous>, transform_indices = @transform_2, window_bounds = array<i64: 1, 128>}, {pipeline_mode = #tpu.pipeline_mode<synchronous>, transform_indices = @transform_3, window_bounds = array<i64: 3, 3, 128, 128>}, {pipeline_mode = #tpu.pipeline_mode<synchronous>, transform_indices = @transform_4, window_bounds = array<i64: 1, 128>}, {transform_indices = @transform_5, window_bounds = array<i64: 8, 8, 128>}, {transform_indices = @transform_6, window_bounds = array<i64: 1, 2, 128>}]} {
    %c8_i32 = arith.constant 8 : i32
    %0 = arith.muli %arg0, %c8_i32 : i32
    %c0 = arith.constant 0 : index
    %c0_0 = arith.constant 0 : index
    %1 = vector.load %arg2[%c0, %c0_0] : memref<1x128xf32, #tpu.memory_space<vmem>>, vector<1x128xf32>
    %2 = vector.shape_cast %1 : vector<1x128xf32> to vector<128xf32>
    %c0_1 = arith.constant 0 : index
    %c0_2 = arith.constant 0 : index
    %3 = vector.load %arg3[%c0_1, %c0_2] : memref<1x128xf32, #tpu.memory_space<vmem>>, vector<1x128xf32>
    %4 = vector.shape_cast %3 : vector<1x128xf32> to vector<128xf32>
    %cst = arith.constant 0.000000e+00 : f32
    %5 = vector.broadcast %cst : f32 to vector<10x10x128xf32>
    %c0_3 = arith.constant 0 : index
    %c0_4 = arith.constant 0 : index
    %c0_5 = arith.constant 0 : index
    %6 = vector.load %arg8[%c0_3, %c0_4, %c0_5] : memref<10x10x128xf32, #tpu.memory_space<vmem>>, vector<10x10x128xf32>
    tpu.vector_store %arg8[%c0_3, %c0_4, %c0_5], %5 {strides = array<i32>} : memref<10x10x128xf32, #tpu.memory_space<vmem>>, vector<10x10x128xf32>,
    %7 = arith.index_cast %0 : i32 to index
    %c0_6 = arith.constant 0 : index
    %c0_7 = arith.constant 0 : index
    %8 = vector.load %arg1[%7, %c0_6, %c0_7] : memref<8x8x128xf32, #tpu.memory_space<vmem>>, vector<8x8x128xf32>
    %9 = vector.shape_cast %2 : vector<128xf32> to vector<1x1x128xf32>
    %10 = vector.broadcast %9 : vector<1x1x128xf32> to vector<8x8x128xf32>
    %11 = arith.mulf %8, %10 : vector<8x8x128xf32>
    %12 = vector.shape_cast %4 : vector<128xf32> to vector<1x1x128xf32>
    %13 = vector.broadcast %12 : vector<1x1x128xf32> to vector<8x8x128xf32>
    %14 = arith.addf %11, %13 : vector<8x8x128xf32>
    %cst_8 = arith.constant 0.000000e+00 : f32
    %15 = vector.broadcast %cst_8 : f32 to vector<8x8x128xf32>
    %16 = arith.cmpf oge, %14, %15 : vector<8x8x128xf32>
    %cst_9 = arith.constant 2.000000e-01 : f32
    %17 = vector.broadcast %cst_9 : f32 to vector<8x8x128xf32>
    %18 = arith.mulf %17, %14 : vector<8x8x128xf32>
    %19 = arith.select %16, %14, %18 : vector<8x8x128xi1>, vector<8x8x128xf32>
    %c1 = arith.constant 1 : index
    %c1_10 = arith.constant 1 : index
    %c0_11 = arith.constant 0 : index
    %20 = vector.load %arg8[%c1, %c1_10, %c0_11] : memref<10x10x128xf32, #tpu.memory_space<vmem>>, vector<8x8x128xf32>
    tpu.vector_store %arg8[%c1, %c1_10, %c0_11], %19 {strides = array<i32>} : memref<10x10x128xf32, #tpu.memory_space<vmem>>, vector<8x8x128xf32>,
    %cst_12 = arith.constant 0.000000e+00 : f32
    %21 = vector.broadcast %cst_12 : f32 to vector<64x128xf32>
    %c0_13 = arith.constant 0 : index
    %c0_14 = arith.constant 0 : index
    %c0_15 = arith.constant 0 : index
    %22 = vector.load %arg8[%c0_13, %c0_14, %c0_15] : memref<10x10x128xf32, #tpu.memory_space<vmem>>, vector<8x8x128xf32>
    %23 = vector.shape_cast %22 : vector<8x8x128xf32> to vector<64x128xf32>
    %c0_16 = arith.constant 0 : index
    %c0_17 = arith.constant 0 : index
    %c0_18 = arith.constant 0 : index
    %c0_19 = arith.constant 0 : index
    %24 = vector.load %arg4[%c0_16, %c0_17, %c0_18, %c0_19] : memref<3x3x128x128xf32, #tpu.memory_space<vmem>>, vector<1x1x128x128xf32>
    %25 = vector.shape_cast %24 : vector<1x1x128x128xf32> to vector<128x128xf32>
    %cst_20 = arith.constant dense<0.000000e+00> : vector<64x128xf32>
    %26 = tpu.matmul %23, %25, %cst_20 {dimension_numbers = #tpu.dot_dimension_numbers<[1], [0], [0], [1], [0, 0, 1, 1], [], []>} : vector<64x128xf32>, vector<128x128xf32>, vector<64x128xf32> -> vector<64x128xf32>
    %27 = arith.addf %21, %26 : vector<64x128xf32>
    %c0_21 = arith.constant 0 : index
    %c1_22 = arith.constant 1 : index
    %c0_23 = arith.constant 0 : index
    %28 = vector.load %arg8[%c0_21, %c1_22, %c0_23] : memref<10x10x128xf32, #tpu.memory_space<vmem>>, vector<8x8x128xf32>
    %29 = vector.shape_cast %28 : vector<8x8x128xf32> to vector<64x128xf32>
    %c0_24 = arith.constant 0 : index
    %c1_25 = arith.constant 1 : index
    %c0_26 = arith.constant 0 : index
    %c0_27 = arith.constant 0 : index
    %30 = vector.load %arg4[%c0_24, %c1_25, %c0_26, %c0_27] : memref<3x3x128x128xf32, #tpu.memory_space<vmem>>, vector<1x1x128x128xf32>
    %31 = vector.shape_cast %30 : vector<1x1x128x128xf32> to vector<128x128xf32>
    %cst_28 = arith.constant dense<0.000000e+00> : vector<64x128xf32>
    %32 = tpu.matmul %29, %31, %cst_28 {dimension_numbers = #tpu.dot_dimension_numbers<[1], [0], [0], [1], [0, 0, 1, 1], [], []>} : vector<64x128xf32>, vector<128x128xf32>, vector<64x128xf32> -> vector<64x128xf32>
    %33 = arith.addf %27, %32 : vector<64x128xf32>
    %c0_29 = arith.constant 0 : index
    %c2 = arith.constant 2 : index
    %c0_30 = arith.constant 0 : index
    %34 = vector.load %arg8[%c0_29, %c2, %c0_30] : memref<10x10x128xf32, #tpu.memory_space<vmem>>, vector<8x8x128xf32>
    %35 = vector.shape_cast %34 : vector<8x8x128xf32> to vector<64x128xf32>
    %c0_31 = arith.constant 0 : index
    %c2_32 = arith.constant 2 : index
    %c0_33 = arith.constant 0 : index
    %c0_34 = arith.constant 0 : index
    %36 = vector.load %arg4[%c0_31, %c2_32, %c0_33, %c0_34] : memref<3x3x128x128xf32, #tpu.memory_space<vmem>>, vector<1x1x128x128xf32>
    %37 = vector.shape_cast %36 : vector<1x1x128x128xf32> to vector<128x128xf32>
    %cst_35 = arith.constant dense<0.000000e+00> : vector<64x128xf32>
    %38 = tpu.matmul %35, %37, %cst_35 {dimension_numbers = #tpu.dot_dimension_numbers<[1], [0], [0], [1], [0, 0, 1, 1], [], []>} : vector<64x128xf32>, vector<128x128xf32>, vector<64x128xf32> -> vector<64x128xf32>
    %39 = arith.addf %33, %38 : vector<64x128xf32>
    %c1_36 = arith.constant 1 : index
    %c0_37 = arith.constant 0 : index
    %c0_38 = arith.constant 0 : index
    %40 = vector.load %arg8[%c1_36, %c0_37, %c0_38] : memref<10x10x128xf32, #tpu.memory_space<vmem>>, vector<8x8x128xf32>
    %41 = vector.shape_cast %40 : vector<8x8x128xf32> to vector<64x128xf32>
    %c1_39 = arith.constant 1 : index
    %c0_40 = arith.constant 0 : index
    %c0_41 = arith.constant 0 : index
    %c0_42 = arith.constant 0 : index
    %42 = vector.load %arg4[%c1_39, %c0_40, %c0_41, %c0_42] : memref<3x3x128x128xf32, #tpu.memory_space<vmem>>, vector<1x1x128x128xf32>
    %43 = vector.shape_cast %42 : vector<1x1x128x128xf32> to vector<128x128xf32>
    %cst_43 = arith.constant dense<0.000000e+00> : vector<64x128xf32>
    %44 = tpu.matmul %41, %43, %cst_43 {dimension_numbers = #tpu.dot_dimension_numbers<[1], [0], [0], [1], [0, 0, 1, 1], [], []>} : vector<64x128xf32>, vector<128x128xf32>, vector<64x128xf32> -> vector<64x128xf32>
    %45 = arith.addf %39, %44 : vector<64x128xf32>
    %c1_44 = arith.constant 1 : index
    %c1_45 = arith.constant 1 : index
    %c0_46 = arith.constant 0 : index
    %46 = vector.load %arg8[%c1_44, %c1_45, %c0_46] : memref<10x10x128xf32, #tpu.memory_space<vmem>>, vector<8x8x128xf32>
    %47 = vector.shape_cast %46 : vector<8x8x128xf32> to vector<64x128xf32>
    %c1_47 = arith.constant 1 : index
    %c1_48 = arith.constant 1 : index
    %c0_49 = arith.constant 0 : index
    %c0_50 = arith.constant 0 : index
    %48 = vector.load %arg4[%c1_47, %c1_48, %c0_49, %c0_50] : memref<3x3x128x128xf32, #tpu.memory_space<vmem>>, vector<1x1x128x128xf32>
    %49 = vector.shape_cast %48 : vector<1x1x128x128xf32> to vector<128x128xf32>
    %cst_51 = arith.constant dense<0.000000e+00> : vector<64x128xf32>
    %50 = tpu.matmul %47, %49, %cst_51 {dimension_numbers = #tpu.dot_dimension_numbers<[1], [0], [0], [1], [0, 0, 1, 1], [], []>} : vector<64x128xf32>, vector<128x128xf32>, vector<64x128xf32> -> vector<64x128xf32>
    %51 = arith.addf %45, %50 : vector<64x128xf32>
    %c1_52 = arith.constant 1 : index
    %c2_53 = arith.constant 2 : index
    %c0_54 = arith.constant 0 : index
    %52 = vector.load %arg8[%c1_52, %c2_53, %c0_54] : memref<10x10x128xf32, #tpu.memory_space<vmem>>, vector<8x8x128xf32>
    %53 = vector.shape_cast %52 : vector<8x8x128xf32> to vector<64x128xf32>
    %c1_55 = arith.constant 1 : index
    %c2_56 = arith.constant 2 : index
    %c0_57 = arith.constant 0 : index
    %c0_58 = arith.constant 0 : index
    %54 = vector.load %arg4[%c1_55, %c2_56, %c0_57, %c0_58] : memref<3x3x128x128xf32, #tpu.memory_space<vmem>>, vector<1x1x128x128xf32>
    %55 = vector.shape_cast %54 : vector<1x1x128x128xf32> to vector<128x128xf32>
    %cst_59 = arith.constant dense<0.000000e+00> : vector<64x128xf32>
    %56 = tpu.matmul %53, %55, %cst_59 {dimension_numbers = #tpu.dot_dimension_numbers<[1], [0], [0], [1], [0, 0, 1, 1], [], []>} : vector<64x128xf32>, vector<128x128xf32>, vector<64x128xf32> -> vector<64x128xf32>
    %57 = arith.addf %51, %56 : vector<64x128xf32>
    %c2_60 = arith.constant 2 : index
    %c0_61 = arith.constant 0 : index
    %c0_62 = arith.constant 0 : index
    %58 = vector.load %arg8[%c2_60, %c0_61, %c0_62] : memref<10x10x128xf32, #tpu.memory_space<vmem>>, vector<8x8x128xf32>
    %59 = vector.shape_cast %58 : vector<8x8x128xf32> to vector<64x128xf32>
    %c2_63 = arith.constant 2 : index
    %c0_64 = arith.constant 0 : index
    %c0_65 = arith.constant 0 : index
    %c0_66 = arith.constant 0 : index
    %60 = vector.load %arg4[%c2_63, %c0_64, %c0_65, %c0_66] : memref<3x3x128x128xf32, #tpu.memory_space<vmem>>, vector<1x1x128x128xf32>
    %61 = vector.shape_cast %60 : vector<1x1x128x128xf32> to vector<128x128xf32>
    %cst_67 = arith.constant dense<0.000000e+00> : vector<64x128xf32>
    %62 = tpu.matmul %59, %61, %cst_67 {dimension_numbers = #tpu.dot_dimension_numbers<[1], [0], [0], [1], [0, 0, 1, 1], [], []>} : vector<64x128xf32>, vector<128x128xf32>, vector<64x128xf32> -> vector<64x128xf32>
    %63 = arith.addf %57, %62 : vector<64x128xf32>
    %c2_68 = arith.constant 2 : index
    %c1_69 = arith.constant 1 : index
    %c0_70 = arith.constant 0 : index
    %64 = vector.load %arg8[%c2_68, %c1_69, %c0_70] : memref<10x10x128xf32, #tpu.memory_space<vmem>>, vector<8x8x128xf32>
    %65 = vector.shape_cast %64 : vector<8x8x128xf32> to vector<64x128xf32>
    %c2_71 = arith.constant 2 : index
    %c1_72 = arith.constant 1 : index
    %c0_73 = arith.constant 0 : index
    %c0_74 = arith.constant 0 : index
    %66 = vector.load %arg4[%c2_71, %c1_72, %c0_73, %c0_74] : memref<3x3x128x128xf32, #tpu.memory_space<vmem>>, vector<1x1x128x128xf32>
    %67 = vector.shape_cast %66 : vector<1x1x128x128xf32> to vector<128x128xf32>
    %cst_75 = arith.constant dense<0.000000e+00> : vector<64x128xf32>
    %68 = tpu.matmul %65, %67, %cst_75 {dimension_numbers = #tpu.dot_dimension_numbers<[1], [0], [0], [1], [0, 0, 1, 1], [], []>} : vector<64x128xf32>, vector<128x128xf32>, vector<64x128xf32> -> vector<64x128xf32>
    %69 = arith.addf %63, %68 : vector<64x128xf32>
    %c2_76 = arith.constant 2 : index
    %c2_77 = arith.constant 2 : index
    %c0_78 = arith.constant 0 : index
    %70 = vector.load %arg8[%c2_76, %c2_77, %c0_78] : memref<10x10x128xf32, #tpu.memory_space<vmem>>, vector<8x8x128xf32>
    %71 = vector.shape_cast %70 : vector<8x8x128xf32> to vector<64x128xf32>
    %c2_79 = arith.constant 2 : index
    %c2_80 = arith.constant 2 : index
    %c0_81 = arith.constant 0 : index
    %c0_82 = arith.constant 0 : index
    %72 = vector.load %arg4[%c2_79, %c2_80, %c0_81, %c0_82] : memref<3x3x128x128xf32, #tpu.memory_space<vmem>>, vector<1x1x128x128xf32>
    %73 = vector.shape_cast %72 : vector<1x1x128x128xf32> to vector<128x128xf32>
    %cst_83 = arith.constant dense<0.000000e+00> : vector<64x128xf32>
    %74 = tpu.matmul %71, %73, %cst_83 {dimension_numbers = #tpu.dot_dimension_numbers<[1], [0], [0], [1], [0, 0, 1, 1], [], []>} : vector<64x128xf32>, vector<128x128xf32>, vector<64x128xf32> -> vector<64x128xf32>
    %75 = arith.addf %69, %74 : vector<64x128xf32>
    %c0_84 = arith.constant 0 : index
    %c0_85 = arith.constant 0 : index
    %76 = vector.load %arg5[%c0_84, %c0_85] : memref<1x128xf32, #tpu.memory_space<vmem>>, vector<1x128xf32>
    %77 = vector.shape_cast %76 : vector<1x128xf32> to vector<128xf32>
    %78 = vector.shape_cast %77 : vector<128xf32> to vector<1x128xf32>
    %79 = vector.broadcast %78 : vector<1x128xf32> to vector<64x128xf32>
    %80 = arith.addf %75, %79 : vector<64x128xf32>
    %81 = vector.shape_cast %80 : vector<64x128xf32> to vector<8x8x128xf32>
    %c0_86 = arith.constant 0 : index
    %c0_87 = arith.constant 0 : index
    %c0_88 = arith.constant 0 : index
    %82 = vector.load %arg6[%c0_86, %c0_87, %c0_88] : memref<8x8x128xf32, #tpu.memory_space<vmem>>, vector<8x8x128xf32>
    tpu.vector_store %arg6[%c0_86, %c0_87, %c0_88], %81 {strides = array<i32>} : memref<8x8x128xf32, #tpu.memory_space<vmem>>, vector<8x8x128xf32>,
    %cst_89 = arith.constant dense<0.000000e+00> : vector<128xf32>
    %83 = vector.multi_reduction <add>, %80, %cst_89 [0] : vector<64x128xf32> to vector<128xf32>
    %84 = vector.shape_cast %83 : vector<128xf32> to vector<1x128xf32>
    %85 = arith.mulf %80, %80 : vector<64x128xf32>
    %cst_90 = arith.constant dense<0.000000e+00> : vector<128xf32>
    %86 = vector.multi_reduction <add>, %85, %cst_90 [0] : vector<64x128xf32> to vector<128xf32>
    %87 = vector.shape_cast %86 : vector<128xf32> to vector<1x128xf32>
    %88 = tpu.concatenate %84, %87 in 0 : vector<1x128xf32>, vector<1x128xf32> -> vector<2x128xf32>
    %89 = vector.shape_cast %88 : vector<2x128xf32> to vector<1x2x128xf32>
    %c0_91 = arith.constant 0 : index
    %c0_92 = arith.constant 0 : index
    %c0_93 = arith.constant 0 : index
    %90 = vector.load %arg7[%c0_91, %c0_92, %c0_93] : memref<1x2x128xf32, #tpu.memory_space<vmem>>, vector<1x2x128xf32>
    tpu.vector_store %arg7[%c0_91, %c0_92, %c0_93], %89 {strides = array<i32>} : memref<1x2x128xf32, #tpu.memory_space<vmem>>, vector<1x2x128xf32>,
    return
  }
  func.func @transform_0(%arg0: i32) -> (i32, i32, i32) {
    %c0_i32 = arith.constant 0 : i32
    %c0_i32_0 = arith.constant 0 : i32
    %c0_i32_1 = arith.constant 0 : i32
    %c0_i32_2 = arith.constant 0 : i32
    return %c0_i32, %c0_i32_0, %c0_i32_1 : i32, i32, i32
  }
  func.func @transform_1(%arg0: i32) -> (i32, i32) {
    %c0_i32 = arith.constant 0 : i32
    %c0_i32_0 = arith.constant 0 : i32
    %c0_i32_1 = arith.constant 0 : i32
    return %c0_i32, %c0_i32_0 : i32, i32
  }
  func.func @transform_2(%arg0: i32) -> (i32, i32) {
    %c0_i32 = arith.constant 0 : i32
    %c0_i32_0 = arith.constant 0 : i32
    %c0_i32_1 = arith.constant 0 : i32
    return %c0_i32, %c0_i32_0 : i32, i32
  }
  func.func @transform_3(%arg0: i32) -> (i32, i32, i32, i32) {
    %c0_i32 = arith.constant 0 : i32
    %c0_i32_0 = arith.constant 0 : i32
    %c0_i32_1 = arith.constant 0 : i32
    %c0_i32_2 = arith.constant 0 : i32
    %c0_i32_3 = arith.constant 0 : i32
    return %c0_i32, %c0_i32_0, %c0_i32_1, %c0_i32_2 : i32, i32, i32, i32
  }
  func.func @transform_4(%arg0: i32) -> (i32, i32) {
    %c0_i32 = arith.constant 0 : i32
    %c0_i32_0 = arith.constant 0 : i32
    %c0_i32_1 = arith.constant 0 : i32
    return %c0_i32, %c0_i32_0 : i32, i32
  }
  func.func @transform_5(%arg0: i32) -> (i32, i32, i32) {
    %c0_i32 = arith.constant 0 : i32
    %c0_i32_0 = arith.constant 0 : i32
    %c0_i32_1 = arith.constant 0 : i32
    return %arg0, %c0_i32, %c0_i32_0 : i32, i32, i32
  }
  func.func @transform_6(%arg0: i32) -> (i32, i32, i32) {
    %c0_i32 = arith.constant 0 : i32
    %c0_i32_0 = arith.constant 0 : i32
    %c0_i32_1 = arith.constant 0 : i32
    return %arg0, %c0_i32, %c0_i32_0 : i32, i32, i32
  }
}

module attributes {stable_mosaic.version = 11 : i64} {
  func.func @fused_block_kernel(%arg0: i32, %arg1: memref<16x16x128xf32, #tpu.memory_space<vmem>>, %arg2: memref<1x128xf32, #tpu.memory_space<vmem>>, %arg3: memref<1x128xf32, #tpu.memory_space<vmem>>, %arg4: memref<3x3x128x128xf32, #tpu.memory_space<vmem>>, %arg5: memref<1x128xf32, #tpu.memory_space<vmem>>, %arg6: memref<8x16x128xf32, #tpu.memory_space<vmem>>, %arg7: memref<1x2x128xf32, #tpu.memory_space<vmem>>, %arg8: memref<10x18x128xf32, #tpu.memory_space<vmem>>) attributes {dimension_semantics = [#tpu.dimension_semantics<parallel>], iteration_bounds = array<i64: 2>, scalar_prefetch = 0 : i64, scratch_operands = 1 : i64, tpu.core_type = #tpu.core_type<tc>, window_params = [{pipeline_mode = #tpu.pipeline_mode<synchronous>, transform_indices = @transform_0, window_bounds = array<i64: 16, 16, 128>}, {pipeline_mode = #tpu.pipeline_mode<synchronous>, transform_indices = @transform_1, window_bounds = array<i64: 1, 128>}, {pipeline_mode = #tpu.pipeline_mode<synchronous>, transform_indices = @transform_2, window_bounds = array<i64: 1, 128>}, {pipeline_mode = #tpu.pipeline_mode<synchronous>, transform_indices = @transform_3, window_bounds = array<i64: 3, 3, 128, 128>}, {pipeline_mode = #tpu.pipeline_mode<synchronous>, transform_indices = @transform_4, window_bounds = array<i64: 1, 128>}, {transform_indices = @transform_5, window_bounds = array<i64: 8, 16, 128>}, {transform_indices = @transform_6, window_bounds = array<i64: 1, 2, 128>}]} {
    %c8_i32 = arith.constant 8 : i32
    %0 = arith.muli %arg0, %c8_i32 : i32
    %c0 = arith.constant 0 : index
    %c0_0 = arith.constant 0 : index
    %1 = vector.load %arg2[%c0, %c0_0] : memref<1x128xf32, #tpu.memory_space<vmem>>, vector<1x128xf32>
    %2 = vector.shape_cast %1 : vector<1x128xf32> to vector<128xf32>
    %c0_1 = arith.constant 0 : index
    %c0_2 = arith.constant 0 : index
    %3 = vector.load %arg3[%c0_1, %c0_2] : memref<1x128xf32, #tpu.memory_space<vmem>>, vector<1x128xf32>
    %4 = vector.shape_cast %3 : vector<1x128xf32> to vector<128xf32>
    %cst = arith.constant 0.000000e+00 : f32
    %5 = vector.broadcast %cst : f32 to vector<10x18x128xf32>
    %c0_3 = arith.constant 0 : index
    %c0_4 = arith.constant 0 : index
    %c0_5 = arith.constant 0 : index
    %6 = vector.load %arg8[%c0_3, %c0_4, %c0_5] : memref<10x18x128xf32, #tpu.memory_space<vmem>>, vector<10x18x128xf32>
    tpu.vector_store %arg8[%c0_3, %c0_4, %c0_5], %5 {strides = array<i32>} : memref<10x18x128xf32, #tpu.memory_space<vmem>>, vector<10x18x128xf32>,
    %7 = arith.index_cast %0 : i32 to index
    %c0_6 = arith.constant 0 : index
    %c0_7 = arith.constant 0 : index
    %8 = vector.load %arg1[%7, %c0_6, %c0_7] : memref<16x16x128xf32, #tpu.memory_space<vmem>>, vector<8x16x128xf32>
    %9 = vector.shape_cast %2 : vector<128xf32> to vector<1x1x128xf32>
    %10 = vector.broadcast %9 : vector<1x1x128xf32> to vector<8x16x128xf32>
    %11 = arith.mulf %8, %10 : vector<8x16x128xf32>
    %12 = vector.shape_cast %4 : vector<128xf32> to vector<1x1x128xf32>
    %13 = vector.broadcast %12 : vector<1x1x128xf32> to vector<8x16x128xf32>
    %14 = arith.addf %11, %13 : vector<8x16x128xf32>
    %cst_8 = arith.constant 0.000000e+00 : f32
    %15 = vector.broadcast %cst_8 : f32 to vector<8x16x128xf32>
    %16 = arith.cmpf oge, %14, %15 : vector<8x16x128xf32>
    %cst_9 = arith.constant 2.000000e-01 : f32
    %17 = vector.broadcast %cst_9 : f32 to vector<8x16x128xf32>
    %18 = arith.mulf %17, %14 : vector<8x16x128xf32>
    %19 = arith.select %16, %14, %18 : vector<8x16x128xi1>, vector<8x16x128xf32>
    %c1 = arith.constant 1 : index
    %c1_10 = arith.constant 1 : index
    %c0_11 = arith.constant 0 : index
    %20 = vector.load %arg8[%c1, %c1_10, %c0_11] : memref<10x18x128xf32, #tpu.memory_space<vmem>>, vector<8x16x128xf32>
    tpu.vector_store %arg8[%c1, %c1_10, %c0_11], %19 {strides = array<i32>} : memref<10x18x128xf32, #tpu.memory_space<vmem>>, vector<8x16x128xf32>,
    %c0_i32 = arith.constant 0 : i32
    %21 = arith.cmpi sgt, %arg0, %c0_i32 : i32
    %22 = arith.extui %21 : i1 to i32
    %c0_i32_12 = arith.constant 0 : i32
    %23 = arith.cmpi ne, %22, %c0_i32_12 : i32
    scf.if %23 {
      %c1_i32_96 = arith.constant 1 : i32
      %97 = arith.subi %0, %c1_i32_96 : i32
      %98 = arith.index_cast %97 : i32 to index
      %c0_97 = arith.constant 0 : index
      %c0_98 = arith.constant 0 : index
      %99 = vector.load %arg1[%98, %c0_97, %c0_98] : memref<16x16x128xf32, #tpu.memory_space<vmem>>, vector<1x16x128xf32>
      %100 = vector.shape_cast %99 : vector<1x16x128xf32> to vector<16x128xf32>
      %101 = vector.shape_cast %2 : vector<128xf32> to vector<1x128xf32>
      %102 = vector.broadcast %101 : vector<1x128xf32> to vector<16x128xf32>
      %103 = arith.mulf %100, %102 : vector<16x128xf32>
      %104 = vector.shape_cast %4 : vector<128xf32> to vector<1x128xf32>
      %105 = vector.broadcast %104 : vector<1x128xf32> to vector<16x128xf32>
      %106 = arith.addf %103, %105 : vector<16x128xf32>
      %cst_99 = arith.constant 0.000000e+00 : f32
      %107 = vector.broadcast %cst_99 : f32 to vector<16x128xf32>
      %108 = arith.cmpf oge, %106, %107 : vector<16x128xf32>
      %cst_100 = arith.constant 2.000000e-01 : f32
      %109 = vector.broadcast %cst_100 : f32 to vector<16x128xf32>
      %110 = arith.mulf %109, %106 : vector<16x128xf32>
      %111 = arith.select %108, %106, %110 : vector<16x128xi1>, vector<16x128xf32>
      %c0_101 = arith.constant 0 : index
      %c1_102 = arith.constant 1 : index
      %c0_103 = arith.constant 0 : index
      %112 = vector.load %arg8[%c0_101, %c1_102, %c0_103] : memref<10x18x128xf32, #tpu.memory_space<vmem>>, vector<1x16x128xf32>
      %113 = vector.shape_cast %112 : vector<1x16x128xf32> to vector<16x128xf32>
      %114 = vector.shape_cast %111 : vector<16x128xf32> to vector<1x16x128xf32>
      tpu.vector_store %arg8[%c0_101, %c1_102, %c0_103], %114 {strides = array<i32>} : memref<10x18x128xf32, #tpu.memory_space<vmem>>, vector<1x16x128xf32>,
    } else {
    }
    %c1_i32 = arith.constant 1 : i32
    %24 = arith.cmpi slt, %arg0, %c1_i32 : i32
    %25 = arith.extui %24 : i1 to i32
    %c0_i32_13 = arith.constant 0 : i32
    %26 = arith.cmpi ne, %25, %c0_i32_13 : i32
    scf.if %26 {
      %c8_i32_96 = arith.constant 8 : i32
      %97 = arith.addi %0, %c8_i32_96 : i32
      %98 = arith.index_cast %97 : i32 to index
      %c0_97 = arith.constant 0 : index
      %c0_98 = arith.constant 0 : index
      %99 = vector.load %arg1[%98, %c0_97, %c0_98] : memref<16x16x128xf32, #tpu.memory_space<vmem>>, vector<1x16x128xf32>
      %100 = vector.shape_cast %99 : vector<1x16x128xf32> to vector<16x128xf32>
      %101 = vector.shape_cast %2 : vector<128xf32> to vector<1x128xf32>
      %102 = vector.broadcast %101 : vector<1x128xf32> to vector<16x128xf32>
      %103 = arith.mulf %100, %102 : vector<16x128xf32>
      %104 = vector.shape_cast %4 : vector<128xf32> to vector<1x128xf32>
      %105 = vector.broadcast %104 : vector<1x128xf32> to vector<16x128xf32>
      %106 = arith.addf %103, %105 : vector<16x128xf32>
      %cst_99 = arith.constant 0.000000e+00 : f32
      %107 = vector.broadcast %cst_99 : f32 to vector<16x128xf32>
      %108 = arith.cmpf oge, %106, %107 : vector<16x128xf32>
      %cst_100 = arith.constant 2.000000e-01 : f32
      %109 = vector.broadcast %cst_100 : f32 to vector<16x128xf32>
      %110 = arith.mulf %109, %106 : vector<16x128xf32>
      %111 = arith.select %108, %106, %110 : vector<16x128xi1>, vector<16x128xf32>
      %c9 = arith.constant 9 : index
      %c1_101 = arith.constant 1 : index
      %c0_102 = arith.constant 0 : index
      %112 = vector.load %arg8[%c9, %c1_101, %c0_102] : memref<10x18x128xf32, #tpu.memory_space<vmem>>, vector<1x16x128xf32>
      %113 = vector.shape_cast %112 : vector<1x16x128xf32> to vector<16x128xf32>
      %114 = vector.shape_cast %111 : vector<16x128xf32> to vector<1x16x128xf32>
      tpu.vector_store %arg8[%c9, %c1_101, %c0_102], %114 {strides = array<i32>} : memref<10x18x128xf32, #tpu.memory_space<vmem>>, vector<1x16x128xf32>,
    } else {
    }
    %cst_14 = arith.constant 0.000000e+00 : f32
    %27 = vector.broadcast %cst_14 : f32 to vector<128x128xf32>
    %c0_15 = arith.constant 0 : index
    %c0_16 = arith.constant 0 : index
    %c0_17 = arith.constant 0 : index
    %28 = vector.load %arg8[%c0_15, %c0_16, %c0_17] : memref<10x18x128xf32, #tpu.memory_space<vmem>>, vector<8x16x128xf32>
    %29 = vector.shape_cast %28 : vector<8x16x128xf32> to vector<128x128xf32>
    %c0_18 = arith.constant 0 : index
    %c0_19 = arith.constant 0 : index
    %c0_20 = arith.constant 0 : index
    %c0_21 = arith.constant 0 : index
    %30 = vector.load %arg4[%c0_18, %c0_19, %c0_20, %c0_21] : memref<3x3x128x128xf32, #tpu.memory_space<vmem>>, vector<1x1x128x128xf32>
    %31 = vector.shape_cast %30 : vector<1x1x128x128xf32> to vector<128x128xf32>
    %cst_22 = arith.constant dense<0.000000e+00> : vector<128x128xf32>
    %32 = tpu.matmul %29, %31, %cst_22 {dimension_numbers = #tpu.dot_dimension_numbers<[1], [0], [0], [1], [0, 0, 1, 1], [], []>} : vector<128x128xf32>, vector<128x128xf32>, vector<128x128xf32> -> vector<128x128xf32>
    %33 = arith.addf %27, %32 : vector<128x128xf32>
    %c0_23 = arith.constant 0 : index
    %c1_24 = arith.constant 1 : index
    %c0_25 = arith.constant 0 : index
    %34 = vector.load %arg8[%c0_23, %c1_24, %c0_25] : memref<10x18x128xf32, #tpu.memory_space<vmem>>, vector<8x16x128xf32>
    %35 = vector.shape_cast %34 : vector<8x16x128xf32> to vector<128x128xf32>
    %c0_26 = arith.constant 0 : index
    %c1_27 = arith.constant 1 : index
    %c0_28 = arith.constant 0 : index
    %c0_29 = arith.constant 0 : index
    %36 = vector.load %arg4[%c0_26, %c1_27, %c0_28, %c0_29] : memref<3x3x128x128xf32, #tpu.memory_space<vmem>>, vector<1x1x128x128xf32>
    %37 = vector.shape_cast %36 : vector<1x1x128x128xf32> to vector<128x128xf32>
    %cst_30 = arith.constant dense<0.000000e+00> : vector<128x128xf32>
    %38 = tpu.matmul %35, %37, %cst_30 {dimension_numbers = #tpu.dot_dimension_numbers<[1], [0], [0], [1], [0, 0, 1, 1], [], []>} : vector<128x128xf32>, vector<128x128xf32>, vector<128x128xf32> -> vector<128x128xf32>
    %39 = arith.addf %33, %38 : vector<128x128xf32>
    %c0_31 = arith.constant 0 : index
    %c2 = arith.constant 2 : index
    %c0_32 = arith.constant 0 : index
    %40 = vector.load %arg8[%c0_31, %c2, %c0_32] : memref<10x18x128xf32, #tpu.memory_space<vmem>>, vector<8x16x128xf32>
    %41 = vector.shape_cast %40 : vector<8x16x128xf32> to vector<128x128xf32>
    %c0_33 = arith.constant 0 : index
    %c2_34 = arith.constant 2 : index
    %c0_35 = arith.constant 0 : index
    %c0_36 = arith.constant 0 : index
    %42 = vector.load %arg4[%c0_33, %c2_34, %c0_35, %c0_36] : memref<3x3x128x128xf32, #tpu.memory_space<vmem>>, vector<1x1x128x128xf32>
    %43 = vector.shape_cast %42 : vector<1x1x128x128xf32> to vector<128x128xf32>
    %cst_37 = arith.constant dense<0.000000e+00> : vector<128x128xf32>
    %44 = tpu.matmul %41, %43, %cst_37 {dimension_numbers = #tpu.dot_dimension_numbers<[1], [0], [0], [1], [0, 0, 1, 1], [], []>} : vector<128x128xf32>, vector<128x128xf32>, vector<128x128xf32> -> vector<128x128xf32>
    %45 = arith.addf %39, %44 : vector<128x128xf32>
    %c1_38 = arith.constant 1 : index
    %c0_39 = arith.constant 0 : index
    %c0_40 = arith.constant 0 : index
    %46 = vector.load %arg8[%c1_38, %c0_39, %c0_40] : memref<10x18x128xf32, #tpu.memory_space<vmem>>, vector<8x16x128xf32>
    %47 = vector.shape_cast %46 : vector<8x16x128xf32> to vector<128x128xf32>
    %c1_41 = arith.constant 1 : index
    %c0_42 = arith.constant 0 : index
    %c0_43 = arith.constant 0 : index
    %c0_44 = arith.constant 0 : index
    %48 = vector.load %arg4[%c1_41, %c0_42, %c0_43, %c0_44] : memref<3x3x128x128xf32, #tpu.memory_space<vmem>>, vector<1x1x128x128xf32>
    %49 = vector.shape_cast %48 : vector<1x1x128x128xf32> to vector<128x128xf32>
    %cst_45 = arith.constant dense<0.000000e+00> : vector<128x128xf32>
    %50 = tpu.matmul %47, %49, %cst_45 {dimension_numbers = #tpu.dot_dimension_numbers<[1], [0], [0], [1], [0, 0, 1, 1], [], []>} : vector<128x128xf32>, vector<128x128xf32>, vector<128x128xf32> -> vector<128x128xf32>
    %51 = arith.addf %45, %50 : vector<128x128xf32>
    %c1_46 = arith.constant 1 : index
    %c1_47 = arith.constant 1 : index
    %c0_48 = arith.constant 0 : index
    %52 = vector.load %arg8[%c1_46, %c1_47, %c0_48] : memref<10x18x128xf32, #tpu.memory_space<vmem>>, vector<8x16x128xf32>
    %53 = vector.shape_cast %52 : vector<8x16x128xf32> to vector<128x128xf32>
    %c1_49 = arith.constant 1 : index
    %c1_50 = arith.constant 1 : index
    %c0_51 = arith.constant 0 : index
    %c0_52 = arith.constant 0 : index
    %54 = vector.load %arg4[%c1_49, %c1_50, %c0_51, %c0_52] : memref<3x3x128x128xf32, #tpu.memory_space<vmem>>, vector<1x1x128x128xf32>
    %55 = vector.shape_cast %54 : vector<1x1x128x128xf32> to vector<128x128xf32>
    %cst_53 = arith.constant dense<0.000000e+00> : vector<128x128xf32>
    %56 = tpu.matmul %53, %55, %cst_53 {dimension_numbers = #tpu.dot_dimension_numbers<[1], [0], [0], [1], [0, 0, 1, 1], [], []>} : vector<128x128xf32>, vector<128x128xf32>, vector<128x128xf32> -> vector<128x128xf32>
    %57 = arith.addf %51, %56 : vector<128x128xf32>
    %c1_54 = arith.constant 1 : index
    %c2_55 = arith.constant 2 : index
    %c0_56 = arith.constant 0 : index
    %58 = vector.load %arg8[%c1_54, %c2_55, %c0_56] : memref<10x18x128xf32, #tpu.memory_space<vmem>>, vector<8x16x128xf32>
    %59 = vector.shape_cast %58 : vector<8x16x128xf32> to vector<128x128xf32>
    %c1_57 = arith.constant 1 : index
    %c2_58 = arith.constant 2 : index
    %c0_59 = arith.constant 0 : index
    %c0_60 = arith.constant 0 : index
    %60 = vector.load %arg4[%c1_57, %c2_58, %c0_59, %c0_60] : memref<3x3x128x128xf32, #tpu.memory_space<vmem>>, vector<1x1x128x128xf32>
    %61 = vector.shape_cast %60 : vector<1x1x128x128xf32> to vector<128x128xf32>
    %cst_61 = arith.constant dense<0.000000e+00> : vector<128x128xf32>
    %62 = tpu.matmul %59, %61, %cst_61 {dimension_numbers = #tpu.dot_dimension_numbers<[1], [0], [0], [1], [0, 0, 1, 1], [], []>} : vector<128x128xf32>, vector<128x128xf32>, vector<128x128xf32> -> vector<128x128xf32>
    %63 = arith.addf %57, %62 : vector<128x128xf32>
    %c2_62 = arith.constant 2 : index
    %c0_63 = arith.constant 0 : index
    %c0_64 = arith.constant 0 : index
    %64 = vector.load %arg8[%c2_62, %c0_63, %c0_64] : memref<10x18x128xf32, #tpu.memory_space<vmem>>, vector<8x16x128xf32>
    %65 = vector.shape_cast %64 : vector<8x16x128xf32> to vector<128x128xf32>
    %c2_65 = arith.constant 2 : index
    %c0_66 = arith.constant 0 : index
    %c0_67 = arith.constant 0 : index
    %c0_68 = arith.constant 0 : index
    %66 = vector.load %arg4[%c2_65, %c0_66, %c0_67, %c0_68] : memref<3x3x128x128xf32, #tpu.memory_space<vmem>>, vector<1x1x128x128xf32>
    %67 = vector.shape_cast %66 : vector<1x1x128x128xf32> to vector<128x128xf32>
    %cst_69 = arith.constant dense<0.000000e+00> : vector<128x128xf32>
    %68 = tpu.matmul %65, %67, %cst_69 {dimension_numbers = #tpu.dot_dimension_numbers<[1], [0], [0], [1], [0, 0, 1, 1], [], []>} : vector<128x128xf32>, vector<128x128xf32>, vector<128x128xf32> -> vector<128x128xf32>
    %69 = arith.addf %63, %68 : vector<128x128xf32>
    %c2_70 = arith.constant 2 : index
    %c1_71 = arith.constant 1 : index
    %c0_72 = arith.constant 0 : index
    %70 = vector.load %arg8[%c2_70, %c1_71, %c0_72] : memref<10x18x128xf32, #tpu.memory_space<vmem>>, vector<8x16x128xf32>
    %71 = vector.shape_cast %70 : vector<8x16x128xf32> to vector<128x128xf32>
    %c2_73 = arith.constant 2 : index
    %c1_74 = arith.constant 1 : index
    %c0_75 = arith.constant 0 : index
    %c0_76 = arith.constant 0 : index
    %72 = vector.load %arg4[%c2_73, %c1_74, %c0_75, %c0_76] : memref<3x3x128x128xf32, #tpu.memory_space<vmem>>, vector<1x1x128x128xf32>
    %73 = vector.shape_cast %72 : vector<1x1x128x128xf32> to vector<128x128xf32>
    %cst_77 = arith.constant dense<0.000000e+00> : vector<128x128xf32>
    %74 = tpu.matmul %71, %73, %cst_77 {dimension_numbers = #tpu.dot_dimension_numbers<[1], [0], [0], [1], [0, 0, 1, 1], [], []>} : vector<128x128xf32>, vector<128x128xf32>, vector<128x128xf32> -> vector<128x128xf32>
    %75 = arith.addf %69, %74 : vector<128x128xf32>
    %c2_78 = arith.constant 2 : index
    %c2_79 = arith.constant 2 : index
    %c0_80 = arith.constant 0 : index
    %76 = vector.load %arg8[%c2_78, %c2_79, %c0_80] : memref<10x18x128xf32, #tpu.memory_space<vmem>>, vector<8x16x128xf32>
    %77 = vector.shape_cast %76 : vector<8x16x128xf32> to vector<128x128xf32>
    %c2_81 = arith.constant 2 : index
    %c2_82 = arith.constant 2 : index
    %c0_83 = arith.constant 0 : index
    %c0_84 = arith.constant 0 : index
    %78 = vector.load %arg4[%c2_81, %c2_82, %c0_83, %c0_84] : memref<3x3x128x128xf32, #tpu.memory_space<vmem>>, vector<1x1x128x128xf32>
    %79 = vector.shape_cast %78 : vector<1x1x128x128xf32> to vector<128x128xf32>
    %cst_85 = arith.constant dense<0.000000e+00> : vector<128x128xf32>
    %80 = tpu.matmul %77, %79, %cst_85 {dimension_numbers = #tpu.dot_dimension_numbers<[1], [0], [0], [1], [0, 0, 1, 1], [], []>} : vector<128x128xf32>, vector<128x128xf32>, vector<128x128xf32> -> vector<128x128xf32>
    %81 = arith.addf %75, %80 : vector<128x128xf32>
    %c0_86 = arith.constant 0 : index
    %c0_87 = arith.constant 0 : index
    %82 = vector.load %arg5[%c0_86, %c0_87] : memref<1x128xf32, #tpu.memory_space<vmem>>, vector<1x128xf32>
    %83 = vector.shape_cast %82 : vector<1x128xf32> to vector<128xf32>
    %84 = vector.shape_cast %83 : vector<128xf32> to vector<1x128xf32>
    %85 = vector.broadcast %84 : vector<1x128xf32> to vector<128x128xf32>
    %86 = arith.addf %81, %85 : vector<128x128xf32>
    %87 = vector.shape_cast %86 : vector<128x128xf32> to vector<8x16x128xf32>
    %c0_88 = arith.constant 0 : index
    %c0_89 = arith.constant 0 : index
    %c0_90 = arith.constant 0 : index
    %88 = vector.load %arg6[%c0_88, %c0_89, %c0_90] : memref<8x16x128xf32, #tpu.memory_space<vmem>>, vector<8x16x128xf32>
    tpu.vector_store %arg6[%c0_88, %c0_89, %c0_90], %87 {strides = array<i32>} : memref<8x16x128xf32, #tpu.memory_space<vmem>>, vector<8x16x128xf32>,
    %cst_91 = arith.constant dense<0.000000e+00> : vector<128xf32>
    %89 = vector.multi_reduction <add>, %86, %cst_91 [0] : vector<128x128xf32> to vector<128xf32>
    %90 = vector.shape_cast %89 : vector<128xf32> to vector<1x128xf32>
    %91 = arith.mulf %86, %86 : vector<128x128xf32>
    %cst_92 = arith.constant dense<0.000000e+00> : vector<128xf32>
    %92 = vector.multi_reduction <add>, %91, %cst_92 [0] : vector<128x128xf32> to vector<128xf32>
    %93 = vector.shape_cast %92 : vector<128xf32> to vector<1x128xf32>
    %94 = tpu.concatenate %90, %93 in 0 : vector<1x128xf32>, vector<1x128xf32> -> vector<2x128xf32>
    %95 = vector.shape_cast %94 : vector<2x128xf32> to vector<1x2x128xf32>
    %c0_93 = arith.constant 0 : index
    %c0_94 = arith.constant 0 : index
    %c0_95 = arith.constant 0 : index
    %96 = vector.load %arg7[%c0_93, %c0_94, %c0_95] : memref<1x2x128xf32, #tpu.memory_space<vmem>>, vector<1x2x128xf32>
    tpu.vector_store %arg7[%c0_93, %c0_94, %c0_95], %95 {strides = array<i32>} : memref<1x2x128xf32, #tpu.memory_space<vmem>>, vector<1x2x128xf32>,
    return
  }
  func.func @transform_0(%arg0: i32) -> (i32, i32, i32) {
    %c0_i32 = arith.constant 0 : i32
    %c0_i32_0 = arith.constant 0 : i32
    %c0_i32_1 = arith.constant 0 : i32
    %c0_i32_2 = arith.constant 0 : i32
    return %c0_i32, %c0_i32_0, %c0_i32_1 : i32, i32, i32
  }
  func.func @transform_1(%arg0: i32) -> (i32, i32) {
    %c0_i32 = arith.constant 0 : i32
    %c0_i32_0 = arith.constant 0 : i32
    %c0_i32_1 = arith.constant 0 : i32
    return %c0_i32, %c0_i32_0 : i32, i32
  }
  func.func @transform_2(%arg0: i32) -> (i32, i32) {
    %c0_i32 = arith.constant 0 : i32
    %c0_i32_0 = arith.constant 0 : i32
    %c0_i32_1 = arith.constant 0 : i32
    return %c0_i32, %c0_i32_0 : i32, i32
  }
  func.func @transform_3(%arg0: i32) -> (i32, i32, i32, i32) {
    %c0_i32 = arith.constant 0 : i32
    %c0_i32_0 = arith.constant 0 : i32
    %c0_i32_1 = arith.constant 0 : i32
    %c0_i32_2 = arith.constant 0 : i32
    %c0_i32_3 = arith.constant 0 : i32
    return %c0_i32, %c0_i32_0, %c0_i32_1, %c0_i32_2 : i32, i32, i32, i32
  }
  func.func @transform_4(%arg0: i32) -> (i32, i32) {
    %c0_i32 = arith.constant 0 : i32
    %c0_i32_0 = arith.constant 0 : i32
    %c0_i32_1 = arith.constant 0 : i32
    return %c0_i32, %c0_i32_0 : i32, i32
  }
  func.func @transform_5(%arg0: i32) -> (i32, i32, i32) {
    %c0_i32 = arith.constant 0 : i32
    %c0_i32_0 = arith.constant 0 : i32
    %c0_i32_1 = arith.constant 0 : i32
    return %arg0, %c0_i32, %c0_i32_0 : i32, i32, i32
  }
  func.func @transform_6(%arg0: i32) -> (i32, i32, i32) {
    %c0_i32 = arith.constant 0 : i32
    %c0_i32_0 = arith.constant 0 : i32
    %c0_i32_1 = arith.constant 0 : i32
    return %arg0, %c0_i32, %c0_i32_0 : i32, i32, i32
  }
}

module attributes {stable_mosaic.version = 11 : i64} {
  func.func @fused_block_kernel(%arg0: i32, %arg1: memref<32x32x128xf32, #tpu.memory_space<vmem>>, %arg2: memref<1x128xf32, #tpu.memory_space<vmem>>, %arg3: memref<1x128xf32, #tpu.memory_space<vmem>>, %arg4: memref<3x3x128x128xf32, #tpu.memory_space<vmem>>, %arg5: memref<1x128xf32, #tpu.memory_space<vmem>>, %arg6: memref<4x32x128xf32, #tpu.memory_space<vmem>>, %arg7: memref<1x2x128xf32, #tpu.memory_space<vmem>>, %arg8: memref<6x34x128xf32, #tpu.memory_space<vmem>>) attributes {dimension_semantics = [#tpu.dimension_semantics<parallel>], iteration_bounds = array<i64: 8>, scalar_prefetch = 0 : i64, scratch_operands = 1 : i64, tpu.core_type = #tpu.core_type<tc>, window_params = [{pipeline_mode = #tpu.pipeline_mode<synchronous>, transform_indices = @transform_0, window_bounds = array<i64: 32, 32, 128>}, {pipeline_mode = #tpu.pipeline_mode<synchronous>, transform_indices = @transform_1, window_bounds = array<i64: 1, 128>}, {pipeline_mode = #tpu.pipeline_mode<synchronous>, transform_indices = @transform_2, window_bounds = array<i64: 1, 128>}, {pipeline_mode = #tpu.pipeline_mode<synchronous>, transform_indices = @transform_3, window_bounds = array<i64: 3, 3, 128, 128>}, {pipeline_mode = #tpu.pipeline_mode<synchronous>, transform_indices = @transform_4, window_bounds = array<i64: 1, 128>}, {transform_indices = @transform_5, window_bounds = array<i64: 4, 32, 128>}, {transform_indices = @transform_6, window_bounds = array<i64: 1, 2, 128>}]} {
    %c4_i32 = arith.constant 4 : i32
    %0 = arith.muli %arg0, %c4_i32 : i32
    %c0 = arith.constant 0 : index
    %c0_0 = arith.constant 0 : index
    %1 = vector.load %arg2[%c0, %c0_0] : memref<1x128xf32, #tpu.memory_space<vmem>>, vector<1x128xf32>
    %2 = vector.shape_cast %1 : vector<1x128xf32> to vector<128xf32>
    %c0_1 = arith.constant 0 : index
    %c0_2 = arith.constant 0 : index
    %3 = vector.load %arg3[%c0_1, %c0_2] : memref<1x128xf32, #tpu.memory_space<vmem>>, vector<1x128xf32>
    %4 = vector.shape_cast %3 : vector<1x128xf32> to vector<128xf32>
    %cst = arith.constant 0.000000e+00 : f32
    %5 = vector.broadcast %cst : f32 to vector<6x34x128xf32>
    %c0_3 = arith.constant 0 : index
    %c0_4 = arith.constant 0 : index
    %c0_5 = arith.constant 0 : index
    %6 = vector.load %arg8[%c0_3, %c0_4, %c0_5] : memref<6x34x128xf32, #tpu.memory_space<vmem>>, vector<6x34x128xf32>
    tpu.vector_store %arg8[%c0_3, %c0_4, %c0_5], %5 {strides = array<i32>} : memref<6x34x128xf32, #tpu.memory_space<vmem>>, vector<6x34x128xf32>,
    %7 = arith.index_cast %0 : i32 to index
    %c0_6 = arith.constant 0 : index
    %c0_7 = arith.constant 0 : index
    %8 = vector.load %arg1[%7, %c0_6, %c0_7] : memref<32x32x128xf32, #tpu.memory_space<vmem>>, vector<4x32x128xf32>
    %9 = vector.shape_cast %2 : vector<128xf32> to vector<1x1x128xf32>
    %10 = vector.broadcast %9 : vector<1x1x128xf32> to vector<4x32x128xf32>
    %11 = arith.mulf %8, %10 : vector<4x32x128xf32>
    %12 = vector.shape_cast %4 : vector<128xf32> to vector<1x1x128xf32>
    %13 = vector.broadcast %12 : vector<1x1x128xf32> to vector<4x32x128xf32>
    %14 = arith.addf %11, %13 : vector<4x32x128xf32>
    %cst_8 = arith.constant 0.000000e+00 : f32
    %15 = vector.broadcast %cst_8 : f32 to vector<4x32x128xf32>
    %16 = arith.cmpf oge, %14, %15 : vector<4x32x128xf32>
    %cst_9 = arith.constant 2.000000e-01 : f32
    %17 = vector.broadcast %cst_9 : f32 to vector<4x32x128xf32>
    %18 = arith.mulf %17, %14 : vector<4x32x128xf32>
    %19 = arith.select %16, %14, %18 : vector<4x32x128xi1>, vector<4x32x128xf32>
    %c1 = arith.constant 1 : index
    %c1_10 = arith.constant 1 : index
    %c0_11 = arith.constant 0 : index
    %20 = vector.load %arg8[%c1, %c1_10, %c0_11] : memref<6x34x128xf32, #tpu.memory_space<vmem>>, vector<4x32x128xf32>
    tpu.vector_store %arg8[%c1, %c1_10, %c0_11], %19 {strides = array<i32>} : memref<6x34x128xf32, #tpu.memory_space<vmem>>, vector<4x32x128xf32>,
    %c0_i32 = arith.constant 0 : i32
    %21 = arith.cmpi sgt, %arg0, %c0_i32 : i32
    %22 = arith.extui %21 : i1 to i32
    %c0_i32_12 = arith.constant 0 : i32
    %23 = arith.cmpi ne, %22, %c0_i32_12 : i32
    scf.if %23 {
      %c1_i32 = arith.constant 1 : i32
      %97 = arith.subi %0, %c1_i32 : i32
      %98 = arith.index_cast %97 : i32 to index
      %c0_96 = arith.constant 0 : index
      %c0_97 = arith.constant 0 : index
      %99 = vector.load %arg1[%98, %c0_96, %c0_97] : memref<32x32x128xf32, #tpu.memory_space<vmem>>, vector<1x32x128xf32>
      %100 = vector.shape_cast %99 : vector<1x32x128xf32> to vector<32x128xf32>
      %101 = vector.shape_cast %2 : vector<128xf32> to vector<1x128xf32>
      %102 = vector.broadcast %101 : vector<1x128xf32> to vector<32x128xf32>
      %103 = arith.mulf %100, %102 : vector<32x128xf32>
      %104 = vector.shape_cast %4 : vector<128xf32> to vector<1x128xf32>
      %105 = vector.broadcast %104 : vector<1x128xf32> to vector<32x128xf32>
      %106 = arith.addf %103, %105 : vector<32x128xf32>
      %cst_98 = arith.constant 0.000000e+00 : f32
      %107 = vector.broadcast %cst_98 : f32 to vector<32x128xf32>
      %108 = arith.cmpf oge, %106, %107 : vector<32x128xf32>
      %cst_99 = arith.constant 2.000000e-01 : f32
      %109 = vector.broadcast %cst_99 : f32 to vector<32x128xf32>
      %110 = arith.mulf %109, %106 : vector<32x128xf32>
      %111 = arith.select %108, %106, %110 : vector<32x128xi1>, vector<32x128xf32>
      %c0_100 = arith.constant 0 : index
      %c1_101 = arith.constant 1 : index
      %c0_102 = arith.constant 0 : index
      %112 = vector.load %arg8[%c0_100, %c1_101, %c0_102] : memref<6x34x128xf32, #tpu.memory_space<vmem>>, vector<1x32x128xf32>
      %113 = vector.shape_cast %112 : vector<1x32x128xf32> to vector<32x128xf32>
      %114 = vector.shape_cast %111 : vector<32x128xf32> to vector<1x32x128xf32>
      tpu.vector_store %arg8[%c0_100, %c1_101, %c0_102], %114 {strides = array<i32>} : memref<6x34x128xf32, #tpu.memory_space<vmem>>, vector<1x32x128xf32>,
    } else {
    }
    %c7_i32 = arith.constant 7 : i32
    %24 = arith.cmpi slt, %arg0, %c7_i32 : i32
    %25 = arith.extui %24 : i1 to i32
    %c0_i32_13 = arith.constant 0 : i32
    %26 = arith.cmpi ne, %25, %c0_i32_13 : i32
    scf.if %26 {
      %c4_i32_96 = arith.constant 4 : i32
      %97 = arith.addi %0, %c4_i32_96 : i32
      %98 = arith.index_cast %97 : i32 to index
      %c0_97 = arith.constant 0 : index
      %c0_98 = arith.constant 0 : index
      %99 = vector.load %arg1[%98, %c0_97, %c0_98] : memref<32x32x128xf32, #tpu.memory_space<vmem>>, vector<1x32x128xf32>
      %100 = vector.shape_cast %99 : vector<1x32x128xf32> to vector<32x128xf32>
      %101 = vector.shape_cast %2 : vector<128xf32> to vector<1x128xf32>
      %102 = vector.broadcast %101 : vector<1x128xf32> to vector<32x128xf32>
      %103 = arith.mulf %100, %102 : vector<32x128xf32>
      %104 = vector.shape_cast %4 : vector<128xf32> to vector<1x128xf32>
      %105 = vector.broadcast %104 : vector<1x128xf32> to vector<32x128xf32>
      %106 = arith.addf %103, %105 : vector<32x128xf32>
      %cst_99 = arith.constant 0.000000e+00 : f32
      %107 = vector.broadcast %cst_99 : f32 to vector<32x128xf32>
      %108 = arith.cmpf oge, %106, %107 : vector<32x128xf32>
      %cst_100 = arith.constant 2.000000e-01 : f32
      %109 = vector.broadcast %cst_100 : f32 to vector<32x128xf32>
      %110 = arith.mulf %109, %106 : vector<32x128xf32>
      %111 = arith.select %108, %106, %110 : vector<32x128xi1>, vector<32x128xf32>
      %c5 = arith.constant 5 : index
      %c1_101 = arith.constant 1 : index
      %c0_102 = arith.constant 0 : index
      %112 = vector.load %arg8[%c5, %c1_101, %c0_102] : memref<6x34x128xf32, #tpu.memory_space<vmem>>, vector<1x32x128xf32>
      %113 = vector.shape_cast %112 : vector<1x32x128xf32> to vector<32x128xf32>
      %114 = vector.shape_cast %111 : vector<32x128xf32> to vector<1x32x128xf32>
      tpu.vector_store %arg8[%c5, %c1_101, %c0_102], %114 {strides = array<i32>} : memref<6x34x128xf32, #tpu.memory_space<vmem>>, vector<1x32x128xf32>,
    } else {
    }
    %cst_14 = arith.constant 0.000000e+00 : f32
    %27 = vector.broadcast %cst_14 : f32 to vector<128x128xf32>
    %c0_15 = arith.constant 0 : index
    %c0_16 = arith.constant 0 : index
    %c0_17 = arith.constant 0 : index
    %28 = vector.load %arg8[%c0_15, %c0_16, %c0_17] : memref<6x34x128xf32, #tpu.memory_space<vmem>>, vector<4x32x128xf32>
    %29 = vector.shape_cast %28 : vector<4x32x128xf32> to vector<128x128xf32>
    %c0_18 = arith.constant 0 : index
    %c0_19 = arith.constant 0 : index
    %c0_20 = arith.constant 0 : index
    %c0_21 = arith.constant 0 : index
    %30 = vector.load %arg4[%c0_18, %c0_19, %c0_20, %c0_21] : memref<3x3x128x128xf32, #tpu.memory_space<vmem>>, vector<1x1x128x128xf32>
    %31 = vector.shape_cast %30 : vector<1x1x128x128xf32> to vector<128x128xf32>
    %cst_22 = arith.constant dense<0.000000e+00> : vector<128x128xf32>
    %32 = tpu.matmul %29, %31, %cst_22 {dimension_numbers = #tpu.dot_dimension_numbers<[1], [0], [0], [1], [0, 0, 1, 1], [], []>} : vector<128x128xf32>, vector<128x128xf32>, vector<128x128xf32> -> vector<128x128xf32>
    %33 = arith.addf %27, %32 : vector<128x128xf32>
    %c0_23 = arith.constant 0 : index
    %c1_24 = arith.constant 1 : index
    %c0_25 = arith.constant 0 : index
    %34 = vector.load %arg8[%c0_23, %c1_24, %c0_25] : memref<6x34x128xf32, #tpu.memory_space<vmem>>, vector<4x32x128xf32>
    %35 = vector.shape_cast %34 : vector<4x32x128xf32> to vector<128x128xf32>
    %c0_26 = arith.constant 0 : index
    %c1_27 = arith.constant 1 : index
    %c0_28 = arith.constant 0 : index
    %c0_29 = arith.constant 0 : index
    %36 = vector.load %arg4[%c0_26, %c1_27, %c0_28, %c0_29] : memref<3x3x128x128xf32, #tpu.memory_space<vmem>>, vector<1x1x128x128xf32>
    %37 = vector.shape_cast %36 : vector<1x1x128x128xf32> to vector<128x128xf32>
    %cst_30 = arith.constant dense<0.000000e+00> : vector<128x128xf32>
    %38 = tpu.matmul %35, %37, %cst_30 {dimension_numbers = #tpu.dot_dimension_numbers<[1], [0], [0], [1], [0, 0, 1, 1], [], []>} : vector<128x128xf32>, vector<128x128xf32>, vector<128x128xf32> -> vector<128x128xf32>
    %39 = arith.addf %33, %38 : vector<128x128xf32>
    %c0_31 = arith.constant 0 : index
    %c2 = arith.constant 2 : index
    %c0_32 = arith.constant 0 : index
    %40 = vector.load %arg8[%c0_31, %c2, %c0_32] : memref<6x34x128xf32, #tpu.memory_space<vmem>>, vector<4x32x128xf32>
    %41 = vector.shape_cast %40 : vector<4x32x128xf32> to vector<128x128xf32>
    %c0_33 = arith.constant 0 : index
    %c2_34 = arith.constant 2 : index
    %c0_35 = arith.constant 0 : index
    %c0_36 = arith.constant 0 : index
    %42 = vector.load %arg4[%c0_33, %c2_34, %c0_35, %c0_36] : memref<3x3x128x128xf32, #tpu.memory_space<vmem>>, vector<1x1x128x128xf32>
    %43 = vector.shape_cast %42 : vector<1x1x128x128xf32> to vector<128x128xf32>
    %cst_37 = arith.constant dense<0.000000e+00> : vector<128x128xf32>
    %44 = tpu.matmul %41, %43, %cst_37 {dimension_numbers = #tpu.dot_dimension_numbers<[1], [0], [0], [1], [0, 0, 1, 1], [], []>} : vector<128x128xf32>, vector<128x128xf32>, vector<128x128xf32> -> vector<128x128xf32>
    %45 = arith.addf %39, %44 : vector<128x128xf32>
    %c1_38 = arith.constant 1 : index
    %c0_39 = arith.constant 0 : index
    %c0_40 = arith.constant 0 : index
    %46 = vector.load %arg8[%c1_38, %c0_39, %c0_40] : memref<6x34x128xf32, #tpu.memory_space<vmem>>, vector<4x32x128xf32>
    %47 = vector.shape_cast %46 : vector<4x32x128xf32> to vector<128x128xf32>
    %c1_41 = arith.constant 1 : index
    %c0_42 = arith.constant 0 : index
    %c0_43 = arith.constant 0 : index
    %c0_44 = arith.constant 0 : index
    %48 = vector.load %arg4[%c1_41, %c0_42, %c0_43, %c0_44] : memref<3x3x128x128xf32, #tpu.memory_space<vmem>>, vector<1x1x128x128xf32>
    %49 = vector.shape_cast %48 : vector<1x1x128x128xf32> to vector<128x128xf32>
    %cst_45 = arith.constant dense<0.000000e+00> : vector<128x128xf32>
    %50 = tpu.matmul %47, %49, %cst_45 {dimension_numbers = #tpu.dot_dimension_numbers<[1], [0], [0], [1], [0, 0, 1, 1], [], []>} : vector<128x128xf32>, vector<128x128xf32>, vector<128x128xf32> -> vector<128x128xf32>
    %51 = arith.addf %45, %50 : vector<128x128xf32>
    %c1_46 = arith.constant 1 : index
    %c1_47 = arith.constant 1 : index
    %c0_48 = arith.constant 0 : index
    %52 = vector.load %arg8[%c1_46, %c1_47, %c0_48] : memref<6x34x128xf32, #tpu.memory_space<vmem>>, vector<4x32x128xf32>
    %53 = vector.shape_cast %52 : vector<4x32x128xf32> to vector<128x128xf32>
    %c1_49 = arith.constant 1 : index
    %c1_50 = arith.constant 1 : index
    %c0_51 = arith.constant 0 : index
    %c0_52 = arith.constant 0 : index
    %54 = vector.load %arg4[%c1_49, %c1_50, %c0_51, %c0_52] : memref<3x3x128x128xf32, #tpu.memory_space<vmem>>, vector<1x1x128x128xf32>
    %55 = vector.shape_cast %54 : vector<1x1x128x128xf32> to vector<128x128xf32>
    %cst_53 = arith.constant dense<0.000000e+00> : vector<128x128xf32>
    %56 = tpu.matmul %53, %55, %cst_53 {dimension_numbers = #tpu.dot_dimension_numbers<[1], [0], [0], [1], [0, 0, 1, 1], [], []>} : vector<128x128xf32>, vector<128x128xf32>, vector<128x128xf32> -> vector<128x128xf32>
    %57 = arith.addf %51, %56 : vector<128x128xf32>
    %c1_54 = arith.constant 1 : index
    %c2_55 = arith.constant 2 : index
    %c0_56 = arith.constant 0 : index
    %58 = vector.load %arg8[%c1_54, %c2_55, %c0_56] : memref<6x34x128xf32, #tpu.memory_space<vmem>>, vector<4x32x128xf32>
    %59 = vector.shape_cast %58 : vector<4x32x128xf32> to vector<128x128xf32>
    %c1_57 = arith.constant 1 : index
    %c2_58 = arith.constant 2 : index
    %c0_59 = arith.constant 0 : index
    %c0_60 = arith.constant 0 : index
    %60 = vector.load %arg4[%c1_57, %c2_58, %c0_59, %c0_60] : memref<3x3x128x128xf32, #tpu.memory_space<vmem>>, vector<1x1x128x128xf32>
    %61 = vector.shape_cast %60 : vector<1x1x128x128xf32> to vector<128x128xf32>
    %cst_61 = arith.constant dense<0.000000e+00> : vector<128x128xf32>
    %62 = tpu.matmul %59, %61, %cst_61 {dimension_numbers = #tpu.dot_dimension_numbers<[1], [0], [0], [1], [0, 0, 1, 1], [], []>} : vector<128x128xf32>, vector<128x128xf32>, vector<128x128xf32> -> vector<128x128xf32>
    %63 = arith.addf %57, %62 : vector<128x128xf32>
    %c2_62 = arith.constant 2 : index
    %c0_63 = arith.constant 0 : index
    %c0_64 = arith.constant 0 : index
    %64 = vector.load %arg8[%c2_62, %c0_63, %c0_64] : memref<6x34x128xf32, #tpu.memory_space<vmem>>, vector<4x32x128xf32>
    %65 = vector.shape_cast %64 : vector<4x32x128xf32> to vector<128x128xf32>
    %c2_65 = arith.constant 2 : index
    %c0_66 = arith.constant 0 : index
    %c0_67 = arith.constant 0 : index
    %c0_68 = arith.constant 0 : index
    %66 = vector.load %arg4[%c2_65, %c0_66, %c0_67, %c0_68] : memref<3x3x128x128xf32, #tpu.memory_space<vmem>>, vector<1x1x128x128xf32>
    %67 = vector.shape_cast %66 : vector<1x1x128x128xf32> to vector<128x128xf32>
    %cst_69 = arith.constant dense<0.000000e+00> : vector<128x128xf32>
    %68 = tpu.matmul %65, %67, %cst_69 {dimension_numbers = #tpu.dot_dimension_numbers<[1], [0], [0], [1], [0, 0, 1, 1], [], []>} : vector<128x128xf32>, vector<128x128xf32>, vector<128x128xf32> -> vector<128x128xf32>
    %69 = arith.addf %63, %68 : vector<128x128xf32>
    %c2_70 = arith.constant 2 : index
    %c1_71 = arith.constant 1 : index
    %c0_72 = arith.constant 0 : index
    %70 = vector.load %arg8[%c2_70, %c1_71, %c0_72] : memref<6x34x128xf32, #tpu.memory_space<vmem>>, vector<4x32x128xf32>
    %71 = vector.shape_cast %70 : vector<4x32x128xf32> to vector<128x128xf32>
    %c2_73 = arith.constant 2 : index
    %c1_74 = arith.constant 1 : index
    %c0_75 = arith.constant 0 : index
    %c0_76 = arith.constant 0 : index
    %72 = vector.load %arg4[%c2_73, %c1_74, %c0_75, %c0_76] : memref<3x3x128x128xf32, #tpu.memory_space<vmem>>, vector<1x1x128x128xf32>
    %73 = vector.shape_cast %72 : vector<1x1x128x128xf32> to vector<128x128xf32>
    %cst_77 = arith.constant dense<0.000000e+00> : vector<128x128xf32>
    %74 = tpu.matmul %71, %73, %cst_77 {dimension_numbers = #tpu.dot_dimension_numbers<[1], [0], [0], [1], [0, 0, 1, 1], [], []>} : vector<128x128xf32>, vector<128x128xf32>, vector<128x128xf32> -> vector<128x128xf32>
    %75 = arith.addf %69, %74 : vector<128x128xf32>
    %c2_78 = arith.constant 2 : index
    %c2_79 = arith.constant 2 : index
    %c0_80 = arith.constant 0 : index
    %76 = vector.load %arg8[%c2_78, %c2_79, %c0_80] : memref<6x34x128xf32, #tpu.memory_space<vmem>>, vector<4x32x128xf32>
    %77 = vector.shape_cast %76 : vector<4x32x128xf32> to vector<128x128xf32>
    %c2_81 = arith.constant 2 : index
    %c2_82 = arith.constant 2 : index
    %c0_83 = arith.constant 0 : index
    %c0_84 = arith.constant 0 : index
    %78 = vector.load %arg4[%c2_81, %c2_82, %c0_83, %c0_84] : memref<3x3x128x128xf32, #tpu.memory_space<vmem>>, vector<1x1x128x128xf32>
    %79 = vector.shape_cast %78 : vector<1x1x128x128xf32> to vector<128x128xf32>
    %cst_85 = arith.constant dense<0.000000e+00> : vector<128x128xf32>
    %80 = tpu.matmul %77, %79, %cst_85 {dimension_numbers = #tpu.dot_dimension_numbers<[1], [0], [0], [1], [0, 0, 1, 1], [], []>} : vector<128x128xf32>, vector<128x128xf32>, vector<128x128xf32> -> vector<128x128xf32>
    %81 = arith.addf %75, %80 : vector<128x128xf32>
    %c0_86 = arith.constant 0 : index
    %c0_87 = arith.constant 0 : index
    %82 = vector.load %arg5[%c0_86, %c0_87] : memref<1x128xf32, #tpu.memory_space<vmem>>, vector<1x128xf32>
    %83 = vector.shape_cast %82 : vector<1x128xf32> to vector<128xf32>
    %84 = vector.shape_cast %83 : vector<128xf32> to vector<1x128xf32>
    %85 = vector.broadcast %84 : vector<1x128xf32> to vector<128x128xf32>
    %86 = arith.addf %81, %85 : vector<128x128xf32>
    %87 = vector.shape_cast %86 : vector<128x128xf32> to vector<4x32x128xf32>
    %c0_88 = arith.constant 0 : index
    %c0_89 = arith.constant 0 : index
    %c0_90 = arith.constant 0 : index
    %88 = vector.load %arg6[%c0_88, %c0_89, %c0_90] : memref<4x32x128xf32, #tpu.memory_space<vmem>>, vector<4x32x128xf32>
    tpu.vector_store %arg6[%c0_88, %c0_89, %c0_90], %87 {strides = array<i32>} : memref<4x32x128xf32, #tpu.memory_space<vmem>>, vector<4x32x128xf32>,
    %cst_91 = arith.constant dense<0.000000e+00> : vector<128xf32>
    %89 = vector.multi_reduction <add>, %86, %cst_91 [0] : vector<128x128xf32> to vector<128xf32>
    %90 = vector.shape_cast %89 : vector<128xf32> to vector<1x128xf32>
    %91 = arith.mulf %86, %86 : vector<128x128xf32>
    %cst_92 = arith.constant dense<0.000000e+00> : vector<128xf32>
    %92 = vector.multi_reduction <add>, %91, %cst_92 [0] : vector<128x128xf32> to vector<128xf32>
    %93 = vector.shape_cast %92 : vector<128xf32> to vector<1x128xf32>
    %94 = tpu.concatenate %90, %93 in 0 : vector<1x128xf32>, vector<1x128xf32> -> vector<2x128xf32>
    %95 = vector.shape_cast %94 : vector<2x128xf32> to vector<1x2x128xf32>
    %c0_93 = arith.constant 0 : index
    %c0_94 = arith.constant 0 : index
    %c0_95 = arith.constant 0 : index
    %96 = vector.load %arg7[%c0_93, %c0_94, %c0_95] : memref<1x2x128xf32, #tpu.memory_space<vmem>>, vector<1x2x128xf32>
    tpu.vector_store %arg7[%c0_93, %c0_94, %c0_95], %95 {strides = array<i32>} : memref<1x2x128xf32, #tpu.memory_space<vmem>>, vector<1x2x128xf32>,
    return
  }
  func.func @transform_0(%arg0: i32) -> (i32, i32, i32) {
    %c0_i32 = arith.constant 0 : i32
    %c0_i32_0 = arith.constant 0 : i32
    %c0_i32_1 = arith.constant 0 : i32
    %c0_i32_2 = arith.constant 0 : i32
    return %c0_i32, %c0_i32_0, %c0_i32_1 : i32, i32, i32
  }
  func.func @transform_1(%arg0: i32) -> (i32, i32) {
    %c0_i32 = arith.constant 0 : i32
    %c0_i32_0 = arith.constant 0 : i32
    %c0_i32_1 = arith.constant 0 : i32
    return %c0_i32, %c0_i32_0 : i32, i32
  }
  func.func @transform_2(%arg0: i32) -> (i32, i32) {
    %c0_i32 = arith.constant 0 : i32
    %c0_i32_0 = arith.constant 0 : i32
    %c0_i32_1 = arith.constant 0 : i32
    return %c0_i32, %c0_i32_0 : i32, i32
  }
  func.func @transform_3(%arg0: i32) -> (i32, i32, i32, i32) {
    %c0_i32 = arith.constant 0 : i32
    %c0_i32_0 = arith.constant 0 : i32
    %c0_i32_1 = arith.constant 0 : i32
    %c0_i32_2 = arith.constant 0 : i32
    %c0_i32_3 = arith.constant 0 : i32
    return %c0_i32, %c0_i32_0, %c0_i32_1, %c0_i32_2 : i32, i32, i32, i32
  }
  func.func @transform_4(%arg0: i32) -> (i32, i32) {
    %c0_i32 = arith.constant 0 : i32
    %c0_i32_0 = arith.constant 0 : i32
    %c0_i32_1 = arith.constant 0 : i32
    return %c0_i32, %c0_i32_0 : i32, i32
  }
  func.func @transform_5(%arg0: i32) -> (i32, i32, i32) {
    %c0_i32 = arith.constant 0 : i32
    %c0_i32_0 = arith.constant 0 : i32
    %c0_i32_1 = arith.constant 0 : i32
    return %arg0, %c0_i32, %c0_i32_0 : i32, i32, i32
  }
  func.func @transform_6(%arg0: i32) -> (i32, i32, i32) {
    %c0_i32 = arith.constant 0 : i32
    %c0_i32_0 = arith.constant 0 : i32
    %c0_i32_1 = arith.constant 0 : i32
    return %arg0, %c0_i32, %c0_i32_0 : i32, i32, i32
  }
}

module attributes {stable_mosaic.version = 11 : i64} {
  func.func @fused_block_kernel(%arg0: i32, %arg1: memref<32x32x128xf32, #tpu.memory_space<vmem>>, %arg2: memref<1x128xf32, #tpu.memory_space<vmem>>, %arg3: memref<1x128xf32, #tpu.memory_space<vmem>>, %arg4: memref<3x3x128x6xf32, #tpu.memory_space<vmem>>, %arg5: memref<1x6xf32, #tpu.memory_space<vmem>>, %arg6: memref<4x32x6xf32, #tpu.memory_space<vmem>>, %arg7: memref<1x2x6xf32, #tpu.memory_space<vmem>>, %arg8: memref<6x34x128xf32, #tpu.memory_space<vmem>>) attributes {dimension_semantics = [#tpu.dimension_semantics<parallel>], iteration_bounds = array<i64: 8>, scalar_prefetch = 0 : i64, scratch_operands = 1 : i64, tpu.core_type = #tpu.core_type<tc>, window_params = [{pipeline_mode = #tpu.pipeline_mode<synchronous>, transform_indices = @transform_0, window_bounds = array<i64: 32, 32, 128>}, {pipeline_mode = #tpu.pipeline_mode<synchronous>, transform_indices = @transform_1, window_bounds = array<i64: 1, 128>}, {pipeline_mode = #tpu.pipeline_mode<synchronous>, transform_indices = @transform_2, window_bounds = array<i64: 1, 128>}, {pipeline_mode = #tpu.pipeline_mode<synchronous>, transform_indices = @transform_3, window_bounds = array<i64: 3, 3, 128, 6>}, {pipeline_mode = #tpu.pipeline_mode<synchronous>, transform_indices = @transform_4, window_bounds = array<i64: 1, 6>}, {transform_indices = @transform_5, window_bounds = array<i64: 4, 32, 6>}, {transform_indices = @transform_6, window_bounds = array<i64: 1, 2, 6>}]} {
    %c4_i32 = arith.constant 4 : i32
    %0 = arith.muli %arg0, %c4_i32 : i32
    %c0 = arith.constant 0 : index
    %c0_0 = arith.constant 0 : index
    %1 = vector.load %arg2[%c0, %c0_0] : memref<1x128xf32, #tpu.memory_space<vmem>>, vector<1x128xf32>
    %2 = vector.shape_cast %1 : vector<1x128xf32> to vector<128xf32>
    %c0_1 = arith.constant 0 : index
    %c0_2 = arith.constant 0 : index
    %3 = vector.load %arg3[%c0_1, %c0_2] : memref<1x128xf32, #tpu.memory_space<vmem>>, vector<1x128xf32>
    %4 = vector.shape_cast %3 : vector<1x128xf32> to vector<128xf32>
    %cst = arith.constant 0.000000e+00 : f32
    %5 = vector.broadcast %cst : f32 to vector<6x34x128xf32>
    %c0_3 = arith.constant 0 : index
    %c0_4 = arith.constant 0 : index
    %c0_5 = arith.constant 0 : index
    %6 = vector.load %arg8[%c0_3, %c0_4, %c0_5] : memref<6x34x128xf32, #tpu.memory_space<vmem>>, vector<6x34x128xf32>
    tpu.vector_store %arg8[%c0_3, %c0_4, %c0_5], %5 {strides = array<i32>} : memref<6x34x128xf32, #tpu.memory_space<vmem>>, vector<6x34x128xf32>,
    %7 = arith.index_cast %0 : i32 to index
    %c0_6 = arith.constant 0 : index
    %c0_7 = arith.constant 0 : index
    %8 = vector.load %arg1[%7, %c0_6, %c0_7] : memref<32x32x128xf32, #tpu.memory_space<vmem>>, vector<4x32x128xf32>
    %9 = vector.shape_cast %2 : vector<128xf32> to vector<1x1x128xf32>
    %10 = vector.broadcast %9 : vector<1x1x128xf32> to vector<4x32x128xf32>
    %11 = arith.mulf %8, %10 : vector<4x32x128xf32>
    %12 = vector.shape_cast %4 : vector<128xf32> to vector<1x1x128xf32>
    %13 = vector.broadcast %12 : vector<1x1x128xf32> to vector<4x32x128xf32>
    %14 = arith.addf %11, %13 : vector<4x32x128xf32>
    %cst_8 = arith.constant 0.000000e+00 : f32
    %15 = vector.broadcast %cst_8 : f32 to vector<4x32x128xf32>
    %16 = arith.cmpf oge, %14, %15 : vector<4x32x128xf32>
    %cst_9 = arith.constant 2.000000e-01 : f32
    %17 = vector.broadcast %cst_9 : f32 to vector<4x32x128xf32>
    %18 = arith.mulf %17, %14 : vector<4x32x128xf32>
    %19 = arith.select %16, %14, %18 : vector<4x32x128xi1>, vector<4x32x128xf32>
    %c1 = arith.constant 1 : index
    %c1_10 = arith.constant 1 : index
    %c0_11 = arith.constant 0 : index
    %20 = vector.load %arg8[%c1, %c1_10, %c0_11] : memref<6x34x128xf32, #tpu.memory_space<vmem>>, vector<4x32x128xf32>
    tpu.vector_store %arg8[%c1, %c1_10, %c0_11], %19 {strides = array<i32>} : memref<6x34x128xf32, #tpu.memory_space<vmem>>, vector<4x32x128xf32>,
    %c0_i32 = arith.constant 0 : i32
    %21 = arith.cmpi sgt, %arg0, %c0_i32 : i32
    %22 = arith.extui %21 : i1 to i32
    %c0_i32_12 = arith.constant 0 : i32
    %23 = arith.cmpi ne, %22, %c0_i32_12 : i32
    scf.if %23 {
      %c1_i32 = arith.constant 1 : i32
      %98 = arith.subi %0, %c1_i32 : i32
      %99 = arith.index_cast %98 : i32 to index
      %c0_96 = arith.constant 0 : index
      %c0_97 = arith.constant 0 : index
      %100 = vector.load %arg1[%99, %c0_96, %c0_97] : memref<32x32x128xf32, #tpu.memory_space<vmem>>, vector<1x32x128xf32>
      %101 = vector.shape_cast %100 : vector<1x32x128xf32> to vector<32x128xf32>
      %102 = vector.shape_cast %2 : vector<128xf32> to vector<1x128xf32>
      %103 = vector.broadcast %102 : vector<1x128xf32> to vector<32x128xf32>
      %104 = arith.mulf %101, %103 : vector<32x128xf32>
      %105 = vector.shape_cast %4 : vector<128xf32> to vector<1x128xf32>
      %106 = vector.broadcast %105 : vector<1x128xf32> to vector<32x128xf32>
      %107 = arith.addf %104, %106 : vector<32x128xf32>
      %cst_98 = arith.constant 0.000000e+00 : f32
      %108 = vector.broadcast %cst_98 : f32 to vector<32x128xf32>
      %109 = arith.cmpf oge, %107, %108 : vector<32x128xf32>
      %cst_99 = arith.constant 2.000000e-01 : f32
      %110 = vector.broadcast %cst_99 : f32 to vector<32x128xf32>
      %111 = arith.mulf %110, %107 : vector<32x128xf32>
      %112 = arith.select %109, %107, %111 : vector<32x128xi1>, vector<32x128xf32>
      %c0_100 = arith.constant 0 : index
      %c1_101 = arith.constant 1 : index
      %c0_102 = arith.constant 0 : index
      %113 = vector.load %arg8[%c0_100, %c1_101, %c0_102] : memref<6x34x128xf32, #tpu.memory_space<vmem>>, vector<1x32x128xf32>
      %114 = vector.shape_cast %113 : vector<1x32x128xf32> to vector<32x128xf32>
      %115 = vector.shape_cast %112 : vector<32x128xf32> to vector<1x32x128xf32>
      tpu.vector_store %arg8[%c0_100, %c1_101, %c0_102], %115 {strides = array<i32>} : memref<6x34x128xf32, #tpu.memory_space<vmem>>, vector<1x32x128xf32>,
    } else {
    }
    %c7_i32 = arith.constant 7 : i32
    %24 = arith.cmpi slt, %arg0, %c7_i32 : i32
    %25 = arith.extui %24 : i1 to i32
    %c0_i32_13 = arith.constant 0 : i32
    %26 = arith.cmpi ne, %25, %c0_i32_13 : i32
    scf.if %26 {
      %c4_i32_96 = arith.constant 4 : i32
      %98 = arith.addi %0, %c4_i32_96 : i32
      %99 = arith.index_cast %98 : i32 to index
      %c0_97 = arith.constant 0 : index
      %c0_98 = arith.constant 0 : index
      %100 = vector.load %arg1[%99, %c0_97, %c0_98] : memref<32x32x128xf32, #tpu.memory_space<vmem>>, vector<1x32x128xf32>
      %101 = vector.shape_cast %100 : vector<1x32x128xf32> to vector<32x128xf32>
      %102 = vector.shape_cast %2 : vector<128xf32> to vector<1x128xf32>
      %103 = vector.broadcast %102 : vector<1x128xf32> to vector<32x128xf32>
      %104 = arith.mulf %101, %103 : vector<32x128xf32>
      %105 = vector.shape_cast %4 : vector<128xf32> to vector<1x128xf32>
      %106 = vector.broadcast %105 : vector<1x128xf32> to vector<32x128xf32>
      %107 = arith.addf %104, %106 : vector<32x128xf32>
      %cst_99 = arith.constant 0.000000e+00 : f32
      %108 = vector.broadcast %cst_99 : f32 to vector<32x128xf32>
      %109 = arith.cmpf oge, %107, %108 : vector<32x128xf32>
      %cst_100 = arith.constant 2.000000e-01 : f32
      %110 = vector.broadcast %cst_100 : f32 to vector<32x128xf32>
      %111 = arith.mulf %110, %107 : vector<32x128xf32>
      %112 = arith.select %109, %107, %111 : vector<32x128xi1>, vector<32x128xf32>
      %c5 = arith.constant 5 : index
      %c1_101 = arith.constant 1 : index
      %c0_102 = arith.constant 0 : index
      %113 = vector.load %arg8[%c5, %c1_101, %c0_102] : memref<6x34x128xf32, #tpu.memory_space<vmem>>, vector<1x32x128xf32>
      %114 = vector.shape_cast %113 : vector<1x32x128xf32> to vector<32x128xf32>
      %115 = vector.shape_cast %112 : vector<32x128xf32> to vector<1x32x128xf32>
      tpu.vector_store %arg8[%c5, %c1_101, %c0_102], %115 {strides = array<i32>} : memref<6x34x128xf32, #tpu.memory_space<vmem>>, vector<1x32x128xf32>,
    } else {
    }
    %cst_14 = arith.constant 0.000000e+00 : f32
    %27 = vector.broadcast %cst_14 : f32 to vector<128x6xf32>
    %c0_15 = arith.constant 0 : index
    %c0_16 = arith.constant 0 : index
    %c0_17 = arith.constant 0 : index
    %28 = vector.load %arg8[%c0_15, %c0_16, %c0_17] : memref<6x34x128xf32, #tpu.memory_space<vmem>>, vector<4x32x128xf32>
    %29 = vector.shape_cast %28 : vector<4x32x128xf32> to vector<128x128xf32>
    %c0_18 = arith.constant 0 : index
    %c0_19 = arith.constant 0 : index
    %c0_20 = arith.constant 0 : index
    %c0_21 = arith.constant 0 : index
    %30 = vector.load %arg4[%c0_18, %c0_19, %c0_20, %c0_21] : memref<3x3x128x6xf32, #tpu.memory_space<vmem>>, vector<1x1x128x6xf32>
    %31 = vector.shape_cast %30 : vector<1x1x128x6xf32> to vector<128x6xf32>
    %cst_22 = arith.constant dense<0.000000e+00> : vector<128x6xf32>
    %32 = tpu.matmul %29, %31, %cst_22 {dimension_numbers = #tpu.dot_dimension_numbers<[1], [0], [0], [1], [0, 0, 1, 1], [], []>} : vector<128x128xf32>, vector<128x6xf32>, vector<128x6xf32> -> vector<128x6xf32>
    %33 = arith.addf %27, %32 : vector<128x6xf32>
    %c0_23 = arith.constant 0 : index
    %c1_24 = arith.constant 1 : index
    %c0_25 = arith.constant 0 : index
    %34 = vector.load %arg8[%c0_23, %c1_24, %c0_25] : memref<6x34x128xf32, #tpu.memory_space<vmem>>, vector<4x32x128xf32>
    %35 = vector.shape_cast %34 : vector<4x32x128xf32> to vector<128x128xf32>
    %c0_26 = arith.constant 0 : index
    %c1_27 = arith.constant 1 : index
    %c0_28 = arith.constant 0 : index
    %c0_29 = arith.constant 0 : index
    %36 = vector.load %arg4[%c0_26, %c1_27, %c0_28, %c0_29] : memref<3x3x128x6xf32, #tpu.memory_space<vmem>>, vector<1x1x128x6xf32>
    %37 = vector.shape_cast %36 : vector<1x1x128x6xf32> to vector<128x6xf32>
    %cst_30 = arith.constant dense<0.000000e+00> : vector<128x6xf32>
    %38 = tpu.matmul %35, %37, %cst_30 {dimension_numbers = #tpu.dot_dimension_numbers<[1], [0], [0], [1], [0, 0, 1, 1], [], []>} : vector<128x128xf32>, vector<128x6xf32>, vector<128x6xf32> -> vector<128x6xf32>
    %39 = arith.addf %33, %38 : vector<128x6xf32>
    %c0_31 = arith.constant 0 : index
    %c2 = arith.constant 2 : index
    %c0_32 = arith.constant 0 : index
    %40 = vector.load %arg8[%c0_31, %c2, %c0_32] : memref<6x34x128xf32, #tpu.memory_space<vmem>>, vector<4x32x128xf32>
    %41 = vector.shape_cast %40 : vector<4x32x128xf32> to vector<128x128xf32>
    %c0_33 = arith.constant 0 : index
    %c2_34 = arith.constant 2 : index
    %c0_35 = arith.constant 0 : index
    %c0_36 = arith.constant 0 : index
    %42 = vector.load %arg4[%c0_33, %c2_34, %c0_35, %c0_36] : memref<3x3x128x6xf32, #tpu.memory_space<vmem>>, vector<1x1x128x6xf32>
    %43 = vector.shape_cast %42 : vector<1x1x128x6xf32> to vector<128x6xf32>
    %cst_37 = arith.constant dense<0.000000e+00> : vector<128x6xf32>
    %44 = tpu.matmul %41, %43, %cst_37 {dimension_numbers = #tpu.dot_dimension_numbers<[1], [0], [0], [1], [0, 0, 1, 1], [], []>} : vector<128x128xf32>, vector<128x6xf32>, vector<128x6xf32> -> vector<128x6xf32>
    %45 = arith.addf %39, %44 : vector<128x6xf32>
    %c1_38 = arith.constant 1 : index
    %c0_39 = arith.constant 0 : index
    %c0_40 = arith.constant 0 : index
    %46 = vector.load %arg8[%c1_38, %c0_39, %c0_40] : memref<6x34x128xf32, #tpu.memory_space<vmem>>, vector<4x32x128xf32>
    %47 = vector.shape_cast %46 : vector<4x32x128xf32> to vector<128x128xf32>
    %c1_41 = arith.constant 1 : index
    %c0_42 = arith.constant 0 : index
    %c0_43 = arith.constant 0 : index
    %c0_44 = arith.constant 0 : index
    %48 = vector.load %arg4[%c1_41, %c0_42, %c0_43, %c0_44] : memref<3x3x128x6xf32, #tpu.memory_space<vmem>>, vector<1x1x128x6xf32>
    %49 = vector.shape_cast %48 : vector<1x1x128x6xf32> to vector<128x6xf32>
    %cst_45 = arith.constant dense<0.000000e+00> : vector<128x6xf32>
    %50 = tpu.matmul %47, %49, %cst_45 {dimension_numbers = #tpu.dot_dimension_numbers<[1], [0], [0], [1], [0, 0, 1, 1], [], []>} : vector<128x128xf32>, vector<128x6xf32>, vector<128x6xf32> -> vector<128x6xf32>
    %51 = arith.addf %45, %50 : vector<128x6xf32>
    %c1_46 = arith.constant 1 : index
    %c1_47 = arith.constant 1 : index
    %c0_48 = arith.constant 0 : index
    %52 = vector.load %arg8[%c1_46, %c1_47, %c0_48] : memref<6x34x128xf32, #tpu.memory_space<vmem>>, vector<4x32x128xf32>
    %53 = vector.shape_cast %52 : vector<4x32x128xf32> to vector<128x128xf32>
    %c1_49 = arith.constant 1 : index
    %c1_50 = arith.constant 1 : index
    %c0_51 = arith.constant 0 : index
    %c0_52 = arith.constant 0 : index
    %54 = vector.load %arg4[%c1_49, %c1_50, %c0_51, %c0_52] : memref<3x3x128x6xf32, #tpu.memory_space<vmem>>, vector<1x1x128x6xf32>
    %55 = vector.shape_cast %54 : vector<1x1x128x6xf32> to vector<128x6xf32>
    %cst_53 = arith.constant dense<0.000000e+00> : vector<128x6xf32>
    %56 = tpu.matmul %53, %55, %cst_53 {dimension_numbers = #tpu.dot_dimension_numbers<[1], [0], [0], [1], [0, 0, 1, 1], [], []>} : vector<128x128xf32>, vector<128x6xf32>, vector<128x6xf32> -> vector<128x6xf32>
    %57 = arith.addf %51, %56 : vector<128x6xf32>
    %c1_54 = arith.constant 1 : index
    %c2_55 = arith.constant 2 : index
    %c0_56 = arith.constant 0 : index
    %58 = vector.load %arg8[%c1_54, %c2_55, %c0_56] : memref<6x34x128xf32, #tpu.memory_space<vmem>>, vector<4x32x128xf32>
    %59 = vector.shape_cast %58 : vector<4x32x128xf32> to vector<128x128xf32>
    %c1_57 = arith.constant 1 : index
    %c2_58 = arith.constant 2 : index
    %c0_59 = arith.constant 0 : index
    %c0_60 = arith.constant 0 : index
    %60 = vector.load %arg4[%c1_57, %c2_58, %c0_59, %c0_60] : memref<3x3x128x6xf32, #tpu.memory_space<vmem>>, vector<1x1x128x6xf32>
    %61 = vector.shape_cast %60 : vector<1x1x128x6xf32> to vector<128x6xf32>
    %cst_61 = arith.constant dense<0.000000e+00> : vector<128x6xf32>
    %62 = tpu.matmul %59, %61, %cst_61 {dimension_numbers = #tpu.dot_dimension_numbers<[1], [0], [0], [1], [0, 0, 1, 1], [], []>} : vector<128x128xf32>, vector<128x6xf32>, vector<128x6xf32> -> vector<128x6xf32>
    %63 = arith.addf %57, %62 : vector<128x6xf32>
    %c2_62 = arith.constant 2 : index
    %c0_63 = arith.constant 0 : index
    %c0_64 = arith.constant 0 : index
    %64 = vector.load %arg8[%c2_62, %c0_63, %c0_64] : memref<6x34x128xf32, #tpu.memory_space<vmem>>, vector<4x32x128xf32>
    %65 = vector.shape_cast %64 : vector<4x32x128xf32> to vector<128x128xf32>
    %c2_65 = arith.constant 2 : index
    %c0_66 = arith.constant 0 : index
    %c0_67 = arith.constant 0 : index
    %c0_68 = arith.constant 0 : index
    %66 = vector.load %arg4[%c2_65, %c0_66, %c0_67, %c0_68] : memref<3x3x128x6xf32, #tpu.memory_space<vmem>>, vector<1x1x128x6xf32>
    %67 = vector.shape_cast %66 : vector<1x1x128x6xf32> to vector<128x6xf32>
    %cst_69 = arith.constant dense<0.000000e+00> : vector<128x6xf32>
    %68 = tpu.matmul %65, %67, %cst_69 {dimension_numbers = #tpu.dot_dimension_numbers<[1], [0], [0], [1], [0, 0, 1, 1], [], []>} : vector<128x128xf32>, vector<128x6xf32>, vector<128x6xf32> -> vector<128x6xf32>
    %69 = arith.addf %63, %68 : vector<128x6xf32>
    %c2_70 = arith.constant 2 : index
    %c1_71 = arith.constant 1 : index
    %c0_72 = arith.constant 0 : index
    %70 = vector.load %arg8[%c2_70, %c1_71, %c0_72] : memref<6x34x128xf32, #tpu.memory_space<vmem>>, vector<4x32x128xf32>
    %71 = vector.shape_cast %70 : vector<4x32x128xf32> to vector<128x128xf32>
    %c2_73 = arith.constant 2 : index
    %c1_74 = arith.constant 1 : index
    %c0_75 = arith.constant 0 : index
    %c0_76 = arith.constant 0 : index
    %72 = vector.load %arg4[%c2_73, %c1_74, %c0_75, %c0_76] : memref<3x3x128x6xf32, #tpu.memory_space<vmem>>, vector<1x1x128x6xf32>
    %73 = vector.shape_cast %72 : vector<1x1x128x6xf32> to vector<128x6xf32>
    %cst_77 = arith.constant dense<0.000000e+00> : vector<128x6xf32>
    %74 = tpu.matmul %71, %73, %cst_77 {dimension_numbers = #tpu.dot_dimension_numbers<[1], [0], [0], [1], [0, 0, 1, 1], [], []>} : vector<128x128xf32>, vector<128x6xf32>, vector<128x6xf32> -> vector<128x6xf32>
    %75 = arith.addf %69, %74 : vector<128x6xf32>
    %c2_78 = arith.constant 2 : index
    %c2_79 = arith.constant 2 : index
    %c0_80 = arith.constant 0 : index
    %76 = vector.load %arg8[%c2_78, %c2_79, %c0_80] : memref<6x34x128xf32, #tpu.memory_space<vmem>>, vector<4x32x128xf32>
    %77 = vector.shape_cast %76 : vector<4x32x128xf32> to vector<128x128xf32>
    %c2_81 = arith.constant 2 : index
    %c2_82 = arith.constant 2 : index
    %c0_83 = arith.constant 0 : index
    %c0_84 = arith.constant 0 : index
    %78 = vector.load %arg4[%c2_81, %c2_82, %c0_83, %c0_84] : memref<3x3x128x6xf32, #tpu.memory_space<vmem>>, vector<1x1x128x6xf32>
    %79 = vector.shape_cast %78 : vector<1x1x128x6xf32> to vector<128x6xf32>
    %cst_85 = arith.constant dense<0.000000e+00> : vector<128x6xf32>
    %80 = tpu.matmul %77, %79, %cst_85 {dimension_numbers = #tpu.dot_dimension_numbers<[1], [0], [0], [1], [0, 0, 1, 1], [], []>} : vector<128x128xf32>, vector<128x6xf32>, vector<128x6xf32> -> vector<128x6xf32>
    %81 = arith.addf %75, %80 : vector<128x6xf32>
    %c0_86 = arith.constant 0 : index
    %c0_87 = arith.constant 0 : index
    %82 = vector.load %arg5[%c0_86, %c0_87] : memref<1x6xf32, #tpu.memory_space<vmem>>, vector<1x6xf32>
    %83 = vector.shape_cast %82 : vector<1x6xf32> to vector<6xf32>
    %84 = vector.shape_cast %83 : vector<6xf32> to vector<1x6xf32>
    %85 = vector.broadcast %84 : vector<1x6xf32> to vector<128x6xf32>
    %86 = arith.addf %81, %85 : vector<128x6xf32>
    %87 = math.tanh %86 : vector<128x6xf32>
    %88 = vector.shape_cast %87 : vector<128x6xf32> to vector<4x32x6xf32>
    %c0_88 = arith.constant 0 : index
    %c0_89 = arith.constant 0 : index
    %c0_90 = arith.constant 0 : index
    %89 = vector.load %arg6[%c0_88, %c0_89, %c0_90] : memref<4x32x6xf32, #tpu.memory_space<vmem>>, vector<4x32x6xf32>
    tpu.vector_store %arg6[%c0_88, %c0_89, %c0_90], %88 {strides = array<i32>} : memref<4x32x6xf32, #tpu.memory_space<vmem>>, vector<4x32x6xf32>,
    %cst_91 = arith.constant dense<0.000000e+00> : vector<6xf32>
    %90 = vector.multi_reduction <add>, %87, %cst_91 [0] : vector<128x6xf32> to vector<6xf32>
    %91 = vector.shape_cast %90 : vector<6xf32> to vector<1x6xf32>
    %92 = arith.mulf %87, %87 : vector<128x6xf32>
    %cst_92 = arith.constant dense<0.000000e+00> : vector<6xf32>
    %93 = vector.multi_reduction <add>, %92, %cst_92 [0] : vector<128x6xf32> to vector<6xf32>
    %94 = vector.shape_cast %93 : vector<6xf32> to vector<1x6xf32>
    %95 = tpu.concatenate %91, %94 in 0 : vector<1x6xf32>, vector<1x6xf32> -> vector<2x6xf32>
    %96 = vector.shape_cast %95 : vector<2x6xf32> to vector<1x2x6xf32>
    %c0_93 = arith.constant 0 : index
    %c0_94 = arith.constant 0 : index
    %c0_95 = arith.constant 0 : index
    %97 = vector.load %arg7[%c0_93, %c0_94, %c0_95] : memref<1x2x6xf32, #tpu.memory_space<vmem>>, vector<1x2x6xf32>
    tpu.vector_store %arg7[%c0_93, %c0_94, %c0_95], %96 {strides = array<i32>} : memref<1x2x6xf32, #tpu.memory_space<vmem>>, vector<1x2x6xf32>,
    return
  }
  func.func @transform_0(%arg0: i32) -> (i32, i32, i32) {
    %c0_i32 = arith.constant 0 : i32
    %c0_i32_0 = arith.constant 0 : i32
    %c0_i32_1 = arith.constant 0 : i32
    %c0_i32_2 = arith.constant 0 : i32
    return %c0_i32, %c0_i32_0, %c0_i32_1 : i32, i32, i32
  }
  func.func @transform_1(%arg0: i32) -> (i32, i32) {
    %c0_i32 = arith.constant 0 : i32
    %c0_i32_0 = arith.constant 0 : i32
    %c0_i32_1 = arith.constant 0 : i32
    return %c0_i32, %c0_i32_0 : i32, i32
  }
  func.func @transform_2(%arg0: i32) -> (i32, i32) {
    %c0_i32 = arith.constant 0 : i32
    %c0_i32_0 = arith.constant 0 : i32
    %c0_i32_1 = arith.constant 0 : i32
    return %c0_i32, %c0_i32_0 : i32, i32
  }
  func.func @transform_3(%arg0: i32) -> (i32, i32, i32, i32) {
    %c0_i32 = arith.constant 0 : i32
    %c0_i32_0 = arith.constant 0 : i32
    %c0_i32_1 = arith.constant 0 : i32
    %c0_i32_2 = arith.constant 0 : i32
    %c0_i32_3 = arith.constant 0 : i32
    return %c0_i32, %c0_i32_0, %c0_i32_1, %c0_i32_2 : i32, i32, i32, i32
  }
  func.func @transform_4(%arg0: i32) -> (i32, i32) {
    %c0_i32 = arith.constant 0 : i32
    %c0_i32_0 = arith.constant 0 : i32
    %c0_i32_1 = arith.constant 0 : i32
    return %c0_i32, %c0_i32_0 : i32, i32
  }
  func.func @transform_5(%arg0: i32) -> (i32, i32, i32) {
    %c0_i32 = arith.constant 0 : i32
    %c0_i32_0 = arith.constant 0 : i32
    %c0_i32_1 = arith.constant 0 : i32
    return %arg0, %c0_i32, %c0_i32_0 : i32, i32, i32
  }
  func.func @transform_6(%arg0: i32) -> (i32, i32, i32) {
    %c0_i32 = arith.constant 0 : i32
    %c0_i32_0 = arith.constant 0 : i32
    %c0_i32_1 = arith.constant 0 : i32
    return %arg0, %c0_i32, %c0_i32_0 : i32, i32, i32
  }
}

</mosaic_0001>

<bundles_post_ra>
// kernel: tile.103
= control target key start
LH: loop header
LB: loop body
LE: loop exit
PB: predicated region body
PF: predicated region fallthrough
CT: control target
= control target key end

     0   :  { %s22_s0 = inlined_call_operand.vmem [shape: f32[64], index: 0, kind: input, shape index: {}]   ;;  %s23_s1 = inlined_call_operand.vmem [shape: f32[2,64], index: 1, kind: output, shape index: {}]  }
   0x1   :  { %v4_v0 = vld [vmem:[%s22_s0] ss:$0 sm:$0xff] }
   0x2   :  { %5 = vst [vmem:[%s23_s1] sm:$0x3] %v4_v0 }

// kernel: tile.112
= control target key start
LH: loop header
LB: loop body
LE: loop exit
PB: predicated region body
PF: predicated region fallthrough
CT: control target
= control target key end

     0   :  { %vm7_vm0 = vcmask 523264   ;;  %vm13_vm1 = vcmask 1048064   ;;  %s39_s0 = inlined_call_operand.vmem [shape: f32[2,64], index: 0, kind: input, shape index: {}]   ;;  %s40_s1 = inlined_call_operand.vmem [shape: f32[1,128], index: 1, kind: output, shape index: {}]  }
   0x1   :  { %v4_v0 = vld [vmem:[%s39_s0] sm:$0x3]  ;;  %s22_s0 = smov 64  }
   0x2   :  { %5 = vst [vmem:[#allocation1] sm:$0x3] %v4_v0 }
   0x9   :  { %v10_v1 = vld [vmem:[#allocation1 + $0x1] sm:$0x1]   ;;  %v6_v2 = vld [vmem:[#allocation1] sm:$0x1]  }
   0xa   :  { %11 = vrot.lane.b32.xlu0 %v10_v1, %s22_s0  ;;  %8 = vst.msk [vmem:[#allocation0] sm:$0x1] %vm7_vm0, %v6_v2  }
  0x7c   :  { %v12_v3 = vpop.permute.xlu0 %11  }
  0x7d   :  { %14 = vst.msk [vmem:[#allocation0] sm:$0x1] %vm13_vm1, %v12_v3  }
  0x84   :  { %v17_v4 = vld [vmem:[#allocation0] sm:$0x1] }
  0x85   :  { %20 = vst [vmem:[%s40_s1] sm:$0x1] %v17_v4 }

// kernel: generator_big_forward.7
= control target key start
LH: loop header
LB: loop body
LE: loop exit
PB: predicated region body
PF: predicated region fallthrough
CT: control target
= control target key end

     0   :  { %8 = vsyncpa [#allocation3], 0  ;;  %s101_s15 = smov [#allocation2]   ;;  %s102_s17 = smov 128   ;;  %s136_s0 = inlined_call_operand.vmem [shape: f32[2,32], index: 0, kind: input, shape index: {}]   ;;  %s137_s1 = inlined_call_operand.hbm [shape: f32[32,64], index: 1, kind: input, shape index: {}]   ;;  %s138_s2 = inlined_call_operand.vmem [shape: f32[1,64], index: 2, kind: input, shape index: {}]   ;;  %s139_s3 = inlined_call_operand.vmem [shape: f32[2,64], index: 3, kind: output, shape index: {}]  }
   0x1   :  { %s15_s14 = sshll.u32 %s137_s1, 4  ;;  %s17_s16 = sshll.u32 %s101_s15, 4  ;;  %s16_s14 = int_to_ptr.hbm [resolvable:$true] %s15_s14  ;;  %s18_s16 = int_to_ptr.vmem [resolvable:$true] %s17_s16 }
   0x2   :  { %s103_s18 = smov 8  }
   0x3   :  { %23 = dma.hbm_to_vmem [thread:$0]  %s16_s14, 512, %s18_s16, [#allocation3], %s102_s17, %s102_s17, %s103_s18  }
   0x4   :  { %99 = dma.done.wait [#allocation3], 512  }
   0x5   :  { %100 = vsyncadd [#allocation3], 4294966784  ;;  %v34_v0 = vld [vmem:[#allocation2 + $0x18] sm:$0xff]  ;;  %v33_v1 = vld [vmem:[#allocation2 + $0x10] sm:$0xff]  ;;  %vm39_vm0 = vcmask 261120   ;;  %vm63_vm1 = vcmask 517120  }
   0x6   :  { %55 = vmatpush.msra.mxu0 %v34_v0  ;;  %v32_v2 = vld [vmem:[#allocation2 + $0x8] sm:$0xff]  ;;  %v31_v3 = vld [vmem:[#allocation2] sm:$0xff] }
   0x7   :  { %v30_v4 = vld [vmem:[%s136_s0] sm:$0x3] }
   0x8   :  { %56 = vmatpush.msra.mxu0 %v33_v1  ;;  %v74_v5 = vld [vmem:[%s138_s2] ss:$0 sm:$0xff] }
   0xa   :  { %57 = vmatpush.msra.mxu0 %v32_v2 }
   0xc   :  { %58 = vmatpush.msra.mxu0 %v31_v3 }
   0xd   :  { %70 = vmatmul.msk.f32.vlgmr.msra.gmra.mxu0 %vm39_vm0, %v30_v4 }
  0x8a   :  { %v60_v6 = vpop.f32.mrf.mxu0 }
  0x8b   :  { %v61_v7 = vadd.f32 %v74_v5, %v60_v6 }
  0x8d   :  { %64 = vst.msk [vmem:[%s139_s3] sm:$0x3] %vm63_vm1, %v61_v7 }
  0x8e   :  { %69 = vsyncpa [#allocation3], 1 }

// kernel: squeeze.12
= control target key start
LH: loop header
LB: loop body
LE: loop exit
PB: predicated region body
PF: predicated region fallthrough
CT: control target
= control target key end

     0   :  { %vm7_vm0 = vcmask 523264   ;;  %s39_s0 = inlined_call_operand.vmem [shape: f32[128], index: 0, kind: input, shape index: {}]   ;;  %s40_s1 = inlined_call_operand.vmem [shape: f32[2,64], index: 1, kind: output, shape index: {}]  }
   0x1   :  { %v4_v0 = vld [vmem:[%s39_s0] sm:$0x1]  ;;  %s22_s0 = smov 64  }
   0x2   :  { %5 = vst [vmem:[#allocation1] sm:$0x1] %v4_v0 }
   0x9   :  { %v9_v1 = vld [vmem:[#allocation1] sm:$0x1]  }
   0xa   :  { %v6_v2 = vld [vmem:[#allocation1] sm:$0x1]   ;;  %10 = vrot.lane.b32.xlu0 %v9_v1, %s22_s0 }
   0xb   :  { %8 = vst.msk [vmem:[#allocation0] sm:$0x1] %vm7_vm0, %v6_v2  }
  0x7c   :  { %v11_v3 = vpop.permute.xlu0 %10  }
  0x7d   :  { %14 = vst.msk [vmem:[#allocation0 + $0x1] sm:$0x1] %vm7_vm0, %v11_v3  }
  0x84   :  { %v17_v4 = vld [vmem:[#allocation0] sm:$0x3] }
  0x85   :  { %20 = vst [vmem:[%s40_s1] sm:$0x3] %v17_v4 }

// kernel: generator_big_forward.8
= control target key start
LH: loop header
LB: loop body
LE: loop exit
PB: predicated region body
PF: predicated region fallthrough
CT: control target
= control target key end

     0   :  { %v636_v2 = vmov 0.0   ;;  %vm477_vm0 = vcmask 1043456   ;;  %vm493_vm1 = vcmask 1040384   ;;  %s1128_s3 = inlined_call_operand.vmem [shape: f32[3,3,128,128], index: 3, kind: input, shape index: {}]   ;;  %s1129_s0 = inlined_call_operand.vmem [shape: f32[2,2,128], index: 0, kind: input, shape index: {}]   ;;  %s1130_s1 = inlined_call_operand.vmem [shape: f32[1,128], index: 1, kind: input, shape index: {}]   ;;  %s1131_s2 = inlined_call_operand.vmem [shape: f32[1,128], index: 2, kind: input, shape index: {}]   ;;  %s1132_s4 = inlined_call_operand.vmem [shape: f32[1,128], index: 4, kind: input, shape index: {}]   ;;  %s1133_s5 = inlined_call_operand.vmem [shape: f32[2,2,128], index: 5, kind: output, shape index: {0}]   ;;  %s1134_s6 = inlined_call_operand.vmem [shape: f32[1,2,128], index: 6, kind: output, shape index: {1}]  }
   0x1   :  { %v519_v0 = vld [vmem:[%s1128_s3 + $0xf8] sm:$0xff]  ;;  %v518_v1 = vld [vmem:[%s1128_s3 + $0xf0] sm:$0xff]  ;;  %25 = vst [vmem:[#allocation2] sm:$0xf] %v636_v2  ;;  %v517_v4 = vld [vmem:[%s1128_s3 + $0xe8] sm:$0xff] }
   0x2   :  { %90 = vmatpush.msra.mxu0 %v519_v0  ;;  %v63_v3 = vld [vmem:[%s1128_s3 + $0x78] sm:$0xff]  ;;  %26 = vst [vmem:[#allocation2 + $0x4] sm:$0xf] %v636_v2  ;;  %v62_v6 = vld [vmem:[%s1128_s3 + $0x70] sm:$0xff]  ;;  %v61_v8 = vld [vmem:[%s1128_s3 + $0x68] sm:$0xff] }
   0x3   :  { %117 = vmatpush.msra.mxu1 %v63_v3  ;;  %v535_v5 = vld [vmem:[%s1128_s3 + $0x178] sm:$0xff]  ;;  %27 = vst [vmem:[#allocation2 + $0x8] sm:$0xf] %v636_v2  ;;  %v534_v7 = vld [vmem:[%s1128_s3 + $0x170] sm:$0xff]  ;;  %v516_v9 = vld [vmem:[%s1128_s3 + $0xe0] sm:$0xff] }
   0x4   :  { %91 = vmatpush.msra.mxu0 %v518_v1  ;;  %163 = vmatpush.msra.mxu2 %v535_v5  ;;  %28 = vst [vmem:[#allocation2 + $0xc] sm:$0xf] %v636_v2  ;;  %v533_v10 = vld [vmem:[%s1128_s3 + $0x168] sm:$0xff]  ;;  %v60_v11 = vld [vmem:[%s1128_s3 + $0x60] sm:$0xff]  ;;  %v515_v12 = vld [vmem:[%s1128_s3 + $0xd8] sm:$0xff] }
   0x5   :  { %118 = vmatpush.msra.mxu1 %v62_v6  ;;  %v532_v13 = vld [vmem:[%s1128_s3 + $0x160] sm:$0xff]  ;;  %v551_v14 = vld [vmem:[%s1128_s3 + $0x1f8] sm:$0xff]  ;;  %v550_v16 = vld [vmem:[%s1128_s3 + $0x1f0] sm:$0xff] }
   0x6   :  { %92 = vmatpush.msra.mxu0 %v517_v4  ;;  %164 = vmatpush.msra.mxu2 %v534_v7  ;;  %v59_v15 = vld [vmem:[%s1128_s3 + $0x58] sm:$0xff]  ;;  %v514_v17 = vld [vmem:[%s1128_s3 + $0xd0] sm:$0xff]  ;;  %v549_v20 = vld [vmem:[%s1128_s3 + $0x1e8] sm:$0xff] }
   0x7   :  { %119 = vmatpush.msra.mxu1 %v61_v8  ;;  %v531_v18 = vld [vmem:[%s1128_s3 + $0x158] sm:$0xff]  ;;  %210 = vmatpush.msra.mxu3 %v551_v14  ;;  %v58_v19 = vld [vmem:[%s1128_s3 + $0x50] sm:$0xff]  ;;  %v513_v21 = vld [vmem:[%s1128_s3 + $0xc8] sm:$0xff] }
   0x8   :  { %93 = vmatpush.msra.mxu0 %v516_v9  ;;  %165 = vmatpush.msra.mxu2 %v533_v10  ;;  %v530_v22 = vld [vmem:[%s1128_s3 + $0x150] sm:$0xff]  ;;  %v57_v23 = vld [vmem:[%s1128_s3 + $0x48] sm:$0xff]  ;;  %v548_v24 = vld [vmem:[%s1128_s3 + $0x1e0] sm:$0xff] }
   0x9   :  { %120 = vmatpush.msra.mxu1 %v60_v11  ;;  %211 = vmatpush.msra.mxu3 %v550_v16  ;;  %v512_v25 = vld [vmem:[%s1128_s3 + $0xc0] sm:$0xff]  ;;  %v529_v26 = vld [vmem:[%s1128_s3 + $0x148] sm:$0xff]  ;;  %v547_v28 = vld [vmem:[%s1128_s3 + $0x1d8] sm:$0xff] }
   0xa   :  { %94 = vmatpush.msra.mxu0 %v515_v12  ;;  %166 = vmatpush.msra.mxu2 %v532_v13  ;;  %v56_v27 = vld [vmem:[%s1128_s3 + $0x40] sm:$0xff]  ;;  %v511_v29 = vld [vmem:[%s1128_s3 + $0xb8] sm:$0xff]  ;;  %v546_v32 = vld [vmem:[%s1128_s3 + $0x1d0] sm:$0xff] }
   0xb   :  { %121 = vmatpush.msra.mxu1 %v59_v15  ;;  %212 = vmatpush.msra.mxu3 %v549_v20  ;;  %v528_v30 = vld [vmem:[%s1128_s3 + $0x140] sm:$0xff]  ;;  %v55_v31 = vld [vmem:[%s1128_s3 + $0x38] sm:$0xff]  ;;  %v510_v33 = vld [vmem:[%s1128_s3 + $0xb0] sm:$0xff] }
   0xc   :  { %95 = vmatpush.msra.mxu0 %v514_v17  ;;  %167 = vmatpush.msra.mxu2 %v531_v18  ;;  %v527_v34 = vld [vmem:[%s1128_s3 + $0x138] sm:$0xff]  ;;  %v54_v35 = vld [vmem:[%s1128_s3 + $0x30] sm:$0xff]  ;;  %v545_v36 = vld [vmem:[%s1128_s3 + $0x1c8] sm:$0xff] }
   0xd   :  { %122 = vmatpush.msra.mxu1 %v58_v19  ;;  %213 = vmatpush.msra.mxu3 %v548_v24  ;;  %v509_v37 = vld [vmem:[%s1128_s3 + $0xa8] sm:$0xff]  ;;  %v526_v38 = vld [vmem:[%s1128_s3 + $0x130] sm:$0xff]  ;;  %v544_v40 = vld [vmem:[%s1128_s3 + $0x1c0] sm:$0xff] }
   0xe   :  { %96 = vmatpush.msra.mxu0 %v513_v21  ;;  %168 = vmatpush.msra.mxu2 %v530_v22  ;;  %v53_v39 = vld [vmem:[%s1128_s3 + $0x28] sm:$0xff]  ;;  %v508_v41 = vld [vmem:[%s1128_s3 + $0xa0] sm:$0xff]  ;;  %v543_v44 = vld [vmem:[%s1128_s3 + $0x1b8] sm:$0xff] }
   0xf   :  { %123 = vmatpush.msra.mxu1 %v57_v23  ;;  %214 = vmatpush.msra.mxu3 %v547_v28  ;;  %v525_v42 = vld [vmem:[%s1128_s3 + $0x128] sm:$0xff]  ;;  %v52_v43 = vld [vmem:[%s1128_s3 + $0x20] sm:$0xff]  ;;  %v507_v45 = vld [vmem:[%s1128_s3 + $0x98] sm:$0xff] }
  0x10   :  { %97 = vmatpush.msra.mxu0 %v512_v25  ;;  %169 = vmatpush.msra.mxu2 %v529_v26  ;;  %v524_v46 = vld [vmem:[%s1128_s3 + $0x120] sm:$0xff]  ;;  %v51_v47 = vld [vmem:[%s1128_s3 + $0x18] sm:$0xff]  ;;  %v542_v48 = vld [vmem:[%s1128_s3 + $0x1b0] sm:$0xff] }
  0x11   :  { %124 = vmatpush.msra.mxu1 %v56_v27  ;;  %215 = vmatpush.msra.mxu3 %v546_v32  ;;  %v506_v49 = vld [vmem:[%s1128_s3 + $0x90] sm:$0xff]  ;;  %v523_v50 = vld [vmem:[%s1128_s3 + $0x118] sm:$0xff]  ;;  %v541_v52 = vld [vmem:[%s1128_s3 + $0x1a8] sm:$0xff] }
  0x12   :  { %98 = vmatpush.msra.mxu0 %v511_v29  ;;  %170 = vmatpush.msra.mxu2 %v528_v30  ;;  %v50_v51 = vld [vmem:[%s1128_s3 + $0x10] sm:$0xff]  ;;  %v505_v53 = vld [vmem:[%s1128_s3 + $0x88] sm:$0xff]  ;;  %v540_v56 = vld [vmem:[%s1128_s3 + $0x1a0] sm:$0xff] }
  0x13   :  { %125 = vmatpush.msra.mxu1 %v55_v31  ;;  %216 = vmatpush.msra.mxu3 %v545_v36  ;;  %v522_v54 = vld [vmem:[%s1128_s3 + $0x110] sm:$0xff]  ;;  %v49_v55 = vld [vmem:[%s1128_s3 + $0x8] sm:$0xff]  ;;  %v504_v57 = vld [vmem:[%s1128_s3 + $0x80] sm:$0xff] }
  0x14   :  { %99 = vmatpush.msra.mxu0 %v510_v33  ;;  %171 = vmatpush.msra.mxu2 %v527_v34  ;;  %v521_v58 = vld [vmem:[%s1128_s3 + $0x108] sm:$0xff]  ;;  %v567_v59 = vld [vmem:[%s1128_s3 + $0x278] sm:$0xff]  ;;  %v48_v60 = vld [vmem:[%s1128_s3] sm:$0xff] }
  0x15   :  { %126 = vmatpush.msra.mxu1 %v54_v35  ;;  %217 = vmatpush.msra.mxu3 %v544_v40  ;;  %v520_v61 = vld [vmem:[%s1128_s3 + $0x100] sm:$0xff]  ;;  %v583_v62 = vld [vmem:[%s1128_s3 + $0x2f8] sm:$0xff]  ;;  %v566_v63 = vld [vmem:[%s1128_s3 + $0x270] sm:$0xff] }
  0x16   :  { %100 = vmatpush.msra.mxu0 %v509_v37  ;;  %172 = vmatpush.msra.mxu2 %v526_v38  ;;  %v599_v0 = vld [vmem:[%s1128_s3 + $0x378] sm:$0xff]  ;;  %v565_v1 = vld [vmem:[%s1128_s3 + $0x268] sm:$0xff]  ;;  %v582_v3 = vld [vmem:[%s1128_s3 + $0x2f0] sm:$0xff] }
  0x17   :  { %127 = vmatpush.msra.mxu1 %v53_v39  ;;  %218 = vmatpush.msra.mxu3 %v543_v44  ;;  %v539_v2 = vld [vmem:[%s1128_s3 + $0x198] sm:$0xff]  ;;  %v564_v4 = vld [vmem:[%s1128_s3 + $0x260] sm:$0xff]  ;;  %v598_v5 = vld [vmem:[%s1128_s3 + $0x370] sm:$0xff] }
  0x18   :  { %101 = vmatpush.msra.mxu0 %v508_v41  ;;  %173 = vmatpush.msra.mxu2 %v525_v42  ;;  %v538_v6 = vld [vmem:[%s1128_s3 + $0x190] sm:$0xff]  ;;  %v581_v7 = vld [vmem:[%s1128_s3 + $0x2e8] sm:$0xff]  ;;  %v31_v10 = vld [vmem:[%s1129_s0] sm:$0x3] }
  0x19   :  { %128 = vmatpush.msra.mxu1 %v52_v43  ;;  %219 = vmatpush.msra.mxu3 %v542_v48  ;;  %v597_v8 = vld [vmem:[%s1128_s3 + $0x368] sm:$0xff]  ;;  %v633_v11 = vld [vmem:[%s1130_s1] ss:$0 sm:$0xff]  ;;  %v563_v15 = vld [vmem:[%s1128_s3 + $0x258] sm:$0xff] }
  0x1a   :  { %102 = vmatpush.msra.mxu0 %v507_v45  ;;  %174 = vmatpush.msra.mxu2 %v524_v46  ;;  %v537_v9 = vld [vmem:[%s1128_s3 + $0x188] sm:$0xff]  ;;  %v580_v12 = vld [vmem:[%s1128_s3 + $0x2e0] sm:$0xff]  ;;  %v36_v17 = vmul.f32 %v633_v11, %v31_v10  ;;  %v579_v20 = vld [vmem:[%s1128_s3 + $0x2d8] sm:$0xff] }
  0x1b   :  { %129 = vmatpush.msra.mxu1 %v51_v47  ;;  %220 = vmatpush.msra.mxu3 %v541_v52  ;;  %v634_v13 = vld [vmem:[%s1131_s2] ss:$0 sm:$0xff]  ;;  %v64_v14 = vld [vmem:[#allocation2 + $0x1] sm:$0x3]  ;;  %v32_v18 = vld [vmem:[%s1129_s0 + $0x2] sm:$0x3] }
  0x1c   :  { %103 = vmatpush.msra.mxu0 %v506_v49  ;;  %175 = vmatpush.msra.mxu2 %v523_v50  ;;  %v596_v16 = vld [vmem:[%s1128_s3 + $0x360] sm:$0xff]  ;;  %85 = vst [vmem:[#allocation1] ss:$4 sm:$0xff] %v64_v14  ;;  %v37_v21 = vmul.f32 %v633_v11, %v32_v18  ;;  %v562_v22 = vld [vmem:[%s1128_s3 + $0x250] sm:$0xff]  ;;  %v595_v23 = vld [vmem:[%s1128_s3 + $0x358] sm:$0xff]  ;;  %v41_v24 = vadd.f32 %v634_v13, %v36_v17 }
  0x1d   :  { %130 = vmatpush.msra.mxu1 %v50_v51  ;;  %221 = vmatpush.msra.mxu3 %v540_v56  ;;  %v536_v19 = vld [vmem:[%s1128_s3 + $0x180] sm:$0xff]  ;;  %v615_v25 = vld [vmem:[%s1128_s3 + $0x3f8] sm:$0xff]  ;;  %v578_v26 = vld [vmem:[%s1128_s3 + $0x2d0] sm:$0xff] }
  0x1e   :  { %104 = vmatpush.msra.mxu0 %v505_v53  ;;  %176 = vmatpush.msra.mxu2 %v522_v54  ;;  %v42_v27 = vadd.f32 %v634_v13, %v37_v21  ;;  %v561_v28 = vld [vmem:[%s1128_s3 + $0x248] sm:$0xff]  ;;  %v594_v29 = vld [vmem:[%s1128_s3 + $0x350] sm:$0xff]  ;;  %44 = vst [vmem:[#allocation2 + $0x5] sm:$0x3] %v41_v24  ;;  %v560_v32 = vld [vmem:[%s1128_s3 + $0x240] sm:$0xff] }
  0x1f   :  { %131 = vmatpush.msra.mxu1 %v49_v55  ;;  %222 = vmatpush.msra.mxu3 %v539_v2  ;;  %v614_v30 = vld [vmem:[%s1128_s3 + $0x3f0] sm:$0xff]  ;;  %v577_v31 = vld [vmem:[%s1128_s3 + $0x2c8] sm:$0xff]  ;;  %v576_v35 = vld [vmem:[%s1128_s3 + $0x2c0] sm:$0xff] }
  0x20   :  { %105 = vmatpush.msra.mxu0 %v504_v57  ;;  %177 = vmatpush.msra.mxu2 %v521_v58  ;;  %45 = vst [vmem:[#allocation2 + $0x9] sm:$0x3] %v42_v27  ;;  %v593_v33 = vld [vmem:[%s1128_s3 + $0x348] sm:$0xff]  ;;  %v559_v36 = vld [vmem:[%s1128_s3 + $0x238] sm:$0xff]  ;;  %v592_v37 = vld [vmem:[%s1128_s3 + $0x340] sm:$0xff] }
  0x21   :  { %132 = vmatpush.msra.mxu1 %v48_v60  ;;  %223 = vmatpush.msra.mxu3 %v538_v6  ;;  %v613_v34 = vld [vmem:[%s1128_s3 + $0x3e8] sm:$0xff]  ;;  %v612_v38 = vld [vmem:[%s1128_s3 + $0x3e0] sm:$0xff]  ;;  %v575_v39 = vld [vmem:[%s1128_s3 + $0x2b8] sm:$0xff] }
  0x22   :  { %257 = vmatpush.msrb.mxu0 %v567_v59  ;;  %178 = vmatpush.msra.mxu2 %v520_v61  ;;  %v558_v40 = vld [vmem:[%s1128_s3 + $0x230] sm:$0xff]  ;;  %v591_v41 = vld [vmem:[%s1128_s3 + $0x338] sm:$0xff]  ;;  %v557_v45 = vld [vmem:[%s1128_s3 + $0x228] sm:$0xff] }
  0x23   :  { %304 = vmatpush.msrb.mxu1 %v583_v62  ;;  %224 = vmatpush.msra.mxu3 %v537_v9  ;;  %v611_v42 = vld [vmem:[%s1128_s3 + $0x3d8] sm:$0xff]  ;;  %v574_v43 = vld [vmem:[%s1128_s3 + $0x2b0] sm:$0xff]  ;;  %v573_v48 = vld [vmem:[%s1128_s3 + $0x2a8] sm:$0xff] }
  0x24   :  { %258 = vmatpush.msrb.mxu0 %v566_v63  ;;  %352 = vmatpush.msrb.mxu2 %v599_v0  ;;  %v590_v46 = vld [vmem:[%s1128_s3 + $0x330] sm:$0xff]  ;;  %v556_v49 = vld [vmem:[%s1128_s3 + $0x220] sm:$0xff]  ;;  %v589_v50 = vld [vmem:[%s1128_s3 + $0x328] sm:$0xff] }
  0x25   :  { %305 = vmatpush.msrb.mxu1 %v582_v3  ;;  %225 = vmatpush.msra.mxu3 %v536_v19  ;;  %v65_v44 = vld [vmem:[#allocation2 + $0x5] sm:$0x3]  ;;  %v610_v47 = vld [vmem:[%s1128_s3 + $0x3d0] sm:$0xff]  ;;  %v572_v52 = vld [vmem:[%s1128_s3 + $0x2a0] sm:$0xff] }
  0x26   :  { %259 = vmatpush.msrb.mxu0 %v565_v1  ;;  %353 = vmatpush.msrb.mxu2 %v598_v5  ;;  %87 = vst [vmem:[#allocation1 + $0x1] ss:$4 sm:$0xff] %v65_v44  ;;  %v609_v51 = vld [vmem:[%s1128_s3 + $0x3c8] sm:$0xff]  ;;  %v555_v53 = vld [vmem:[%s1128_s3 + $0x218] sm:$0xff]  ;;  %v588_v54 = vld [vmem:[%s1128_s3 + $0x320] sm:$0xff] }
  0x27   :  { %306 = vmatpush.msrb.mxu1 %v581_v7  ;;  %399 = vmatpush.msrb.mxu3 %v615_v25  ;;  %v46_v55 = vld [vmem:[#allocation2] sm:$0x3]  ;;  %v608_v56 = vld [vmem:[%s1128_s3 + $0x3c0] sm:$0xff]  ;;  %v554_v57 = vld [vmem:[%s1128_s3 + $0x210] sm:$0xff] }
  0x28   :  { %260 = vmatpush.msrb.mxu0 %v564_v4  ;;  %354 = vmatpush.msrb.mxu2 %v597_v8  ;;  %v47_v58 = vld [vmem:[#allocation2 + $0x4] sm:$0x3]  ;;  %v571_v59 = vld [vmem:[%s1128_s3 + $0x298] sm:$0xff]  ;;  %v570_v0 = vld [vmem:[%s1128_s3 + $0x290] sm:$0xff] }
  0x29   :  { %307 = vmatpush.msrb.mxu1 %v580_v12  ;;  %400 = vmatpush.msrb.mxu3 %v614_v30  ;;  %v587_v61 = vld [vmem:[%s1128_s3 + $0x318] sm:$0xff]  ;;  %v553_v63 = vld [vmem:[%s1128_s3 + $0x208] sm:$0xff]  ;;  %v586_v1 = vld [vmem:[%s1128_s3 + $0x310] sm:$0xff] }
  0x2a   :  { %261 = vmatpush.msrb.mxu0 %v563_v15  ;;  %355 = vmatpush.msrb.mxu2 %v596_v16  ;;  %v607_v62 = vld [vmem:[%s1128_s3 + $0x3b8] sm:$0xff]  ;;  %v606_v2 = vld [vmem:[%s1128_s3 + $0x3b0] sm:$0xff]  ;;  %v552_v3 = vld [vmem:[%s1128_s3 + $0x200] sm:$0xff] }
  0x2b   :  { %308 = vmatpush.msrb.mxu1 %v579_v20  ;;  %401 = vmatpush.msrb.mxu3 %v613_v34  ;;  %v569_v4 = vld [vmem:[%s1128_s3 + $0x288] sm:$0xff]  ;;  %v631_v5 = vld [vmem:[%s1128_s3 + $0x478] sm:$0xff]  ;;  %v630_v8 = vld [vmem:[%s1128_s3 + $0x470] sm:$0xff] }
  0x2c   :  { %262 = vmatpush.msrb.mxu0 %v562_v22  ;;  %356 = vmatpush.msrb.mxu2 %v595_v23  ;;  %v585_v6 = vld [vmem:[%s1128_s3 + $0x308] sm:$0xff]  ;;  %v568_v9 = vld [vmem:[%s1128_s3 + $0x280] sm:$0xff]  ;;  %v185_v18 = vld [vmem:[#allocation2 + $0x8] sm:$0x3] }
  0x2d   :  { %309 = vmatpush.msrb.mxu1 %v578_v26  ;;  %402 = vmatpush.msrb.mxu3 %v612_v38  ;;  %v88_v60 = vld.sshfl [vmem:[#allocation1] sm:$0xff pattern:$0x73625140]  ;;  %v605_v7 = vld [vmem:[%s1128_s3 + $0x3a8] sm:$0xff]  ;;  %v627_v20 = vld [vmem:[%s1128_s3 + $0x458] sm:$0xff] }
  0x2e   :  { %263 = vmatpush.msrb.mxu0 %v561_v28  ;;  %357 = vmatpush.msrb.mxu2 %v594_v29  ;;  %112 = vst [vmem:[#allocation1] ss:$4 sm:$0xff] %v46_v55  ;;  %v584_v10 = vld [vmem:[%s1128_s3 + $0x300] sm:$0xff]  ;;  %v137_v11 = vld [vmem:[#allocation2 + $0x2] sm:$0x3]  ;;  %v603_v21 = vld [vmem:[%s1128_s3 + $0x398] sm:$0xff] }
  0x2f   :  { %310 = vmatpush.msrb.mxu1 %v577_v31  ;;  %403 = vmatpush.msrb.mxu3 %v611_v42  ;;  %114 = vst [vmem:[#allocation1 + $0x1] ss:$4 sm:$0xff] %v47_v58  ;;  %v604_v12 = vld [vmem:[%s1128_s3 + $0x3a0] sm:$0xff]  ;;  %v138_v13 = vld [vmem:[#allocation2 + $0x6] sm:$0x3]  ;;  %v626_v22 = vld [vmem:[%s1128_s3 + $0x450] sm:$0xff] }
  0x30   :  { %264 = vmatpush.msrb.mxu0 %v560_v32  ;;  %358 = vmatpush.msrb.mxu2 %v593_v33  ;;  %v629_v14 = vld [vmem:[%s1128_s3 + $0x468] sm:$0xff]  ;;  %v628_v16 = vld [vmem:[%s1128_s3 + $0x460] sm:$0xff]  ;;  %v602_v24 = vld [vmem:[%s1128_s3 + $0x390] sm:$0xff] }
  0x31   :  { %311 = vmatpush.msrb.mxu1 %v576_v35  ;;  %404 = vmatpush.msrb.mxu3 %v610_v47  ;;  %v184_v17 = vld [vmem:[#allocation2 + $0x4] sm:$0x3]  ;;  %v232_v25 = vld [vmem:[#allocation2 + $0x9] sm:$0x3]  ;;  %v624_v29 = vld [vmem:[%s1128_s3 + $0x440] sm:$0xff] }
  0x32   :  { %265 = vmatpush.msrb.mxu0 %v559_v36  ;;  %359 = vmatpush.msrb.mxu2 %v592_v37  ;;  %v231_v23 = vld [vmem:[#allocation2 + $0x5] sm:$0x3]  ;;  %v600_v30 = vld [vmem:[%s1128_s3 + $0x380] sm:$0xff]  ;;  %v623_v31 = vld [vmem:[%s1128_s3 + $0x438] sm:$0xff] }
  0x33   :  { %312 = vmatpush.msrb.mxu1 %v575_v39  ;;  %405 = vmatpush.msrb.mxu3 %v609_v51  ;;  %v625_v26 = vld [vmem:[%s1128_s3 + $0x448] sm:$0xff]  ;;  %v622_v32 = vld [vmem:[%s1128_s3 + $0x430] sm:$0xff]  ;;  %v620_v37 = vld [vmem:[%s1128_s3 + $0x420] sm:$0xff] }
  0x34   :  { %266 = vmatpush.msrb.mxu0 %v558_v40  ;;  %360 = vmatpush.msrb.mxu2 %v591_v41  ;;  %v601_v27 = vld [vmem:[%s1128_s3 + $0x388] sm:$0xff]  ;;  %v279_v34 = vld [vmem:[#allocation2 + $0xa] sm:$0x3]  ;;  %v619_v38 = vld [vmem:[%s1128_s3 + $0x418] sm:$0xff] }
  0x35   :  { %313 = vmatpush.msrb.mxu1 %v574_v43  ;;  %106 = vmatmul.f32.vlgmr.msra.gmra.mxu0 %v88_v60  ;;  %v278_v33 = vld [vmem:[#allocation2 + $0x6] sm:$0x3]  ;;  %v618_v39 = vld [vmem:[%s1128_s3 + $0x410] sm:$0xff]  ;;  %v616_v44 = vld [vmem:[%s1128_s3 + $0x400] sm:$0xff] }
  0x36   :  { %267 = vmatpush.msrb.mxu0 %v557_v45  ;;  %361 = vmatpush.msrb.mxu2 %v590_v46  ;;  %v115_v15 = vld.sshfl [vmem:[#allocation1] sm:$0xff pattern:$0x73625140]  ;;  %v621_v35 = vld [vmem:[%s1128_s3 + $0x428] sm:$0xff]  ;;  %v326_v40 = vld [vmem:[#allocation2 + $0x8] sm:$0x3] }
  0x37   :  { %314 = vmatpush.msrb.mxu1 %v573_v48  ;;  %406 = vmatpush.msrb.mxu3 %v608_v56  ;;  %158 = vst [vmem:[#allocation1] ss:$4 sm:$0xff] %v137_v11  ;;  %v617_v41 = vld [vmem:[%s1128_s3 + $0x408] sm:$0xff]  ;;  %v327_v42 = vld [vmem:[#allocation2 + $0xc] sm:$0x3] }
  0x38   :  { %268 = vmatpush.msrb.mxu0 %v556_v49  ;;  %362 = vmatpush.msrb.mxu2 %v589_v50  ;;  %160 = vst [vmem:[#allocation1 + $0x1] ss:$4 sm:$0xff] %v138_v13  ;;  %v373_v45 = vld [vmem:[#allocation2 + $0x9] sm:$0x3]  ;;  %v374_v46 = vld [vmem:[#allocation2 + $0xd] sm:$0x3] }
  0x39   :  { %315 = vmatpush.msrb.mxu1 %v572_v52  ;;  %407 = vmatpush.msrb.mxu3 %v607_v62  ;;  %v420_v48 = vld [vmem:[#allocation2 + $0xa] sm:$0x3]  ;;  %v421_v49 = vld [vmem:[#allocation2 + $0xe] sm:$0x3] }
  0x3a   :  { %269 = vmatpush.msrb.mxu0 %v555_v53  ;;  %363 = vmatpush.msrb.mxu2 %v588_v54 }
  0x3b   :  { %316 = vmatpush.msrb.mxu1 %v571_v59  ;;  %408 = vmatpush.msrb.mxu3 %v606_v2 }
  0x3c   :  { %270 = vmatpush.msrb.mxu0 %v554_v57  ;;  %364 = vmatpush.msrb.mxu2 %v587_v61 }
  0x3d   :  { %317 = vmatpush.msrb.mxu1 %v570_v0  ;;  %409 = vmatpush.msrb.mxu3 %v605_v7 }
  0x3e   :  { %271 = vmatpush.msrb.mxu0 %v553_v63  ;;  %365 = vmatpush.msrb.mxu2 %v586_v1 }
  0x3f   :  { %318 = vmatpush.msrb.mxu1 %v569_v4  ;;  %410 = vmatpush.msrb.mxu3 %v604_v12  ;;  %v161_v19 = vld.sshfl [vmem:[#allocation1] sm:$0xff pattern:$0x73625140] }
  0x40   :  { %272 = vmatpush.msrb.mxu0 %v552_v3  ;;  %366 = vmatpush.msrb.mxu2 %v585_v6  ;;  %205 = vst [vmem:[#allocation1] ss:$4 sm:$0xff] %v184_v17  ;;  %v635_v3 = vld [vmem:[%s1132_s4] ss:$0 sm:$0xff] }
  0x41   :  { %319 = vmatpush.msrb.mxu1 %v568_v9  ;;  %179 = vmatmul.f32.vlgmr.msra.gmra.mxu2 %v161_v19  ;;  %207 = vst [vmem:[#allocation1 + $0x1] ss:$4 sm:$0xff] %v185_v18 }
  0x42   :  { %446 = vmatpush.msra.mxu0 %v631_v5  ;;  %367 = vmatpush.msrb.mxu2 %v584_v10 }
  0x43   :  { %133 = vmatmul.f32.vlgmr.msra.gmra.mxu1 %v115_v15  ;;  %411 = vmatpush.msrb.mxu3 %v603_v21 }
  0x44   :  { %447 = vmatpush.msra.mxu0 %v630_v8 }
  0x45   :  { %412 = vmatpush.msrb.mxu3 %v602_v24 }
  0x46   :  { %448 = vmatpush.msra.mxu0 %v629_v14 }
  0x47   :  { %413 = vmatpush.msrb.mxu3 %v601_v27 }
  0x48   :  { %449 = vmatpush.msra.mxu0 %v628_v16  ;;  %v208_v28 = vld.sshfl [vmem:[#allocation1] sm:$0xff pattern:$0x73625140] }
  0x49   :  { %226 = vmatmul.f32.vlgmr.msra.gmra.mxu3 %v208_v28  ;;  %252 = vst [vmem:[#allocation1] ss:$4 sm:$0xff] %v231_v23 }
  0x4a   :  { %450 = vmatpush.msra.mxu0 %v627_v20  ;;  %254 = vst [vmem:[#allocation1 + $0x1] ss:$4 sm:$0xff] %v232_v25  ;;  %414 = vmatpush.msrb.mxu3 %v600_v30 }
  0x4c   :  { %451 = vmatpush.msra.mxu0 %v626_v22 }
  0x4e   :  { %452 = vmatpush.msra.mxu0 %v625_v26 }
  0x50   :  { %453 = vmatpush.msra.mxu0 %v624_v29 }
  0x51   :  { %v255_v36 = vld.sshfl [vmem:[#allocation1] sm:$0xff pattern:$0x73625140] }
  0x52   :  { %454 = vmatpush.msra.mxu0 %v623_v31  ;;  %299 = vst [vmem:[#allocation1] ss:$4 sm:$0xff] %v278_v33 }
  0x53   :  { %273 = vmatmul.f32.vlgmr.msrb.gmra.mxu0 %v255_v36  ;;  %301 = vst [vmem:[#allocation1 + $0x1] ss:$4 sm:$0xff] %v279_v34 }
  0x54   :  { %455 = vmatpush.msra.mxu0 %v622_v32 }
  0x56   :  { %456 = vmatpush.msra.mxu0 %v621_v35 }
  0x58   :  { %457 = vmatpush.msra.mxu0 %v620_v37 }
  0x5a   :  { %458 = vmatpush.msra.mxu0 %v619_v38  ;;  %v302_v43 = vld.sshfl [vmem:[#allocation1] sm:$0xff pattern:$0x73625140] }
  0x5b   :  { %320 = vmatmul.f32.vlgmr.msrb.gmra.mxu1 %v302_v43  ;;  %347 = vst [vmem:[#allocation1] ss:$4 sm:$0xff] %v326_v40 }
  0x5c   :  { %459 = vmatpush.msra.mxu0 %v618_v39  ;;  %349 = vst [vmem:[#allocation1 + $0x1] ss:$4 sm:$0xff] %v327_v42 }
  0x5e   :  { %460 = vmatpush.msra.mxu0 %v617_v41 }
  0x60   :  { %461 = vmatpush.msra.mxu0 %v616_v44 }
  0x63   :  { %v350_v47 = vld.sshfl [vmem:[#allocation1] sm:$0xff pattern:$0x73625140] }
  0x64   :  { %368 = vmatmul.f32.vlgmr.msrb.gmra.mxu2 %v350_v47  ;;  %394 = vst [vmem:[#allocation1] ss:$4 sm:$0xff] %v373_v45 }
  0x65   :  { %396 = vst [vmem:[#allocation1 + $0x1] ss:$4 sm:$0xff] %v374_v46 }
  0x6c   :  { %v397_v50 = vld.sshfl [vmem:[#allocation1] sm:$0xff pattern:$0x73625140] }
  0x6d   :  { %415 = vmatmul.f32.vlgmr.msrb.gmra.mxu3 %v397_v50  ;;  %441 = vst [vmem:[#allocation1] ss:$4 sm:$0xff] %v420_v48 }
  0x6e   :  { %443 = vst [vmem:[#allocation1 + $0x1] ss:$4 sm:$0xff] %v421_v49 }
  0x75   :  { %v444_v51 = vld.sshfl [vmem:[#allocation1] sm:$0xff pattern:$0x73625140] }
  0x76   :  { %462 = vmatmul.f32.vlgmr.msra.gmra.mxu0 %v444_v51 }
  0xb2   :  { %v107_v53 = vpop.f32.mrf.mxu0 }
  0xc0   :  { %v134_v52 = vpop.f32.mrf.mxu1 }
  0xc1   :  { %v135_v54 = vadd.f32 %v134_v52, %v107_v53 }
  0xc4   :  { %v180_v55 = vpop.f32.mrf.mxu2 }
  0xc5   :  { %v183_v56 = vadd.f32 %v180_v55, %v135_v54 }
  0xcc   :  { %v227_v57 = vpop.f32.mrf.mxu3 }
  0xcd   :  { %v230_v58 = vadd.f32 %v227_v57, %v183_v56 }
  0xd0   :  { %v274_v59 = vpop.f32.mrf.mxu0 }
  0xd1   :  { %v277_v60 = vadd.f32 %v274_v59, %v230_v58 }
  0xd8   :  { %v321_v61 = vpop.f32.mrf.mxu1 }
  0xd9   :  { %v324_v63 = vadd.f32 %v321_v61, %v277_v60 }
  0xe7   :  { %v369_v62 = vpop.f32.mrf.mxu2 }
  0xe8   :  { %v372_v0 = vadd.f32 %v369_v62, %v324_v63 }
  0xf0   :  { %v416_v1 = vpop.f32.mrf.mxu3 }
  0xf1   :  { %v419_v2 = vadd.f32 %v416_v1, %v372_v0 }
  0xf3   :  { %v463_v4 = vpop.f32.mrf.mxu0 }
  0xf4   :  { %v466_v5 = vadd.f32 %v463_v4, %v419_v2 }
  0xf6   :  { %v471_v6 = vadd.f32 %v635_v3, %v466_v5 }
  0xf8   :  { %v473_v7 = vrot.slane %v471_v6, 2  ;;  %475 = vst [vmem:[%s1133_s5] sm:$0x3] %v471_v6  ;;  %v478_v8 = vsel %vm477_vm0, %v471_v6, 0.0  ;;  %v485_v9 = vmul.f32 %v471_v6, %v471_v6 }
  0xf9   :  { %v479_v10 = vrot.slane %v478_v8, 4 }
  0xfa   :  { %476 = vst [vmem:[%s1133_s5 + $0x2] sm:$0x3] %v473_v7  ;;  %v486_v11 = vsel %vm477_vm0, %v485_v9, 0.0 }
  0xfb   :  { %v480_v12 = vadd.f32 %v479_v10, %v478_v8  ;;  %v487_v13 = vrot.slane %v486_v11, 4 }
  0xfd   :  { %v481_v14 = vrot.slane %v480_v12, 2  ;;  %v488_v15 = vadd.f32 %v487_v13, %v486_v11 }
  0xff   :  { %v482_v16 = vadd.f32 %v481_v14, %v480_v12  ;;  %v489_v17 = vrot.slane %v488_v15, 2 }
 0x101   :  { %v483_v18 = vrot.slane %v482_v16, 1  ;;  %v490_v19 = vadd.f32 %v489_v17, %v488_v15 }
 0x103   :  { %v491_v20 = vrot.slane %v490_v19, 1  ;;  %v484_v21 = vadd.f32 %v483_v18, %v482_v16 }
 0x105   :  { %v492_v22 = vadd.f32 %v491_v20, %v490_v19 }
 0x107   :  { %v494_v23 = vsel %vm493_vm1, %v484_v21, %v492_v22 }
 0x108   :  { %495 = vst [vmem:[%s1134_s6] sm:$0x3] %v494_v23 }

// kernel: generator_big_forward.9
= control target key start
LH: loop header
LB: loop body
LE: loop exit
PB: predicated region body
PF: predicated region fallthrough
CT: control target
= control target key end

     0   :  { %v804_v2 = vmov 0.0   ;;  %vm645_vm4 = vcmask 1040384   ;;  %s1309_s3 = inlined_call_operand.vmem [shape: f32[3,3,128,128], index: 3, kind: input, shape index: {}]   ;;  %s1310_s0 = inlined_call_operand.vmem [shape: f32[4,4,128], index: 0, kind: input, shape index: {}]   ;;  %s1311_s1 = inlined_call_operand.vmem [shape: f32[1,128], index: 1, kind: input, shape index: {}]   ;;  %s1312_s2 = inlined_call_operand.vmem [shape: f32[1,128], index: 2, kind: input, shape index: {}]   ;;  %s1313_s4 = inlined_call_operand.vmem [shape: f32[1,128], index: 4, kind: input, shape index: {}]   ;;  %s1314_s5 = inlined_call_operand.vmem [shape: f32[4,4,128], index: 5, kind: output, shape index: {0}]   ;;  %s1315_s6 = inlined_call_operand.vmem [shape: f32[1,2,128], index: 6, kind: output, shape index: {1}]  }
   0x1   :  { %v671_v0 = vld [vmem:[%s1309_s3 + $0xf8] sm:$0xff]  ;;  %v670_v1 = vld [vmem:[%s1309_s3 + $0xf0] sm:$0xff]  ;;  %25 = vst [vmem:[#allocation2] sm:$0x3f] %v804_v2  ;;  %v669_v5 = vld [vmem:[%s1309_s3 + $0xe8] sm:$0xff] }
   0x2   :  { %124 = vmatpush.msra.mxu0 %v671_v0  ;;  %v87_v3 = vld [vmem:[%s1309_s3 + $0x78] sm:$0xff]  ;;  %v86_v4 = vld [vmem:[%s1309_s3 + $0x70] sm:$0xff]  ;;  %26 = vst [vmem:[#allocation2 + $0x8] sm:$0x3f] %v804_v2  ;;  %v85_v6 = vld [vmem:[%s1309_s3 + $0x68] sm:$0xff] }
   0x3   :  { %162 = vmatpush.msra.mxu1 %v87_v3  ;;  %27 = vst [vmem:[#allocation2 + $0x10] sm:$0x3f] %v804_v2  ;;  %v687_v7 = vld [vmem:[%s1309_s3 + $0x178] sm:$0xff]  ;;  %v668_v8 = vld [vmem:[%s1309_s3 + $0xe0] sm:$0xff]  ;;  %v686_v9 = vld [vmem:[%s1309_s3 + $0x170] sm:$0xff] }
   0x4   :  { %125 = vmatpush.msra.mxu0 %v670_v1  ;;  %28 = vst [vmem:[#allocation2 + $0x18] sm:$0x3f] %v804_v2  ;;  %221 = vmatpush.msra.mxu2 %v687_v7  ;;  %v84_v10 = vld [vmem:[%s1309_s3 + $0x60] sm:$0xff]  ;;  %v685_v11 = vld [vmem:[%s1309_s3 + $0x168] sm:$0xff]  ;;  %v667_v12 = vld [vmem:[%s1309_s3 + $0xd8] sm:$0xff] }
   0x5   :  { %163 = vmatpush.msra.mxu1 %v86_v4  ;;  %29 = vst [vmem:[#allocation2 + $0x20] sm:$0x3f] %v804_v2  ;;  %v83_v13 = vld [vmem:[%s1309_s3 + $0x58] sm:$0xff]  ;;  %v684_v14 = vld [vmem:[%s1309_s3 + $0x160] sm:$0xff]  ;;  %v666_v16 = vld [vmem:[%s1309_s3 + $0xd0] sm:$0xff] }
   0x6   :  { %126 = vmatpush.msra.mxu0 %v669_v5  ;;  %30 = vst [vmem:[#allocation2 + $0x28] sm:$0x3f] %v804_v2  ;;  %222 = vmatpush.msra.mxu2 %v686_v9  ;;  %v703_v15 = vld [vmem:[%s1309_s3 + $0x1f8] sm:$0xff]  ;;  %v82_v17 = vld [vmem:[%s1309_s3 + $0x50] sm:$0xff]  ;;  %v665_v20 = vld [vmem:[%s1309_s3 + $0xc8] sm:$0xff] }
   0x7   :  { %164 = vmatpush.msra.mxu1 %v85_v6  ;;  %v683_v18 = vld [vmem:[%s1309_s3 + $0x158] sm:$0xff]  ;;  %282 = vmatpush.msra.mxu3 %v703_v15  ;;  %v702_v19 = vld [vmem:[%s1309_s3 + $0x1f0] sm:$0xff]  ;;  %v701_v21 = vld [vmem:[%s1309_s3 + $0x1e8] sm:$0xff] }
   0x8   :  { %127 = vmatpush.msra.mxu0 %v668_v8  ;;  %223 = vmatpush.msra.mxu2 %v685_v11  ;;  %v81_v22 = vld [vmem:[%s1309_s3 + $0x48] sm:$0xff]  ;;  %v682_v23 = vld [vmem:[%s1309_s3 + $0x150] sm:$0xff]  ;;  %v664_v24 = vld [vmem:[%s1309_s3 + $0xc0] sm:$0xff] }
   0x9   :  { %165 = vmatpush.msra.mxu1 %v84_v10  ;;  %283 = vmatpush.msra.mxu3 %v702_v19  ;;  %v700_v25 = vld [vmem:[%s1309_s3 + $0x1e0] sm:$0xff]  ;;  %v681_v27 = vld [vmem:[%s1309_s3 + $0x148] sm:$0xff]  ;;  %v663_v28 = vld [vmem:[%s1309_s3 + $0xb8] sm:$0xff] }
   0xa   :  { %128 = vmatpush.msra.mxu0 %v667_v12  ;;  %224 = vmatpush.msra.mxu2 %v684_v14  ;;  %v80_v26 = vld [vmem:[%s1309_s3 + $0x40] sm:$0xff]  ;;  %v699_v29 = vld [vmem:[%s1309_s3 + $0x1d8] sm:$0xff]  ;;  %v662_v32 = vld [vmem:[%s1309_s3 + $0xb0] sm:$0xff] }
   0xb   :  { %166 = vmatpush.msra.mxu1 %v83_v13  ;;  %284 = vmatpush.msra.mxu3 %v701_v21  ;;  %v79_v30 = vld [vmem:[%s1309_s3 + $0x38] sm:$0xff]  ;;  %v680_v31 = vld [vmem:[%s1309_s3 + $0x140] sm:$0xff]  ;;  %v698_v33 = vld [vmem:[%s1309_s3 + $0x1d0] sm:$0xff] }
   0xc   :  { %129 = vmatpush.msra.mxu0 %v666_v16  ;;  %225 = vmatpush.msra.mxu2 %v683_v18  ;;  %v78_v34 = vld [vmem:[%s1309_s3 + $0x30] sm:$0xff]  ;;  %v679_v35 = vld [vmem:[%s1309_s3 + $0x138] sm:$0xff]  ;;  %v661_v36 = vld [vmem:[%s1309_s3 + $0xa8] sm:$0xff] }
   0xd   :  { %167 = vmatpush.msra.mxu1 %v82_v17  ;;  %285 = vmatpush.msra.mxu3 %v700_v25  ;;  %v697_v37 = vld [vmem:[%s1309_s3 + $0x1c8] sm:$0xff]  ;;  %v678_v39 = vld [vmem:[%s1309_s3 + $0x130] sm:$0xff]  ;;  %v660_v40 = vld [vmem:[%s1309_s3 + $0xa0] sm:$0xff] }
   0xe   :  { %130 = vmatpush.msra.mxu0 %v665_v20  ;;  %226 = vmatpush.msra.mxu2 %v682_v23  ;;  %v77_v38 = vld [vmem:[%s1309_s3 + $0x28] sm:$0xff]  ;;  %v696_v41 = vld [vmem:[%s1309_s3 + $0x1c0] sm:$0xff]  ;;  %v659_v44 = vld [vmem:[%s1309_s3 + $0x98] sm:$0xff] }
   0xf   :  { %168 = vmatpush.msra.mxu1 %v81_v22  ;;  %286 = vmatpush.msra.mxu3 %v699_v29  ;;  %v76_v42 = vld [vmem:[%s1309_s3 + $0x20] sm:$0xff]  ;;  %v677_v43 = vld [vmem:[%s1309_s3 + $0x128] sm:$0xff]  ;;  %v695_v45 = vld [vmem:[%s1309_s3 + $0x1b8] sm:$0xff] }
  0x10   :  { %131 = vmatpush.msra.mxu0 %v664_v24  ;;  %227 = vmatpush.msra.mxu2 %v681_v27  ;;  %v75_v46 = vld [vmem:[%s1309_s3 + $0x18] sm:$0xff]  ;;  %v676_v47 = vld [vmem:[%s1309_s3 + $0x120] sm:$0xff]  ;;  %v658_v48 = vld [vmem:[%s1309_s3 + $0x90] sm:$0xff] }
  0x11   :  { %169 = vmatpush.msra.mxu1 %v80_v26  ;;  %287 = vmatpush.msra.mxu3 %v698_v33  ;;  %v694_v49 = vld [vmem:[%s1309_s3 + $0x1b0] sm:$0xff]  ;;  %v675_v51 = vld [vmem:[%s1309_s3 + $0x118] sm:$0xff]  ;;  %v657_v52 = vld [vmem:[%s1309_s3 + $0x88] sm:$0xff] }
  0x12   :  { %132 = vmatpush.msra.mxu0 %v663_v28  ;;  %228 = vmatpush.msra.mxu2 %v680_v31  ;;  %v74_v50 = vld [vmem:[%s1309_s3 + $0x10] sm:$0xff]  ;;  %v693_v53 = vld [vmem:[%s1309_s3 + $0x1a8] sm:$0xff]  ;;  %v656_v56 = vld [vmem:[%s1309_s3 + $0x80] sm:$0xff] }
  0x13   :  { %170 = vmatpush.msra.mxu1 %v79_v30  ;;  %288 = vmatpush.msra.mxu3 %v697_v37  ;;  %v73_v54 = vld [vmem:[%s1309_s3 + $0x8] sm:$0xff]  ;;  %v674_v55 = vld [vmem:[%s1309_s3 + $0x110] sm:$0xff]  ;;  %v692_v57 = vld [vmem:[%s1309_s3 + $0x1a0] sm:$0xff] }
  0x14   :  { %133 = vmatpush.msra.mxu0 %v662_v32  ;;  %229 = vmatpush.msra.mxu2 %v679_v35  ;;  %v719_v58 = vld [vmem:[%s1309_s3 + $0x278] sm:$0xff]  ;;  %v718_v59 = vld [vmem:[%s1309_s3 + $0x270] sm:$0xff]  ;;  %v72_v60 = vld [vmem:[%s1309_s3] sm:$0xff] }
  0x15   :  { %171 = vmatpush.msra.mxu1 %v78_v34  ;;  %289 = vmatpush.msra.mxu3 %v696_v41  ;;  %v735_v61 = vld [vmem:[%s1309_s3 + $0x2f8] sm:$0xff]  ;;  %v734_v62 = vld [vmem:[%s1309_s3 + $0x2f0] sm:$0xff]  ;;  %v673_v63 = vld [vmem:[%s1309_s3 + $0x108] sm:$0xff] }
  0x16   :  { %134 = vmatpush.msra.mxu0 %v661_v36  ;;  %230 = vmatpush.msra.mxu2 %v678_v39  ;;  %v717_v0 = vld [vmem:[%s1309_s3 + $0x268] sm:$0xff]  ;;  %v672_v1 = vld [vmem:[%s1309_s3 + $0x100] sm:$0xff]  ;;  %v751_v2 = vld [vmem:[%s1309_s3 + $0x378] sm:$0xff] }
  0x17   :  { %172 = vmatpush.msra.mxu1 %v77_v38  ;;  %290 = vmatpush.msra.mxu3 %v695_v45  ;;  %v691_v3 = vld [vmem:[%s1309_s3 + $0x198] sm:$0xff]  ;;  %v33_v4 = vld [vmem:[%s1310_s0] sm:$0xf]  ;;  %v88_v7 = vld [vmem:[#allocation2 + $0x1] sm:$0xf] }
  0x18   :  { %135 = vmatpush.msra.mxu0 %v660_v40  ;;  %231 = vmatpush.msra.mxu2 %v677_v43  ;;  %v801_v5 = vld [vmem:[%s1311_s1] ss:$0 sm:$0xff]  ;;  %v733_v8 = vld [vmem:[%s1309_s3 + $0x2e8] sm:$0xff]  ;;  %v690_v9 = vld [vmem:[%s1309_s3 + $0x190] sm:$0xff]  ;;  %113 = vst [vmem:[#allocation1] ss:$2 sm:$0xff] %v88_v7 }
  0x19   :  { %173 = vmatpush.msra.mxu1 %v76_v42  ;;  %291 = vmatpush.msra.mxu3 %v694_v49  ;;  %v802_v6 = vld [vmem:[%s1312_s2] ss:$0 sm:$0xff]  ;;  %v750_v12 = vld [vmem:[%s1309_s3 + $0x370] sm:$0xff]  ;;  %v40_v13 = vmul.f32 %v801_v5, %v33_v4  ;;  %v689_v14 = vld [vmem:[%s1309_s3 + $0x188] sm:$0xff] }
  0x1a   :  { %136 = vmatpush.msra.mxu0 %v659_v44  ;;  %232 = vmatpush.msra.mxu2 %v676_v47  ;;  %v716_v10 = vld [vmem:[%s1309_s3 + $0x260] sm:$0xff]  ;;  %v35_v16 = vld [vmem:[%s1310_s0 + $0x8] sm:$0xf]  ;;  %v715_v17 = vld [vmem:[%s1309_s3 + $0x258] sm:$0xff] }
  0x1b   :  { %174 = vmatpush.msra.mxu1 %v75_v46  ;;  %292 = vmatpush.msra.mxu3 %v693_v53  ;;  %v732_v11 = vld [vmem:[%s1309_s3 + $0x2e0] sm:$0xff]  ;;  %v749_v18 = vld [vmem:[%s1309_s3 + $0x368] sm:$0xff]  ;;  %v47_v19 = vadd.f32 %v802_v6, %v40_v13  ;;  %v42_v21 = vmul.f32 %v801_v5, %v35_v16  ;;  %v731_v23 = vld [vmem:[%s1309_s3 + $0x2d8] sm:$0xff] }
  0x1c   :  { %137 = vmatpush.msra.mxu0 %v658_v48  ;;  %233 = vmatpush.msra.mxu2 %v675_v51  ;;  %v34_v15 = vld [vmem:[%s1310_s0 + $0x4] sm:$0xf]  ;;  %v36_v22 = vld [vmem:[%s1310_s0 + $0xc] sm:$0xf]  ;;  %v714_v26 = vld [vmem:[%s1309_s3 + $0x250] sm:$0xff] }
  0x1d   :  { %175 = vmatpush.msra.mxu1 %v74_v50  ;;  %293 = vmatpush.msra.mxu3 %v692_v57  ;;  %v41_v20 = vmul.f32 %v801_v5, %v34_v15  ;;  %v688_v24 = vld [vmem:[%s1309_s3 + $0x180] sm:$0xff]  ;;  %v43_v25 = vmul.f32 %v801_v5, %v36_v22  ;;  %v713_v27 = vld [vmem:[%s1309_s3 + $0x248] sm:$0xff]  ;;  %vm51_vm0 = vcmp.ge.f32.partialorder %v47_v19, 0.0  ;;  %v55_v29 = vmul.f32 0.2, %v47_v19  ;;  %v730_v32 = vld [vmem:[%s1309_s3 + $0x2d0] sm:$0xff] }
  0x1e   :  { %138 = vmatpush.msra.mxu0 %v657_v52  ;;  %234 = vmatpush.msra.mxu2 %v674_v55  ;;  %v748_v28 = vld [vmem:[%s1309_s3 + $0x360] sm:$0xff]  ;;  %v49_v31 = vadd.f32 %v802_v6, %v42_v21  ;;  %v729_v33 = vld [vmem:[%s1309_s3 + $0x2c8] sm:$0xff]  ;;  %v767_v34 = vld [vmem:[%s1309_s3 + $0x3f8] sm:$0xff] }
  0x1f   :  { %176 = vmatpush.msra.mxu1 %v73_v54  ;;  %294 = vmatpush.msra.mxu3 %v691_v3  ;;  %v48_v30 = vadd.f32 %v802_v6, %v41_v20  ;;  %v50_v35 = vadd.f32 %v802_v6, %v43_v25  ;;  %v747_v36 = vld [vmem:[%s1309_s3 + $0x358] sm:$0xff]  ;;  %v766_v37 = vld [vmem:[%s1309_s3 + $0x3f0] sm:$0xff]  ;;  %v59_v38 = vsel %vm51_vm0, %v47_v19, %v55_v29  ;;  %v712_v42 = vld [vmem:[%s1309_s3 + $0x240] sm:$0xff] }
  0x20   :  { %139 = vmatpush.msra.mxu0 %v656_v56  ;;  %235 = vmatpush.msra.mxu2 %v673_v63  ;;  %vm53_vm2 = vcmp.ge.f32.partialorder %v49_v31, 0.0  ;;  %64 = vst [vmem:[#allocation2 + $0x9] sm:$0xf] %v59_v38  ;;  %v57_v40 = vmul.f32 0.2, %v49_v31  ;;  %v746_v43 = vld [vmem:[%s1309_s3 + $0x350] sm:$0xff] }
  0x21   :  { %177 = vmatpush.msra.mxu1 %v72_v60  ;;  %295 = vmatpush.msra.mxu3 %v690_v9  ;;  %vm52_vm1 = vcmp.ge.f32.partialorder %v48_v30, 0.0  ;;  %v56_v39 = vmul.f32 0.2, %v48_v30  ;;  %v58_v41 = vmul.f32 0.2, %v50_v35  ;;  %vm54_vm3 = vcmp.ge.f32.partialorder %v50_v35, 0.0 }
  0x22   :  { %343 = vmatpush.msrb.mxu0 %v719_v58  ;;  %236 = vmatpush.msra.mxu2 %v672_v1  ;;  %v728_v45 = vld [vmem:[%s1309_s3 + $0x2c0] sm:$0xff]  ;;  %v765_v46 = vld [vmem:[%s1309_s3 + $0x3e8] sm:$0xff]  ;;  %v61_v47 = vsel %vm53_vm2, %v49_v31, %v57_v40  ;;  %v711_v49 = vld [vmem:[%s1309_s3 + $0x238] sm:$0xff] }
  0x23   :  { %404 = vmatpush.msrb.mxu1 %v735_v61  ;;  %296 = vmatpush.msra.mxu3 %v689_v14  ;;  %v60_v44 = vsel %vm52_vm1, %v48_v30, %v56_v39  ;;  %v62_v48 = vsel %vm54_vm3, %v50_v35, %v58_v41  ;;  %v745_v50 = vld [vmem:[%s1309_s3 + $0x348] sm:$0xff]  ;;  %66 = vst [vmem:[#allocation2 + $0x19] sm:$0xf] %v61_v47  ;;  %v727_v51 = vld [vmem:[%s1309_s3 + $0x2b8] sm:$0xff]  ;;  %v764_v52 = vld [vmem:[%s1309_s3 + $0x3e0] sm:$0xff] }
  0x24   :  { %344 = vmatpush.msrb.mxu0 %v718_v59  ;;  %466 = vmatpush.msrb.mxu2 %v751_v2  ;;  %65 = vst [vmem:[#allocation2 + $0x11] sm:$0xf] %v60_v44  ;;  %v710_v53 = vld [vmem:[%s1309_s3 + $0x230] sm:$0xff]  ;;  %v744_v54 = vld [vmem:[%s1309_s3 + $0x340] sm:$0xff]  ;;  %v763_v56 = vld [vmem:[%s1309_s3 + $0x3d8] sm:$0xff] }
  0x25   :  { %405 = vmatpush.msrb.mxu1 %v734_v62  ;;  %297 = vmatpush.msra.mxu3 %v688_v24  ;;  %67 = vst [vmem:[#allocation2 + $0x21] sm:$0xf] %v62_v48  ;;  %v726_v55 = vld [vmem:[%s1309_s3 + $0x2b0] sm:$0xff]  ;;  %v709_v57 = vld [vmem:[%s1309_s3 + $0x228] sm:$0xff]  ;;  %v743_v59 = vld [vmem:[%s1309_s3 + $0x338] sm:$0xff] }
  0x26   :  { %345 = vmatpush.msrb.mxu0 %v717_v0  ;;  %467 = vmatpush.msrb.mxu2 %v750_v12  ;;  %v725_v60 = vld [vmem:[%s1309_s3 + $0x2a8] sm:$0xff]  ;;  %v762_v61 = vld [vmem:[%s1309_s3 + $0x3d0] sm:$0xff]  ;;  %v708_v62 = vld [vmem:[%s1309_s3 + $0x220] sm:$0xff] }
  0x27   :  { %406 = vmatpush.msrb.mxu1 %v733_v8  ;;  %527 = vmatpush.msrb.mxu3 %v767_v34  ;;  %v89_v58 = vld [vmem:[#allocation2 + $0x9] sm:$0xf]  ;;  %v724_v1 = vld [vmem:[%s1309_s3 + $0x2a0] sm:$0xff]  ;;  %v761_v2 = vld [vmem:[%s1309_s3 + $0x3c8] sm:$0xff] }
  0x28   :  { %346 = vmatpush.msrb.mxu0 %v716_v10  ;;  %468 = vmatpush.msrb.mxu2 %v749_v18  ;;  %115 = vst [vmem:[#allocation1 + $0x1] ss:$2 sm:$0xff] %v89_v58  ;;  %v742_v63 = vld [vmem:[%s1309_s3 + $0x330] sm:$0xff]  ;;  %v707_v4 = vld [vmem:[%s1309_s3 + $0x218] sm:$0xff]  ;;  %v741_v5 = vld [vmem:[%s1309_s3 + $0x328] sm:$0xff] }
  0x29   :  { %407 = vmatpush.msrb.mxu1 %v732_v11  ;;  %528 = vmatpush.msrb.mxu3 %v766_v37  ;;  %v723_v6 = vld [vmem:[%s1309_s3 + $0x298] sm:$0xff]  ;;  %v760_v7 = vld [vmem:[%s1309_s3 + $0x3c0] sm:$0xff]  ;;  %v68_v8 = vld [vmem:[#allocation2] sm:$0xf] }
  0x2a   :  { %347 = vmatpush.msrb.mxu0 %v715_v17  ;;  %469 = vmatpush.msrb.mxu2 %v748_v28  ;;  %v91_v3 = vld [vmem:[#allocation2 + $0x19] sm:$0xf]  ;;  %v69_v10 = vld [vmem:[#allocation2 + $0x8] sm:$0xf]  ;;  %v739_v14 = vld [vmem:[%s1309_s3 + $0x318] sm:$0xff] }
  0x2b   :  { %408 = vmatpush.msrb.mxu1 %v731_v23  ;;  %529 = vmatpush.msrb.mxu3 %v765_v46  ;;  %v90_v0 = vld [vmem:[#allocation2 + $0x11] sm:$0xf]  ;;  %119 = vst [vmem:[#allocation1 + $0x11] ss:$2 sm:$0xff] %v91_v3  ;;  %v740_v9 = vld [vmem:[%s1309_s3 + $0x320] sm:$0xff]  ;;  %v706_v11 = vld [vmem:[%s1309_s3 + $0x210] sm:$0xff] }
  0x2c   :  { %348 = vmatpush.msrb.mxu0 %v714_v26  ;;  %470 = vmatpush.msrb.mxu2 %v747_v36  ;;  %117 = vst [vmem:[#allocation1 + $0x10] ss:$2 sm:$0xff] %v90_v0  ;;  %v722_v12 = vld [vmem:[%s1309_s3 + $0x290] sm:$0xff]  ;;  %v759_v15 = vld [vmem:[%s1309_s3 + $0x3b8] sm:$0xff]  ;;  %v705_v16 = vld [vmem:[%s1309_s3 + $0x208] sm:$0xff] }
  0x2d   :  { %409 = vmatpush.msrb.mxu1 %v730_v32  ;;  %530 = vmatpush.msrb.mxu3 %v764_v52  ;;  %v721_v17 = vld [vmem:[%s1309_s3 + $0x288] sm:$0xff]  ;;  %v70_v18 = vld [vmem:[#allocation2 + $0x10] sm:$0xf]  ;;  %v71_v19 = vld [vmem:[#allocation2 + $0x18] sm:$0xf] }
  0x2e   :  { %349 = vmatpush.msrb.mxu0 %v713_v27  ;;  %471 = vmatpush.msrb.mxu2 %v746_v43  ;;  %v738_v20 = vld [vmem:[%s1309_s3 + $0x310] sm:$0xff]  ;;  %v704_v22 = vld [vmem:[%s1309_s3 + $0x200] sm:$0xff]  ;;  %v783_v25 = vld [vmem:[%s1309_s3 + $0x478] sm:$0xff] }
  0x2f   :  { %410 = vmatpush.msrb.mxu1 %v729_v33  ;;  %531 = vmatpush.msrb.mxu3 %v763_v56  ;;  %v120_v13 = vld.sshfl [vmem:[#allocation1] sm:$0xff pattern:$0x75316420]  ;;  %v758_v21 = vld [vmem:[%s1309_s3 + $0x3b0] sm:$0xff]  ;;  %v737_v26 = vld [vmem:[%s1309_s3 + $0x308] sm:$0xff] }
  0x30   :  { %350 = vmatpush.msrb.mxu0 %v712_v42  ;;  %472 = vmatpush.msrb.mxu2 %v745_v50  ;;  %151 = vst [vmem:[#allocation1] ss:$2 sm:$0xff] %v68_v8  ;;  %v720_v24 = vld [vmem:[%s1309_s3 + $0x280] sm:$0xff]  ;;  %v757_v27 = vld [vmem:[%s1309_s3 + $0x3a8] sm:$0xff]  ;;  %v782_v30 = vld [vmem:[%s1309_s3 + $0x470] sm:$0xff] }
  0x31   :  { %411 = vmatpush.msrb.mxu1 %v728_v45  ;;  %532 = vmatpush.msrb.mxu3 %v762_v61  ;;  %153 = vst [vmem:[#allocation1 + $0x1] ss:$2 sm:$0xff] %v69_v10  ;;  %v736_v28 = vld [vmem:[%s1309_s3 + $0x300] sm:$0xff]  ;;  %v185_v29 = vld [vmem:[#allocation2 + $0x2] sm:$0xf]  ;;  %v779_v39 = vld [vmem:[%s1309_s3 + $0x458] sm:$0xff] }
  0x32   :  { %351 = vmatpush.msrb.mxu0 %v711_v49  ;;  %473 = vmatpush.msrb.mxu2 %v744_v54  ;;  %v186_v31 = vld [vmem:[#allocation2 + $0xa] sm:$0xf]  ;;  %v756_v32 = vld [vmem:[%s1309_s3 + $0x3a0] sm:$0xff]  ;;  %v781_v34 = vld [vmem:[%s1309_s3 + $0x468] sm:$0xff] }
  0x33   :  { %412 = vmatpush.msrb.mxu1 %v727_v51  ;;  %533 = vmatpush.msrb.mxu3 %v761_v2  ;;  %v121_v23 = vld.sshfl [vmem:[#allocation1 + $0x10] sm:$0xff pattern:$0x75316420]  ;;  %v187_v35 = vld [vmem:[#allocation2 + $0x12] sm:$0xf]  ;;  %v780_v37 = vld [vmem:[%s1309_s3 + $0x460] sm:$0xff] }
  0x34   :  { %352 = vmatpush.msrb.mxu0 %v710_v53  ;;  %474 = vmatpush.msrb.mxu2 %v743_v59  ;;  %155 = vst [vmem:[#allocation1 + $0x10] ss:$2 sm:$0xff] %v70_v18  ;;  %v188_v36 = vld [vmem:[#allocation2 + $0x1a] sm:$0xf]  ;;  %v778_v40 = vld [vmem:[%s1309_s3 + $0x450] sm:$0xff]  ;;  %v755_v47 = vld [vmem:[%s1309_s3 + $0x398] sm:$0xff] }
  0x35   :  { %413 = vmatpush.msrb.mxu1 %v726_v55  ;;  %534 = vmatpush.msrb.mxu3 %v760_v7  ;;  %157 = vst [vmem:[#allocation1 + $0x11] ss:$2 sm:$0xff] %v71_v19  ;;  %v246_v41 = vld [vmem:[#allocation2 + $0x8] sm:$0xf]  ;;  %v247_v42 = vld [vmem:[#allocation2 + $0x10] sm:$0xf] }
  0x36   :  { %353 = vmatpush.msrb.mxu0 %v709_v57  ;;  %475 = vmatpush.msrb.mxu2 %v742_v63  ;;  %v248_v44 = vld [vmem:[#allocation2 + $0x18] sm:$0xf]  ;;  %v249_v45 = vld [vmem:[#allocation2 + $0x20] sm:$0xf]  ;;  %v754_v49 = vld [vmem:[%s1309_s3 + $0x390] sm:$0xff] }
  0x37   :  { %414 = vmatpush.msrb.mxu1 %v725_v60  ;;  %140 = vmatmul.f32.vlgmr.msra.gmra.mxu0 %v120_v13  ;;  %v777_v48 = vld [vmem:[%s1309_s3 + $0x448] sm:$0xff]  ;;  %v307_v50 = vld [vmem:[#allocation2 + $0x9] sm:$0xf]  ;;  %v776_v51 = vld [vmem:[%s1309_s3 + $0x440] sm:$0xff] }
  0x38   :  { %354 = vmatpush.msrb.mxu0 %v708_v62  ;;  %476 = vmatpush.msrb.mxu2 %v741_v5  ;;  %v158_v33 = vld.sshfl [vmem:[#allocation1] sm:$0xff pattern:$0x75316420]  ;;  %v308_v52 = vld [vmem:[#allocation2 + $0x11] sm:$0xf]  ;;  %v753_v53 = vld [vmem:[%s1309_s3 + $0x388] sm:$0xff] }
  0x39   :  { %415 = vmatpush.msrb.mxu1 %v724_v1  ;;  %535 = vmatpush.msrb.mxu3 %v759_v15  ;;  %210 = vst [vmem:[#allocation1] ss:$2 sm:$0xff] %v185_v29  ;;  %v775_v55 = vld [vmem:[%s1309_s3 + $0x438] sm:$0xff]  ;;  %v309_v56 = vld [vmem:[#allocation2 + $0x19] sm:$0xf]  ;;  %v774_v59 = vld [vmem:[%s1309_s3 + $0x430] sm:$0xff] }
  0x3a   :  { %355 = vmatpush.msrb.mxu0 %v707_v4  ;;  %477 = vmatpush.msrb.mxu2 %v740_v9  ;;  %212 = vst [vmem:[#allocation1 + $0x1] ss:$2 sm:$0xff] %v186_v31  ;;  %v752_v57 = vld [vmem:[%s1309_s3 + $0x380] sm:$0xff]  ;;  %v310_v58 = vld [vmem:[#allocation2 + $0x21] sm:$0xf]  ;;  %v771_v1 = vld [vmem:[%s1309_s3 + $0x418] sm:$0xff] }
  0x3b   :  { %416 = vmatpush.msrb.mxu1 %v723_v6  ;;  %536 = vmatpush.msrb.mxu3 %v758_v21  ;;  %v773_v61 = vld [vmem:[%s1309_s3 + $0x428] sm:$0xff]  ;;  %v772_v62 = vld [vmem:[%s1309_s3 + $0x420] sm:$0xff]  ;;  %v368_v63 = vld [vmem:[#allocation2 + $0xa] sm:$0xf] }
  0x3c   :  { %356 = vmatpush.msrb.mxu0 %v706_v11  ;;  %478 = vmatpush.msrb.mxu2 %v739_v14  ;;  %v159_v38 = vld.sshfl [vmem:[#allocation1 + $0x10] sm:$0xff pattern:$0x75316420]  ;;  %v369_v0 = vld [vmem:[#allocation2 + $0x12] sm:$0xf]  ;;  %v769_v7 = vld [vmem:[%s1309_s3 + $0x408] sm:$0xff] }
  0x3d   :  { %417 = vmatpush.msrb.mxu1 %v722_v12  ;;  %537 = vmatpush.msrb.mxu3 %v757_v27  ;;  %214 = vst [vmem:[#allocation1 + $0x10] ss:$2 sm:$0xff] %v187_v35  ;;  %v370_v3 = vld [vmem:[#allocation2 + $0x1a] sm:$0xf]  ;;  %v770_v4 = vld [vmem:[%s1309_s3 + $0x410] sm:$0xff] }
  0x3e   :  { %357 = vmatpush.msrb.mxu0 %v705_v16  ;;  %479 = vmatpush.msrb.mxu2 %v738_v20  ;;  %216 = vst [vmem:[#allocation1 + $0x11] ss:$2 sm:$0xff] %v188_v36  ;;  %v371_v5 = vld [vmem:[#allocation2 + $0x22] sm:$0xf]  ;;  %v768_v8 = vld [vmem:[%s1309_s3 + $0x400] sm:$0xff] }
  0x3f   :  { %418 = vmatpush.msrb.mxu1 %v721_v17  ;;  %143 = vmatmul.f32.gmra.mxu0 %v121_v23  ;;  %v430_v9 = vld [vmem:[#allocation2 + $0x10] sm:$0xf]  ;;  %v431_v10 = vld [vmem:[#allocation2 + $0x18] sm:$0xf]  ;;  %v432_v12 = vld [vmem:[#allocation2 + $0x20] sm:$0xf] }
  0x40   :  { %358 = vmatpush.msrb.mxu0 %v704_v22  ;;  %480 = vmatpush.msrb.mxu2 %v737_v26  ;;  %v433_v13 = vld [vmem:[#allocation2 + $0x28] sm:$0xf]  ;;  %v491_v15 = vld [vmem:[#allocation2 + $0x11] sm:$0xf]  ;;  %v492_v16 = vld [vmem:[#allocation2 + $0x19] sm:$0xf] }
  0x41   :  { %419 = vmatpush.msrb.mxu1 %v720_v24  ;;  %538 = vmatpush.msrb.mxu3 %v756_v32  ;;  %v217_v43 = vld.sshfl [vmem:[#allocation1] sm:$0xff pattern:$0x75316420]  ;;  %v493_v18 = vld [vmem:[#allocation2 + $0x21] sm:$0xf] }
  0x42   :  { %588 = vmatpush.msra.mxu0 %v783_v25  ;;  %481 = vmatpush.msrb.mxu2 %v736_v28  ;;  %271 = vst [vmem:[#allocation1] ss:$2 sm:$0xff] %v246_v41  ;;  %v494_v19 = vld [vmem:[#allocation2 + $0x29] sm:$0xf]  ;;  %v552_v21 = vld [vmem:[#allocation2 + $0x12] sm:$0xf] }
  0x43   :  { %178 = vmatmul.f32.vlgmr.msra.gmra.mxu1 %v158_v33  ;;  %237 = vmatmul.f32.vlgmr.msra.gmra.mxu2 %v217_v43  ;;  %273 = vst [vmem:[#allocation1 + $0x1] ss:$2 sm:$0xff] %v247_v42  ;;  %v553_v22 = vld [vmem:[#allocation2 + $0x1a] sm:$0xf]  ;;  %v554_v24 = vld [vmem:[#allocation2 + $0x22] sm:$0xf] }
  0x44   :  { %589 = vmatpush.msra.mxu0 %v782_v30  ;;  %784 = vmatpush.msra.mxu1 %v783_v25  ;;  %v555_v25 = vld [vmem:[#allocation2 + $0x2a] sm:$0xf] }
  0x45   :  { %v218_v46 = vld.sshfl [vmem:[#allocation1 + $0x10] sm:$0xff pattern:$0x75316420]  ;;  %539 = vmatpush.msrb.mxu3 %v755_v47 }
  0x46   :  { %590 = vmatpush.msra.mxu0 %v781_v34  ;;  %785 = vmatpush.msra.mxu1 %v782_v30  ;;  %275 = vst [vmem:[#allocation1 + $0x10] ss:$2 sm:$0xff] %v248_v44 }
  0x47   :  { %277 = vst [vmem:[#allocation1 + $0x11] ss:$2 sm:$0xff] %v249_v45  ;;  %540 = vmatpush.msrb.mxu3 %v754_v49 }
  0x48   :  { %591 = vmatpush.msra.mxu0 %v780_v37  ;;  %786 = vmatpush.msra.mxu1 %v781_v34 }
  0x49   :  { %541 = vmatpush.msrb.mxu3 %v753_v53 }
  0x4a   :  { %592 = vmatpush.msra.mxu0 %v779_v39  ;;  %787 = vmatpush.msra.mxu1 %v780_v37  ;;  %v278_v54 = vld.sshfl [vmem:[#allocation1] sm:$0xff pattern:$0x75316420] }
  0x4b   :  { %181 = vmatmul.f32.gmra.mxu1 %v159_v38  ;;  %240 = vmatmul.f32.gmra.mxu2 %v218_v46  ;;  %332 = vst [vmem:[#allocation1] ss:$2 sm:$0xff] %v307_v50 }
  0x4c   :  { %593 = vmatpush.msra.mxu0 %v778_v40  ;;  %788 = vmatpush.msra.mxu1 %v779_v39  ;;  %334 = vst [vmem:[#allocation1 + $0x1] ss:$2 sm:$0xff] %v308_v52 }
  0x4d   :  { %298 = vmatmul.f32.vlgmr.msra.gmra.mxu3 %v278_v54  ;;  %v803_v54 = vld [vmem:[%s1313_s4] ss:$0 sm:$0xff] }
  0x4e   :  { %789 = vmatpush.msra.mxu1 %v778_v40  ;;  %594 = vmatpush.msra.mxu0 %v777_v48  ;;  %v279_v60 = vld.sshfl [vmem:[#allocation1 + $0x10] sm:$0xff pattern:$0x75316420] }
  0x4f   :  { %336 = vst [vmem:[#allocation1 + $0x10] ss:$2 sm:$0xff] %v309_v56  ;;  %542 = vmatpush.msrb.mxu3 %v752_v57 }
  0x50   :  { %790 = vmatpush.msra.mxu1 %v777_v48  ;;  %595 = vmatpush.msra.mxu0 %v776_v51  ;;  %338 = vst [vmem:[#allocation1 + $0x11] ss:$2 sm:$0xff] %v310_v58 }
  0x52   :  { %791 = vmatpush.msra.mxu1 %v776_v51  ;;  %596 = vmatpush.msra.mxu0 %v775_v55 }
  0x53   :  { %v339_v2 = vld.sshfl [vmem:[#allocation1] sm:$0xff pattern:$0x75316420] }
  0x54   :  { %792 = vmatpush.msra.mxu1 %v775_v55  ;;  %597 = vmatpush.msra.mxu0 %v774_v59  ;;  %393 = vst [vmem:[#allocation1] ss:$2 sm:$0xff] %v368_v63 }
  0x55   :  { %301 = vmatmul.f32.gmra.mxu3 %v279_v60  ;;  %359 = vmatmul.f32.vlgmr.msrb.gmra.mxu0 %v339_v2  ;;  %395 = vst [vmem:[#allocation1 + $0x1] ss:$2 sm:$0xff] %v369_v0 }
  0x56   :  { %793 = vmatpush.msra.mxu1 %v774_v59  ;;  %598 = vmatpush.msra.mxu0 %v773_v61 }
  0x57   :  { %v340_v6 = vld.sshfl [vmem:[#allocation1 + $0x10] sm:$0xff pattern:$0x75316420] }
  0x58   :  { %794 = vmatpush.msra.mxu1 %v773_v61  ;;  %599 = vmatpush.msra.mxu0 %v772_v62  ;;  %397 = vst [vmem:[#allocation1 + $0x10] ss:$2 sm:$0xff] %v370_v3 }
  0x59   :  { %399 = vst [vmem:[#allocation1 + $0x11] ss:$2 sm:$0xff] %v371_v5 }
  0x5a   :  { %795 = vmatpush.msra.mxu1 %v772_v62  ;;  %600 = vmatpush.msra.mxu0 %v771_v1 }
  0x5c   :  { %796 = vmatpush.msra.mxu1 %v771_v1  ;;  %601 = vmatpush.msra.mxu0 %v770_v4  ;;  %v400_v11 = vld.sshfl [vmem:[#allocation1] sm:$0xff pattern:$0x75316420] }
  0x5d   :  { %362 = vmatmul.f32.gmra.mxu0 %v340_v6  ;;  %420 = vmatmul.f32.vlgmr.msrb.gmra.mxu1 %v400_v11  ;;  %455 = vst [vmem:[#allocation1] ss:$2 sm:$0xff] %v430_v9 }
  0x5e   :  { %797 = vmatpush.msra.mxu1 %v770_v4  ;;  %602 = vmatpush.msra.mxu0 %v769_v7  ;;  %457 = vst [vmem:[#allocation1 + $0x1] ss:$2 sm:$0xff] %v431_v10 }
  0x60   :  { %798 = vmatpush.msra.mxu1 %v769_v7  ;;  %603 = vmatpush.msra.mxu0 %v768_v8  ;;  %v401_v14 = vld.sshfl [vmem:[#allocation1 + $0x10] sm:$0xff pattern:$0x75316420] }
  0x61   :  { %459 = vst [vmem:[#allocation1 + $0x10] ss:$2 sm:$0xff] %v432_v12 }
  0x62   :  { %799 = vmatpush.msra.mxu1 %v768_v8  ;;  %461 = vst [vmem:[#allocation1 + $0x11] ss:$2 sm:$0xff] %v433_v13 }
  0x65   :  { %v462_v17 = vld.sshfl [vmem:[#allocation1] sm:$0xff pattern:$0x75316420]  ;;  %423 = vmatmul.f32.gmra.mxu1 %v401_v14 }
  0x66   :  { %482 = vmatmul.f32.vlgmr.msrb.gmra.mxu2 %v462_v17  ;;  %516 = vst [vmem:[#allocation1] ss:$2 sm:$0xff] %v491_v15 }
  0x67   :  { %518 = vst [vmem:[#allocation1 + $0x1] ss:$2 sm:$0xff] %v492_v16 }
  0x69   :  { %v463_v20 = vld.sshfl [vmem:[#allocation1 + $0x10] sm:$0xff pattern:$0x75316420] }
  0x6a   :  { %520 = vst [vmem:[#allocation1 + $0x10] ss:$2 sm:$0xff] %v493_v18 }
  0x6b   :  { %522 = vst [vmem:[#allocation1 + $0x11] ss:$2 sm:$0xff] %v494_v19 }
  0x6e   :  { %485 = vmatmul.f32.gmra.mxu2 %v463_v20  ;;  %v523_v23 = vld.sshfl [vmem:[#allocation1] sm:$0xff pattern:$0x75316420] }
  0x6f   :  { %543 = vmatmul.f32.vlgmr.msrb.gmra.mxu3 %v523_v23  ;;  %577 = vst [vmem:[#allocation1] ss:$2 sm:$0xff] %v552_v21 }
  0x70   :  { %579 = vst [vmem:[#allocation1 + $0x1] ss:$2 sm:$0xff] %v553_v22 }
  0x72   :  { %v524_v26 = vld.sshfl [vmem:[#allocation1 + $0x10] sm:$0xff pattern:$0x75316420] }
  0x73   :  { %581 = vst [vmem:[#allocation1 + $0x10] ss:$2 sm:$0xff] %v554_v24 }
  0x74   :  { %583 = vst [vmem:[#allocation1 + $0x11] ss:$2 sm:$0xff] %v555_v25 }
  0x77   :  { %546 = vmatmul.f32.gmra.mxu3 %v524_v26  ;;  %v584_v27 = vld.sshfl [vmem:[#allocation1] sm:$0xff pattern:$0x75316420] }
  0x78   :  { %604 = vmatmul.f32.vlgmr.msra.gmra.mxu0 %v584_v27 }
  0x7b   :  { %v585_v28 = vld.sshfl [vmem:[#allocation1 + $0x10] sm:$0xff pattern:$0x75316420] }
  0x7c   :  { %607 = vmatmul.f32.vlgmr.msra.gmra.mxu1 %v585_v28 }
  0xb4   :  { %v141_v29 = vpop.f32.mrf.mxu0 }
  0xbc   :  { %v144_v32 = vpop.f32.mrf.mxu0 }
  0xc0   :  { %v179_v30 = vpop.f32.mrf.mxu1 }
  0xc1   :  { %v180_v34 = vadd.f32 %v179_v30, %v141_v29 }
  0xc6   :  { %v238_v31 = vpop.f32.mrf.mxu2 }
  0xc7   :  { %v244_v38 = vadd.f32 %v238_v31, %v180_v34 }
  0xc8   :  { %v182_v33 = vpop.f32.mrf.mxu1 }
  0xc9   :  { %v183_v39 = vadd.f32 %v182_v33, %v144_v32 }
  0xce   :  { %v241_v36 = vpop.f32.mrf.mxu2 }
  0xcf   :  { %v245_v43 = vadd.f32 %v241_v36, %v183_v39 }
  0xd0   :  { %v299_v35 = vpop.f32.mrf.mxu3 }
  0xd1   :  { %v305_v40 = vadd.f32 %v299_v35, %v244_v38 }
  0xd2   :  { %v360_v37 = vpop.f32.mrf.mxu0 }
  0xd3   :  { %v366_v44 = vadd.f32 %v360_v37, %v305_v40 }
  0xd8   :  { %v302_v42 = vpop.f32.mrf.mxu3 }
  0xd9   :  { %v306_v47 = vadd.f32 %v302_v42, %v245_v43 }
  0xda   :  { %v421_v41 = vpop.f32.mrf.mxu1  ;;  %v363_v46 = vpop.f32.mrf.mxu0 }
  0xdb   :  { %v427_v48 = vadd.f32 %v421_v41, %v366_v44  ;;  %v367_v52 = vadd.f32 %v363_v46, %v306_v47 }
  0xe2   :  { %v424_v50 = vpop.f32.mrf.mxu1 }
  0xe3   :  { %v428_v58 = vadd.f32 %v424_v50, %v367_v52 }
  0xe9   :  { %v483_v45 = vpop.f32.mrf.mxu2 }
  0xea   :  { %v489_v49 = vadd.f32 %v483_v45, %v427_v48 }
  0xf1   :  { %v486_v56 = vpop.f32.mrf.mxu2 }
  0xf2   :  { %v544_v51 = vpop.f32.mrf.mxu3  ;;  %v490_v60 = vadd.f32 %v486_v56, %v428_v58 }
  0xf3   :  { %v550_v53 = vadd.f32 %v544_v51, %v489_v49 }
  0xf5   :  { %v605_v55 = vpop.f32.mrf.mxu0 }
  0xf6   :  { %v611_v57 = vadd.f32 %v605_v55, %v550_v53 }
  0xf8   :  { %v617_v59 = vadd.f32 %v803_v54, %v611_v57 }
  0xf9   :  { %v608_v63 = vpop.f32.mrf.mxu1 }
  0xfa   :  { %v621_v61 = vrot.slane %v617_v59, 4  ;;  %625 = vst [vmem:[%s1314_s5] sm:$0xf] %v617_v59  ;;  %v547_v62 = vpop.f32.mrf.mxu3  ;;  %v636_v3 = vmul.f32 %v617_v59, %v617_v59 }
  0xfb   :  { %v551_v0 = vadd.f32 %v547_v62, %v490_v60 }
  0xfc   :  { %626 = vst [vmem:[%s1314_s5 + $0x4] sm:$0xf] %v621_v61 }
  0xfd   :  { %v612_v1 = vadd.f32 %v608_v63, %v551_v0 }
  0xff   :  { %v618_v2 = vadd.f32 %v803_v54, %v612_v1 }
 0x101   :  { %v622_v4 = vrot.slane %v618_v2, 4  ;;  %627 = vst [vmem:[%s1314_s5 + $0x8] sm:$0xf] %v618_v2  ;;  %v629_v5 = vadd.f32 %v618_v2, %v617_v59  ;;  %v637_v6 = vmul.f32 %v618_v2, %v618_v2 }
 0x103   :  { %628 = vst [vmem:[%s1314_s5 + $0xc] sm:$0xf] %v622_v4  ;;  %v630_v7 = vrot.slane %v629_v5, 4  ;;  %v638_v8 = vadd.f32 %v637_v6, %v636_v3 }
 0x105   :  { %v631_v9 = vadd.f32 %v630_v7, %v629_v5  ;;  %v639_v10 = vrot.slane %v638_v8, 4 }
 0x107   :  { %v632_v11 = vrot.slane %v631_v9, 2  ;;  %v640_v12 = vadd.f32 %v639_v10, %v638_v8 }
 0x109   :  { %v633_v13 = vadd.f32 %v632_v11, %v631_v9  ;;  %v641_v14 = vrot.slane %v640_v12, 2 }
 0x10b   :  { %v634_v15 = vrot.slane %v633_v13, 1  ;;  %v642_v16 = vadd.f32 %v641_v14, %v640_v12 }
 0x10d   :  { %v643_v17 = vrot.slane %v642_v16, 1  ;;  %v635_v18 = vadd.f32 %v634_v15, %v633_v13 }
 0x10f   :  { %v644_v19 = vadd.f32 %v643_v17, %v642_v16 }
 0x111   :  { %v646_v20 = vsel %vm645_vm4, %v635_v18, %v644_v19 }
 0x112   :  { %647 = vst [vmem:[%s1315_s6] sm:$0x3] %v646_v20 }

// kernel: generator_big_forward.10
= control target key start
LH: loop header
LB: loop body
LE: loop exit
PB: predicated region body
PF: predicated region fallthrough
CT: control target
= control target key end

     0   :  { %v989_v2 = vmov 0.0   ;;  %vm814_vm8 = vcmask 1040384   ;;  %s1749_s3 = inlined_call_operand.vmem [shape: f32[3,3,128,128], index: 3, kind: input, shape index: {}]   ;;  %s1750_s0 = inlined_call_operand.vmem [shape: f32[8,8,128], index: 0, kind: input, shape index: {}]   ;;  %s1751_s1 = inlined_call_operand.vmem [shape: f32[1,128], index: 1, kind: input, shape index: {}]   ;;  %s1752_s2 = inlined_call_operand.vmem [shape: f32[1,128], index: 2, kind: input, shape index: {}]   ;;  %s1753_s4 = inlined_call_operand.vmem [shape: f32[1,128], index: 4, kind: input, shape index: {}]   ;;  %s1754_s5 = inlined_call_operand.vmem [shape: f32[8,8,128], index: 5, kind: output, shape index: {0}]   ;;  %s1755_s6 = inlined_call_operand.vmem [shape: f32[1,2,128], index: 6, kind: output, shape index: {1}]  }
   0x1   :  { %v840_v0 = vld [vmem:[%s1749_s3 + $0xf8] sm:$0xff]  ;;  %v839_v1 = vld [vmem:[%s1749_s3 + $0xf0] sm:$0xff]  ;;  %33 = vst [vmem:[#allocation2 + $0x40] sm:$0xff] %v989_v2  ;;  %v838_v3 = vld [vmem:[%s1749_s3 + $0xe8] sm:$0xff] }
   0x2   :  { %953 = vmatpush.msra.mxu1 %v840_v0  ;;  %159 = vmatpush.msra.mxu0 %v840_v0  ;;  %34 = vst [vmem:[#allocation2 + $0x48] sm:$0x3] %v989_v2  ;;  %v856_v4 = vld [vmem:[%s1749_s3 + $0x178] sm:$0xff]  ;;  %v855_v5 = vld [vmem:[%s1749_s3 + $0x170] sm:$0xff]  ;;  %v837_v6 = vld [vmem:[%s1749_s3 + $0xe0] sm:$0xff] }
   0x3   :  { %25 = vst [vmem:[#allocation2] sm:$0xff] %v989_v2  ;;  %266 = vmatpush.msra.mxu2 %v856_v4  ;;  %v854_v7 = vld [vmem:[%s1749_s3 + $0x168] sm:$0xff]  ;;  %v836_v8 = vld [vmem:[%s1749_s3 + $0xd8] sm:$0xff]  ;;  %v835_v9 = vld [vmem:[%s1749_s3 + $0xd0] sm:$0xff] }
   0x4   :  { %954 = vmatpush.msra.mxu1 %v839_v1  ;;  %160 = vmatpush.msra.mxu0 %v839_v1  ;;  %26 = vst [vmem:[#allocation2 + $0x8] sm:$0x3] %v989_v2  ;;  %v853_v10 = vld [vmem:[%s1749_s3 + $0x160] sm:$0xff]  ;;  %v852_v11 = vld [vmem:[%s1749_s3 + $0x158] sm:$0xff]  ;;  %v834_v16 = vld [vmem:[%s1749_s3 + $0xc8] sm:$0xff] }
   0x5   :  { %27 = vst [vmem:[#allocation2 + $0x10] sm:$0xff] %v989_v2  ;;  %267 = vmatpush.msra.mxu2 %v855_v5  ;;  %v872_v12 = vld [vmem:[%s1749_s3 + $0x1f8] sm:$0xff]  ;;  %v1076_v14 = vld [vmem:[%s1751_s1] ss:$0 sm:$0xff]  ;;  %v871_v17 = vld [vmem:[%s1749_s3 + $0x1f0] sm:$0xff] }
   0x6   :  { %955 = vmatpush.msra.mxu1 %v838_v3  ;;  %161 = vmatpush.msra.mxu0 %v838_v3  ;;  %28 = vst [vmem:[#allocation2 + $0x18] sm:$0x3] %v989_v2  ;;  %v50_v13 = vld [vmem:[%s1750_s0 + $0x18] sm:$0xff]  ;;  %v1081_v15 = vld [vmem:[%s1752_s2] ss:$0 sm:$0xff]  ;;  %v851_v18 = vld [vmem:[%s1749_s3 + $0x150] sm:$0xff] }
   0x7   :  { %29 = vst [vmem:[#allocation2 + $0x20] sm:$0xff] %v989_v2  ;;  %268 = vmatpush.msra.mxu2 %v854_v7  ;;  %340 = vmatpush.msra.mxu3 %v872_v12  ;;  %v61_v19 = vmul.f32 %v1076_v14, %v50_v13  ;;  %v870_v20 = vld [vmem:[%s1749_s3 + $0x1e8] sm:$0xff]  ;;  %v833_v21 = vld [vmem:[%s1749_s3 + $0xc0] sm:$0xff]  ;;  %v832_v25 = vld [vmem:[%s1749_s3 + $0xb8] sm:$0xff] }
   0x8   :  { %956 = vmatpush.msra.mxu1 %v837_v6  ;;  %162 = vmatpush.msra.mxu0 %v837_v6  ;;  %30 = vst [vmem:[#allocation2 + $0x28] sm:$0x3] %v989_v2  ;;  %v850_v22 = vld [vmem:[%s1749_s3 + $0x148] sm:$0xff]  ;;  %v869_v24 = vld [vmem:[%s1749_s3 + $0x1e0] sm:$0xff]  ;;  %v868_v29 = vld [vmem:[%s1749_s3 + $0x1d8] sm:$0xff] }
   0x9   :  { %31 = vst [vmem:[#allocation2 + $0x30] sm:$0xff] %v989_v2  ;;  %269 = vmatpush.msra.mxu2 %v853_v10  ;;  %341 = vmatpush.msra.mxu3 %v871_v17  ;;  %v72_v23 = vadd.f32 %v1081_v15, %v61_v19  ;;  %v849_v26 = vld [vmem:[%s1749_s3 + $0x140] sm:$0xff]  ;;  %v831_v31 = vld [vmem:[%s1749_s3 + $0xb0] sm:$0xff]  ;;  %v848_v33 = vld [vmem:[%s1749_s3 + $0x138] sm:$0xff] }
   0xa   :  { %957 = vmatpush.msra.mxu1 %v836_v8  ;;  %163 = vmatpush.msra.mxu0 %v836_v8  ;;  %35 = vst [vmem:[#allocation2 + $0x50] sm:$0xff] %v989_v2  ;;  %v51_v27 = vld [vmem:[%s1750_s0 + $0x20] sm:$0xff]  ;;  %v867_v35 = vld [vmem:[%s1749_s3 + $0x1d0] sm:$0xff]  ;;  %v830_v36 = vld [vmem:[%s1749_s3 + $0xa8] sm:$0xff] }
   0xb   :  { %32 = vst [vmem:[#allocation2 + $0x38] sm:$0x3] %v989_v2  ;;  %270 = vmatpush.msra.mxu2 %v852_v11  ;;  %342 = vmatpush.msra.mxu3 %v870_v20  ;;  %vm80_vm0 = vcmp.ge.f32.partialorder %v72_v23, 0.0  ;;  %v88_v28 = vmul.f32 0.2, %v72_v23  ;;  %v62_v30 = vmul.f32 %v1076_v14, %v51_v27  ;;  %v847_v37 = vld [vmem:[%s1749_s3 + $0x130] sm:$0xff] }
   0xc   :  { %958 = vmatpush.msra.mxu1 %v835_v9  ;;  %164 = vmatpush.msra.mxu0 %v835_v9  ;;  %36 = vst [vmem:[#allocation2 + $0x58] sm:$0x3] %v989_v2  ;;  %v866_v39 = vld [vmem:[%s1749_s3 + $0x1c8] sm:$0xff]  ;;  %v829_v40 = vld [vmem:[%s1749_s3 + $0xa0] sm:$0xff]  ;;  %v828_v47 = vld [vmem:[%s1749_s3 + $0x98] sm:$0xff] }
   0xd   :  { %37 = vst [vmem:[#allocation2 + $0x60] sm:$0xff] %v989_v2  ;;  %271 = vmatpush.msra.mxu2 %v851_v18  ;;  %343 = vmatpush.msra.mxu3 %v869_v24  ;;  %v1130_v32 = vsel %vm80_vm0, %v72_v23, %v88_v28  ;;  %v73_v34 = vadd.f32 %v1081_v15, %v62_v30  ;;  %v47_v41 = vld [vmem:[%s1750_s0] sm:$0xff]  ;;  %v846_v42 = vld [vmem:[%s1749_s3 + $0x128] sm:$0xff]  ;;  %v864_v51 = vld [vmem:[%s1749_s3 + $0x1b8] sm:$0xff] }
   0xe   :  { %959 = vmatpush.msra.mxu1 %v834_v16  ;;  %165 = vmatpush.msra.mxu0 %v834_v16  ;;  %38 = vst [vmem:[#allocation2 + $0x68] sm:$0x3] %v989_v2  ;;  %v865_v44 = vld [vmem:[%s1749_s3 + $0x1c0] sm:$0xff]  ;;  %v58_v45 = vmul.f32 %v1076_v14, %v47_v41  ;;  %v52_v46 = vld [vmem:[%s1750_s0 + $0x28] sm:$0xff]  ;;  %v827_v52 = vld [vmem:[%s1749_s3 + $0x90] sm:$0xff] }
   0xf   :  { %39 = vst [vmem:[#allocation2 + $0x70] sm:$0xff] %v989_v2  ;;  %272 = vmatpush.msra.mxu2 %v850_v22  ;;  %344 = vmatpush.msra.mxu3 %v868_v29  ;;  %vm81_vm1 = vcmp.ge.f32.partialorder %v73_v34, 0.0  ;;  %v89_v38 = vmul.f32 0.2, %v73_v34  ;;  %v63_v48 = vmul.f32 %v1076_v14, %v52_v46  ;;  %v845_v49 = vld [vmem:[%s1749_s3 + $0x120] sm:$0xff]  ;;  %v844_v54 = vld [vmem:[%s1749_s3 + $0x118] sm:$0xff] }
  0x10   :  { %960 = vmatpush.msra.mxu1 %v833_v21  ;;  %166 = vmatpush.msra.mxu0 %v833_v21  ;;  %40 = vst [vmem:[#allocation2 + $0x78] sm:$0x3] %v989_v2  ;;  %v69_v50 = vadd.f32 %v1081_v15, %v58_v45  ;;  %v863_v56 = vld [vmem:[%s1749_s3 + $0x1b0] sm:$0xff]  ;;  %v826_v57 = vld [vmem:[%s1749_s3 + $0x88] sm:$0xff]  ;;  %v825_v1 = vld [vmem:[%s1749_s3 + $0x80] sm:$0xff] }
  0x11   :  { %41 = vst [vmem:[#allocation2 + $0x80] sm:$0xff] %v989_v2  ;;  %273 = vmatpush.msra.mxu2 %v849_v26  ;;  %345 = vmatpush.msra.mxu3 %v867_v35  ;;  %v1161_v43 = vsel %vm81_vm1, %v73_v34, %v89_v38  ;;  %v74_v53 = vadd.f32 %v1081_v15, %v63_v48  ;;  %v48_v59 = vld [vmem:[%s1750_s0 + $0x8] sm:$0xff]  ;;  %v843_v60 = vld [vmem:[%s1749_s3 + $0x110] sm:$0xff]  ;;  %v133_v7 = vld [vmem:[%s1749_s3 + $0x78] sm:$0xff] }
  0x12   :  { %961 = vmatpush.msra.mxu1 %v832_v25  ;;  %167 = vmatpush.msra.mxu0 %v832_v25  ;;  %42 = vst [vmem:[#allocation2 + $0x88] sm:$0x3] %v989_v2  ;;  %vm77_vm2 = vcmp.ge.f32.partialorder %v69_v50, 0.0  ;;  %v85_v55 = vmul.f32 0.2, %v69_v50  ;;  %v862_v62 = vld [vmem:[%s1749_s3 + $0x1a8] sm:$0xff]  ;;  %v59_v63 = vmul.f32 %v1076_v14, %v48_v59 }
  0x13   :  { %105 = vst [vmem:[#allocation2 + $0x41] sm:$0xff] %v1130_v32  ;;  %274 = vmatpush.msra.mxu2 %v848_v33  ;;  %346 = vmatpush.msra.mxu3 %v866_v39  ;;  %vm82_vm3 = vcmp.ge.f32.partialorder %v74_v53, 0.0  ;;  %v90_v58 = vmul.f32 0.2, %v74_v53  ;;  %v53_v0 = vld [vmem:[%s1750_s0 + $0x30] sm:$0xff]  ;;  %v134_v5 = vld [vmem:[#allocation2 + $0x1] sm:$0xff] }
  0x14   :  { %962 = vmatpush.msra.mxu1 %v831_v31  ;;  %168 = vmatpush.msra.mxu0 %v831_v31  ;;  %43 = vst [vmem:[#allocation2 + $0x90] sm:$0xff] %v989_v2  ;;  %v1201_v61 = vsel %vm77_vm2, %v69_v50, %v85_v55  ;;  %v64_v4 = vmul.f32 %v1076_v14, %v53_v0  ;;  %v888_v8 = vld [vmem:[%s1749_s3 + $0x278] sm:$0xff]  ;;  %v842_v10 = vld [vmem:[%s1749_s3 + $0x108] sm:$0xff]  ;;  %v861_v11 = vld [vmem:[%s1749_s3 + $0x1a0] sm:$0xff] }
  0x15   :  { %44 = vst [vmem:[#allocation2 + $0x98] sm:$0x3] %v989_v2  ;;  %275 = vmatpush.msra.mxu2 %v847_v37  ;;  %347 = vmatpush.msra.mxu3 %v865_v44  ;;  %v1214_v3 = vsel %vm82_vm3, %v74_v53, %v90_v58  ;;  %v70_v6 = vadd.f32 %v1081_v15, %v59_v63  ;;  %v49_v13 = vld [vmem:[%s1750_s0 + $0x10] sm:$0xff]  ;;  %v841_v20 = vld [vmem:[%s1749_s3 + $0x100] sm:$0xff]  ;;  %v860_v22 = vld [vmem:[%s1749_s3 + $0x198] sm:$0xff] }
  0x16   :  { %963 = vmatpush.msra.mxu1 %v830_v36  ;;  %169 = vmatpush.msra.mxu0 %v830_v36  ;;  %106 = vst [vmem:[#allocation2 + $0x51] sm:$0xff] %v1161_v43  ;;  %v75_v9 = vadd.f32 %v1081_v15, %v64_v4  ;;  %v132_v16 = vld [vmem:[%s1749_s3 + $0x70] sm:$0xff]  ;;  %v60_v19 = vmul.f32 %v1076_v14, %v49_v13  ;;  %v131_v23 = vld [vmem:[%s1749_s3 + $0x68] sm:$0xff]  ;;  %v130_v29 = vld [vmem:[%s1749_s3 + $0x60] sm:$0xff] }
  0x17   :  { %276 = vmatpush.msra.mxu2 %v846_v42  ;;  %348 = vmatpush.msra.mxu3 %v864_v51  ;;  %102 = vst [vmem:[#allocation2 + $0x11] sm:$0xff] %v1201_v61  ;;  %vm78_vm4 = vcmp.ge.f32.partialorder %v70_v6, 0.0  ;;  %v86_v12 = vmul.f32 0.2, %v70_v6  ;;  %v887_v17 = vld [vmem:[%s1749_s3 + $0x270] sm:$0xff]  ;;  %v886_v24 = vld [vmem:[%s1749_s3 + $0x268] sm:$0xff] }
  0x18   :  { %964 = vmatpush.msra.mxu1 %v829_v40  ;;  %170 = vmatpush.msra.mxu0 %v829_v40  ;;  %107 = vst [vmem:[#allocation2 + $0x61] sm:$0xff] %v1214_v3  ;;  %vm83_vm5 = vcmp.ge.f32.partialorder %v75_v9, 0.0  ;;  %v91_v18 = vmul.f32 0.2, %v75_v9  ;;  %v71_v26 = vadd.f32 %v1081_v15, %v60_v19  ;;  %v241_v27 = vld [vmem:[#allocation2 + $0x2] sm:$0xff]  ;;  %v859_v28 = vld [vmem:[%s1749_s3 + $0x190] sm:$0xff] }
  0x19   :  { %277 = vmatpush.msra.mxu2 %v845_v49  ;;  %349 = vmatpush.msra.mxu3 %v863_v56  ;;  %v1246_v21 = vsel %vm78_vm4, %v70_v6, %v86_v12  ;;  %v885_v30 = vld [vmem:[%s1749_s3 + $0x260] sm:$0xff]  ;;  %v129_v33 = vld [vmem:[%s1749_s3 + $0x58] sm:$0xff]  ;;  %v858_v37 = vld [vmem:[%s1749_s3 + $0x188] sm:$0xff] }
  0x1a   :  { %965 = vmatpush.msra.mxu1 %v828_v47  ;;  %171 = vmatpush.msra.mxu0 %v828_v47  ;;  %103 = vst [vmem:[#allocation2 + $0x21] sm:$0xff] %v1246_v21  ;;  %v1258_v25 = vsel %vm83_vm5, %v75_v9, %v91_v18  ;;  %vm79_vm6 = vcmp.ge.f32.partialorder %v71_v26, 0.0  ;;  %v87_v31 = vmul.f32 0.2, %v71_v26  ;;  %v884_v34 = vld [vmem:[%s1749_s3 + $0x258] sm:$0xff]  ;;  %v128_v38 = vld [vmem:[%s1749_s3 + $0x50] sm:$0xff] }
  0x1b   :  { %278 = vmatpush.msra.mxu2 %v844_v54  ;;  %350 = vmatpush.msra.mxu3 %v862_v62  ;;  %108 = vst [vmem:[#allocation2 + $0x71] sm:$0xff] %v1258_v25  ;;  %v920_v36 = vld [vmem:[%s1749_s3 + $0x378] sm:$0xff]  ;;  %v883_v39 = vld [vmem:[%s1749_s3 + $0x250] sm:$0xff]  ;;  %v857_v41 = vld [vmem:[%s1749_s3 + $0x180] sm:$0xff] }
  0x1c   :  { %966 = vmatpush.msra.mxu1 %v827_v52  ;;  %172 = vmatpush.msra.mxu0 %v827_v52  ;;  %v1277_v35 = vsel %vm79_vm6, %v71_v26, %v87_v31  ;;  %v919_v40 = vld [vmem:[%s1749_s3 + $0x370] sm:$0xff]  ;;  %v127_v42 = vld [vmem:[%s1749_s3 + $0x48] sm:$0xff]  ;;  %v126_v47 = vld [vmem:[%s1749_s3 + $0x40] sm:$0xff] }
  0x1d   :  { %279 = vmatpush.msra.mxu2 %v843_v60  ;;  %351 = vmatpush.msra.mxu3 %v861_v11  ;;  %104 = vst [vmem:[#allocation2 + $0x31] sm:$0xff] %v1277_v35  ;;  %v882_v44 = vld [vmem:[%s1749_s3 + $0x248] sm:$0xff]  ;;  %v881_v48 = vld [vmem:[%s1749_s3 + $0x240] sm:$0xff]  ;;  %v125_v49 = vld [vmem:[%s1749_s3 + $0x38] sm:$0xff] }
  0x1e   :  { %967 = vmatpush.msra.mxu1 %v826_v57  ;;  %173 = vmatpush.msra.mxu0 %v826_v57  ;;  %v1306_v45 = vld [vmem:[#allocation2 + $0x12] sm:$0xff]  ;;  %v918_v51 = vld [vmem:[%s1749_s3 + $0x368] sm:$0xff]  ;;  %v917_v55 = vld [vmem:[%s1749_s3 + $0x360] sm:$0xff] }
  0x1f   :  { %280 = vmatpush.msra.mxu2 %v842_v10  ;;  %352 = vmatpush.msra.mxu3 %v860_v22  ;;  %v1308_v46 = vld [vmem:[#allocation2 + $0x10] sm:$0xff]  ;;  %v880_v50 = vld [vmem:[%s1749_s3 + $0x238] sm:$0xff]  ;;  %v123_v57 = vld [vmem:[%s1749_s3 + $0x28] sm:$0xff] }
  0x20   :  { %968 = vmatpush.msra.mxu1 %v825_v1  ;;  %174 = vmatpush.msra.mxu0 %v825_v1  ;;  %v936_v52 = vld [vmem:[%s1749_s3 + $0x3f8] sm:$0xff]  ;;  %v124_v53 = vld [vmem:[%s1749_s3 + $0x30] sm:$0xff]  ;;  %v878_v58 = vld [vmem:[%s1749_s3 + $0x228] sm:$0xff] }
  0x21   :  { %187 = vmatmul.f32.vlgmr.msra.gmra.mxu1 %v1130_v32  ;;  %175 = vmatmul.f32.vlgmr.msra.gmra.mxu0 %v134_v5  ;;  %v879_v54 = vld [vmem:[%s1749_s3 + $0x230] sm:$0xff]  ;;  %v1350_v59 = vld [vmem:[#allocation2 + $0x22] sm:$0xff]  ;;  %v121_v0 = vld [vmem:[%s1749_s3 + $0x18] sm:$0xff] }
  0x22   :  { %200 = vmatpush.msrb.mxu1 %v133_v7  ;;  %414 = vmatpush.msrb.mxu0 %v888_v8  ;;  %v935_v56 = vld [vmem:[%s1749_s3 + $0x3f0] sm:$0xff]  ;;  %v1352_v60 = vld [vmem:[#allocation2 + $0x20] sm:$0xff]  ;;  %v876_v1 = vld [vmem:[%s1749_s3 + $0x218] sm:$0xff] }
  0x23   :  { %281 = vmatpush.msra.mxu2 %v841_v20  ;;  %353 = vmatpush.msra.mxu3 %v859_v28  ;;  %v122_v62 = vld [vmem:[%s1749_s3 + $0x20] sm:$0xff]  ;;  %v916_v4 = vld [vmem:[%s1749_s3 + $0x358] sm:$0xff]  ;;  %v934_v5 = vld [vmem:[%s1749_s3 + $0x3e8] sm:$0xff] }
  0x24   :  { %201 = vmatpush.msrb.mxu1 %v132_v16  ;;  %415 = vmatpush.msrb.mxu0 %v887_v17  ;;  %v877_v63 = vld [vmem:[%s1749_s3 + $0x220] sm:$0xff]  ;;  %v120_v6 = vld [vmem:[%s1749_s3 + $0x10] sm:$0xff]  ;;  %v119_v10 = vld [vmem:[%s1749_s3 + $0x8] sm:$0xff] }
  0x25   :  { %282 = vmatmul.f32.vlgmr.msra.gmra.mxu2 %v241_v27  ;;  %354 = vmatpush.msra.mxu3 %v858_v37  ;;  %v875_v7 = vld [vmem:[%s1749_s3 + $0x210] sm:$0xff]  ;;  %v933_v9 = vld [vmem:[%s1749_s3 + $0x3e0] sm:$0xff]  ;;  %v874_v11 = vld [vmem:[%s1749_s3 + $0x208] sm:$0xff] }
  0x26   :  { %202 = vmatpush.msrb.mxu1 %v131_v23  ;;  %416 = vmatpush.msrb.mxu0 %v886_v24  ;;  %v915_v8 = vld [vmem:[%s1749_s3 + $0x350] sm:$0xff]  ;;  %v118_v16 = vld [vmem:[%s1749_s3] sm:$0xff]  ;;  %v904_v18 = vld [vmem:[%s1749_s3 + $0x2f8] sm:$0xff] }
  0x27   :  { %563 = vmatpush.msrb.mxu2 %v920_v36  ;;  %355 = vmatpush.msra.mxu3 %v857_v41  ;;  %v1394_v12 = vld [vmem:[#allocation2 + $0x32] sm:$0xff]  ;;  %v873_v17 = vld [vmem:[%s1749_s3 + $0x200] sm:$0xff]  ;;  %v914_v19 = vld [vmem:[%s1749_s3 + $0x348] sm:$0xff] }
  0x28   :  { %203 = vmatpush.msrb.mxu1 %v130_v29  ;;  %417 = vmatpush.msrb.mxu0 %v885_v30  ;;  %v1396_v13 = vld [vmem:[#allocation2 + $0x30] sm:$0xff]  ;;  %v932_v20 = vld [vmem:[%s1749_s3 + $0x3d8] sm:$0xff]  ;;  %v913_v24 = vld [vmem:[%s1749_s3 + $0x340] sm:$0xff] }
  0x29   :  { %190 = vmatmul.f32.gmra.mxu1 %v1161_v43  ;;  %178 = vmatmul.f32.gmra.mxu0 %v1201_v61  ;;  %v1418_v22 = vld [vmem:[%s1749_s3 + $0x478] sm:$0xff]  ;;  %v903_v23 = vld [vmem:[%s1749_s3 + $0x2f0] sm:$0xff]  ;;  %v902_v28 = vld [vmem:[%s1749_s3 + $0x2e8] sm:$0xff] }
  0x2a   :  { %204 = vmatpush.msrb.mxu1 %v129_v33  ;;  %418 = vmatpush.msrb.mxu0 %v884_v34  ;;  %v931_v26 = vld [vmem:[%s1749_s3 + $0x3d0] sm:$0xff]  ;;  %v1443_v29 = vld [vmem:[#allocation2 + $0x42] sm:$0xff]  ;;  %v900_v34 = vld [vmem:[%s1749_s3 + $0x2d8] sm:$0xff] }
  0x2b   :  { %564 = vmatpush.msrb.mxu2 %v919_v40  ;;  %356 = vmatmul.f32.vlgmr.msra.gmra.mxu3 %v1308_v46  ;;  %v1434_v27 = vld [vmem:[%s1749_s3 + $0x470] sm:$0xff]  ;;  %v1445_v30 = vld [vmem:[#allocation2 + $0x40] sm:$0xff]  ;;  %v930_v36 = vld [vmem:[%s1749_s3 + $0x3c8] sm:$0xff] }
  0x2c   :  { %205 = vmatpush.msrb.mxu1 %v128_v38  ;;  %419 = vmatpush.msrb.mxu0 %v883_v39  ;;  %v901_v31 = vld [vmem:[%s1749_s3 + $0x2e0] sm:$0xff]  ;;  %v911_v33 = vld [vmem:[%s1749_s3 + $0x330] sm:$0xff]  ;;  %v54_v37 = vld [vmem:[%s1750_s0 + $0x38] sm:$0xff] }
  0x2d   :  { %285 = vmatmul.f32.gmra.mxu2 %v1306_v45  ;;  %637 = vmatpush.msrb.mxu3 %v936_v52  ;;  %v910_v38 = vld [vmem:[%s1749_s3 + $0x328] sm:$0xff]  ;;  %v65_v40 = vmul.f32 %v1076_v14, %v54_v37  ;;  %v899_v41 = vld [vmem:[%s1749_s3 + $0x2d0] sm:$0xff]  ;;  %v1488_v14 = vld [vmem:[%s1749_s3 + $0x460] sm:$0xff] }
  0x2e   :  { %206 = vmatpush.msrb.mxu1 %v127_v42  ;;  %420 = vmatpush.msrb.mxu0 %v882_v44  ;;  %v1471_v39 = vld [vmem:[%s1749_s3 + $0x468] sm:$0xff]  ;;  %v929_v42 = vld [vmem:[%s1749_s3 + $0x3c0] sm:$0xff]  ;;  %v908_v52 = vld [vmem:[%s1749_s3 + $0x318] sm:$0xff] }
  0x2f   :  { %565 = vmatpush.msrb.mxu2 %v918_v51  ;;  %638 = vmatpush.msrb.mxu3 %v935_v56  ;;  %v909_v44 = vld [vmem:[%s1749_s3 + $0x320] sm:$0xff]  ;;  %v1523_v56 = vld [vmem:[%s1749_s3 + $0x458] sm:$0xff]  ;;  %v938_v37 = vld [vmem:[%s1749_s3 + $0x408] sm:$0xff] }
  0x30   :  { %207 = vmatpush.msrb.mxu1 %v126_v47  ;;  %421 = vmatpush.msrb.mxu0 %v881_v48  ;;  %v898_v47 = vld [vmem:[%s1749_s3 + $0x2c8] sm:$0xff]  ;;  %v928_v48 = vld [vmem:[%s1749_s3 + $0x3b8] sm:$0xff] }
  0x31   :  { %193 = vmatmul.f32.gmra.mxu1 %v1214_v3  ;;  %181 = vmatmul.f32.gmra.mxu0 %v1246_v21 }
  0x32   :  { %208 = vmatpush.msrb.mxu1 %v125_v49  ;;  %422 = vmatpush.msrb.mxu0 %v880_v50  ;;  %v1498_v49 = vld [vmem:[#allocation2 + $0x52] sm:$0xff] }
  0x33   :  { %566 = vmatpush.msrb.mxu2 %v917_v55  ;;  %359 = vmatmul.f32.gmra.mxu3 %v1352_v60  ;;  %v1500_v50 = vld [vmem:[#allocation2 + $0x50] sm:$0xff] }
  0x34   :  { %209 = vmatpush.msrb.mxu1 %v124_v53  ;;  %423 = vmatpush.msrb.mxu0 %v879_v54  ;;  %v896_v54 = vld [vmem:[%s1749_s3 + $0x2b8] sm:$0xff]  ;;  %v927_v55 = vld [vmem:[%s1749_s3 + $0x3b0] sm:$0xff] }
  0x35   :  { %288 = vmatmul.f32.gmra.mxu2 %v1350_v59  ;;  %639 = vmatpush.msrb.mxu3 %v934_v5  ;;  %v1551_v5 = vld [vmem:[#allocation2 + $0x62] sm:$0xff] }
  0x36   :  { %210 = vmatpush.msrb.mxu1 %v123_v57  ;;  %424 = vmatpush.msrb.mxu0 %v878_v58  ;;  %v907_v57 = vld [vmem:[%s1749_s3 + $0x310] sm:$0xff] }
  0x37   :  { %567 = vmatpush.msrb.mxu2 %v916_v4  ;;  %640 = vmatpush.msrb.mxu3 %v933_v9  ;;  %v895_v58 = vld [vmem:[%s1749_s3 + $0x2b0] sm:$0xff]  ;;  %v925_v4 = vld [vmem:[%s1749_s3 + $0x3a0] sm:$0xff] }
  0x38   :  { %211 = vmatpush.msrb.mxu1 %v122_v62  ;;  %425 = vmatpush.msrb.mxu0 %v877_v63  ;;  %v926_v62 = vld [vmem:[%s1749_s3 + $0x3a8] sm:$0xff]  ;;  %v1539_v63 = vld [vmem:[%s1749_s3 + $0x450] sm:$0xff]  ;;  %v905_v9 = vld [vmem:[%s1749_s3 + $0x300] sm:$0xff] }
  0x39   :  { %196 = vmatmul.f32.gmra.mxu1 %v1258_v25  ;;  %184 = vmatmul.f32.gmra.mxu0 %v1277_v35 }
  0x3a   :  { %212 = vmatpush.msrb.mxu1 %v121_v0  ;;  %426 = vmatpush.msrb.mxu0 %v876_v1  ;;  %v906_v0 = vld [vmem:[%s1749_s3 + $0x308] sm:$0xff] }
  0x3b   :  { %568 = vmatpush.msrb.mxu2 %v915_v8  ;;  %362 = vmatmul.f32.gmra.mxu3 %v1396_v13  ;;  %v894_v1 = vld [vmem:[%s1749_s3 + $0x2a8] sm:$0xff]  ;;  %v893_v8 = vld [vmem:[%s1749_s3 + $0x2a0] sm:$0xff] }
  0x3c   :  { %213 = vmatpush.msrb.mxu1 %v120_v6  ;;  %427 = vmatpush.msrb.mxu0 %v875_v7  ;;  %v1553_v6 = vld [vmem:[#allocation2 + $0x60] sm:$0xff]  ;;  %v946_v7 = vld [vmem:[%s1749_s3 + $0x448] sm:$0xff] }
  0x3d   :  { %291 = vmatmul.f32.gmra.mxu2 %v1394_v12  ;;  %641 = vmatpush.msrb.mxu3 %v932_v20  ;;  %v922_v20 = vld [vmem:[%s1749_s3 + $0x388] sm:$0xff] }
  0x3e   :  { %214 = vmatpush.msrb.mxu1 %v119_v10  ;;  %428 = vmatpush.msrb.mxu0 %v874_v11  ;;  %v924_v10 = vld [vmem:[%s1749_s3 + $0x398] sm:$0xff]  ;;  %v945_v11 = vld [vmem:[%s1749_s3 + $0x440] sm:$0xff] }
  0x3f   :  { %569 = vmatpush.msrb.mxu2 %v914_v19  ;;  %642 = vmatpush.msrb.mxu3 %v931_v26  ;;  %v891_v19 = vld [vmem:[%s1749_s3 + $0x290] sm:$0xff] }
  0x40   :  { %215 = vmatpush.msrb.mxu1 %v118_v16  ;;  %429 = vmatpush.msrb.mxu0 %v873_v17  ;;  %v892_v16 = vld [vmem:[%s1749_s3 + $0x298] sm:$0xff]  ;;  %v923_v17 = vld [vmem:[%s1749_s3 + $0x390] sm:$0xff] }
  0x41   :  { %216 = vmatmul.f32.vlgmr.msrb.gmra.mxu1 %v989_v2  ;;  %430 = vmatmul.f32.vlgmr.msrb.gmra.mxu0 %v1201_v61  ;;  %v912_v61 = vld [vmem:[%s1749_s3 + $0x338] sm:$0xff]  ;;  %v943_v26 = vld [vmem:[%s1749_s3 + $0x430] sm:$0xff] }
  0x42   :  { %488 = vmatpush.msra.mxu1 %v904_v18  ;;  %711 = vmatpush.msra.mxu0 %v1418_v22  ;;  %v944_v18 = vld [vmem:[%s1749_s3 + $0x438] sm:$0xff] }
  0x43   :  { %570 = vmatpush.msrb.mxu2 %v913_v24  ;;  %365 = vmatmul.f32.gmra.mxu3 %v1445_v30  ;;  %v1592_v24 = vld [vmem:[#allocation2 + $0x70] sm:$0xff] }
  0x44   :  { %489 = vmatpush.msra.mxu1 %v903_v23  ;;  %712 = vmatpush.msra.mxu0 %v1434_v27  ;;  %v1590_v23 = vld [vmem:[#allocation2 + $0x72] sm:$0xff] }
  0x45   :  { %571 = vmatpush.msrb.mxu2 %v912_v61  ;;  %643 = vmatpush.msrb.mxu3 %v930_v36  ;;  %v942_v61 = vld [vmem:[%s1749_s3 + $0x428] sm:$0xff]  ;;  %v939_v36 = vld [vmem:[%s1749_s3 + $0x410] sm:$0xff] }
  0x46   :  { %490 = vmatpush.msra.mxu1 %v902_v28  ;;  %294 = vmatmul.f32.gmra.mxu2 %v1443_v29  ;;  %v890_v28 = vld [vmem:[%s1749_s3 + $0x288] sm:$0xff] }
  0x47   :  { %572 = vmatpush.msrb.mxu2 %v911_v33  ;;  %713 = vmatpush.msra.mxu0 %v1471_v39 }
  0x48   :  { %491 = vmatpush.msra.mxu1 %v901_v31  ;;  %644 = vmatpush.msrb.mxu3 %v929_v42  ;;  %v889_v31 = vld [vmem:[%s1749_s3 + $0x280] sm:$0xff] }
  0x49   :  { %219 = vmatmul.f32.gmra.mxu1 %v1308_v46  ;;  %433 = vmatmul.f32.gmra.mxu0 %v1246_v21  ;;  %v76_v46 = vadd.f32 %v1081_v15, %v65_v40  ;;  %v897_v15 = vld [vmem:[%s1749_s3 + $0x2c0] sm:$0xff] }
  0x4a   :  { %492 = vmatpush.msra.mxu1 %v900_v34  ;;  %573 = vmatpush.msrb.mxu2 %v910_v38  ;;  %v940_v34 = vld [vmem:[%s1749_s3 + $0x418] sm:$0xff] }
  0x4b   :  { %v92_v51 = vmul.f32 0.2, %v76_v46  ;;  %714 = vmatpush.msra.mxu0 %v1488_v14  ;;  %vm84_vm7 = vcmp.ge.f32.partialorder %v76_v46, 0.0  ;;  %645 = vmatpush.msrb.mxu3 %v928_v48 }
  0x4c   :  { %493 = vmatpush.msra.mxu1 %v899_v41  ;;  %574 = vmatpush.msrb.mxu2 %v909_v44 }
  0x4d   :  { %v1509_v53 = vsel %vm84_vm7, %v76_v46, %v92_v51  ;;  %368 = vmatmul.f32.gmra.mxu3 %v1500_v50  ;;  %715 = vmatpush.msra.mxu0 %v1523_v56 }
  0x4e   :  { %494 = vmatpush.msra.mxu1 %v898_v47  ;;  %297 = vmatmul.f32.gmra.mxu2 %v1498_v49  ;;  %109 = vst [vmem:[#allocation2 + $0x81] sm:$0xff] %v1509_v53 }
  0x4f   :  { %575 = vmatpush.msrb.mxu2 %v908_v52  ;;  %646 = vmatpush.msrb.mxu3 %v927_v55 }
  0x50   :  { %495 = vmatpush.msra.mxu1 %v897_v15  ;;  %716 = vmatpush.msra.mxu0 %v1539_v63 }
  0x51   :  { %222 = vmatmul.f32.gmra.mxu1 %v1352_v60  ;;  %436 = vmatmul.f32.gmra.mxu0 %v1277_v35 }
  0x52   :  { %496 = vmatpush.msra.mxu1 %v896_v54  ;;  %576 = vmatpush.msrb.mxu2 %v907_v57 }
  0x53   :  { %647 = vmatpush.msrb.mxu3 %v926_v62  ;;  %717 = vmatpush.msra.mxu0 %v946_v7 }
  0x54   :  { %497 = vmatpush.msra.mxu1 %v895_v58  ;;  %577 = vmatpush.msrb.mxu2 %v906_v0 }
  0x55   :  { %648 = vmatpush.msrb.mxu3 %v925_v4  ;;  %718 = vmatpush.msra.mxu0 %v945_v11  ;;  %v322_v33 = vld [vmem:[#allocation2 + $0x80] sm:$0xff] }
  0x56   :  { %498 = vmatpush.msra.mxu1 %v894_v1  ;;  %300 = vmatmul.f32.gmra.mxu2 %v1551_v5 }
  0x57   :  { %371 = vmatmul.f32.gmra.mxu3 %v1553_v6  ;;  %578 = vmatpush.msrb.mxu2 %v905_v9 }
  0x58   :  { %499 = vmatpush.msra.mxu1 %v893_v8  ;;  %649 = vmatpush.msrb.mxu3 %v924_v10 }
  0x59   :  { %225 = vmatmul.f32.gmra.mxu1 %v1396_v13  ;;  %439 = vmatmul.f32.gmra.mxu0 %v1130_v32 }
  0x5a   :  { %500 = vmatpush.msra.mxu1 %v892_v16  ;;  %969 = vmatpush.msra.mxu2 %v1418_v22  ;;  %v921_v22 = vld [vmem:[%s1749_s3 + $0x380] sm:$0xff] }
  0x5b   :  { %650 = vmatpush.msrb.mxu3 %v923_v17  ;;  %719 = vmatpush.msra.mxu0 %v944_v18 }
  0x5c   :  { %501 = vmatpush.msra.mxu1 %v891_v19  ;;  %970 = vmatpush.msra.mxu2 %v1434_v27  ;;  %v941_v27 = vld [vmem:[%s1749_s3 + $0x420] sm:$0xff] }
  0x5d   :  { %651 = vmatpush.msrb.mxu3 %v922_v20  ;;  %720 = vmatpush.msra.mxu0 %v943_v26 }
  0x5e   :  { %303 = vmatmul.f32.gmra.mxu2 %v1590_v23  ;;  %502 = vmatpush.msra.mxu1 %v890_v28 }
  0x5f   :  { %374 = vmatmul.f32.gmra.mxu3 %v1592_v24  ;;  %971 = vmatpush.msra.mxu2 %v1471_v39 }
  0x60   :  { %652 = vmatpush.msrb.mxu3 %v921_v22  ;;  %721 = vmatpush.msra.mxu0 %v942_v61 }
  0x61   :  { %228 = vmatmul.f32.gmra.mxu1 %v1445_v30  ;;  %442 = vmatmul.f32.gmra.mxu0 %v1161_v43 }
  0x62   :  { %503 = vmatpush.msra.mxu1 %v889_v31  ;;  %972 = vmatpush.msra.mxu2 %v1488_v14 }
  0x63   :  { %722 = vmatpush.msra.mxu0 %v941_v27 }
  0x64   :  { %973 = vmatpush.msra.mxu2 %v1523_v56 }
  0x65   :  { %723 = vmatpush.msra.mxu0 %v940_v34 }
  0x66   :  { %579 = vmatmul.f32.vlgmr.msrb.gmra.mxu2 %v1352_v60  ;;  %v937_v60 = vld [vmem:[%s1749_s3 + $0x400] sm:$0xff] }
  0x67   :  { %377 = vmatmul.f32.gmra.mxu3 %v322_v33  ;;  %974 = vmatpush.msra.mxu2 %v1539_v63 }
  0x68   :  { %724 = vmatpush.msra.mxu0 %v939_v36 }
  0x69   :  { %231 = vmatmul.f32.gmra.mxu1 %v1500_v50  ;;  %445 = vmatmul.f32.gmra.mxu0 %v1214_v3 }
  0x6a   :  { %975 = vmatpush.msra.mxu2 %v946_v7  ;;  %725 = vmatpush.msra.mxu0 %v938_v37 }
  0x6c   :  { %976 = vmatpush.msra.mxu2 %v945_v11  ;;  %726 = vmatpush.msra.mxu0 %v937_v60 }
  0x6e   :  { %977 = vmatpush.msra.mxu2 %v944_v18 }
  0x6f   :  { %582 = vmatmul.f32.gmra.mxu2 %v1396_v13  ;;  %653 = vmatmul.f32.vlgmr.msrb.gmra.mxu3 %v1246_v21  ;;  %v619_v21 = vld [vmem:[#allocation2 + $0x91] sm:$0xff] }
  0x70   :  { %978 = vmatpush.msra.mxu2 %v943_v26 }
  0x71   :  { %234 = vmatmul.f32.gmra.mxu1 %v1553_v6  ;;  %448 = vmatmul.f32.gmra.mxu0 %v1258_v25 }
  0x72   :  { %979 = vmatpush.msra.mxu2 %v942_v61 }
  0x74   :  { %980 = vmatpush.msra.mxu2 %v941_v27 }
  0x76   :  { %981 = vmatpush.msra.mxu2 %v940_v34 }
  0x77   :  { %585 = vmatmul.f32.gmra.mxu2 %v1445_v30  ;;  %656 = vmatmul.f32.gmra.mxu3 %v1277_v35 }
  0x78   :  { %982 = vmatpush.msra.mxu2 %v939_v36 }
  0x79   :  { %237 = vmatmul.f32.gmra.mxu1 %v1592_v24  ;;  %451 = vmatmul.f32.gmra.mxu0 %v1509_v53 }
  0x7a   :  { %983 = vmatpush.msra.mxu2 %v938_v37 }
  0x7c   :  { %984 = vmatpush.msra.mxu2 %v937_v60 }
  0x7f   :  { %588 = vmatmul.f32.gmra.mxu2 %v1500_v50  ;;  %659 = vmatmul.f32.gmra.mxu3 %v1130_v32 }
  0x81   :  { %504 = vmatmul.f32.vlgmr.msra.gmra.mxu1 %v1306_v45  ;;  %727 = vmatmul.f32.vlgmr.msra.gmra.mxu0 %v1350_v59 }
  0x87   :  { %591 = vmatmul.f32.gmra.mxu2 %v1553_v6  ;;  %662 = vmatmul.f32.gmra.mxu3 %v1161_v43 }
  0x89   :  { %507 = vmatmul.f32.gmra.mxu1 %v1350_v59  ;;  %730 = vmatmul.f32.gmra.mxu0 %v1394_v12  ;;  %v693_v59 = vld [vmem:[#allocation2 + $0x92] sm:$0xff] }
  0x8f   :  { %594 = vmatmul.f32.gmra.mxu2 %v1592_v24  ;;  %665 = vmatmul.f32.gmra.mxu3 %v1214_v3  ;;  %v692_v3 = vld [vmem:[#allocation2 + $0x82] sm:$0xff] }
  0x91   :  { %510 = vmatmul.f32.gmra.mxu1 %v1394_v12  ;;  %733 = vmatmul.f32.gmra.mxu0 %v1443_v29 }
  0x97   :  { %597 = vmatmul.f32.gmra.mxu2 %v322_v33  ;;  %668 = vmatmul.f32.gmra.mxu3 %v1258_v25 }
  0x99   :  { %513 = vmatmul.f32.gmra.mxu1 %v1443_v29  ;;  %736 = vmatmul.f32.gmra.mxu0 %v1498_v49 }
  0x9e   :  { %v188_v32 = vpop.f32.mrf.mxu1  ;;  %v176_v43 = vpop.f32.mrf.mxu0 }
  0x9f   :  { %600 = vmatmul.f32.gmra.mxu2 %v989_v2  ;;  %671 = vmatmul.f32.gmra.mxu3 %v1509_v53 }
  0xa1   :  { %516 = vmatmul.f32.gmra.mxu1 %v1498_v49  ;;  %739 = vmatmul.f32.gmra.mxu0 %v1551_v5 }
  0xa6   :  { %v191_v35 = vpop.f32.mrf.mxu1  ;;  %v179_v45 = vpop.f32.mrf.mxu0 }
  0xa7   :  { %745 = vmatmul.f32.vlgmr.msra.gmra.mxu2 %v692_v3  ;;  %674 = vmatmul.f32.gmra.mxu3 %v619_v21 }
  0xa8   :  { %v283_v25 = vpop.f32.mrf.mxu2 }
  0xa9   :  { %519 = vmatmul.f32.gmra.mxu1 %v1551_v5  ;;  %742 = vmatmul.f32.gmra.mxu0 %v1590_v23 }
  0xae   :  { %v194_v12 = vpop.f32.mrf.mxu1  ;;  %v182_v2 = vpop.f32.mrf.mxu0 }
  0xaf   :  { %748 = vmatmul.f32.gmra.mxu2 %v693_v59  ;;  %v357_v29 = vpop.f32.mrf.mxu3 }
  0xb0   :  { %v286_v13 = vpop.f32.mrf.mxu2 }
  0xb1   :  { %522 = vmatmul.f32.gmra.mxu1 %v1590_v23 }
  0xb6   :  { %v197_v30 = vpop.f32.mrf.mxu1  ;;  %v185_v38 = vpop.f32.mrf.mxu0 }
  0xb7   :  { %v360_v40 = vpop.f32.mrf.mxu3 }
  0xb8   :  { %v289_v39 = vpop.f32.mrf.mxu2 }
  0xb9   :  { %525 = vmatmul.f32.gmra.mxu1 %v692_v3 }
  0xbe   :  { %v217_v41 = vpop.f32.mrf.mxu1  ;;  %v431_v42 = vpop.f32.mrf.mxu0 }
  0xbf   :  { %v218_v44 = vadd.f32 %v217_v41, %v176_v43  ;;  %v363_v47 = vpop.f32.mrf.mxu3 }
  0xc0   :  { %v292_v46 = vpop.f32.mrf.mxu2 }
  0xc1   :  { %v307_v14 = vadd.f32 %v283_v25, %v218_v44 }
  0xc3   :  { %v381_v36 = vadd.f32 %v357_v29, %v307_v14 }
  0xc5   :  { %v455_v43 = vadd.f32 %v431_v42, %v381_v36 }
  0xc6   :  { %v220_v48 = vpop.f32.mrf.mxu1  ;;  %v434_v49 = vpop.f32.mrf.mxu0 }
  0xc7   :  { %v221_v50 = vadd.f32 %v220_v48, %v179_v45  ;;  %v1667_v52 = vpop.f32.mrf.mxu3 }
  0xc9   :  { %v308_v51 = vadd.f32 %v286_v13, %v221_v50  ;;  %v295_v15 = vpop.f32.mrf.mxu2 }
  0xcb   :  { %v382_v45 = vadd.f32 %v360_v40, %v308_v51 }
  0xcd   :  { %v456_v13 = vadd.f32 %v434_v49, %v382_v45 }
  0xce   :  { %v223_v53 = vpop.f32.mrf.mxu1  ;;  %v437_v54 = vpop.f32.mrf.mxu0 }
  0xcf   :  { %v224_v55 = vadd.f32 %v223_v53, %v182_v2  ;;  %v1698_v2 = vld [vmem:[%s1753_s4] ss:$0 sm:$0xff] }
  0xd0   :  { %v1669_v58 = vpop.f32.mrf.mxu3 }
  0xd1   :  { %v309_v56 = vadd.f32 %v289_v39, %v224_v55  ;;  %v298_v57 = vpop.f32.mrf.mxu2 }
  0xd3   :  { %v383_v44 = vadd.f32 %v363_v47, %v309_v56 }
  0xd5   :  { %v457_v48 = vadd.f32 %v437_v54, %v383_v44 }
  0xd6   :  { %v226_v62 = vpop.f32.mrf.mxu1  ;;  %v1671_v63 = vpop.f32.mrf.mxu0 }
  0xd7   :  { %v227_v0 = vadd.f32 %v226_v62, %v185_v38 }
  0xd9   :  { %v310_v1 = vadd.f32 %v292_v46, %v227_v0  ;;  %v301_v4 = vpop.f32.mrf.mxu2 }
  0xda   :  { %v1673_v5 = vpop.f32.mrf.mxu3 }
  0xdb   :  { %v384_v55 = vadd.f32 %v1667_v52, %v310_v1 }
  0xde   :  { %v229_v6 = vpop.f32.mrf.mxu1  ;;  %v1675_v7 = vpop.f32.mrf.mxu0 }
  0xdf   :  { %v230_v8 = vadd.f32 %v229_v6, %v188_v32 }
  0xe1   :  { %v1677_v9 = vadd.f32 %v295_v15, %v230_v8  ;;  %v304_v10 = vpop.f32.mrf.mxu2  ;;  %v458_v8 = vadd.f32 %v1671_v63, %v384_v55 }
  0xe2   :  { %v1679_v11 = vpop.f32.mrf.mxu3 }
  0xe3   :  { %v385_v1 = vadd.f32 %v1669_v58, %v1677_v9 }
  0xe5   :  { %v459_v36 = vadd.f32 %v1675_v7, %v385_v1 }
  0xe6   :  { %v232_v16 = vpop.f32.mrf.mxu1  ;;  %v1681_v17 = vpop.f32.mrf.mxu0 }
  0xe7   :  { %v233_v18 = vadd.f32 %v232_v16, %v191_v35 }
  0xe9   :  { %v1683_v19 = vadd.f32 %v298_v57, %v233_v18  ;;  %v580_v20 = vpop.f32.mrf.mxu2 }
  0xea   :  { %v1685_v23 = vpop.f32.mrf.mxu3 }
  0xeb   :  { %v386_v58 = vadd.f32 %v1673_v5, %v1683_v19 }
  0xed   :  { %v460_v7 = vadd.f32 %v1681_v17, %v386_v58 }
  0xee   :  { %v235_v24 = vpop.f32.mrf.mxu1  ;;  %v1687_v26 = vpop.f32.mrf.mxu0 }
  0xef   :  { %v236_v28 = vadd.f32 %v235_v24, %v194_v12 }
  0xf1   :  { %v1689_v22 = vadd.f32 %v301_v4, %v236_v28 }
  0xf2   :  { %v583_v61 = vpop.f32.mrf.mxu2  ;;  %v654_v31 = vpop.f32.mrf.mxu3 }
  0xf3   :  { %v387_v5 = vadd.f32 %v1679_v11, %v1689_v22 }
  0xf5   :  { %v461_v17 = vadd.f32 %v1687_v26, %v387_v5 }
  0xf6   :  { %v238_v27 = vpop.f32.mrf.mxu1  ;;  %v1691_v33 = vpop.f32.mrf.mxu0 }
  0xf7   :  { %v239_v34 = vadd.f32 %v238_v27, %v197_v30 }
  0xf9   :  { %v1693_v37 = vadd.f32 %v304_v10, %v239_v34 }
  0xfa   :  { %v586_v60 = vpop.f32.mrf.mxu2  ;;  %v657_v32 = vpop.f32.mrf.mxu3 }
  0xfb   :  { %v388_v11 = vadd.f32 %v1685_v23, %v1693_v37 }
  0xfd   :  { %v462_v26 = vadd.f32 %v1691_v33, %v388_v11 }
  0xfe   :  { %v505_v3 = vpop.f32.mrf.mxu1  ;;  %v728_v21 = vpop.f32.mrf.mxu0 }
  0xff   :  { %v529_v35 = vadd.f32 %v505_v3, %v455_v43 }
 0x101   :  { %v604_v25 = vadd.f32 %v580_v20, %v529_v35 }
 0x102   :  { %v589_v59 = vpop.f32.mrf.mxu2  ;;  %v660_v29 = vpop.f32.mrf.mxu3 }
 0x103   :  { %v678_v12 = vadd.f32 %v654_v31, %v604_v25 }
 0x105   :  { %v752_v30 = vadd.f32 %v728_v21, %v678_v12 }
 0x106   :  { %v508_v38 = vpop.f32.mrf.mxu1  ;;  %v731_v39 = vpop.f32.mrf.mxu0 }
 0x107   :  { %v764_v41 = vadd.f32 %v1698_v2, %v752_v30  ;;  %v530_v42 = vadd.f32 %v508_v38, %v456_v13 }
 0x109   :  { %772 = vst [vmem:[%s1754_s5] sm:$0xff] %v764_v41  ;;  %v605_v40 = vadd.f32 %v583_v61, %v530_v42  ;;  %v793_v62 = vmul.f32 %v764_v41, %v764_v41 }
 0x10a   :  { %v592_v14 = vpop.f32.mrf.mxu2  ;;  %v663_v57 = vpop.f32.mrf.mxu3 }
 0x10b   :  { %v679_v46 = vadd.f32 %v657_v32, %v605_v40 }
 0x10d   :  { %v753_v50 = vadd.f32 %v731_v39, %v679_v46 }
 0x10e   :  { %v511_v51 = vpop.f32.mrf.mxu1  ;;  %v734_v15 = vpop.f32.mrf.mxu0 }
 0x10f   :  { %v765_v49 = vadd.f32 %v1698_v2, %v753_v50  ;;  %v531_v53 = vadd.f32 %v511_v51, %v457_v48 }
 0x111   :  { %773 = vst [vmem:[%s1754_s5 + $0x8] sm:$0xff] %v765_v49  ;;  %v780_v47 = vadd.f32 %v765_v49, %v764_v41  ;;  %v794_v56 = vmul.f32 %v765_v49, %v765_v49  ;;  %v606_v0 = vadd.f32 %v586_v60, %v531_v53 }
 0x112   :  { %v595_v4 = vpop.f32.mrf.mxu2  ;;  %v666_v31 = vpop.f32.mrf.mxu3 }
 0x113   :  { %v801_v6 = vadd.f32 %v794_v56, %v793_v62  ;;  %v680_v54 = vadd.f32 %v660_v29, %v606_v0 }
 0x115   :  { %v754_v10 = vadd.f32 %v734_v15, %v680_v54 }
 0x116   :  { %v514_v16 = vpop.f32.mrf.mxu1  ;;  %v737_v18 = vpop.f32.mrf.mxu0 }
 0x117   :  { %v766_v20 = vadd.f32 %v1698_v2, %v754_v10  ;;  %v532_v52 = vadd.f32 %v514_v16, %v458_v8 }
 0x119   :  { %774 = vst [vmem:[%s1754_s5 + $0x10] sm:$0xff] %v766_v20  ;;  %v781_v24 = vadd.f32 %v780_v47, %v766_v20  ;;  %v795_v28 = vmul.f32 %v766_v20, %v766_v20  ;;  %v607_v61 = vadd.f32 %v589_v59, %v532_v52 }
 0x11a   :  { %v598_v63 = vpop.f32.mrf.mxu2  ;;  %v669_v12 = vpop.f32.mrf.mxu3 }
 0x11b   :  { %v802_v27 = vadd.f32 %v801_v6, %v795_v28  ;;  %v681_v34 = vadd.f32 %v663_v57, %v607_v61 }
 0x11d   :  { %v755_v60 = vadd.f32 %v737_v18, %v681_v34 }
 0x11e   :  { %v517_v32 = vpop.f32.mrf.mxu1  ;;  %v740_v21 = vpop.f32.mrf.mxu0 }
 0x11f   :  { %v767_v43 = vadd.f32 %v1698_v2, %v755_v60  ;;  %v533_v3 = vadd.f32 %v517_v32, %v459_v36 }
 0x121   :  { %775 = vst [vmem:[%s1754_s5 + $0x18] sm:$0xff] %v767_v43  ;;  %v782_v9 = vadd.f32 %v781_v24, %v767_v43  ;;  %v796_v35 = vmul.f32 %v767_v43, %v767_v43  ;;  %v608_v45 = vadd.f32 %v592_v14, %v533_v3 }
 0x122   :  { %v601_v29 = vpop.f32.mrf.mxu2  ;;  %v672_v50 = vpop.f32.mrf.mxu3 }
 0x123   :  { %v803_v25 = vadd.f32 %v802_v27, %v796_v35  ;;  %v682_v59 = vadd.f32 %v666_v31, %v608_v45 }
 0x125   :  { %v756_v13 = vadd.f32 %v740_v21, %v682_v59 }
 0x126   :  { %v520_v30 = vpop.f32.mrf.mxu1  ;;  %v743_v44 = vpop.f32.mrf.mxu0 }
 0x127   :  { %v768_v38 = vadd.f32 %v1698_v2, %v756_v13  ;;  %v534_v39 = vadd.f32 %v520_v30, %v460_v7 }
 0x129   :  { %776 = vst [vmem:[%s1754_s5 + $0x20] sm:$0xff] %v768_v38  ;;  %v783_v19 = vadd.f32 %v782_v9, %v768_v38  ;;  %v797_v41 = vmul.f32 %v768_v38, %v768_v38  ;;  %v609_v42 = vadd.f32 %v595_v4, %v534_v39 }
 0x12a   :  { %v746_v49 = vpop.f32.mrf.mxu2  ;;  %v675_v6 = vpop.f32.mrf.mxu3 }
 0x12b   :  { %v804_v40 = vadd.f32 %v803_v25, %v797_v41  ;;  %v683_v14 = vadd.f32 %v669_v12, %v609_v42 }
 0x12d   :  { %v757_v46 = vadd.f32 %v743_v44, %v683_v14 }
 0x12e   :  { %v523_v48 = vpop.f32.mrf.mxu1 }
 0x12f   :  { %v769_v51 = vadd.f32 %v1698_v2, %v757_v46  ;;  %v535_v15 = vadd.f32 %v523_v48, %v461_v17 }
 0x131   :  { %777 = vst [vmem:[%s1754_s5 + $0x28] sm:$0xff] %v769_v51  ;;  %v784_v22 = vadd.f32 %v783_v19, %v769_v51  ;;  %v798_v53 = vmul.f32 %v769_v51, %v769_v51  ;;  %v610_v55 = vadd.f32 %v598_v63, %v535_v15 }
 0x132   :  { %v749_v8 = vpop.f32.mrf.mxu2 }
 0x133   :  { %v805_v57 = vadd.f32 %v804_v40, %v798_v53  ;;  %v684_v62 = vadd.f32 %v672_v50, %v610_v55 }
 0x135   :  { %v758_v47 = vadd.f32 %v746_v49, %v684_v62 }
 0x136   :  { %v526_v56 = vpop.f32.mrf.mxu1 }
 0x137   :  { %v770_v0 = vadd.f32 %v1698_v2, %v758_v47  ;;  %v536_v4 = vadd.f32 %v526_v56, %v462_v26 }
 0x139   :  { %778 = vst [vmem:[%s1754_s5 + $0x30] sm:$0xff] %v770_v0  ;;  %v785_v23 = vadd.f32 %v784_v22, %v770_v0  ;;  %v799_v37 = vmul.f32 %v770_v0, %v770_v0  ;;  %v611_v54 = vadd.f32 %v601_v29, %v536_v4 }
 0x13b   :  { %v806_v10 = vadd.f32 %v805_v57, %v799_v37  ;;  %v685_v16 = vadd.f32 %v675_v6, %v611_v54 }
 0x13d   :  { %v759_v18 = vadd.f32 %v749_v8, %v685_v16 }
 0x13f   :  { %v771_v20 = vadd.f32 %v1698_v2, %v759_v18 }
 0x141   :  { %779 = vst [vmem:[%s1754_s5 + $0x38] sm:$0xff] %v771_v20  ;;  %v786_v33 = vadd.f32 %v785_v23, %v771_v20  ;;  %v800_v52 = vmul.f32 %v771_v20, %v771_v20 }
 0x143   :  { %v787_v1 = vrot.slane %v786_v33, 4  ;;  %v807_v24 = vadd.f32 %v806_v10, %v800_v52 }
 0x145   :  { %v788_v28 = vadd.f32 %v787_v1, %v786_v33  ;;  %v808_v61 = vrot.slane %v807_v24, 4 }
 0x147   :  { %v789_v31 = vrot.slane %v788_v28, 2  ;;  %v809_v27 = vadd.f32 %v808_v61, %v807_v24 }
 0x149   :  { %v790_v34 = vadd.f32 %v789_v31, %v788_v28  ;;  %v810_v63 = vrot.slane %v809_v27, 2 }
 0x14b   :  { %v791_v36 = vrot.slane %v790_v34, 1  ;;  %v811_v60 = vadd.f32 %v810_v63, %v809_v27 }
 0x14d   :  { %v812_v32 = vrot.slane %v811_v60, 1  ;;  %v792_v43 = vadd.f32 %v791_v36, %v790_v34 }
 0x14f   :  { %v813_v2 = vadd.f32 %v812_v32, %v811_v60 }
 0x151   :  { %v815_v3 = vsel %vm814_vm8, %v792_v43, %v813_v2 }
 0x152   :  { %816 = vst [vmem:[%s1755_s6] sm:$0x3] %v815_v3 }

// kernel: generator_big_forward.11
= control target key start
LH: loop header
LB: loop body
LE: loop exit
PB: predicated region body
PF: predicated region fallthrough
CT: control target
= control target key end

     0   :  { %s1874_s21 = smov 0   ;;  %s2807_s0 = inlined_call_operand.vmem [shape: f32[16,16,128], index: 0, kind: input, shape index: {}]   ;;  %s2808_s1 = inlined_call_operand.vmem [shape: f32[1,128], index: 1, kind: input, shape index: {}]   ;;  %s2809_s2 = inlined_call_operand.vmem [shape: f32[1,128], index: 2, kind: input, shape index: {}]   ;;  %s2810_s3 = inlined_call_operand.vmem [shape: f32[3,3,128,128], index: 3, kind: input, shape index: {}]   ;;  %s2811_s4 = inlined_call_operand.vmem [shape: f32[1,128], index: 4, kind: input, shape index: {}]   ;;  %s2812_s5 = inlined_call_operand.vmem [shape: f32[16,16,128], index: 5, kind: output, shape index: {0}]   ;;  %s2813_s6 = inlined_call_operand.vmem [shape: f32[2,2,128], index: 6, kind: output, shape index: {1}]  }
   0x1 LB: > { %s1880_s22 = sadd.s32 4294967295, %s1836_s21   ;;  %p1622_p0 = scmp.ge.s32.totalorder %s1836_s21, 1  ;;  %s1836_s21 = sphi %s1874_s21, %s17_s21  }
   0x2   : > { %p205_p1 = scmp.lt.s32.totalorder %s1836_s21, 3 }
   0x4   : > { %p206_p2 = pnand %p1622_p0, %p205_p1 }
   0x5   : > { %s1885_s23 = sshll.u32 (!%p206_p2), %s1880_s22, 3  ;;  %p242_p3 = scmp.lt.s32.totalorder (!%p206_p2), %s1880_s22, 1 }
   0x6   : > { %209 = sbr.rel (%p206_p2) target bundleno = 561 (0x231), region = 40  ;;  %p236_p4 = scmp.lt.s32.totalorder (!%p206_p2), %s1885_s23, 15 }
   0x7   : > { %s1768_s27 = sshll.u32 (!%p206_p2), %s1880_s22, 7  ;;  %p1629_p5 = scmp.le.s32.totalorder (!%p206_p2), %s1880_s22, 0 }
   0x8   : > { %s1913_s13 = scalar_lea.vmem (!%p206_p2), %s2807_s0, %s1768_s27 }
   0xb   : > { %v1838_v0 = vmov 0.0   ;;  %s243_s24 = scalar_select %p242_p3, %s1880_s22, 1  ;;  %v1920_v1 = vld [vmem:[%s2808_s1] ss:$0 sm:$0xff]  ;;  %v282_v3 = vld [vmem:[%s1913_s13 + $0x8] sm:$0xff]  ;;  %v283_v6 = vld [vmem:[%s1913_s13 + $0x10] sm:$0xff] }
   0xc   : > { %252 = vst [vmem:[#allocation2 + $0x18] sm:$0xff] %v1838_v0  ;;  %s237_s25 = scalar_select %p236_p4, %s1885_s23, 15  ;;  %v281_v2 = vld [vmem:[%s1913_s13] sm:$0xff]  ;;  %v284_v7 = vld [vmem:[%s1913_s13 + $0x18] sm:$0xff]  ;;  %v301_v8 = vmul.f32 %v1920_v1, %v282_v3  ;;  %v286_v10 = vld [vmem:[%s1913_s13 + $0x28] sm:$0xff]  ;;  %v302_v11 = vmul.f32 %v1920_v1, %v283_v6 }
   0xd   : > { %249 = vst [vmem:[#allocation2] sm:$0xff] %v1838_v0  ;;  %s1626_s26 = sshll.u32 %s243_s24, 1  ;;  %v300_v4 = vmul.f32 %v1920_v1, %v281_v2  ;;  %v1932_v5 = vld [vmem:[%s2809_s2] ss:$0 sm:$0xff]  ;;  %v303_v12 = vmul.f32 %v1920_v1, %v284_v7  ;;  %v305_v15 = vmul.f32 %v1920_v1, %v286_v10  ;;  %v287_v16 = vld [vmem:[%s1913_s13 + $0x30] sm:$0xff]  ;;  %v288_v18 = vld [vmem:[%s1913_s13 + $0x38] sm:$0xff] }
   0xe   : > { %250 = vst [vmem:[#allocation2 + $0x8] sm:$0xff] %v1838_v0  ;;  %s1767_s28 = sshll.u32 %s237_s25, 4  ;;  %s1900_s7 = scalar_lea.vmem %s2813_s6, %s1626_s26  ;;  %v285_v9 = vld [vmem:[%s1913_s13 + $0x20] sm:$0xff]  ;;  %v320_v17 = vadd.f32 %v1932_v5, %v301_v8  ;;  %v321_v19 = vadd.f32 %v1932_v5, %v302_v11  ;;  %v306_v23 = vmul.f32 %v1920_v1, %v287_v16  ;;  %v290_v24 = vld [vmem:[%s1913_s13 + $0x48] sm:$0xff]  ;;  %v307_v27 = vmul.f32 %v1920_v1, %v288_v18  ;;  %v291_v28 = vld [vmem:[%s1913_s13 + $0x50] sm:$0xff] }
   0xf   : > { %251 = vst [vmem:[#allocation2 + $0x10] sm:$0x3] %v1838_v0  ;;  %s1906_s10 = scalar_lea.vmem %s2812_s5, %s1767_s28  ;;  %v319_v13 = vadd.f32 %v1932_v5, %v300_v4  ;;  %v304_v14 = vmul.f32 %v1920_v1, %v285_v9  ;;  %v322_v20 = vadd.f32 %v1932_v5, %v303_v12  ;;  %v289_v21 = vld [vmem:[%s1913_s13 + $0x40] sm:$0xff]  ;;  %v324_v26 = vadd.f32 %v1932_v5, %v305_v15  ;;  %v292_v31 = vld [vmem:[%s1913_s13 + $0x58] sm:$0xff]  ;;  %v294_v39 = vld [vmem:[%s1913_s13 + $0x68] sm:$0xff]  ;;  %s1630_s18 = sadd.s32 (!%p1629_p5), 4294967295, %s1885_s23 }
  0x10   : > { %253 = vst [vmem:[#allocation2 + $0x20] sm:$0xff] %v1838_v0  ;;  %vm336_vm1 = vcmp.ge.f32.partialorder %v320_v17, 0.0  ;;  %v352_v29 = vmul.f32 0.2, %v320_v17  ;;  %v308_v30 = vmul.f32 %v1920_v1, %v289_v21  ;;  %vm337_vm2 = vcmp.ge.f32.partialorder %v321_v19, 0.0  ;;  %v293_v34 = vld [vmem:[%s1913_s13 + $0x60] sm:$0xff] }
  0x11   : > { %254 = vst [vmem:[#allocation2 + $0x28] sm:$0x3] %v1838_v0  ;;  %v351_v22 = vmul.f32 0.2, %v319_v13  ;;  %vm335_vm0 = vcmp.ge.f32.partialorder %v319_v13, 0.0  ;;  %v323_v25 = vadd.f32 %v1932_v5, %v304_v14  ;;  %vm338_vm3 = vcmp.ge.f32.partialorder %v322_v20, 0.0 }
  0x12   : > { %255 = vst [vmem:[#allocation2 + $0x30] sm:$0xff] %v1838_v0  ;;  %v353_v32 = vmul.f32 0.2, %v321_v19  ;;  %v309_v33 = vmul.f32 %v1920_v1, %v290_v24  ;;  %v354_v36 = vmul.f32 0.2, %v322_v20  ;;  %v325_v37 = vadd.f32 %v1932_v5, %v306_v23  ;;  %v295_v42 = vld [vmem:[%s1913_s13 + $0x70] sm:$0xff] }
  0x13   : > { %256 = vst [vmem:[#allocation2 + $0x38] sm:$0xff] %v1838_v0  ;;  %v367_v35 = vsel %vm335_vm0, %v319_v13, %v351_v22  ;;  %v310_v38 = vmul.f32 %v1920_v1, %v291_v28  ;;  %vm339_vm4 = vcmp.ge.f32.partialorder %v323_v25, 0.0  ;;  %vm340_vm5 = vcmp.ge.f32.partialorder %v324_v26, 0.0  ;;  %v296_v47 = vld [vmem:[%s1913_s13 + $0x78] sm:$0xff]  ;;  %s1631_s19 = sshll.u32 (!%p1629_p5), %s1630_s18, 4 }
  0x14   : > { %257 = vst [vmem:[#allocation2 + $0x40] sm:$0x3] %v1838_v0  ;;  %v326_v40 = vadd.f32 %v1932_v5, %v307_v27  ;;  %v311_v41 = vmul.f32 %v1920_v1, %v292_v31  ;;  %v368_v43 = vsel %vm336_vm1, %v320_v17, %v352_v29  ;;  %v355_v44 = vmul.f32 0.2, %v323_v25  ;;  %s406_s25 = scalar_lea.vmem (!%p1629_p5), %s2807_s0, %s1631_s19 }
  0x15   : > { %258 = vst [vmem:[#allocation2 + $0x48] sm:$0xff] %v1838_v0  ;;  %v327_v45 = vadd.f32 %v1932_v5, %v308_v30  ;;  %v312_v46 = vmul.f32 %v1920_v1, %v293_v34  ;;  %v369_v48 = vsel %vm337_vm2, %v321_v19, %v353_v32  ;;  %v356_v49 = vmul.f32 0.2, %v324_v26 }
  0x16   : > { %259 = vst [vmem:[#allocation2 + $0x50] sm:$0xff] %v1838_v0  ;;  %v328_v50 = vadd.f32 %v1932_v5, %v309_v33  ;;  %v313_v51 = vmul.f32 %v1920_v1, %v294_v39  ;;  %v370_v52 = vsel %vm338_vm3, %v322_v20, %v354_v36  ;;  %v357_v53 = vmul.f32 0.2, %v325_v37 }
  0x17   : > { %260 = vst [vmem:[#allocation2 + $0x58] sm:$0x3] %v1838_v0  ;;  %v329_v54 = vadd.f32 %v1932_v5, %v310_v38  ;;  %v314_v55 = vmul.f32 %v1920_v1, %v295_v42  ;;  %vm341_vm6 = vcmp.ge.f32.partialorder %v325_v37, 0.0  ;;  %v358_v56 = vmul.f32 0.2, %v326_v40 }
  0x18   : > { %261 = vst [vmem:[#allocation2 + $0x60] sm:$0xff] %v1838_v0  ;;  %v330_v57 = vadd.f32 %v1932_v5, %v311_v41  ;;  %v315_v58 = vmul.f32 %v1920_v1, %v296_v47  ;;  %v371_v59 = vsel %vm339_vm4, %v323_v25, %v355_v44  ;;  %vm342_vm7 = vcmp.ge.f32.partialorder %v326_v40, 0.0 }
  0x19   : > { %262 = vst [vmem:[#allocation2 + $0x68] sm:$0xff] %v1838_v0  ;;  %v359_v60 = vmul.f32 0.2, %v327_v45  ;;  %v331_v61 = vadd.f32 %v1932_v5, %v312_v46  ;;  %v372_v62 = vsel %vm340_vm5, %v324_v26, %v356_v49  ;;  %vm343_vm8 = vcmp.ge.f32.partialorder %v327_v45, 0.0 }
  0x1a   : > { %263 = vst [vmem:[#allocation2 + $0x70] sm:$0x3] %v1838_v0  ;;  %v360_v63 = vmul.f32 0.2, %v328_v50  ;;  %v373_v2 = vsel %vm341_vm6, %v325_v37, %v357_v53  ;;  %vm344_vm9 = vcmp.ge.f32.partialorder %v328_v50, 0.0  ;;  %v333_v4 = vadd.f32 %v1932_v5, %v314_v55 }
  0x1b   : > { %264 = vst [vmem:[#allocation2 + $0x78] sm:$0xff] %v1838_v0  ;;  %v361_v3 = vmul.f32 0.2, %v329_v54  ;;  %v374_v6 = vsel %vm342_vm7, %v326_v40, %v358_v56  ;;  %vm345_vm10 = vcmp.ge.f32.partialorder %v329_v54, 0.0  ;;  %v362_v7 = vmul.f32 0.2, %v330_v57 }
  0x1c   : > { %265 = vst [vmem:[#allocation2 + $0x80] sm:$0xff] %v1838_v0  ;;  %v334_v8 = vadd.f32 %v1932_v5, %v315_v58  ;;  %v375_v9 = vsel %vm343_vm8, %v327_v45, %v359_v60  ;;  %vm346_vm11 = vcmp.ge.f32.partialorder %v330_v57, 0.0  ;;  %v363_v10 = vmul.f32 0.2, %v331_v61 }
  0x1d   : > { %266 = vst [vmem:[#allocation2 + $0x88] sm:$0x3] %v1838_v0  ;;  %v376_v11 = vsel %vm344_vm9, %v328_v50, %v360_v63  ;;  %vm347_vm12 = vcmp.ge.f32.partialorder %v331_v61, 0.0  ;;  %v377_v13 = vsel %vm345_vm10, %v329_v54, %v361_v3  ;;  %v365_v14 = vmul.f32 0.2, %v333_v4 }
  0x1e   : > { %267 = vst [vmem:[#allocation2 + $0x90] sm:$0xff] %v1838_v0  ;;  %v378_v15 = vsel %vm346_vm11, %v330_v57, %v362_v7  ;;  %vm349_vm14 = vcmp.ge.f32.partialorder %v333_v4, 0.0  ;;  %v366_v16 = vmul.f32 0.2, %v334_v8  ;;  %v379_v17 = vsel %vm347_vm12, %v331_v61, %v363_v10 }
  0x1f   : > { %268 = vst [vmem:[#allocation2 + $0x98] sm:$0xff] %v1838_v0  ;;  %vm350_vm15 = vcmp.ge.f32.partialorder %v334_v8, 0.0  ;;  %v381_v19 = vsel %vm349_vm14, %v333_v4, %v365_v14 }
  0x20   : > { %269 = vst [vmem:[#allocation2 + $0xa0] sm:$0x3] %v1838_v0  ;;  %v382_v20 = vsel %vm350_vm15, %v334_v8, %v366_v16 }
  0x21   : > { %270 = vst [vmem:[#allocation2 + $0xa8] sm:$0xff] %v1838_v0 }
  0x22   : > { %271 = vst [vmem:[#allocation2 + $0xb0] sm:$0xff] %v1838_v0 }
  0x23   : > { %272 = vst [vmem:[#allocation2 + $0xb8] sm:$0x3] %v1838_v0 }
  0x24   : > { %273 = vst [vmem:[#allocation2 + $0xc0] sm:$0xff] %v1838_v0 }
  0x25   : > { %274 = vst [vmem:[#allocation2 + $0xc8] sm:$0xff] %v1838_v0 }
  0x26   : > { %275 = vst [vmem:[#allocation2 + $0xd0] sm:$0x3] %v1838_v0 }
  0x27   : > { %276 = vst [vmem:[#allocation2 + $0xd8] sm:$0xff] %v1838_v0 }
  0x28   : > { %277 = vst [vmem:[#allocation2 + $0xe0] sm:$0xff] %v1838_v0 }
  0x29   : > { %278 = vst [vmem:[#allocation2 + $0xe8] sm:$0x3] %v1838_v0  ;;  %v332_v0 = vadd.f32 %v1932_v5, %v313_v51 }
  0x2a   : > { %384 = vst [vmem:[#allocation2 + $0x19] sm:$0xff] %v367_v35 }
  0x2b   : > { %385 = vst [vmem:[#allocation2 + $0x21] sm:$0xff] %v368_v43  ;;  %v364_v12 = vmul.f32 0.2, %v332_v0  ;;  %vm348_vm13 = vcmp.ge.f32.partialorder %v332_v0, 0.0 }
  0x2c   : > { %386 = vst [vmem:[#allocation2 + $0x31] sm:$0xff] %v369_v48 }
  0x2d   : > { %387 = vst [vmem:[#allocation2 + $0x39] sm:$0xff] %v370_v52  ;;  %v380_v18 = vsel %vm348_vm13, %v332_v0, %v364_v12 }
  0x2e   : > { %388 = vst [vmem:[#allocation2 + $0x49] sm:$0xff] %v371_v59 }
  0x2f   : > { %389 = vst [vmem:[#allocation2 + $0x51] sm:$0xff] %v372_v62 }
  0x30   : > { %390 = vst [vmem:[#allocation2 + $0x61] sm:$0xff] %v373_v2 }
  0x31   : > { %391 = vst [vmem:[#allocation2 + $0x69] sm:$0xff] %v374_v6 }
  0x32   : > { %392 = vst [vmem:[#allocation2 + $0x79] sm:$0xff] %v375_v9 }
  0x33   : > { %393 = vst [vmem:[#allocation2 + $0x81] sm:$0xff] %v376_v11 }
  0x34   : > { %394 = vst [vmem:[#allocation2 + $0x91] sm:$0xff] %v377_v13 }
  0x35   : > { %395 = vst [vmem:[#allocation2 + $0x99] sm:$0xff] %v378_v15  ;;  %403 = sbr.rel (%p1629_p5) target bundleno = 68 (0x44), region = 44 }
  0x36   : > { %396 = vst [vmem:[#allocation2 + $0xa9] sm:$0xff] %v379_v17 }
  0x37   : > { %397 = vst [vmem:[#allocation2 + $0xb1] sm:$0xff] %v380_v18 }
  0x38   : > { %398 = vst [vmem:[#allocation2 + $0xc1] sm:$0xff] %v381_v19 }
  0x39   : > { %399 = vst [vmem:[#allocation2 + $0xc9] sm:$0xff] %v382_v20 }
  0x3a   : > { %v407_v21 = vld [vmem:[%s406_s25] sm:$0xff]  ;;  %v408_v22 = vld [vmem:[%s406_s25 + $0x8] sm:$0xff] }
  0x3b   : > { %v409_v23 = vmul.f32 %v1920_v1, %v407_v21  ;;  %v410_v24 = vmul.f32 %v1920_v1, %v408_v22 }
  0x3d   : > { %v411_v25 = vadd.f32 %v1932_v5, %v409_v23  ;;  %v412_v26 = vadd.f32 %v1932_v5, %v410_v24 }
  0x3f   : > { %vm413_vm0 = vcmp.ge.f32.partialorder %v411_v25, 0.0  ;;  %v415_v27 = vmul.f32 0.2, %v411_v25  ;;  %vm414_vm1 = vcmp.ge.f32.partialorder %v412_v26, 0.0  ;;  %v416_v28 = vmul.f32 0.2, %v412_v26 }
  0x41   : > { %v417_v29 = vsel %vm413_vm0, %v411_v25, %v415_v27  ;;  %v418_v30 = vsel %vm414_vm1, %v412_v26, %v416_v28 }
  0x42   : > { %419 = vst [vmem:[#allocation2 + $0x1] sm:$0xff] %v417_v29 }
  0x43   : > { %420 = vst [vmem:[#allocation2 + $0x9] sm:$0xff] %v418_v30 }
  0x44 PF: > { %p1632_p6 = scmp.ge.s32.totalorder %s1880_s22, 1 }
  0x46   : > { %424 = sbr.rel (%p1632_p6) target bundleno = 85 (0x55), region = 48 }
  0x4b   : > { %v1635_v31 = vld [vmem:[%s1913_s13 + $0x80] sm:$0xff]  ;;  %v1636_v32 = vld [vmem:[%s1913_s13 + $0x88] sm:$0xff] }
  0x4c   : > { %v430_v33 = vmul.f32 %v1920_v1, %v1635_v31  ;;  %v431_v34 = vmul.f32 %v1920_v1, %v1636_v32 }
  0x4e   : > { %v432_v35 = vadd.f32 %v1932_v5, %v430_v33  ;;  %v433_v36 = vadd.f32 %v1932_v5, %v431_v34 }
  0x50   : > { %vm434_vm2 = vcmp.ge.f32.partialorder %v432_v35, 0.0  ;;  %v436_v37 = vmul.f32 0.2, %v432_v35  ;;  %vm435_vm3 = vcmp.ge.f32.partialorder %v433_v36, 0.0  ;;  %v437_v38 = vmul.f32 0.2, %v433_v36 }
  0x52   : > { %v438_v39 = vsel %vm434_vm2, %v432_v35, %v436_v37  ;;  %v439_v40 = vsel %vm435_vm3, %v433_v36, %v437_v38 }
  0x53   : > { %441 = vst [vmem:[#allocation2 + $0xd9] sm:$0xff] %v438_v39 }
  0x54   : > { %442 = vst [vmem:[#allocation2 + $0xe1] sm:$0xff] %v439_v40 }
  0x55 PF: > { %v1652_v41 = vld [vmem:[%s2810_s3 + $0xf8] sm:$0xff]  ;;  %v1651_v1 = vld [vmem:[%s2810_s3 + $0xf0] sm:$0xff]  ;;  %v1650_v5 = vld [vmem:[%s2810_s3 + $0xe8] sm:$0xff]  ;;  %vm1531_vm4 = vcmask 1040384  }
  0x56   : > { %1770 = vmatpush.msra.mxu1 %v1652_v41  ;;  %1771 = vmatpush.msra.mxu2 %v1652_v41  ;;  %v1649_v42 = vld [vmem:[%s2810_s3 + $0xe0] sm:$0xff]  ;;  %v1648_v43 = vld [vmem:[%s2810_s3 + $0xd8] sm:$0xff]  ;;  %v1647_v44 = vld [vmem:[%s2810_s3 + $0xd0] sm:$0xff] }
  0x57   : > { %1772 = vmatpush.msra.mxu3 %v1652_v41  ;;  %508 = vmatpush.msra.mxu0 %v1652_v41  ;;  %v1646_v45 = vld [vmem:[%s2810_s3 + $0xc8] sm:$0xff]  ;;  %v1645_v46 = vld [vmem:[%s2810_s3 + $0xc0] sm:$0xff]  ;;  %v1644_v47 = vld [vmem:[%s2810_s3 + $0xb8] sm:$0xff] }
  0x58   : > { %1773 = vmatpush.msra.mxu1 %v1651_v1  ;;  %1774 = vmatpush.msra.mxu2 %v1651_v1  ;;  %v1643_v48 = vld [vmem:[%s2810_s3 + $0xb0] sm:$0xff]  ;;  %v1642_v49 = vld [vmem:[%s2810_s3 + $0xa8] sm:$0xff]  ;;  %v1641_v50 = vld [vmem:[%s2810_s3 + $0xa0] sm:$0xff] }
  0x59   : > { %1775 = vmatpush.msra.mxu3 %v1651_v1  ;;  %509 = vmatpush.msra.mxu0 %v1651_v1  ;;  %v1640_v51 = vld [vmem:[%s2810_s3 + $0x98] sm:$0xff]  ;;  %v1639_v52 = vld [vmem:[%s2810_s3 + $0x90] sm:$0xff]  ;;  %v1638_v53 = vld [vmem:[%s2810_s3 + $0x88] sm:$0xff] }
  0x5a   : > { %1776 = vmatpush.msra.mxu1 %v1650_v5  ;;  %1777 = vmatpush.msra.mxu2 %v1650_v5  ;;  %v1637_v54 = vld [vmem:[%s2810_s3 + $0x80] sm:$0xff]  ;;  %v2065_v55 = vld [vmem:[#allocation2 + $0x31] sm:$0xff]  ;;  %v1666_v63 = vld [vmem:[%s2810_s3 + $0x168] sm:$0xff] }
  0x5b   : > { %1778 = vmatpush.msra.mxu3 %v1650_v5  ;;  %510 = vmatpush.msra.mxu0 %v1650_v5  ;;  %v2067_v56 = vld [vmem:[#allocation2 + $0x61] sm:$0xff]  ;;  %v1668_v57 = vld [vmem:[%s2810_s3 + $0x178] sm:$0xff]  ;;  %v1667_v60 = vld [vmem:[%s2810_s3 + $0x170] sm:$0xff] }
  0x5c   : > { %1779 = vmatpush.msra.mxu1 %v1649_v42  ;;  %1780 = vmatpush.msra.mxu2 %v1649_v42  ;;  %v474_v58 = vld [vmem:[%s2810_s3 + $0x78] sm:$0xff]  ;;  %v473_v62 = vld [vmem:[%s2810_s3 + $0x70] sm:$0xff]  ;;  %v472_v2 = vld [vmem:[%s2810_s3 + $0x68] sm:$0xff] }
  0x5d   : > { %1781 = vmatpush.msra.mxu3 %v1649_v42  ;;  %511 = vmatpush.msra.mxu0 %v1649_v42  ;;  %v2075_v59 = vld [vmem:[#allocation2 + $0x91] sm:$0xff]  ;;  %v475_v3 = vld [vmem:[#allocation2 + $0x1] sm:$0xff]  ;;  %v2107_v8 = vld [vmem:[#allocation2 + $0x69] sm:$0xff] }
  0x5e   : > { %1782 = vmatpush.msra.mxu1 %v1648_v43  ;;  %1783 = vmatpush.msra.mxu2 %v1648_v43  ;;  %v1684_v61 = vld [vmem:[%s2810_s3 + $0x1f8] sm:$0xff]  ;;  %v1683_v0 = vld [vmem:[%s2810_s3 + $0x1f0] sm:$0xff]  ;;  %v1665_v4 = vld [vmem:[%s2810_s3 + $0x160] sm:$0xff] }
  0x5f   : > { %1784 = vmatpush.msra.mxu3 %v1648_v43  ;;  %512 = vmatpush.msra.mxu0 %v1648_v43  ;;  %v1682_v6 = vld [vmem:[%s2810_s3 + $0x1e8] sm:$0xff]  ;;  %v471_v7 = vld [vmem:[%s2810_s3 + $0x60] sm:$0xff]  ;;  %v1664_v10 = vld [vmem:[%s2810_s3 + $0x158] sm:$0xff] }
  0x60   : > { %1785 = vmatpush.msra.mxu1 %v1647_v44  ;;  %1786 = vmatpush.msra.mxu2 %v1647_v44  ;;  %v2109_v9 = vld [vmem:[#allocation2 + $0x39] sm:$0xff]  ;;  %v1663_v14 = vld [vmem:[%s2810_s3 + $0x150] sm:$0xff]  ;;  %v1662_v18 = vld [vmem:[%s2810_s3 + $0x148] sm:$0xff] }
  0x61   : > { %1787 = vmatpush.msra.mxu3 %v1647_v44  ;;  %513 = vmatpush.msra.mxu0 %v1647_v44  ;;  %v1681_v11 = vld [vmem:[%s2810_s3 + $0x1e0] sm:$0xff]  ;;  %v470_v12 = vld [vmem:[%s2810_s3 + $0x58] sm:$0xff]  ;;  %v469_v17 = vld [vmem:[%s2810_s3 + $0x50] sm:$0xff] }
  0x62   : > { %1788 = vmatpush.msra.mxu1 %v1646_v45  ;;  %1789 = vmatpush.msra.mxu2 %v1646_v45  ;;  %v2121_v13 = vld [vmem:[#allocation2 + $0x99] sm:$0xff]  ;;  %v1679_v19 = vld [vmem:[%s2810_s3 + $0x1d0] sm:$0xff]  ;;  %v468_v21 = vld [vmem:[%s2810_s3 + $0x48] sm:$0xff] }
  0x63   : > { %1790 = vmatpush.msra.mxu3 %v1646_v45  ;;  %514 = vmatpush.msra.mxu0 %v1646_v45  ;;  %v1680_v15 = vld [vmem:[%s2810_s3 + $0x1d8] sm:$0xff]  ;;  %v1699_v20 = vld [vmem:[%s2810_s3 + $0x270] sm:$0xff]  ;;  %v1661_v22 = vld [vmem:[%s2810_s3 + $0x140] sm:$0xff] }
  0x64   : > { %1791 = vmatpush.msra.mxu1 %v1645_v46  ;;  %1792 = vmatpush.msra.mxu2 %v1645_v46  ;;  %v1700_v16 = vld [vmem:[%s2810_s3 + $0x278] sm:$0xff]  ;;  %v1678_v23 = vld [vmem:[%s2810_s3 + $0x1c8] sm:$0xff]  ;;  %v467_v25 = vld [vmem:[%s2810_s3 + $0x40] sm:$0xff] }
  0x65   : > { %1793 = vmatpush.msra.mxu3 %v1645_v46  ;;  %515 = vmatpush.msra.mxu0 %v1645_v46  ;;  %v1698_v24 = vld [vmem:[%s2810_s3 + $0x268] sm:$0xff]  ;;  %v2161_v26 = vld [vmem:[#allocation2 + $0x79] sm:$0xff]  ;;  %v1659_v34 = vld [vmem:[%s2810_s3 + $0x130] sm:$0xff] }
  0x66   : > { %1794 = vmatpush.msra.mxu1 %v1644_v47  ;;  %1795 = vmatpush.msra.mxu2 %v1644_v47  ;;  %v2163_v27 = vld [vmem:[#allocation2 + $0x49] sm:$0xff]  ;;  %v1660_v28 = vld [vmem:[%s2810_s3 + $0x138] sm:$0xff]  ;;  %v1677_v29 = vld [vmem:[%s2810_s3 + $0x1c0] sm:$0xff] }
  0x67   : > { %1796 = vmatpush.msra.mxu3 %v1644_v47  ;;  %516 = vmatpush.msra.mxu0 %v1644_v47  ;;  %v1697_v30 = vld [vmem:[%s2810_s3 + $0x260] sm:$0xff]  ;;  %v466_v31 = vld [vmem:[%s2810_s3 + $0x38] sm:$0xff]  ;;  %v476_v32 = vld [vmem:[#allocation2 + $0x9] sm:$0xff] }
  0x68   : > { %1797 = vmatpush.msra.mxu1 %v1643_v48  ;;  %1798 = vmatpush.msra.mxu2 %v1643_v48  ;;  %v2179_v33 = vld [vmem:[#allocation2 + $0xa9] sm:$0xff]  ;;  %v1676_v35 = vld [vmem:[%s2810_s3 + $0x1b8] sm:$0xff]  ;;  %v1657_v1 = vld [vmem:[%s2810_s3 + $0x120] sm:$0xff] }
  0x69   : > { %1799 = vmatpush.msra.mxu3 %v1643_v48  ;;  %517 = vmatpush.msra.mxu0 %v1643_v48  ;;  %v1696_v36 = vld [vmem:[%s2810_s3 + $0x258] sm:$0xff]  ;;  %v465_v37 = vld [vmem:[%s2810_s3 + $0x30] sm:$0xff]  ;;  %v1658_v38 = vld [vmem:[%s2810_s3 + $0x128] sm:$0xff] }
  0x6a   : > { %1800 = vmatpush.msra.mxu1 %v1642_v49  ;;  %1801 = vmatpush.msra.mxu2 %v1642_v49  ;;  %v1675_v39 = vld [vmem:[%s2810_s3 + $0x1b0] sm:$0xff]  ;;  %v464_v41 = vld [vmem:[%s2810_s3 + $0x28] sm:$0xff]  ;;  %v463_v43 = vld [vmem:[%s2810_s3 + $0x20] sm:$0xff] }
  0x6b   : > { %1802 = vmatpush.msra.mxu3 %v1642_v49  ;;  %518 = vmatpush.msra.mxu0 %v1642_v49  ;;  %v1695_v40 = vld [vmem:[%s2810_s3 + $0x250] sm:$0xff]  ;;  %v1674_v5 = vld [vmem:[%s2810_s3 + $0x1a8] sm:$0xff]  ;;  %v1656_v46 = vld [vmem:[%s2810_s3 + $0x118] sm:$0xff] }
  0x6c   : > { %1803 = vmatpush.msra.mxu1 %v1641_v50  ;;  %1804 = vmatpush.msra.mxu2 %v1641_v50  ;;  %v1694_v42 = vld [vmem:[%s2810_s3 + $0x248] sm:$0xff]  ;;  %v2220_v45 = vld [vmem:[#allocation2 + $0x51] sm:$0xff]  ;;  %v1673_v47 = vld [vmem:[%s2810_s3 + $0x1a0] sm:$0xff] }
  0x6d   : > { %1805 = vmatpush.msra.mxu3 %v1641_v50  ;;  %519 = vmatpush.msra.mxu0 %v1641_v50  ;;  %v2218_v44 = vld [vmem:[#allocation2 + $0x81] sm:$0xff]  ;;  %v462_v49 = vld [vmem:[%s2810_s3 + $0x18] sm:$0xff] }
  0x6e   : > { %1806 = vmatpush.msra.mxu1 %v1640_v51  ;;  %1807 = vmatpush.msra.mxu2 %v1640_v51  ;;  %v1693_v48 = vld [vmem:[%s2810_s3 + $0x240] sm:$0xff] }
  0x6f   : > { %1808 = vmatpush.msra.mxu3 %v1640_v51  ;;  %520 = vmatpush.msra.mxu0 %v1640_v51  ;;  %v2235_v50 = vld [vmem:[#allocation2 + $0x19] sm:$0xff]  ;;  %v2238_v51 = vld [vmem:[#allocation2 + $0xb1] sm:$0xff] }
  0x70   : > { %1809 = vmatpush.msra.mxu1 %v1639_v52  ;;  %1810 = vmatpush.msra.mxu2 %v1639_v52 }
  0x71   : > { %1811 = vmatpush.msra.mxu3 %v1639_v52  ;;  %521 = vmatpush.msra.mxu0 %v1639_v52  ;;  %v1655_v52 = vld [vmem:[%s2810_s3 + $0x110] sm:$0xff] }
  0x72   : > { %1812 = vmatpush.msra.mxu1 %v1638_v53  ;;  %1813 = vmatpush.msra.mxu2 %v1638_v53 }
  0x73   : > { %1814 = vmatpush.msra.mxu3 %v1638_v53  ;;  %522 = vmatpush.msra.mxu0 %v1638_v53  ;;  %v1672_v53 = vld [vmem:[%s2810_s3 + $0x198] sm:$0xff] }
  0x74   : > { %1815 = vmatpush.msra.mxu1 %v1637_v54  ;;  %1816 = vmatpush.msra.mxu2 %v1637_v54 }
  0x75   : > { %536 = vmatmul.f32.vlgmr.msra.gmra.mxu1 %v2065_v55  ;;  %548 = vmatmul.f32.vlgmr.msra.gmra.mxu2 %v2067_v56 }
  0x76   : > { %671 = vmatpush.msrb.mxu2 %v1668_v57  ;;  %1817 = vmatpush.msra.mxu3 %v1637_v54  ;;  %v461_v57 = vld [vmem:[%s2810_s3 + $0x10] sm:$0xff] }
  0x77   : > { %573 = vmatpush.msrb.mxu1 %v474_v58  ;;  %560 = vmatmul.f32.vlgmr.msra.gmra.mxu3 %v2075_v59  ;;  %v1654_v58 = vld [vmem:[%s2810_s3 + $0x108] sm:$0xff] }
  0x78   : > { %672 = vmatpush.msrb.mxu2 %v1667_v60  ;;  %785 = vmatpush.msrb.mxu3 %v1684_v61  ;;  %v1671_v60 = vld [vmem:[%s2810_s3 + $0x190] sm:$0xff] }
  0x79   : > { %574 = vmatpush.msrb.mxu1 %v473_v62  ;;  %523 = vmatpush.msra.mxu0 %v1637_v54  ;;  %v1692_v54 = vld [vmem:[%s2810_s3 + $0x238] sm:$0xff]  ;;  %v1691_v61 = vld [vmem:[%s2810_s3 + $0x230] sm:$0xff]  ;;  %v460_v62 = vld [vmem:[%s2810_s3 + $0x8] sm:$0xff] }
  0x7a   : > { %673 = vmatpush.msrb.mxu2 %v1666_v63  ;;  %786 = vmatpush.msrb.mxu3 %v1683_v0  ;;  %v1653_v63 = vld [vmem:[%s2810_s3 + $0x100] sm:$0xff]  ;;  %v1670_v0 = vld [vmem:[%s2810_s3 + $0x188] sm:$0xff] }
  0x7b   : > { %575 = vmatpush.msrb.mxu1 %v472_v2  ;;  %524 = vmatmul.f32.vlgmr.msra.gmra.mxu0 %v475_v3  ;;  %v1690_v2 = vld [vmem:[%s2810_s3 + $0x228] sm:$0xff]  ;;  %v459_v3 = vld [vmem:[%s2810_s3] sm:$0xff] }
  0x7c   : > { %674 = vmatpush.msrb.mxu2 %v1665_v4  ;;  %787 = vmatpush.msrb.mxu3 %v1682_v6  ;;  %v638_v4 = vld [vmem:[#allocation2 + $0x2] sm:$0xff] }
  0x7d   : > { %576 = vmatpush.msrb.mxu1 %v471_v7  ;;  %551 = vmatmul.f32.gmra.mxu2 %v2107_v8  ;;  %v443_v6 = vld [vmem:[#allocation2] sm:$0xff] }
  0x7e   : > { %539 = vmatmul.f32.gmra.mxu1 %v2109_v9  ;;  %675 = vmatpush.msrb.mxu2 %v1664_v10  ;;  %v1669_v7 = vld [vmem:[%s2810_s3 + $0x180] sm:$0xff] }
  0x7f   : > { %788 = vmatpush.msrb.mxu3 %v1681_v11  ;;  %577 = vmatpush.msrb.mxu1 %v470_v12  ;;  %v1689_v10 = vld [vmem:[%s2810_s3 + $0x220] sm:$0xff]  ;;  %v1732_v11 = vld [vmem:[%s2810_s3 + $0x378] sm:$0xff] }
  0x80   : > { %563 = vmatmul.f32.gmra.mxu3 %v2121_v13  ;;  %676 = vmatpush.msrb.mxu2 %v1663_v14  ;;  %v2287_v12 = vld [vmem:[#allocation2 + $0x21] sm:$0xff]  ;;  %v752_v14 = vld [vmem:[#allocation2 + $0x18] sm:$0xff] }
  0x81   : > { %789 = vmatpush.msrb.mxu3 %v1680_v15  ;;  %899 = vmatpush.msrb.mxu0 %v1700_v16  ;;  %v1688_v15 = vld [vmem:[%s2810_s3 + $0x218] sm:$0xff] }
  0x82   : > { %578 = vmatpush.msrb.mxu1 %v469_v17  ;;  %677 = vmatpush.msrb.mxu2 %v1662_v18  ;;  %v1748_v16 = vld [vmem:[%s2810_s3 + $0x3f8] sm:$0xff]  ;;  %v1731_v18 = vld [vmem:[%s2810_s3 + $0x370] sm:$0xff] }
  0x83   : > { %790 = vmatpush.msrb.mxu3 %v1679_v19  ;;  %900 = vmatpush.msrb.mxu0 %v1699_v20  ;;  %v1716_v17 = vld [vmem:[%s2810_s3 + $0x2f8] sm:$0xff]  ;;  %v1687_v19 = vld [vmem:[%s2810_s3 + $0x210] sm:$0xff] }
  0x84   : > { %579 = vmatpush.msrb.mxu1 %v468_v21  ;;  %678 = vmatpush.msrb.mxu2 %v1661_v22  ;;  %v1747_v20 = vld [vmem:[%s2810_s3 + $0x3f0] sm:$0xff]  ;;  %v1730_v22 = vld [vmem:[%s2810_s3 + $0x368] sm:$0xff] }
  0x85   : > { %791 = vmatpush.msrb.mxu3 %v1678_v23  ;;  %901 = vmatpush.msrb.mxu0 %v1698_v24  ;;  %v1715_v21 = vld [vmem:[%s2810_s3 + $0x2f0] sm:$0xff]  ;;  %v1686_v23 = vld [vmem:[%s2810_s3 + $0x208] sm:$0xff] }
  0x86   : > { %580 = vmatpush.msrb.mxu1 %v467_v25  ;;  %554 = vmatmul.f32.gmra.mxu2 %v2161_v26  ;;  %v639_v24 = vld [vmem:[#allocation2 + $0xa] sm:$0xff] }
  0x87   : > { %542 = vmatmul.f32.gmra.mxu1 %v2163_v27  ;;  %679 = vmatpush.msrb.mxu2 %v1660_v28  ;;  %v444_v25 = vld [vmem:[#allocation2 + $0x8] sm:$0xff] }
  0x88   : > { %792 = vmatpush.msrb.mxu3 %v1677_v29  ;;  %902 = vmatpush.msrb.mxu0 %v1697_v30  ;;  %v1746_v28 = vld [vmem:[%s2810_s3 + $0x3e8] sm:$0xff]  ;;  %v1685_v29 = vld [vmem:[%s2810_s3 + $0x200] sm:$0xff] }
  0x89   : > { %581 = vmatpush.msrb.mxu1 %v466_v31  ;;  %527 = vmatmul.f32.gmra.mxu0 %v476_v32  ;;  %v1714_v30 = vld [vmem:[%s2810_s3 + $0x2e8] sm:$0xff]  ;;  %v753_v31 = vld [vmem:[#allocation2 + $0x20] sm:$0xff]  ;;  %v1764_v32 = vld [vmem:[%s2810_s3 + $0x478] sm:$0xff] }
  0x8a   : > { %566 = vmatmul.f32.gmra.mxu3 %v2179_v33  ;;  %680 = vmatpush.msrb.mxu2 %v1659_v34  ;;  %v1729_v34 = vld [vmem:[%s2810_s3 + $0x360] sm:$0xff] }
  0x8b   : > { %793 = vmatpush.msrb.mxu3 %v1676_v35  ;;  %903 = vmatpush.msrb.mxu0 %v1696_v36  ;;  %v1745_v35 = vld [vmem:[%s2810_s3 + $0x3e0] sm:$0xff] }
  0x8c   : > { %582 = vmatpush.msrb.mxu1 %v465_v37  ;;  %681 = vmatpush.msrb.mxu2 %v1658_v38  ;;  %v1713_v36 = vld [vmem:[%s2810_s3 + $0x2e0] sm:$0xff]  ;;  %v1763_v37 = vld [vmem:[%s2810_s3 + $0x470] sm:$0xff]  ;;  %v1728_v38 = vld [vmem:[%s2810_s3 + $0x358] sm:$0xff] }
  0x8d   : > { %794 = vmatpush.msrb.mxu3 %v1675_v39  ;;  %904 = vmatpush.msrb.mxu0 %v1695_v40  ;;  %v1744_v39 = vld [vmem:[%s2810_s3 + $0x3d8] sm:$0xff] }
  0x8e   : > { %583 = vmatpush.msrb.mxu1 %v464_v41  ;;  %682 = vmatpush.msrb.mxu2 %v1657_v1  ;;  %v1712_v40 = vld [vmem:[%s2810_s3 + $0x2d8] sm:$0xff]  ;;  %v1762_v1 = vld [vmem:[%s2810_s3 + $0x468] sm:$0xff] }
  0x8f   : > { %795 = vmatpush.msrb.mxu3 %v1674_v5  ;;  %905 = vmatpush.msrb.mxu0 %v1694_v42  ;;  %v2351_v41 = vld [vmem:[#allocation2 + $0x1a] sm:$0xff]  ;;  %v1727_v5 = vld [vmem:[%s2810_s3 + $0x350] sm:$0xff] }
  0x90   : > { %584 = vmatpush.msrb.mxu1 %v463_v43  ;;  %557 = vmatmul.f32.gmra.mxu2 %v2218_v44  ;;  %v1761_v42 = vld [vmem:[%s2810_s3 + $0x460] sm:$0xff]  ;;  %v1743_v43 = vld [vmem:[%s2810_s3 + $0x3d0] sm:$0xff] }
  0x91   : > { %545 = vmatmul.f32.gmra.mxu1 %v2220_v45  ;;  %683 = vmatpush.msrb.mxu2 %v1656_v46  ;;  %v2366_v46 = vld [vmem:[#allocation2 + $0x30] sm:$0xff] }
  0x92   : > { %796 = vmatpush.msrb.mxu3 %v1673_v47  ;;  %906 = vmatpush.msrb.mxu0 %v1693_v48  ;;  %v1760_v47 = vld [vmem:[%s2810_s3 + $0x458] sm:$0xff]  ;;  %v1711_v48 = vld [vmem:[%s2810_s3 + $0x2d0] sm:$0xff] }
  0x93   : > { %585 = vmatpush.msrb.mxu1 %v462_v49  ;;  %530 = vmatmul.f32.gmra.mxu0 %v2235_v50  ;;  %v1726_v49 = vld [vmem:[%s2810_s3 + $0x348] sm:$0xff] }
  0x94   : > { %569 = vmatmul.f32.gmra.mxu3 %v2238_v51  ;;  %684 = vmatpush.msrb.mxu2 %v1655_v52  ;;  %v1759_v52 = vld [vmem:[%s2810_s3 + $0x450] sm:$0xff] }
  0x95   : > { %797 = vmatpush.msrb.mxu3 %v1672_v53  ;;  %907 = vmatpush.msrb.mxu0 %v1692_v54  ;;  %v1710_v53 = vld [vmem:[%s2810_s3 + $0x2c8] sm:$0xff] }
  0x96   : > { %586 = vmatpush.msrb.mxu1 %v461_v57  ;;  %685 = vmatpush.msrb.mxu2 %v1654_v58  ;;  %v2388_v54 = vld [vmem:[#allocation2 + $0x22] sm:$0xff]  ;;  %v2391_v57 = vld [vmem:[#allocation2 + $0x38] sm:$0xff] }
  0x97   : > { %798 = vmatpush.msrb.mxu3 %v1671_v60  ;;  %908 = vmatpush.msrb.mxu0 %v1691_v61  ;;  %v1725_v58 = vld [vmem:[%s2810_s3 + $0x340] sm:$0xff]  ;;  %v1758_v61 = vld [vmem:[%s2810_s3 + $0x448] sm:$0xff] }
  0x98   : > { %587 = vmatpush.msrb.mxu1 %v460_v62  ;;  %686 = vmatpush.msrb.mxu2 %v1653_v63  ;;  %v1741_v60 = vld [vmem:[%s2810_s3 + $0x3c0] sm:$0xff]  ;;  %v2407_v63 = vld [vmem:[#allocation2 + $0x32] sm:$0xff] }
  0x99   : > { %799 = vmatpush.msrb.mxu3 %v1670_v0  ;;  %909 = vmatpush.msrb.mxu0 %v1690_v2  ;;  %v1709_v62 = vld [vmem:[%s2810_s3 + $0x2c0] sm:$0xff]  ;;  %v2410_v0 = vld [vmem:[#allocation2 + $0x48] sm:$0xff]  ;;  %v1724_v2 = vld [vmem:[%s2810_s3 + $0x338] sm:$0xff] }
  0x9a   : > { %588 = vmatpush.msrb.mxu1 %v459_v3  ;;  %687 = vmatmul.f32.vlgmr.msrb.gmra.mxu2 %v638_v4  ;;  %v1740_v3 = vld [vmem:[%s2810_s3 + $0x3b8] sm:$0xff]  ;;  %v1757_v4 = vld [vmem:[%s2810_s3 + $0x440] sm:$0xff] }
  0x9b   : > { %589 = vmatmul.f32.vlgmr.msrb.gmra.mxu1 %v443_v6  ;;  %800 = vmatpush.msrb.mxu3 %v1669_v7  ;;  %v1708_v6 = vld [vmem:[%s2810_s3 + $0x2b8] sm:$0xff] }
  0x9c   : > { %910 = vmatpush.msrb.mxu0 %v1689_v10  ;;  %1128 = vmatpush.msra.mxu2 %v1732_v11  ;;  %v2427_v7 = vld [vmem:[#allocation2 + $0x3a] sm:$0xff]  ;;  %v2430_v10 = vld [vmem:[#allocation2 + $0x50] sm:$0xff] }
  0x9d   : > { %533 = vmatmul.f32.gmra.mxu0 %v2287_v12  ;;  %801 = vmatmul.f32.vlgmr.msrb.gmra.mxu3 %v752_v14  ;;  %v1723_v11 = vld [vmem:[%s2810_s3 + $0x330] sm:$0xff] }
  0x9e   : > { %911 = vmatpush.msrb.mxu0 %v1688_v15  ;;  %1242 = vmatpush.msra.mxu3 %v1748_v16  ;;  %v1707_v15 = vld [vmem:[%s2810_s3 + $0x2b0] sm:$0xff] }
  0x9f   : > { %1013 = vmatpush.msra.mxu1 %v1716_v17  ;;  %1129 = vmatpush.msra.mxu2 %v1731_v18  ;;  %v2447_v16 = vld [vmem:[#allocation2 + $0x4a] sm:$0xff]  ;;  %v2450_v17 = vld [vmem:[#allocation2 + $0x60] sm:$0xff] }
  0xa0   : > { %912 = vmatpush.msrb.mxu0 %v1687_v19  ;;  %1243 = vmatpush.msra.mxu3 %v1747_v20  ;;  %v1722_v18 = vld [vmem:[%s2810_s3 + $0x328] sm:$0xff]  ;;  %v1755_v20 = vld [vmem:[%s2810_s3 + $0x430] sm:$0xff] }
  0xa1   : > { %1014 = vmatpush.msra.mxu1 %v1715_v21  ;;  %1130 = vmatpush.msra.mxu2 %v1730_v22  ;;  %v1738_v19 = vld [vmem:[%s2810_s3 + $0x3a8] sm:$0xff]  ;;  %v2467_v22 = vld [vmem:[#allocation2 + $0x52] sm:$0xff] }
  0xa2   : > { %913 = vmatpush.msrb.mxu0 %v1686_v23  ;;  %690 = vmatmul.f32.gmra.mxu2 %v639_v24  ;;  %v1706_v21 = vld [vmem:[%s2810_s3 + $0x2a8] sm:$0xff]  ;;  %v1721_v24 = vld [vmem:[%s2810_s3 + $0x320] sm:$0xff] }
  0xa3   : > { %592 = vmatmul.f32.gmra.mxu1 %v444_v25  ;;  %1244 = vmatpush.msra.mxu3 %v1746_v28  ;;  %v2470_v23 = vld [vmem:[#allocation2 + $0x68] sm:$0xff]  ;;  %v1737_v25 = vld [vmem:[%s2810_s3 + $0x3a0] sm:$0xff] }
  0xa4   : > { %914 = vmatpush.msrb.mxu0 %v1685_v29  ;;  %1015 = vmatpush.msra.mxu1 %v1714_v30  ;;  %v1754_v28 = vld [vmem:[%s2810_s3 + $0x428] sm:$0xff]  ;;  %v1705_v29 = vld [vmem:[%s2810_s3 + $0x2a0] sm:$0xff] }
  0xa5   : > { %804 = vmatmul.f32.gmra.mxu3 %v753_v31  ;;  %915 = vmatmul.f32.vlgmr.msrb.gmra.mxu0 %v2235_v50  ;;  %v1742_v50 = vld [vmem:[%s2810_s3 + $0x3c8] sm:$0xff] }
  0xa6   : > { %1356 = vmatpush.msra.mxu0 %v1764_v32  ;;  %1131 = vmatpush.msra.mxu2 %v1729_v34  ;;  %v2487_v30 = vld [vmem:[#allocation2 + $0x62] sm:$0xff]  ;;  %v1720_v32 = vld [vmem:[%s2810_s3 + $0x318] sm:$0xff] }
  0xa7   : > { %1245 = vmatpush.msra.mxu3 %v1745_v35  ;;  %1016 = vmatpush.msra.mxu1 %v1713_v36  ;;  %v1736_v34 = vld [vmem:[%s2810_s3 + $0x398] sm:$0xff]  ;;  %v1753_v35 = vld [vmem:[%s2810_s3 + $0x420] sm:$0xff] }
  0xa8   : > { %1357 = vmatpush.msra.mxu0 %v1763_v37  ;;  %1132 = vmatpush.msra.mxu2 %v1728_v38  ;;  %v1704_v36 = vld [vmem:[%s2810_s3 + $0x298] sm:$0xff]  ;;  %v2507_v37 = vld [vmem:[#allocation2 + $0x6a] sm:$0xff]  ;;  %v2510_v38 = vld [vmem:[#allocation2 + $0x80] sm:$0xff] }
  0xa9   : > { %1246 = vmatpush.msra.mxu3 %v1744_v39  ;;  %1017 = vmatpush.msra.mxu1 %v1712_v40  ;;  %v1719_v39 = vld [vmem:[%s2810_s3 + $0x310] sm:$0xff] }
  0xaa   : > { %693 = vmatmul.f32.gmra.mxu2 %v2351_v41  ;;  %1358 = vmatpush.msra.mxu0 %v1762_v1  ;;  %v1735_v40 = vld [vmem:[%s2810_s3 + $0x390] sm:$0xff]  ;;  %v1752_v1 = vld [vmem:[%s2810_s3 + $0x418] sm:$0xff] }
  0xab   : > { %595 = vmatmul.f32.gmra.mxu1 %v752_v14  ;;  %1133 = vmatpush.msra.mxu2 %v1727_v5  ;;  %v1756_v14 = vld [vmem:[%s2810_s3 + $0x438] sm:$0xff]  ;;  %v1703_v5 = vld [vmem:[%s2810_s3 + $0x290] sm:$0xff] }
  0xac   : > { %1359 = vmatpush.msra.mxu0 %v1761_v42  ;;  %1247 = vmatpush.msra.mxu3 %v1743_v43  ;;  %v2527_v42 = vld [vmem:[#allocation2 + $0x7a] sm:$0xff]  ;;  %v2530_v43 = vld [vmem:[#allocation2 + $0x90] sm:$0xff] }
  0xad   : > { %807 = vmatmul.f32.gmra.mxu3 %v2366_v46  ;;  %918 = vmatmul.f32.gmra.mxu0 %v2287_v12  ;;  %v1739_v12 = vld [vmem:[%s2810_s3 + $0x3b0] sm:$0xff] }
  0xae   : > { %1360 = vmatpush.msra.mxu0 %v1760_v47  ;;  %1018 = vmatpush.msra.mxu1 %v1711_v48  ;;  %v1718_v47 = vld [vmem:[%s2810_s3 + $0x308] sm:$0xff] }
  0xaf   : > { %1134 = vmatpush.msra.mxu2 %v1726_v49  ;;  %1248 = vmatpush.msra.mxu3 %v1742_v50  ;;  %v1734_v48 = vld [vmem:[%s2810_s3 + $0x388] sm:$0xff]  ;;  %v1751_v49 = vld [vmem:[%s2810_s3 + $0x410] sm:$0xff] }
  0xb0   : > { %1361 = vmatpush.msra.mxu0 %v1759_v52  ;;  %1019 = vmatpush.msra.mxu1 %v1710_v53  ;;  %v1702_v50 = vld [vmem:[%s2810_s3 + $0x288] sm:$0xff]  ;;  %v2550_v53 = vld [vmem:[#allocation2 + $0x98] sm:$0xff] }
  0xb1   : > { %1135 = vmatpush.msra.mxu2 %v1725_v58  ;;  %1249 = vmatpush.msra.mxu3 %v1741_v60  ;;  %v2547_v52 = vld [vmem:[#allocation2 + $0x82] sm:$0xff] }
  0xb2   : > { %696 = vmatmul.f32.gmra.mxu2 %v2388_v54  ;;  %1362 = vmatpush.msra.mxu0 %v1758_v61  ;;  %v1717_v60 = vld [vmem:[%s2810_s3 + $0x300] sm:$0xff] }
  0xb3   : > { %598 = vmatmul.f32.gmra.mxu1 %v753_v31  ;;  %1136 = vmatpush.msra.mxu2 %v1724_v2  ;;  %v2490_v31 = vld [vmem:[#allocation2 + $0x78] sm:$0xff]  ;;  %v1733_v61 = vld [vmem:[%s2810_s3 + $0x380] sm:$0xff] }
  0xb4   : > { %1020 = vmatpush.msra.mxu1 %v1709_v62  ;;  %1250 = vmatpush.msra.mxu3 %v1740_v3  ;;  %v1750_v62 = vld [vmem:[%s2810_s3 + $0x408] sm:$0xff]  ;;  %v1701_v2 = vld [vmem:[%s2810_s3 + $0x280] sm:$0xff]  ;;  %v2569_v3 = vld [vmem:[#allocation2 + $0x92] sm:$0xff] }
  0xb5   : > { %810 = vmatmul.f32.gmra.mxu3 %v2391_v57  ;;  %921 = vmatmul.f32.gmra.mxu0 %v2065_v55 }
  0xb6   : > { %1363 = vmatpush.msra.mxu0 %v1757_v4  ;;  %1021 = vmatpush.msra.mxu1 %v1708_v6 }
  0xb7   : > { %1137 = vmatpush.msra.mxu2 %v1723_v11  ;;  %1251 = vmatpush.msra.mxu3 %v1739_v12 }
  0xb8   : > { %1364 = vmatpush.msra.mxu0 %v1756_v14  ;;  %1022 = vmatpush.msra.mxu1 %v1707_v15  ;;  %v1749_v14 = vld [vmem:[%s2810_s3 + $0x400] sm:$0xff] }
  0xb9   : > { %1138 = vmatpush.msra.mxu2 %v1722_v18  ;;  %1252 = vmatpush.msra.mxu3 %v1738_v19  ;;  %v2586_v15 = vld [vmem:[#allocation2 + $0x9a] sm:$0xff]  ;;  %v2591_v19 = vld [vmem:[#allocation2 + $0xb0] sm:$0xff] }
  0xba   : > { %699 = vmatmul.f32.gmra.mxu2 %v2407_v63  ;;  %1365 = vmatpush.msra.mxu0 %v1755_v20 }
  0xbb   : > { %601 = vmatmul.f32.gmra.mxu1 %v2366_v46  ;;  %1139 = vmatpush.msra.mxu2 %v1721_v24  ;;  %v2600_v24 = vld [vmem:[#allocation2 + $0xaa] sm:$0xff] }
  0xbc   : > { %1023 = vmatpush.msra.mxu1 %v1706_v21  ;;  %1253 = vmatpush.msra.mxu3 %v1737_v25 }
  0xbd   : > { %813 = vmatmul.f32.gmra.mxu3 %v2410_v0  ;;  %924 = vmatmul.f32.gmra.mxu0 %v2109_v9 }
  0xbe   : > { %1366 = vmatpush.msra.mxu0 %v1754_v28  ;;  %1024 = vmatpush.msra.mxu1 %v1705_v29  ;;  %v2605_v28 = vld [vmem:[#allocation2 + $0xc0] sm:$0xff] }
  0xbf   : > { %1140 = vmatpush.msra.mxu2 %v1720_v32  ;;  %1254 = vmatpush.msra.mxu3 %v1736_v34 }
  0xc0   : > { %1367 = vmatpush.msra.mxu0 %v1753_v35  ;;  %1025 = vmatpush.msra.mxu1 %v1704_v36  ;;  %v2617_v35 = vld [vmem:[#allocation2 + $0xc8] sm:$0xff] }
  0xc1   : > { %1141 = vmatpush.msra.mxu2 %v1719_v39  ;;  %1255 = vmatpush.msra.mxu3 %v1735_v40  ;;  %v2619_v36 = vld [vmem:[#allocation2 + $0xc1] sm:$0xff] }
  0xc2   : > { %702 = vmatmul.f32.gmra.mxu2 %v2427_v7  ;;  %1368 = vmatpush.msra.mxu0 %v1752_v1 }
  0xc3   : > { %604 = vmatmul.f32.gmra.mxu1 %v2391_v57  ;;  %1142 = vmatpush.msra.mxu2 %v1718_v47  ;;  %v2629_v47 = vld [vmem:[#allocation2 + $0xc9] sm:$0xff] }
  0xc4   : > { %1026 = vmatpush.msra.mxu1 %v1703_v5  ;;  %1256 = vmatpush.msra.mxu3 %v1734_v48 }
  0xc5   : > { %816 = vmatmul.f32.gmra.mxu3 %v2430_v10  ;;  %927 = vmatmul.f32.gmra.mxu0 %v2163_v27 }
  0xc6   : > { %1369 = vmatpush.msra.mxu0 %v1751_v49  ;;  %1027 = vmatpush.msra.mxu1 %v1702_v50 }
  0xc7   : > { %1143 = vmatpush.msra.mxu2 %v1717_v60  ;;  %1257 = vmatpush.msra.mxu3 %v1733_v61 }
  0xc8   : > { %1370 = vmatpush.msra.mxu0 %v1750_v62  ;;  %1028 = vmatpush.msra.mxu1 %v1701_v2 }
  0xca   : > { %705 = vmatmul.f32.gmra.mxu2 %v2447_v16  ;;  %1371 = vmatpush.msra.mxu0 %v1749_v14 }
  0xcb   : > { %607 = vmatmul.f32.gmra.mxu1 %v2410_v0 }
  0xcd   : > { %819 = vmatmul.f32.gmra.mxu3 %v2450_v17  ;;  %930 = vmatmul.f32.gmra.mxu0 %v2220_v45 }
  0xd2   : > { %708 = vmatmul.f32.gmra.mxu2 %v2467_v22 }
  0xd3   : > { %610 = vmatmul.f32.gmra.mxu1 %v2430_v10 }
  0xd5   : > { %822 = vmatmul.f32.gmra.mxu3 %v2470_v23  ;;  %933 = vmatmul.f32.gmra.mxu0 %v2067_v56 }
  0xda   : > { %711 = vmatmul.f32.gmra.mxu2 %v2487_v30 }
  0xdb   : > { %613 = vmatmul.f32.gmra.mxu1 %v2450_v17 }
  0xdd   : > { %825 = vmatmul.f32.gmra.mxu3 %v2490_v31  ;;  %936 = vmatmul.f32.gmra.mxu0 %v2107_v8 }
  0xe2   : > { %714 = vmatmul.f32.gmra.mxu2 %v2507_v37 }
  0xe3   : > { %616 = vmatmul.f32.gmra.mxu1 %v2470_v23 }
  0xe5   : > { %828 = vmatmul.f32.gmra.mxu3 %v2510_v38  ;;  %939 = vmatmul.f32.gmra.mxu0 %v2161_v26 }
  0xea   : > { %717 = vmatmul.f32.gmra.mxu2 %v2527_v42 }
  0xeb   : > { %619 = vmatmul.f32.gmra.mxu1 %v2490_v31 }
  0xed   : > { %831 = vmatmul.f32.gmra.mxu3 %v2530_v43  ;;  %942 = vmatmul.f32.gmra.mxu0 %v2218_v44 }
  0xf2   : > { %720 = vmatmul.f32.gmra.mxu2 %v2547_v52  ;;  %v2552_v58 = vpop.f32.mrf.mxu1 }
  0xf3   : > { %622 = vmatmul.f32.gmra.mxu1 %v2510_v38 }
  0xf5   : > { %834 = vmatmul.f32.gmra.mxu3 %v2550_v53  ;;  %945 = vmatmul.f32.gmra.mxu0 %v2075_v59  ;;  %v2574_v59 = vld [vmem:[#allocation2 + $0xa8] sm:$0xff] }
  0xf8   : > { %v2571_v4 = vpop.f32.mrf.mxu2  ;;  %v525_v12 = vpop.f32.mrf.mxu0 }
  0xfa   : > { %723 = vmatmul.f32.gmra.mxu2 %v2569_v3  ;;  %v2576_v6 = vpop.f32.mrf.mxu3 }
  0xfb   : > { %625 = vmatmul.f32.gmra.mxu1 %v2530_v43  ;;  %v2579_v11 = vpop.f32.mrf.mxu1 }
  0xfd   : > { %837 = vmatmul.f32.gmra.mxu3 %v2574_v59  ;;  %948 = vmatmul.f32.gmra.mxu0 %v2121_v13 }
 0x100   : > { %v2588_v18 = vpop.f32.mrf.mxu2 }
 0x102   : > { %726 = vmatmul.f32.gmra.mxu2 %v2586_v15 }
 0x103   : > { %628 = vmatmul.f32.gmra.mxu1 %v2550_v53  ;;  %v2594_v20 = vpop.f32.mrf.mxu3 }
 0x104   : > { %v2596_v21 = vpop.f32.mrf.mxu1 }
 0x105   : > { %840 = vmatmul.f32.gmra.mxu3 %v2591_v19  ;;  %951 = vmatmul.f32.gmra.mxu0 %v2179_v33  ;;  %v2614_v33 = vld [vmem:[#allocation2 + $0xb2] sm:$0xff] }
 0x106   : > { %v528_v13 = vpop.f32.mrf.mxu0 }
 0x109   : > { %v2602_v25 = vpop.f32.mrf.mxu2 }
 0x10a   : > { %729 = vmatmul.f32.gmra.mxu2 %v2600_v24 }
 0x10b   : > { %631 = vmatmul.f32.gmra.mxu1 %v2574_v59 }
 0x10d   : > { %843 = vmatmul.f32.gmra.mxu3 %v2605_v28  ;;  %954 = vmatmul.f32.gmra.mxu0 %v2238_v51  ;;  %v2610_v29 = vpop.f32.mrf.mxu3 }
 0x10e   : > { %v2612_v32 = vpop.f32.mrf.mxu1 }
 0x110   : > { %v531_v34 = vpop.f32.mrf.mxu0 }
 0x112   : > { %732 = vmatmul.f32.gmra.mxu2 %v2614_v33 }
 0x113   : > { %634 = vmatmul.f32.gmra.mxu1 %v2591_v19  ;;  %v2622_v39 = vpop.f32.mrf.mxu2 }
 0x115   : > { %846 = vmatmul.f32.gmra.mxu3 %v2617_v35  ;;  %957 = vmatmul.f32.gmra.mxu0 %v2619_v36 }
 0x117   : > { %v2626_v40 = vpop.f32.mrf.mxu3 }
 0x118   : > { %v590_v1 = vpop.f32.mrf.mxu1 }
 0x119   : > { %v591_v48 = vadd.f32 %v590_v1, %v525_v12 }
 0x11a   : > { %v534_v5 = vpop.f32.mrf.mxu0  ;;  %1144 = vmatmul.f32.vlgmr.msra.gmra.mxu2 %v2366_v46 }
 0x11b   : > { %1029 = vmatmul.f32.vlgmr.msra.gmra.mxu1 %v2351_v41 }
 0x11d   : > { %960 = vmatmul.f32.gmra.mxu0 %v2629_v47  ;;  %1258 = vmatmul.f32.vlgmr.msra.gmra.mxu3 %v2065_v55  ;;  %v688_v49 = vpop.f32.mrf.mxu2 }
 0x11e   : > { %v736_v50 = vadd.f32 %v688_v49, %v591_v48 }
 0x120   : > { %v593_v60 = vpop.f32.mrf.mxu1  ;;  %v802_v61 = vpop.f32.mrf.mxu3 }
 0x121   : > { %v2634_v62 = vadd.f32 %v802_v61, %v736_v50  ;;  %v594_v46 = vadd.f32 %v593_v60, %v528_v13 }
 0x122   : > { %v2636_v2 = vpop.f32.mrf.mxu0  ;;  %1147 = vmatmul.f32.gmra.mxu2 %v2391_v57 }
 0x123   : > { %1032 = vmatmul.f32.gmra.mxu1 %v2388_v54 }
 0x125   : > { %1261 = vmatmul.f32.gmra.mxu3 %v2109_v9  ;;  %1372 = vmatmul.f32.vlgmr.msra.gmra.mxu0 %v2407_v63  ;;  %v691_v41 = vpop.f32.mrf.mxu2 }
 0x126   : > { %v737_v12 = vadd.f32 %v691_v41, %v594_v46 }
 0x128   : > { %v596_v55 = vpop.f32.mrf.mxu1  ;;  %v805_v14 = vpop.f32.mrf.mxu3 }
 0x129   : > { %v2642_v1 = vadd.f32 %v805_v14, %v737_v12  ;;  %v597_v57 = vadd.f32 %v596_v55, %v531_v34 }
 0x12a   : > { %v2644_v48 = vpop.f32.mrf.mxu0  ;;  %1150 = vmatmul.f32.gmra.mxu2 %v2410_v0 }
 0x12b   : > { %1035 = vmatmul.f32.gmra.mxu1 %v2407_v63 }
 0x12d   : > { %1264 = vmatmul.f32.gmra.mxu3 %v2163_v27  ;;  %1375 = vmatmul.f32.gmra.mxu0 %v2427_v7  ;;  %v694_v9 = vpop.f32.mrf.mxu2 }
 0x12e   : > { %v738_v54 = vadd.f32 %v694_v9, %v597_v57 }
 0x130   : > { %v599_v13 = vpop.f32.mrf.mxu1  ;;  %v808_v49 = vpop.f32.mrf.mxu3 }
 0x131   : > { %v2650_v50 = vadd.f32 %v808_v49, %v738_v54  ;;  %v600_v0 = vadd.f32 %v599_v13, %v534_v5 }
 0x132   : > { %v2652_v60 = vpop.f32.mrf.mxu0  ;;  %1153 = vmatmul.f32.gmra.mxu2 %v2430_v10 }
 0x133   : > { %1038 = vmatmul.f32.gmra.mxu1 %v2427_v7 }
 0x135   : > { %1267 = vmatmul.f32.gmra.mxu3 %v2220_v45  ;;  %1378 = vmatmul.f32.gmra.mxu0 %v2447_v16  ;;  %v697_v27 = vpop.f32.mrf.mxu2 }
 0x136   : > { %v739_v63 = vadd.f32 %v697_v27, %v600_v0 }
 0x138   : > { %v602_v34 = vpop.f32.mrf.mxu1  ;;  %v811_v61 = vpop.f32.mrf.mxu3 }
 0x139   : > { %v2658_v46 = vadd.f32 %v811_v61, %v739_v63  ;;  %v603_v10 = vadd.f32 %v602_v34, %v2552_v58  ;;  %v1217_v61 = vld [vmem:[#allocation2 + $0x91] sm:$0xff] }
 0x13a   : > { %v2660_v41 = vpop.f32.mrf.mxu0  ;;  %1156 = vmatmul.f32.gmra.mxu2 %v2450_v17 }
 0x13b   : > { %1041 = vmatmul.f32.gmra.mxu1 %v2447_v16 }
 0x13d   : > { %1270 = vmatmul.f32.gmra.mxu3 %v2067_v56  ;;  %1381 = vmatmul.f32.gmra.mxu0 %v2467_v22  ;;  %v700_v45 = vpop.f32.mrf.mxu2 }
 0x13e   : > { %v740_v7 = vadd.f32 %v700_v45, %v603_v10 }
 0x140   : > { %v605_v5 = vpop.f32.mrf.mxu1  ;;  %v814_v12 = vpop.f32.mrf.mxu3 }
 0x141   : > { %v2667_v55 = vadd.f32 %v814_v12, %v740_v7  ;;  %v606_v16 = vadd.f32 %v605_v5, %v2579_v11  ;;  %v1218_v5 = vld [vmem:[#allocation2 + $0x99] sm:$0xff] }
 0x142   : > { %v2669_v14 = vpop.f32.mrf.mxu0  ;;  %1159 = vmatmul.f32.gmra.mxu2 %v2470_v23 }
 0x143   : > { %1044 = vmatmul.f32.gmra.mxu1 %v2467_v22 }
 0x145   : > { %1273 = vmatmul.f32.gmra.mxu3 %v2107_v8  ;;  %1384 = vmatmul.f32.gmra.mxu0 %v2487_v30  ;;  %v703_v56 = vpop.f32.mrf.mxu2 }
 0x146   : > { %v741_v17 = vadd.f32 %v703_v56, %v606_v16 }
 0x148   : > { %v608_v58 = vpop.f32.mrf.mxu1  ;;  %v817_v57 = vpop.f32.mrf.mxu3 }
 0x149   : > { %v2676_v9 = vadd.f32 %v817_v57, %v741_v17  ;;  %v609_v22 = vadd.f32 %v608_v58, %v2596_v21  ;;  %v1219_v57 = vld [vmem:[#allocation2 + $0xa9] sm:$0xff] }
 0x14a   : > { %v2678_v54 = vpop.f32.mrf.mxu0  ;;  %1162 = vmatmul.f32.gmra.mxu2 %v2490_v31 }
 0x14b   : > { %1047 = vmatmul.f32.gmra.mxu1 %v2487_v30 }
 0x14d   : > { %1276 = vmatmul.f32.gmra.mxu3 %v2161_v26  ;;  %1387 = vmatmul.f32.gmra.mxu0 %v2507_v37  ;;  %v706_v8 = vpop.f32.mrf.mxu2 }
 0x14e   : > { %v742_v23 = vadd.f32 %v706_v8, %v609_v22 }
 0x150   : > { %v611_v11 = vpop.f32.mrf.mxu1  ;;  %v820_v13 = vpop.f32.mrf.mxu3 }
 0x151   : > { %v2685_v49 = vadd.f32 %v820_v13, %v742_v23  ;;  %v612_v30 = vadd.f32 %v611_v11, %v2612_v32 }
 0x152   : > { %v2687_v0 = vpop.f32.mrf.mxu0  ;;  %1165 = vmatmul.f32.gmra.mxu2 %v2510_v38 }
 0x153   : > { %1050 = vmatmul.f32.gmra.mxu1 %v2507_v37 }
 0x155   : > { %1279 = vmatmul.f32.gmra.mxu3 %v2218_v44  ;;  %1390 = vmatmul.f32.gmra.mxu0 %v2527_v42  ;;  %v709_v26 = vpop.f32.mrf.mxu2 }
 0x156   : > { %v743_v31 = vadd.f32 %v709_v26, %v612_v30 }
 0x158   : > { %v614_v21 = vpop.f32.mrf.mxu1  ;;  %v823_v27 = vpop.f32.mrf.mxu3 }
 0x159   : > { %v2694_v63 = vadd.f32 %v823_v27, %v743_v31  ;;  %v615_v37 = vadd.f32 %v614_v21, %v2571_v4 }
 0x15a   : > { %v2696_v34 = vpop.f32.mrf.mxu0  ;;  %1168 = vmatmul.f32.gmra.mxu2 %v2530_v43 }
 0x15b   : > { %1053 = vmatmul.f32.gmra.mxu1 %v2527_v42 }
 0x15d   : > { %1282 = vmatmul.f32.gmra.mxu3 %v1217_v61  ;;  %1393 = vmatmul.f32.gmra.mxu0 %v2547_v52  ;;  %v712_v44 = vpop.f32.mrf.mxu2 }
 0x15e   : > { %v744_v38 = vadd.f32 %v712_v44, %v615_v37 }
 0x160   : > { %v617_v32 = vpop.f32.mrf.mxu1  ;;  %v826_v10 = vpop.f32.mrf.mxu3 }
 0x161   : > { %v858_v45 = vadd.f32 %v826_v10, %v744_v38  ;;  %v618_v42 = vadd.f32 %v617_v32, %v2588_v18  ;;  %v1335_v32 = vld [vmem:[#allocation2 + $0xc2] sm:$0xff]  ;;  %v1109_v10 = vld [vmem:[#allocation2 + $0xd8] sm:$0xff] }
 0x162   : > { %v940_v7 = vpop.f32.mrf.mxu0  ;;  %1171 = vmatmul.f32.gmra.mxu2 %v2550_v53 }
 0x163   : > { %v2703_v12 = vadd.f32 %v940_v7, %v858_v45  ;;  %1056 = vmatmul.f32.gmra.mxu1 %v2547_v52 }
 0x165   : > { %1285 = vmatmul.f32.gmra.mxu3 %v1218_v5  ;;  %1396 = vmatmul.f32.gmra.mxu0 %v2569_v3  ;;  %v715_v43 = vpop.f32.mrf.mxu2 }
 0x166   : > { %v745_v4 = vadd.f32 %v715_v43, %v618_v42  ;;  %v1223_v43 = vld [vmem:[#allocation2 + $0xd9] sm:$0xff] }
 0x168   : > { %v620_v16 = vpop.f32.mrf.mxu1  ;;  %v829_v56 = vpop.f32.mrf.mxu3 }
 0x169   : > { %v859_v17 = vadd.f32 %v829_v56, %v745_v4  ;;  %v621_v52 = vadd.f32 %v620_v16, %v2602_v25  ;;  %v1110_v16 = vld [vmem:[#allocation2 + $0xe0] sm:$0xff] }
 0x16a   : > { %v943_v58 = vpop.f32.mrf.mxu0  ;;  %1174 = vmatmul.f32.gmra.mxu2 %v2574_v59 }
 0x16b   : > { %v2709_v53 = vadd.f32 %v943_v58, %v859_v17  ;;  %1059 = vmatmul.f32.gmra.mxu1 %v2569_v3 }
 0x16d   : > { %1288 = vmatmul.f32.gmra.mxu3 %v1219_v57  ;;  %1399 = vmatmul.f32.gmra.mxu0 %v2586_v15  ;;  %v718_v18 = vpop.f32.mrf.mxu2 }
 0x16e   : > { %v746_v22 = vadd.f32 %v718_v18, %v621_v52  ;;  %v1224_v52 = vld [vmem:[#allocation2 + $0xe1] sm:$0xff] }
 0x16f   : > { %v1337_v18 = vld [vmem:[#allocation2 + $0xda] sm:$0xff] }
 0x170   : > { %v623_v8 = vpop.f32.mrf.mxu1  ;;  %v832_v23 = vpop.f32.mrf.mxu3 }
 0x171   : > { %v860_v11 = vadd.f32 %v832_v23, %v746_v22  ;;  %v624_v59 = vadd.f32 %v623_v8, %v2622_v39 }
 0x172   : > { %v946_v13 = vpop.f32.mrf.mxu0  ;;  %1177 = vmatmul.f32.gmra.mxu2 %v2591_v19 }
 0x173   : > { %v2715_v30 = vadd.f32 %v946_v13, %v860_v11  ;;  %1062 = vmatmul.f32.gmra.mxu1 %v2586_v15 }
 0x175   : > { %1291 = vmatmul.f32.gmra.mxu3 %v2238_v51  ;;  %1402 = vmatmul.f32.gmra.mxu0 %v2600_v24  ;;  %v721_v3 = vpop.f32.mrf.mxu2 }
 0x176   : > { %v747_v25 = vadd.f32 %v721_v3, %v624_v59  ;;  %v964_v3 = vadd.f32 %v2636_v2, %v2634_v62  ;;  %v965_v62 = vadd.f32 %v2644_v48, %v2642_v1 }
 0x178   : > { %v626_v26 = vpop.f32.mrf.mxu1  ;;  %v835_v31 = vpop.f32.mrf.mxu3 }
 0x179   : > { %v861_v21 = vadd.f32 %v835_v31, %v747_v25  ;;  %v627_v15 = vadd.f32 %v626_v26, %v2576_v6  ;;  %v1338_v26 = vld [vmem:[#allocation2 + $0xe2] sm:$0xff] }
 0x17a   : > { %v949_v27 = vpop.f32.mrf.mxu0  ;;  %1180 = vmatmul.f32.gmra.mxu2 %v2605_v28 }
 0x17b   : > { %v2722_v61 = vadd.f32 %v949_v27, %v861_v21  ;;  %1065 = vmatmul.f32.gmra.mxu1 %v2600_v24 }
 0x17d   : > { %1294 = vmatmul.f32.gmra.mxu3 %v2619_v36  ;;  %1405 = vmatmul.f32.gmra.mxu0 %v2614_v33  ;;  %v724_v51 = vpop.f32.mrf.mxu2 }
 0x17e   : > { %v748_v19 = vadd.f32 %v724_v51, %v627_v15 }
 0x180   : > { %v629_v39 = vpop.f32.mrf.mxu1  ;;  %v838_v37 = vpop.f32.mrf.mxu3 }
 0x181   : > { %v862_v44 = vadd.f32 %v838_v37, %v748_v19  ;;  %v630_v24 = vadd.f32 %v629_v39, %v2594_v20  ;;  %v2747_v39 = vld [vmem:[%s2811_s4] ss:$0 sm:$0xff] }
 0x182   : > { %v952_v38 = vpop.f32.mrf.mxu0  ;;  %1183 = vmatmul.f32.gmra.mxu2 %v2617_v35  ;;  %v1336_v35 = vld [vmem:[#allocation2 + $0xca] sm:$0xff] }
 0x183   : > { %v2729_v28 = vadd.f32 %v952_v38, %v862_v44  ;;  %1068 = vmatmul.f32.gmra.mxu1 %v2614_v33 }
 0x185   : > { %1297 = vmatmul.f32.gmra.mxu3 %v2629_v47  ;;  %1408 = vmatmul.f32.gmra.mxu0 %v1335_v32  ;;  %v727_v6 = vpop.f32.mrf.mxu2 }
 0x186   : > { %v749_v36 = vadd.f32 %v727_v6, %v630_v24 }
 0x188   : > { %v632_v45 = vpop.f32.mrf.mxu1  ;;  %v841_v7 = vpop.f32.mrf.mxu3 }
 0x189   : > { %v863_v5 = vadd.f32 %v841_v7, %v749_v36  ;;  %v633_v33 = vadd.f32 %v632_v45, %v2610_v29  ;;  %v966_v45 = vadd.f32 %v2652_v60, %v2650_v50 }
 0x18a   : > { %v955_v42 = vpop.f32.mrf.mxu0  ;;  %1186 = vmatmul.f32.gmra.mxu2 %v1109_v10 }
 0x18b   : > { %v2734_v4 = vadd.f32 %v955_v42, %v863_v5  ;;  %1071 = vmatmul.f32.gmra.mxu1 %v1335_v32 }
 0x18d   : > { %1300 = vmatmul.f32.gmra.mxu3 %v1223_v43  ;;  %1411 = vmatmul.f32.gmra.mxu0 %v1336_v35  ;;  %v730_v20 = vpop.f32.mrf.mxu2 }
 0x18e   : > { %v750_v47 = vadd.f32 %v730_v20, %v633_v33 }
 0x190   : > { %v635_v56 = vpop.f32.mrf.mxu1  ;;  %v844_v17 = vpop.f32.mrf.mxu3 }
 0x191   : > { %v864_v58 = vadd.f32 %v844_v17, %v750_v47  ;;  %v636_v8 = vadd.f32 %v635_v56, %v2626_v40 }
 0x192   : > { %v958_v57 = vpop.f32.mrf.mxu0  ;;  %1189 = vmatmul.f32.gmra.mxu2 %v1110_v16 }
 0x193   : > { %v2737_v22 = vadd.f32 %v958_v57, %v864_v58  ;;  %1074 = vmatmul.f32.gmra.mxu1 %v1336_v35  ;;  %v967_v58 = vadd.f32 %v2660_v41, %v2658_v46 }
 0x195   : > { %1303 = vmatmul.f32.gmra.mxu3 %v1224_v52  ;;  %1414 = vmatmul.f32.gmra.mxu0 %v1337_v18  ;;  %v733_v29 = vpop.f32.mrf.mxu2 }
 0x196   : > { %v751_v23 = vadd.f32 %v733_v29, %v636_v8 }
 0x198   : > { %v847_v11 = vpop.f32.mrf.mxu3  ;;  %v1030_v13 = vpop.f32.mrf.mxu1 }
 0x199   : > { %v865_v59 = vadd.f32 %v847_v11, %v751_v23  ;;  %v1078_v21 = vadd.f32 %v1030_v13, %v964_v3 }
 0x19a   : > { %v961_v25 = vpop.f32.mrf.mxu0 }
 0x19b   : > { %v2742_v31 = vadd.f32 %v961_v25, %v865_v59  ;;  %v968_v25 = vadd.f32 %v2669_v14, %v2667_v55 }
 0x19d   : > { %1417 = vmatmul.f32.gmra.mxu0 %v1338_v26  ;;  %v1145_v27 = vpop.f32.mrf.mxu2 }
 0x19e   : > { %v1193_v15 = vadd.f32 %v1145_v27, %v1078_v21 }
 0x1a0   : > { %v1033_v40 = vpop.f32.mrf.mxu1  ;;  %v1259_v51 = vpop.f32.mrf.mxu3 }
 0x1a1   : > { %v1307_v19 = vadd.f32 %v1259_v51, %v1193_v15  ;;  %v1079_v44 = vadd.f32 %v1033_v40, %v965_v62 }
 0x1a2   : > { %v1373_v2 = vpop.f32.mrf.mxu0 }
 0x1a3   : > { %v1421_v37 = vadd.f32 %v1373_v2, %v1307_v19 }
 0x1a5   : > { %v1441_v38 = vadd.f32 %v2747_v39, %v1421_v37  ;;  %v1148_v32 = vpop.f32.mrf.mxu2 }
 0x1a6   : > { %v1194_v24 = vadd.f32 %v1148_v32, %v1079_v44  ;;  %v969_v44 = vadd.f32 %v2678_v54, %v2676_v9 }
 0x1a7   : > { %1457 = vst [vmem:[%s1906_s10] sm:$0xff] %v1441_v38  ;;  %v1494_v35 = vmul.f32 %v1441_v38, %v1441_v38 }
 0x1a8   : > { %v1036_v6 = vpop.f32.mrf.mxu1  ;;  %v1262_v36 = vpop.f32.mrf.mxu3 }
 0x1a9   : > { %v1308_v10 = vadd.f32 %v1262_v36, %v1194_v24  ;;  %v1080_v42 = vadd.f32 %v1036_v6, %v966_v45 }
 0x1aa   : > { %v1376_v7 = vpop.f32.mrf.mxu0 }
 0x1ab   : > { %v1422_v5 = vadd.f32 %v1376_v7, %v1308_v10 }
 0x1ad   : > { %v1442_v1 = vadd.f32 %v2747_v39, %v1422_v5  ;;  %v1151_v48 = vpop.f32.mrf.mxu2 }
 0x1ae   : > { %v1195_v43 = vadd.f32 %v1151_v48, %v1080_v42 }
 0x1af   : > { %1458 = vst [vmem:[%s1906_s10 + $0x8] sm:$0xff] %v1442_v1  ;;  %v1473_v33 = vadd.f32 %v1442_v1, %v1441_v38  ;;  %v1495_v20 = vmul.f32 %v1442_v1, %v1442_v1  ;;  %v970_v1 = vadd.f32 %v2687_v0, %v2685_v49 }
 0x1b0   : > { %v1039_v47 = vpop.f32.mrf.mxu1  ;;  %v1265_v16 = vpop.f32.mrf.mxu3 }
 0x1b1   : > { %v1510_v56 = vadd.f32 %v1495_v20, %v1494_v35  ;;  %v1309_v17 = vadd.f32 %v1265_v16, %v1195_v43  ;;  %v1081_v57 = vadd.f32 %v1039_v47, %v967_v58 }
 0x1b2   : > { %v1379_v50 = vpop.f32.mrf.mxu0 }
 0x1b3   : > { %v1423_v60 = vadd.f32 %v1379_v50, %v1309_v17  ;;  %v971_v50 = vadd.f32 %v2696_v34, %v2694_v63 }
 0x1b5   : > { %v1443_v52 = vadd.f32 %v2747_v39, %v1423_v60  ;;  %v1154_v18 = vpop.f32.mrf.mxu2 }
 0x1b6   : > { %v1196_v8 = vadd.f32 %v1154_v18, %v1081_v57 }
 0x1b7   : > { %1459 = vst [vmem:[%s1906_s10 + $0x10] sm:$0xff] %v1443_v52  ;;  %v1474_v29 = vadd.f32 %v1473_v33, %v1443_v52  ;;  %v1496_v23 = vmul.f32 %v1443_v52, %v1443_v52 }
 0x1b8   : > { %v1042_v11 = vpop.f32.mrf.mxu1  ;;  %v1268_v13 = vpop.f32.mrf.mxu3 }
 0x1b9   : > { %v1511_v59 = vadd.f32 %v1510_v56, %v1496_v23  ;;  %v1310_v3 = vadd.f32 %v1268_v13, %v1196_v8  ;;  %v1082_v41 = vadd.f32 %v1042_v11, %v968_v25 }
 0x1ba   : > { %v1382_v26 = vpop.f32.mrf.mxu0 }
 0x1bb   : > { %v1424_v46 = vadd.f32 %v1382_v26, %v1310_v3 }
 0x1bd   : > { %v1444_v21 = vadd.f32 %v2747_v39, %v1424_v46  ;;  %v1157_v27 = vpop.f32.mrf.mxu2 }
 0x1be   : > { %v1197_v15 = vadd.f32 %v1157_v27, %v1082_v41 }
 0x1bf   : > { %1460 = vst [vmem:[%s1906_s10 + $0x18] sm:$0xff] %v1444_v21  ;;  %v1475_v40 = vadd.f32 %v1474_v29, %v1444_v21  ;;  %v1497_v51 = vmul.f32 %v1444_v21, %v1444_v21 }
 0x1c0   : > { %v1045_v19 = vpop.f32.mrf.mxu1  ;;  %v1271_v62 = vpop.f32.mrf.mxu3 }
 0x1c1   : > { %v1512_v2 = vadd.f32 %v1511_v59, %v1497_v51  ;;  %v1311_v37 = vadd.f32 %v1271_v62, %v1197_v15  ;;  %v1083_v14 = vadd.f32 %v1045_v19, %v969_v44 }
 0x1c2   : > { %v1385_v38 = vpop.f32.mrf.mxu0 }
 0x1c3   : > { %v1425_v55 = vadd.f32 %v1385_v38, %v1311_v37 }
 0x1c5   : > { %v1445_v32 = vadd.f32 %v2747_v39, %v1425_v55  ;;  %v1160_v24 = vpop.f32.mrf.mxu2 }
 0x1c6   : > { %v1198_v6 = vadd.f32 %v1160_v24, %v1083_v14 }
 0x1c7   : > { %1461 = vst [vmem:[%s1906_s10 + $0x20] sm:$0xff] %v1445_v32  ;;  %v1476_v36 = vadd.f32 %v1475_v40, %v1445_v32  ;;  %v1498_v10 = vmul.f32 %v1445_v32, %v1445_v32 }
 0x1c8   : > { %v1048_v45 = vpop.f32.mrf.mxu1  ;;  %v1274_v7 = vpop.f32.mrf.mxu3 }
 0x1c9   : > { %v1513_v5 = vadd.f32 %v1512_v2, %v1498_v10  ;;  %v1312_v42 = vadd.f32 %v1274_v7, %v1198_v6  ;;  %v1084_v54 = vadd.f32 %v1048_v45, %v970_v1 }
 0x1ca   : > { %v1388_v48 = vpop.f32.mrf.mxu0 }
 0x1cb   : > { %v1426_v9 = vadd.f32 %v1388_v48, %v1312_v42 }
 0x1cd   : > { %v1446_v43 = vadd.f32 %v2747_v39, %v1426_v9  ;;  %v1163_v35 = vpop.f32.mrf.mxu2 }
 0x1ce   : > { %v1199_v33 = vadd.f32 %v1163_v35, %v1084_v54 }
 0x1cf   : > { %1462 = vst [vmem:[%s1906_s10 + $0x28] sm:$0xff] %v1446_v43  ;;  %v1477_v20 = vadd.f32 %v1476_v36, %v1446_v43  ;;  %v1499_v47 = vmul.f32 %v1446_v43, %v1446_v43 }
 0x1d0   : > { %v1051_v16 = vpop.f32.mrf.mxu1  ;;  %v1277_v56 = vpop.f32.mrf.mxu3 }
 0x1d1   : > { %v1514_v17 = vadd.f32 %v1513_v5, %v1499_v47  ;;  %v1313_v58 = vadd.f32 %v1277_v56, %v1199_v33  ;;  %v1085_v0 = vadd.f32 %v1051_v16, %v971_v50 }
 0x1d2   : > { %v1391_v60 = vpop.f32.mrf.mxu0 }
 0x1d3   : > { %v1427_v49 = vadd.f32 %v1391_v60, %v1313_v58 }
 0x1d5   : > { %v1447_v57 = vadd.f32 %v2747_v39, %v1427_v49  ;;  %v1166_v52 = vpop.f32.mrf.mxu2 }
 0x1d6   : > { %v1200_v18 = vadd.f32 %v1166_v52, %v1085_v0 }
 0x1d7   : > { %1463 = vst [vmem:[%s1906_s10 + $0x30] sm:$0xff] %v1447_v57  ;;  %v1478_v8 = vadd.f32 %v1477_v20, %v1447_v57  ;;  %v1500_v29 = vmul.f32 %v1447_v57, %v1447_v57 }
 0x1d8   : > { %v1054_v23 = vpop.f32.mrf.mxu1  ;;  %v1280_v11 = vpop.f32.mrf.mxu3 }
 0x1d9   : > { %v1515_v13 = vadd.f32 %v1514_v17, %v1500_v29  ;;  %v1314_v59 = vadd.f32 %v1280_v11, %v1200_v18  ;;  %v1086_v26 = vadd.f32 %v1054_v23, %v2703_v12 }
 0x1da   : > { %v1394_v3 = vpop.f32.mrf.mxu0 }
 0x1db   : > { %v1428_v25 = vadd.f32 %v1394_v3, %v1314_v59 }
 0x1dd   : > { %v1448_v63 = vadd.f32 %v2747_v39, %v1428_v25  ;;  %v1169_v34 = vpop.f32.mrf.mxu2 }
 0x1de   : > { %v1201_v46 = vadd.f32 %v1169_v34, %v1086_v26 }
 0x1df   : > { %1464 = vst [vmem:[%s1906_s10 + $0x38] sm:$0xff] %v1448_v63  ;;  %v1479_v41 = vadd.f32 %v1478_v8, %v1448_v63  ;;  %v1501_v21 = vmul.f32 %v1448_v63, %v1448_v63 }
 0x1e0   : > { %v1057_v27 = vpop.f32.mrf.mxu1  ;;  %v1283_v15 = vpop.f32.mrf.mxu3 }
 0x1e1   : > { %v1516_v40 = vadd.f32 %v1515_v13, %v1501_v21  ;;  %v1315_v51 = vadd.f32 %v1283_v15, %v1201_v46  ;;  %v1087_v2 = vadd.f32 %v1057_v27, %v2709_v53 }
 0x1e2   : > { %v1397_v19 = vpop.f32.mrf.mxu0 }
 0x1e3   : > { %v1429_v62 = vadd.f32 %v1397_v19, %v1315_v51 }
 0x1e5   : > { %v1449_v37 = vadd.f32 %v2747_v39, %v1429_v62  ;;  %v1172_v12 = vpop.f32.mrf.mxu2 }
 0x1e6   : > { %v1202_v44 = vadd.f32 %v1172_v12, %v1087_v2 }
 0x1e7   : > { %1465 = vst [vmem:[%s1906_s10 + $0x40] sm:$0xff] %v1449_v37  ;;  %v1480_v38 = vadd.f32 %v1479_v41, %v1449_v37  ;;  %v1502_v55 = vmul.f32 %v1449_v37, %v1449_v37 }
 0x1e8   : > { %v1060_v14 = vpop.f32.mrf.mxu1  ;;  %v1286_v32 = vpop.f32.mrf.mxu3 }
 0x1e9   : > { %v1517_v24 = vadd.f32 %v1516_v40, %v1502_v55  ;;  %v1316_v6 = vadd.f32 %v1286_v32, %v1202_v44  ;;  %v1088_v45 = vadd.f32 %v1060_v14, %v2715_v30 }
 0x1ea   : > { %v1400_v36 = vpop.f32.mrf.mxu0 }
 0x1eb   : > { %v1430_v10 = vadd.f32 %v1400_v36, %v1316_v6 }
 0x1ed   : > { %v1450_v7 = vadd.f32 %v2747_v39, %v1430_v10  ;;  %v1175_v53 = vpop.f32.mrf.mxu2 }
 0x1ee   : > { %v1203_v5 = vadd.f32 %v1175_v53, %v1088_v45 }
 0x1ef   : > { %1466 = vst [vmem:[%s1906_s10 + $0x48] sm:$0xff] %v1450_v7  ;;  %v1481_v42 = vadd.f32 %v1480_v38, %v1450_v7  ;;  %v1503_v1 = vmul.f32 %v1450_v7, %v1450_v7 }
 0x1f0   : > { %v1063_v48 = vpop.f32.mrf.mxu1  ;;  %v1289_v9 = vpop.f32.mrf.mxu3 }
 0x1f1   : > { %v1518_v54 = vadd.f32 %v1517_v24, %v1503_v1  ;;  %v1317_v43 = vadd.f32 %v1289_v9, %v1203_v5  ;;  %v1089_v20 = vadd.f32 %v1063_v48, %v2722_v61 }
 0x1f2   : > { %v1403_v35 = vpop.f32.mrf.mxu0 }
 0x1f3   : > { %v1431_v33 = vadd.f32 %v1403_v35, %v1317_v43 }
 0x1f5   : > { %v1451_v47 = vadd.f32 %v2747_v39, %v1431_v33  ;;  %v1178_v30 = vpop.f32.mrf.mxu2 }
 0x1f6   : > { %v1204_v16 = vadd.f32 %v1178_v30, %v1089_v20 }
 0x1f7   : > { %1467 = vst [vmem:[%s1906_s10 + $0x50] sm:$0xff] %v1451_v47  ;;  %v1482_v56 = vadd.f32 %v1481_v42, %v1451_v47  ;;  %v1504_v17 = vmul.f32 %v1451_v47, %v1451_v47 }
 0x1f8   : > { %v1066_v58 = vpop.f32.mrf.mxu1  ;;  %v1292_v50 = vpop.f32.mrf.mxu3 }
 0x1f9   : > { %v1519_v60 = vadd.f32 %v1518_v54, %v1504_v17  ;;  %v1318_v49 = vadd.f32 %v1292_v50, %v1204_v16  ;;  %v1090_v52 = vadd.f32 %v1066_v58, %v2729_v28 }
 0x1fa   : > { %v1406_v0 = vpop.f32.mrf.mxu0 }
 0x1fb   : > { %v1432_v57 = vadd.f32 %v1406_v0, %v1318_v49 }
 0x1fd   : > { %v1452_v18 = vadd.f32 %v2747_v39, %v1432_v57  ;;  %v1181_v61 = vpop.f32.mrf.mxu2 }
 0x1fe   : > { %v1205_v8 = vadd.f32 %v1181_v61, %v1090_v52 }
 0x1ff   : > { %1468 = vst [vmem:[%s1906_s10 + $0x58] sm:$0xff] %v1452_v18  ;;  %v1483_v29 = vadd.f32 %v1482_v56, %v1452_v18  ;;  %v1505_v23 = vmul.f32 %v1452_v18, %v1452_v18 }
 0x200   : > { %v1069_v11 = vpop.f32.mrf.mxu1  ;;  %v1295_v13 = vpop.f32.mrf.mxu3 }
 0x201   : > { %v1520_v59 = vadd.f32 %v1519_v60, %v1505_v23  ;;  %v1319_v3 = vadd.f32 %v1295_v13, %v1205_v8  ;;  %v1091_v63 = vadd.f32 %v1069_v11, %v2734_v4 }
 0x202   : > { %v1409_v25 = vpop.f32.mrf.mxu0 }
 0x203   : > { %v1433_v26 = vadd.f32 %v1409_v25, %v1319_v3 }
 0x205   : > { %v1453_v34 = vadd.f32 %v2747_v39, %v1433_v26  ;;  %v1184_v28 = vpop.f32.mrf.mxu2 }
 0x206   : > { %v1206_v46 = vadd.f32 %v1184_v28, %v1091_v63 }
 0x207   : > { %1469 = vst [vmem:[%s1906_s10 + $0x60] sm:$0xff] %v1453_v34  ;;  %v1484_v41 = vadd.f32 %v1483_v29, %v1453_v34  ;;  %v1506_v21 = vmul.f32 %v1453_v34, %v1453_v34 }
 0x208   : > { %v1072_v27 = vpop.f32.mrf.mxu1  ;;  %v1298_v15 = vpop.f32.mrf.mxu3 }
 0x209   : > { %v1521_v40 = vadd.f32 %v1520_v59, %v1506_v21  ;;  %v1320_v51 = vadd.f32 %v1298_v15, %v1206_v46  ;;  %v1092_v2 = vadd.f32 %v1072_v27, %v2737_v22 }
 0x20a   : > { %v1412_v19 = vpop.f32.mrf.mxu0 }
 0x20b   : > { %v1434_v62 = vadd.f32 %v1412_v19, %v1320_v51 }
 0x20d   : > { %v1454_v37 = vadd.f32 %v2747_v39, %v1434_v62  ;;  %v1187_v4 = vpop.f32.mrf.mxu2 }
 0x20e   : > { %v1207_v12 = vadd.f32 %v1187_v4, %v1092_v2 }
 0x20f   : > { %1470 = vst [vmem:[%s1906_s10 + $0x68] sm:$0xff] %v1454_v37  ;;  %v1485_v44 = vadd.f32 %v1484_v41, %v1454_v37  ;;  %v1507_v38 = vmul.f32 %v1454_v37, %v1454_v37 }
 0x210   : > { %v1301_v55 = vpop.f32.mrf.mxu3  ;;  %v1075_v32 = vpop.f32.mrf.mxu1 }
 0x211   : > { %v1522_v14 = vadd.f32 %v1521_v40, %v1507_v38  ;;  %v1321_v24 = vadd.f32 %v1301_v55, %v1207_v12  ;;  %v1093_v10 = vadd.f32 %v1075_v32, %v2742_v31 }
 0x212   : > { %v1415_v6 = vpop.f32.mrf.mxu0 }
 0x213   : > { %v1435_v36 = vadd.f32 %v1415_v6, %v1321_v24 }
 0x215   : > { %v1455_v45 = vadd.f32 %v2747_v39, %v1435_v36  ;;  %v1190_v22 = vpop.f32.mrf.mxu2 }
 0x216   : > { %v1208_v7 = vadd.f32 %v1190_v22, %v1093_v10 }
 0x217   : > { %1471 = vst [vmem:[%s1906_s10 + $0x70] sm:$0xff] %v1455_v45  ;;  %v1486_v53 = vadd.f32 %v1485_v44, %v1455_v45  ;;  %v1508_v5 = vmul.f32 %v1455_v45, %v1455_v45 }
 0x218   : > { %v1304_v42 = vpop.f32.mrf.mxu3 }
 0x219   : > { %v1523_v1 = vadd.f32 %v1522_v14, %v1508_v5  ;;  %v1322_v48 = vadd.f32 %v1304_v42, %v1208_v7 }
 0x21a   : > { %v1418_v9 = vpop.f32.mrf.mxu0 }
 0x21b   : > { %v1436_v54 = vadd.f32 %v1418_v9, %v1322_v48 }
 0x21d   : > { %v1456_v43 = vadd.f32 %v2747_v39, %v1436_v54 }
 0x21f   : > { %1472 = vst [vmem:[%s1906_s10 + $0x78] sm:$0xff] %v1456_v43  ;;  %v1487_v35 = vadd.f32 %v1486_v53, %v1456_v43  ;;  %v1509_v33 = vmul.f32 %v1456_v43, %v1456_v43 }
 0x221   : > { %v1488_v20 = vrot.slane %v1487_v35, 4  ;;  %v1524_v31 = vadd.f32 %v1523_v1, %v1509_v33 }
 0x223   : > { %v1489_v47 = vadd.f32 %v1488_v20, %v1487_v35  ;;  %v1525_v30 = vrot.slane %v1524_v31, 4 }
 0x225   : > { %v1490_v16 = vrot.slane %v1489_v47, 2  ;;  %v1526_v56 = vadd.f32 %v1525_v30, %v1524_v31 }
 0x227   : > { %v1491_v17 = vadd.f32 %v1490_v16, %v1489_v47  ;;  %v1527_v58 = vrot.slane %v1526_v56, 2 }
 0x229   : > { %v1492_v50 = vrot.slane %v1491_v17, 1  ;;  %v1528_v60 = vadd.f32 %v1527_v58, %v1526_v56 }
 0x22b   : > { %v1529_v49 = vrot.slane %v1528_v60, 1  ;;  %v1493_v0 = vadd.f32 %v1492_v50, %v1491_v17 }
 0x22d   : > { %v1530_v57 = vadd.f32 %v1529_v49, %v1528_v60 }
 0x22f   : > { %v1532_v52 = vsel %vm1531_vm4, %v1493_v0, %v1530_v57 }
 0x230   : > { %1533 = vst [vmem:[%s1900_s7] sm:$0x3] %v1532_v52 }
 0x231 PF: > { %s17_s21 = sadd.s32 1, %s1836_s21  }
 0x232   : > { %p14_p7 = scmp.ge.s32.totalorder %s17_s21, 4  }
 0x234   :  { %16 = sbr.rel (!%p14_p7) target bundleno = 1 (0x1), region = 101 }

// kernel: tile.186
= control target key start
LH: loop header
LB: loop body
LE: loop exit
PB: predicated region body
PF: predicated region fallthrough
CT: control target
= control target key end

     0   :  { %s22_s0 = inlined_call_operand.vmem [shape: f32[3], index: 0, kind: input, shape index: {}]   ;;  %s23_s1 = inlined_call_operand.vmem [shape: f32[2,3], index: 1, kind: output, shape index: {}]  }
   0x1   :  { %v4_v0 = vld [vmem:[%s22_s0] ss:$0 sm:$0xff] }
   0x2   :  { %5 = vst [vmem:[%s23_s1] sm:$0x3] %v4_v0 }

// kernel: tile.189
= control target key start
LH: loop header
LB: loop body
LE: loop exit
PB: predicated region body
PF: predicated region fallthrough
CT: control target
= control target key end

     0   :  { %vm7_vm0 = vcmask 23552   ;;  %vm13_vm1 = vcmask 48152   ;;  %s39_s0 = inlined_call_operand.vmem [shape: f32[2,3], index: 0, kind: input, shape index: {}]   ;;  %s40_s1 = inlined_call_operand.vmem [shape: f32[1,6], index: 1, kind: output, shape index: {}]  }
   0x1   :  { %v4_v0 = vld [vmem:[%s39_s0] sm:$0x3]  ;;  %s22_s0 = smov 3  }
   0x2   :  { %5 = vst [vmem:[#allocation1] sm:$0x3] %v4_v0 }
   0x9   :  { %v10_v1 = vld [vmem:[#allocation1 + $0x1] sm:$0x1]   ;;  %v6_v2 = vld [vmem:[#allocation1] sm:$0x1]  }
   0xa   :  { %11 = vrot.lane.b32.xlu0 %v10_v1, %s22_s0  ;;  %8 = vst.msk [vmem:[#allocation0] sm:$0x1] %vm7_vm0, %v6_v2  }
  0x7c   :  { %v12_v3 = vpop.permute.xlu0 %11  }
  0x7d   :  { %14 = vst.msk [vmem:[#allocation0] sm:$0x1] %vm13_vm1, %v12_v3  }
  0x84   :  { %v17_v4 = vld [vmem:[#allocation0] sm:$0x1] }
  0x85   :  { %20 = vst [vmem:[%s40_s1] sm:$0x1] %v17_v4 }

// kernel: squeeze.22
= control target key start
LH: loop header
LB: loop body
LE: loop exit
PB: predicated region body
PF: predicated region fallthrough
CT: control target
= control target key end

     0   :  { %vm7_vm0 = vcmask 23552   ;;  %s39_s0 = inlined_call_operand.vmem [shape: f32[6], index: 0, kind: input, shape index: {}]   ;;  %s40_s1 = inlined_call_operand.vmem [shape: f32[2,3], index: 1, kind: output, shape index: {}]  }
   0x1   :  { %v4_v0 = vld [vmem:[%s39_s0] sm:$0x1]  ;;  %s22_s0 = smov 125  }
   0x2   :  { %5 = vst [vmem:[#allocation1] sm:$0x1] %v4_v0 }
   0x9   :  { %v9_v1 = vld [vmem:[#allocation1] sm:$0x1]  }
   0xa   :  { %v6_v2 = vld [vmem:[#allocation1] sm:$0x1]   ;;  %10 = vrot.lane.b32.xlu0 %v9_v1, %s22_s0 }
   0xb   :  { %8 = vst.msk [vmem:[#allocation0] sm:$0x1] %vm7_vm0, %v6_v2  }
  0x7c   :  { %v11_v3 = vpop.permute.xlu0 %10  }
  0x7d   :  { %14 = vst.msk [vmem:[#allocation0 + $0x1] sm:$0x1] %vm7_vm0, %v11_v3  }
  0x84   :  { %v17_v4 = vld [vmem:[#allocation0] sm:$0x3] }
  0x85   :  { %20 = vst [vmem:[%s40_s1] sm:$0x3] %v17_v4 }

// kernel: generator_big_forward.12
= control target key start
LH: loop header
LB: loop body
LE: loop exit
PB: predicated region body
PF: predicated region fallthrough
CT: control target
= control target key end

     0   :  { %s1904_s21 = smov 0   ;;  %s2834_s0 = inlined_call_operand.vmem [shape: f32[32,32,128], index: 0, kind: input, shape index: {}]   ;;  %s2835_s1 = inlined_call_operand.vmem [shape: f32[1,128], index: 1, kind: input, shape index: {}]   ;;  %s2836_s2 = inlined_call_operand.vmem [shape: f32[1,128], index: 2, kind: input, shape index: {}]   ;;  %s2837_s3 = inlined_call_operand.vmem [shape: f32[3,3,128,128], index: 3, kind: input, shape index: {}]   ;;  %s2838_s4 = inlined_call_operand.vmem [shape: f32[1,128], index: 4, kind: input, shape index: {}]   ;;  %s2839_s5 = inlined_call_operand.vmem [shape: f32[32,32,128], index: 5, kind: output, shape index: {0}]   ;;  %s2840_s6 = inlined_call_operand.vmem [shape: f32[8,2,128], index: 6, kind: output, shape index: {1}]  }
   0x1 LB: > { %s1910_s22 = sadd.s32 4294967295, %s1866_s21   ;;  %p1650_p0 = scmp.ge.s32.totalorder %s1866_s21, 1  ;;  %s1866_s21 = sphi %s1904_s21, %s17_s21  }
   0x2   : > { %p205_p1 = scmp.lt.s32.totalorder %s1866_s21, 9 }
   0x4   : > { %p206_p2 = pnand %p1650_p0, %p205_p1 }
   0x5   : > { %s1915_s23 = sshll.u32 (!%p206_p2), %s1910_s22, 2  ;;  %p242_p3 = scmp.lt.s32.totalorder (!%p206_p2), %s1910_s22, 7 }
   0x6   : > { %209 = sbr.rel (%p206_p2) target bundleno = 565 (0x235), region = 40  ;;  %p236_p4 = scmp.lt.s32.totalorder (!%p206_p2), %s1915_s23, 31 }
   0x7   : > { %s1798_s27 = sshll.u32 (!%p206_p2), %s1910_s22, 7  ;;  %p1657_p5 = scmp.le.s32.totalorder (!%p206_p2), %s1910_s22, 0 }
   0x8   : > { %s1943_s13 = scalar_lea.vmem (!%p206_p2), %s2834_s0, %s1798_s27 }
   0xb   : > { %v1868_v0 = vmov 0.0   ;;  %s243_s24 = scalar_select %p242_p3, %s1910_s22, 7  ;;  %v1950_v1 = vld [vmem:[%s2835_s1] ss:$0 sm:$0xff]  ;;  %v282_v3 = vld [vmem:[%s1943_s13 + $0x8] sm:$0xff]  ;;  %v283_v4 = vld [vmem:[%s1943_s13 + $0x10] sm:$0xff] }
   0xc   : > { %254 = vst [vmem:[#allocation2 + $0x28] sm:$0xff] %v1868_v0  ;;  %s237_s25 = scalar_select %p236_p4, %s1915_s23, 31  ;;  %v281_v2 = vld [vmem:[%s1943_s13] sm:$0xff]  ;;  %v301_v7 = vmul.f32 %v1950_v1, %v282_v3  ;;  %v284_v8 = vld [vmem:[%s1943_s13 + $0x18] sm:$0xff]  ;;  %v302_v9 = vmul.f32 %v1950_v1, %v283_v4  ;;  %v286_v13 = vld [vmem:[%s1943_s13 + $0x28] sm:$0xff] }
   0xd   : > { %249 = vst [vmem:[#allocation2] sm:$0xff] %v1868_v0  ;;  %s1654_s26 = sshll.u32 %s243_s24, 1  ;;  %v300_v5 = vmul.f32 %v1950_v1, %v281_v2  ;;  %v1963_v6 = vld [vmem:[%s2836_s2] ss:$0 sm:$0xff]  ;;  %v303_v12 = vmul.f32 %v1950_v1, %v284_v8  ;;  %v287_v14 = vld [vmem:[%s1943_s13 + $0x30] sm:$0xff]  ;;  %v288_v17 = vld [vmem:[%s1943_s13 + $0x38] sm:$0xff]  ;;  %v305_v19 = vmul.f32 %v1950_v1, %v286_v13 }
   0xe   : > { %250 = vst [vmem:[#allocation2 + $0x8] sm:$0xff] %v1868_v0  ;;  %s1797_s28 = sshll.u32 %s237_s25, 5  ;;  %s1930_s7 = scalar_lea.vmem %s2840_s6, %s1654_s26  ;;  %v285_v10 = vld [vmem:[%s1943_s13 + $0x20] sm:$0xff]  ;;  %v320_v15 = vadd.f32 %v1963_v6, %v301_v7  ;;  %v321_v18 = vadd.f32 %v1963_v6, %v302_v9  ;;  %v306_v20 = vmul.f32 %v1950_v1, %v287_v14  ;;  %v307_v24 = vmul.f32 %v1950_v1, %v288_v17  ;;  %v290_v25 = vld [vmem:[%s1943_s13 + $0x48] sm:$0xff]  ;;  %v291_v28 = vld [vmem:[%s1943_s13 + $0x50] sm:$0xff] }
   0xf   : > { %251 = vst [vmem:[#allocation2 + $0x10] sm:$0xff] %v1868_v0  ;;  %s1936_s10 = scalar_lea.vmem %s2839_s5, %s1797_s28  ;;  %v319_v11 = vadd.f32 %v1963_v6, %v300_v5  ;;  %v304_v16 = vmul.f32 %v1950_v1, %v285_v10  ;;  %v289_v21 = vld [vmem:[%s1943_s13 + $0x40] sm:$0xff]  ;;  %v322_v23 = vadd.f32 %v1963_v6, %v303_v12  ;;  %v292_v31 = vld [vmem:[%s1943_s13 + $0x58] sm:$0xff]  ;;  %v324_v32 = vadd.f32 %v1963_v6, %v305_v19  ;;  %v294_v40 = vld [vmem:[%s1943_s13 + $0x68] sm:$0xff]  ;;  %s1658_s18 = sadd.s32 (!%p1657_p5), 4294967295, %s1915_s23 }
  0x10   : > { %252 = vst [vmem:[#allocation2 + $0x18] sm:$0xff] %v1868_v0  ;;  %v352_v26 = vmul.f32 0.2, %v320_v15  ;;  %vm336_vm1 = vcmp.ge.f32.partialorder %v320_v15, 0.0  ;;  %v353_v29 = vmul.f32 0.2, %v321_v18  ;;  %v308_v30 = vmul.f32 %v1950_v1, %v289_v21 }
  0x11   : > { %253 = vst [vmem:[#allocation2 + $0x20] sm:$0x3] %v1868_v0  ;;  %v351_v22 = vmul.f32 0.2, %v319_v11  ;;  %vm335_vm0 = vcmp.ge.f32.partialorder %v319_v11, 0.0  ;;  %v323_v27 = vadd.f32 %v1963_v6, %v304_v16  ;;  %vm337_vm2 = vcmp.ge.f32.partialorder %v321_v18, 0.0 }
  0x12   : > { %255 = vst [vmem:[#allocation2 + $0x30] sm:$0xff] %v1868_v0  ;;  %v325_v33 = vadd.f32 %v1963_v6, %v306_v20  ;;  %v309_v34 = vmul.f32 %v1950_v1, %v290_v25  ;;  %v293_v35 = vld [vmem:[%s1943_s13 + $0x60] sm:$0xff]  ;;  %v354_v37 = vmul.f32 0.2, %v322_v23  ;;  %v326_v38 = vadd.f32 %v1963_v6, %v307_v24  ;;  %v295_v43 = vld [vmem:[%s1943_s13 + $0x70] sm:$0xff]  ;;  %v296_v48 = vld [vmem:[%s1943_s13 + $0x78] sm:$0xff] }
  0x13   : > { %256 = vst [vmem:[#allocation2 + $0x38] sm:$0xff] %v1868_v0  ;;  %v367_v36 = vsel %vm335_vm0, %v319_v11, %v351_v22  ;;  %v310_v39 = vmul.f32 %v1950_v1, %v291_v28  ;;  %v368_v41 = vsel %vm336_vm1, %v320_v15, %v352_v26  ;;  %vm338_vm3 = vcmp.ge.f32.partialorder %v322_v23, 0.0  ;;  %s1659_s19 = sshll.u32 (!%p1657_p5), %s1658_s18, 5 }
  0x14   : > { %257 = vst [vmem:[#allocation2 + $0x40] sm:$0xff] %v1868_v0  ;;  %vm339_vm4 = vcmp.ge.f32.partialorder %v323_v27, 0.0  ;;  %v311_v42 = vmul.f32 %v1950_v1, %v292_v31  ;;  %v369_v44 = vsel %vm337_vm2, %v321_v18, %v353_v29  ;;  %v355_v45 = vmul.f32 0.2, %v323_v27  ;;  %s406_s25 = scalar_lea.vmem (!%p1657_p5), %s2834_s0, %s1659_s19 }
  0x15   : > { %258 = vst [vmem:[#allocation2 + $0x48] sm:$0x3] %v1868_v0  ;;  %v327_v46 = vadd.f32 %v1963_v6, %v308_v30  ;;  %v312_v47 = vmul.f32 %v1950_v1, %v293_v35  ;;  %vm340_vm5 = vcmp.ge.f32.partialorder %v324_v32, 0.0  ;;  %v356_v49 = vmul.f32 0.2, %v324_v32 }
  0x16   : > { %259 = vst [vmem:[#allocation2 + $0x50] sm:$0xff] %v1868_v0  ;;  %v328_v50 = vadd.f32 %v1963_v6, %v309_v34  ;;  %v313_v51 = vmul.f32 %v1950_v1, %v294_v40  ;;  %v370_v52 = vsel %vm338_vm3, %v322_v23, %v354_v37  ;;  %v357_v53 = vmul.f32 0.2, %v325_v33 }
  0x17   : > { %260 = vst [vmem:[#allocation2 + $0x58] sm:$0xff] %v1868_v0  ;;  %v329_v54 = vadd.f32 %v1963_v6, %v310_v39  ;;  %v314_v55 = vmul.f32 %v1950_v1, %v295_v43  ;;  %vm341_vm6 = vcmp.ge.f32.partialorder %v325_v33, 0.0  ;;  %v358_v56 = vmul.f32 0.2, %v326_v38 }
  0x18   : > { %261 = vst [vmem:[#allocation2 + $0x60] sm:$0xff] %v1868_v0  ;;  %v330_v57 = vadd.f32 %v1963_v6, %v311_v42  ;;  %v315_v58 = vmul.f32 %v1950_v1, %v296_v48  ;;  %v371_v59 = vsel %vm339_vm4, %v323_v27, %v355_v45  ;;  %vm342_vm7 = vcmp.ge.f32.partialorder %v326_v38, 0.0 }
  0x19   : > { %262 = vst [vmem:[#allocation2 + $0x68] sm:$0xff] %v1868_v0  ;;  %v359_v60 = vmul.f32 0.2, %v327_v46  ;;  %v331_v61 = vadd.f32 %v1963_v6, %v312_v47  ;;  %v372_v62 = vsel %vm340_vm5, %v324_v32, %v356_v49  ;;  %vm343_vm8 = vcmp.ge.f32.partialorder %v327_v46, 0.0 }
  0x1a   : > { %263 = vst [vmem:[#allocation2 + $0x70] sm:$0x3] %v1868_v0  ;;  %v360_v63 = vmul.f32 0.2, %v328_v50  ;;  %v373_v2 = vsel %vm341_vm6, %v325_v33, %v357_v53  ;;  %vm344_vm9 = vcmp.ge.f32.partialorder %v328_v50, 0.0  ;;  %v333_v4 = vadd.f32 %v1963_v6, %v314_v55 }
  0x1b   : > { %264 = vst [vmem:[#allocation2 + $0x78] sm:$0xff] %v1868_v0  ;;  %v361_v3 = vmul.f32 0.2, %v329_v54  ;;  %v374_v5 = vsel %vm342_vm7, %v326_v38, %v358_v56  ;;  %vm345_vm10 = vcmp.ge.f32.partialorder %v329_v54, 0.0  ;;  %v362_v7 = vmul.f32 0.2, %v330_v57 }
  0x1c   : > { %265 = vst [vmem:[#allocation2 + $0x80] sm:$0xff] %v1868_v0  ;;  %v334_v8 = vadd.f32 %v1963_v6, %v315_v58  ;;  %v375_v9 = vsel %vm343_vm8, %v327_v46, %v359_v60  ;;  %vm346_vm11 = vcmp.ge.f32.partialorder %v330_v57, 0.0  ;;  %v363_v10 = vmul.f32 0.2, %v331_v61 }
  0x1d   : > { %266 = vst [vmem:[#allocation2 + $0x88] sm:$0xff] %v1868_v0  ;;  %v376_v11 = vsel %vm344_vm9, %v328_v50, %v360_v63  ;;  %vm347_vm12 = vcmp.ge.f32.partialorder %v331_v61, 0.0  ;;  %v377_v13 = vsel %vm345_vm10, %v329_v54, %v361_v3  ;;  %v365_v14 = vmul.f32 0.2, %v333_v4 }
  0x1e   : > { %267 = vst [vmem:[#allocation2 + $0x90] sm:$0xff] %v1868_v0  ;;  %v378_v15 = vsel %vm346_vm11, %v330_v57, %v362_v7  ;;  %vm349_vm14 = vcmp.ge.f32.partialorder %v333_v4, 0.0  ;;  %v366_v16 = vmul.f32 0.2, %v334_v8  ;;  %v379_v17 = vsel %vm347_vm12, %v331_v61, %v363_v10 }
  0x1f   : > { %268 = vst [vmem:[#allocation2 + $0x98] sm:$0x3] %v1868_v0  ;;  %vm350_vm15 = vcmp.ge.f32.partialorder %v334_v8, 0.0  ;;  %v381_v19 = vsel %vm349_vm14, %v333_v4, %v365_v14 }
  0x20   : > { %269 = vst [vmem:[#allocation2 + $0xa0] sm:$0xff] %v1868_v0  ;;  %v382_v20 = vsel %vm350_vm15, %v334_v8, %v366_v16 }
  0x21   : > { %270 = vst [vmem:[#allocation2 + $0xa8] sm:$0xff] %v1868_v0 }
  0x22   : > { %271 = vst [vmem:[#allocation2 + $0xb0] sm:$0xff] %v1868_v0 }
  0x23   : > { %272 = vst [vmem:[#allocation2 + $0xb8] sm:$0xff] %v1868_v0 }
  0x24   : > { %273 = vst [vmem:[#allocation2 + $0xc0] sm:$0x3] %v1868_v0 }
  0x25   : > { %274 = vst [vmem:[#allocation2 + $0xc8] sm:$0xff] %v1868_v0 }
  0x26   : > { %275 = vst [vmem:[#allocation2 + $0xd0] sm:$0xff] %v1868_v0 }
  0x27   : > { %276 = vst [vmem:[#allocation2 + $0xd8] sm:$0xff] %v1868_v0 }
  0x28   : > { %277 = vst [vmem:[#allocation2 + $0xe0] sm:$0xff] %v1868_v0 }
  0x29   : > { %278 = vst [vmem:[#allocation2 + $0xe8] sm:$0x3] %v1868_v0  ;;  %v332_v0 = vadd.f32 %v1963_v6, %v313_v51 }
  0x2a   : > { %384 = vst [vmem:[#allocation2 + $0x29] sm:$0xff] %v367_v36 }
  0x2b   : > { %385 = vst [vmem:[#allocation2 + $0x31] sm:$0xff] %v368_v41  ;;  %v364_v12 = vmul.f32 0.2, %v332_v0  ;;  %vm348_vm13 = vcmp.ge.f32.partialorder %v332_v0, 0.0 }
  0x2c   : > { %386 = vst [vmem:[#allocation2 + $0x39] sm:$0xff] %v369_v44 }
  0x2d   : > { %387 = vst [vmem:[#allocation2 + $0x41] sm:$0xff] %v370_v52  ;;  %v380_v18 = vsel %vm348_vm13, %v332_v0, %v364_v12 }
  0x2e   : > { %388 = vst [vmem:[#allocation2 + $0x51] sm:$0xff] %v371_v59 }
  0x2f   : > { %389 = vst [vmem:[#allocation2 + $0x59] sm:$0xff] %v372_v62 }
  0x30   : > { %390 = vst [vmem:[#allocation2 + $0x61] sm:$0xff] %v373_v2 }
  0x31   : > { %391 = vst [vmem:[#allocation2 + $0x69] sm:$0xff] %v374_v5 }
  0x32   : > { %392 = vst [vmem:[#allocation2 + $0x79] sm:$0xff] %v375_v9 }
  0x33   : > { %393 = vst [vmem:[#allocation2 + $0x81] sm:$0xff] %v376_v11 }
  0x34   : > { %394 = vst [vmem:[#allocation2 + $0x89] sm:$0xff] %v377_v13 }
  0x35   : > { %395 = vst [vmem:[#allocation2 + $0x91] sm:$0xff] %v378_v15  ;;  %403 = sbr.rel (%p1657_p5) target bundleno = 70 (0x46), region = 44 }
  0x36   : > { %396 = vst [vmem:[#allocation2 + $0xa1] sm:$0xff] %v379_v17 }
  0x37   : > { %397 = vst [vmem:[#allocation2 + $0xa9] sm:$0xff] %v380_v18 }
  0x38   : > { %398 = vst [vmem:[#allocation2 + $0xb1] sm:$0xff] %v381_v19 }
  0x39   : > { %399 = vst [vmem:[#allocation2 + $0xb9] sm:$0xff] %v382_v20 }
  0x3a   : > { %v407_v21 = vld [vmem:[%s406_s25] sm:$0xff]  ;;  %v408_v22 = vld [vmem:[%s406_s25 + $0x8] sm:$0xff]  ;;  %v409_v23 = vld [vmem:[%s406_s25 + $0x10] sm:$0xff] }
  0x3b   : > { %v411_v24 = vmul.f32 %v1950_v1, %v407_v21  ;;  %v412_v25 = vmul.f32 %v1950_v1, %v408_v22  ;;  %v413_v26 = vmul.f32 %v1950_v1, %v409_v23  ;;  %v410_v27 = vld [vmem:[%s406_s25 + $0x18] sm:$0xff] }
  0x3c   : > { %v414_v28 = vmul.f32 %v1950_v1, %v410_v27 }
  0x3d   : > { %v415_v29 = vadd.f32 %v1963_v6, %v411_v24  ;;  %v416_v30 = vadd.f32 %v1963_v6, %v412_v25  ;;  %v417_v31 = vadd.f32 %v1963_v6, %v413_v26 }
  0x3e   : > { %v418_v32 = vadd.f32 %v1963_v6, %v414_v28 }
  0x3f   : > { %vm419_vm0 = vcmp.ge.f32.partialorder %v415_v29, 0.0  ;;  %v423_v33 = vmul.f32 0.2, %v415_v29  ;;  %vm420_vm1 = vcmp.ge.f32.partialorder %v416_v30, 0.0  ;;  %v424_v34 = vmul.f32 0.2, %v416_v30 }
  0x40   : > { %vm421_vm2 = vcmp.ge.f32.partialorder %v417_v31, 0.0  ;;  %v425_v35 = vmul.f32 0.2, %v417_v31  ;;  %vm422_vm3 = vcmp.ge.f32.partialorder %v418_v32, 0.0  ;;  %v426_v36 = vmul.f32 0.2, %v418_v32 }
  0x41   : > { %v427_v37 = vsel %vm419_vm0, %v415_v29, %v423_v33  ;;  %v428_v38 = vsel %vm420_vm1, %v416_v30, %v424_v34 }
  0x42   : > { %431 = vst [vmem:[#allocation2 + $0x1] sm:$0xff] %v427_v37  ;;  %v429_v39 = vsel %vm421_vm2, %v417_v31, %v425_v35  ;;  %v430_v40 = vsel %vm422_vm3, %v418_v32, %v426_v36 }
  0x43   : > { %432 = vst [vmem:[#allocation2 + $0x9] sm:$0xff] %v428_v38 }
  0x44   : > { %433 = vst [vmem:[#allocation2 + $0x11] sm:$0xff] %v429_v39 }
  0x45   : > { %434 = vst [vmem:[#allocation2 + $0x19] sm:$0xff] %v430_v40 }
  0x46 PF: > { %p1660_p6 = scmp.ge.s32.totalorder %s1910_s22, 7 }
  0x48   : > { %438 = sbr.rel (%p1660_p6) target bundleno = 89 (0x59), region = 48 }
  0x4d   : > { %v1663_v41 = vld [vmem:[%s1943_s13 + $0x80] sm:$0xff]  ;;  %v1664_v42 = vld [vmem:[%s1943_s13 + $0x88] sm:$0xff]  ;;  %v1665_v43 = vld [vmem:[%s1943_s13 + $0x90] sm:$0xff] }
  0x4e   : > { %v446_v44 = vmul.f32 %v1950_v1, %v1663_v41  ;;  %v447_v45 = vmul.f32 %v1950_v1, %v1664_v42  ;;  %v448_v46 = vmul.f32 %v1950_v1, %v1665_v43  ;;  %v1666_v47 = vld [vmem:[%s1943_s13 + $0x98] sm:$0xff] }
  0x4f   : > { %v449_v48 = vmul.f32 %v1950_v1, %v1666_v47 }
  0x50   : > { %v450_v49 = vadd.f32 %v1963_v6, %v446_v44  ;;  %v451_v50 = vadd.f32 %v1963_v6, %v447_v45  ;;  %v452_v51 = vadd.f32 %v1963_v6, %v448_v46 }
  0x51   : > { %v453_v52 = vadd.f32 %v1963_v6, %v449_v48 }
  0x52   : > { %vm454_vm4 = vcmp.ge.f32.partialorder %v450_v49, 0.0  ;;  %v458_v53 = vmul.f32 0.2, %v450_v49  ;;  %vm455_vm5 = vcmp.ge.f32.partialorder %v451_v50, 0.0  ;;  %v459_v54 = vmul.f32 0.2, %v451_v50 }
  0x53   : > { %vm456_vm6 = vcmp.ge.f32.partialorder %v452_v51, 0.0  ;;  %v460_v55 = vmul.f32 0.2, %v452_v51  ;;  %vm457_vm7 = vcmp.ge.f32.partialorder %v453_v52, 0.0  ;;  %v461_v56 = vmul.f32 0.2, %v453_v52 }
  0x54   : > { %v462_v57 = vsel %vm454_vm4, %v450_v49, %v458_v53  ;;  %v463_v58 = vsel %vm455_vm5, %v451_v50, %v459_v54 }
  0x55   : > { %467 = vst [vmem:[#allocation2 + $0xc9] sm:$0xff] %v462_v57  ;;  %v464_v1 = vsel %vm456_vm6, %v452_v51, %v460_v55  ;;  %v465_v59 = vsel %vm457_vm7, %v453_v52, %v461_v56 }
  0x56   : > { %468 = vst [vmem:[#allocation2 + $0xd1] sm:$0xff] %v463_v58 }
  0x57   : > { %469 = vst [vmem:[#allocation2 + $0xd9] sm:$0xff] %v464_v1 }
  0x58   : > { %470 = vst [vmem:[#allocation2 + $0xe1] sm:$0xff] %v465_v59 }
  0x59 PF: > { %v1682_v6 = vld [vmem:[%s2837_s3 + $0xf8] sm:$0xff]  ;;  %v1681_v60 = vld [vmem:[%s2837_s3 + $0xf0] sm:$0xff]  ;;  %v1680_v61 = vld [vmem:[%s2837_s3 + $0xe8] sm:$0xff]  ;;  %vm1559_vm8 = vcmask 1040384  }
  0x5a   : > { %1800 = vmatpush.msra.mxu1 %v1682_v6  ;;  %1801 = vmatpush.msra.mxu2 %v1682_v6  ;;  %v1679_v62 = vld [vmem:[%s2837_s3 + $0xe0] sm:$0xff]  ;;  %v1678_v63 = vld [vmem:[%s2837_s3 + $0xd8] sm:$0xff]  ;;  %v1677_v0 = vld [vmem:[%s2837_s3 + $0xd0] sm:$0xff] }
  0x5b   : > { %1802 = vmatpush.msra.mxu3 %v1682_v6  ;;  %536 = vmatpush.msra.mxu0 %v1682_v6  ;;  %v1676_v2 = vld [vmem:[%s2837_s3 + $0xc8] sm:$0xff]  ;;  %v1675_v3 = vld [vmem:[%s2837_s3 + $0xc0] sm:$0xff]  ;;  %v1674_v4 = vld [vmem:[%s2837_s3 + $0xb8] sm:$0xff] }
  0x5c   : > { %1803 = vmatpush.msra.mxu1 %v1681_v60  ;;  %1804 = vmatpush.msra.mxu2 %v1681_v60  ;;  %v1673_v5 = vld [vmem:[%s2837_s3 + $0xb0] sm:$0xff]  ;;  %v1672_v7 = vld [vmem:[%s2837_s3 + $0xa8] sm:$0xff]  ;;  %v1671_v8 = vld [vmem:[%s2837_s3 + $0xa0] sm:$0xff] }
  0x5d   : > { %1805 = vmatpush.msra.mxu3 %v1681_v60  ;;  %537 = vmatpush.msra.mxu0 %v1681_v60  ;;  %v1670_v9 = vld [vmem:[%s2837_s3 + $0x98] sm:$0xff]  ;;  %v1669_v10 = vld [vmem:[%s2837_s3 + $0x90] sm:$0xff]  ;;  %v1668_v11 = vld [vmem:[%s2837_s3 + $0x88] sm:$0xff] }
  0x5e   : > { %1806 = vmatpush.msra.mxu1 %v1680_v61  ;;  %1807 = vmatpush.msra.mxu2 %v1680_v61  ;;  %v1667_v12 = vld [vmem:[%s2837_s3 + $0x80] sm:$0xff]  ;;  %v2105_v13 = vld [vmem:[#allocation2 + $0x29] sm:$0xff]  ;;  %v2107_v14 = vld [vmem:[#allocation2 + $0x51] sm:$0xff] }
  0x5f   : > { %1808 = vmatpush.msra.mxu3 %v1680_v61  ;;  %538 = vmatpush.msra.mxu0 %v1680_v61  ;;  %v1698_v15 = vld [vmem:[%s2837_s3 + $0x178] sm:$0xff]  ;;  %v1697_v18 = vld [vmem:[%s2837_s3 + $0x170] sm:$0xff]  ;;  %v1696_v21 = vld [vmem:[%s2837_s3 + $0x168] sm:$0xff] }
  0x60   : > { %1809 = vmatpush.msra.mxu1 %v1679_v62  ;;  %1810 = vmatpush.msra.mxu2 %v1679_v62  ;;  %v502_v16 = vld [vmem:[%s2837_s3 + $0x78] sm:$0xff]  ;;  %v501_v20 = vld [vmem:[%s2837_s3 + $0x70] sm:$0xff]  ;;  %v500_v23 = vld [vmem:[%s2837_s3 + $0x68] sm:$0xff] }
  0x61   : > { %1811 = vmatpush.msra.mxu3 %v1679_v62  ;;  %539 = vmatpush.msra.mxu0 %v1679_v62  ;;  %v2115_v17 = vld [vmem:[#allocation2 + $0x79] sm:$0xff]  ;;  %v1713_v22 = vld [vmem:[%s2837_s3 + $0x1f0] sm:$0xff]  ;;  %v503_v24 = vld [vmem:[#allocation2 + $0x1] sm:$0xff] }
  0x62   : > { %1812 = vmatpush.msra.mxu1 %v1678_v63  ;;  %1813 = vmatpush.msra.mxu2 %v1678_v63  ;;  %v1714_v19 = vld [vmem:[%s2837_s3 + $0x1f8] sm:$0xff]  ;;  %v1695_v25 = vld [vmem:[%s2837_s3 + $0x160] sm:$0xff]  ;;  %v1712_v26 = vld [vmem:[%s2837_s3 + $0x1e8] sm:$0xff] }
  0x63   : > { %1814 = vmatpush.msra.mxu3 %v1678_v63  ;;  %540 = vmatpush.msra.mxu0 %v1678_v63  ;;  %v499_v27 = vld [vmem:[%s2837_s3 + $0x60] sm:$0xff]  ;;  %v2149_v29 = vld [vmem:[#allocation2 + $0x31] sm:$0xff]  ;;  %v1692_v38 = vld [vmem:[%s2837_s3 + $0x148] sm:$0xff] }
  0x64   : > { %1815 = vmatpush.msra.mxu1 %v1677_v0  ;;  %1816 = vmatpush.msra.mxu2 %v1677_v0  ;;  %v2147_v28 = vld [vmem:[#allocation2 + $0x59] sm:$0xff]  ;;  %v2161_v33 = vld [vmem:[#allocation2 + $0x81] sm:$0xff]  ;;  %v1693_v34 = vld [vmem:[%s2837_s3 + $0x150] sm:$0xff] }
  0x65   : > { %1817 = vmatpush.msra.mxu3 %v1677_v0  ;;  %541 = vmatpush.msra.mxu0 %v1677_v0  ;;  %v1694_v30 = vld [vmem:[%s2837_s3 + $0x158] sm:$0xff]  ;;  %v1711_v31 = vld [vmem:[%s2837_s3 + $0x1e0] sm:$0xff]  ;;  %v497_v37 = vld [vmem:[%s2837_s3 + $0x50] sm:$0xff] }
  0x66   : > { %1818 = vmatpush.msra.mxu1 %v1676_v2  ;;  %1819 = vmatpush.msra.mxu2 %v1676_v2  ;;  %v498_v32 = vld [vmem:[%s2837_s3 + $0x58] sm:$0xff]  ;;  %v1709_v39 = vld [vmem:[%s2837_s3 + $0x1d0] sm:$0xff]  ;;  %v496_v41 = vld [vmem:[%s2837_s3 + $0x48] sm:$0xff] }
  0x67   : > { %1820 = vmatpush.msra.mxu3 %v1676_v2  ;;  %542 = vmatpush.msra.mxu0 %v1676_v2  ;;  %v1710_v35 = vld [vmem:[%s2837_s3 + $0x1d8] sm:$0xff]  ;;  %v1729_v40 = vld [vmem:[%s2837_s3 + $0x270] sm:$0xff]  ;;  %v1691_v42 = vld [vmem:[%s2837_s3 + $0x140] sm:$0xff] }
  0x68   : > { %1821 = vmatpush.msra.mxu1 %v1675_v3  ;;  %1822 = vmatpush.msra.mxu2 %v1675_v3  ;;  %v1730_v36 = vld [vmem:[%s2837_s3 + $0x278] sm:$0xff]  ;;  %v1708_v43 = vld [vmem:[%s2837_s3 + $0x1c8] sm:$0xff]  ;;  %v495_v45 = vld [vmem:[%s2837_s3 + $0x40] sm:$0xff] }
  0x69   : > { %1823 = vmatpush.msra.mxu3 %v1675_v3  ;;  %543 = vmatpush.msra.mxu0 %v1675_v3  ;;  %v1728_v44 = vld [vmem:[%s2837_s3 + $0x268] sm:$0xff]  ;;  %v2203_v47 = vld [vmem:[#allocation2 + $0x39] sm:$0xff]  ;;  %v1689_v54 = vld [vmem:[%s2837_s3 + $0x130] sm:$0xff] }
  0x6a   : > { %1824 = vmatpush.msra.mxu1 %v1674_v4  ;;  %1825 = vmatpush.msra.mxu2 %v1674_v4  ;;  %v2201_v46 = vld [vmem:[#allocation2 + $0x61] sm:$0xff]  ;;  %v1690_v48 = vld [vmem:[%s2837_s3 + $0x138] sm:$0xff]  ;;  %v504_v52 = vld [vmem:[#allocation2 + $0x9] sm:$0xff] }
  0x6b   : > { %1826 = vmatpush.msra.mxu3 %v1674_v4  ;;  %544 = vmatpush.msra.mxu0 %v1674_v4  ;;  %v1707_v49 = vld [vmem:[%s2837_s3 + $0x1c0] sm:$0xff]  ;;  %v494_v51 = vld [vmem:[%s2837_s3 + $0x38] sm:$0xff]  ;;  %v2219_v53 = vld [vmem:[#allocation2 + $0x89] sm:$0xff] }
  0x6c   : > { %1827 = vmatpush.msra.mxu1 %v1673_v5  ;;  %1828 = vmatpush.msra.mxu2 %v1673_v5  ;;  %v1727_v50 = vld [vmem:[%s2837_s3 + $0x260] sm:$0xff]  ;;  %v1706_v55 = vld [vmem:[%s2837_s3 + $0x1b8] sm:$0xff]  ;;  %v493_v57 = vld [vmem:[%s2837_s3 + $0x30] sm:$0xff] }
  0x6d   : > { %1829 = vmatpush.msra.mxu3 %v1673_v5  ;;  %545 = vmatpush.msra.mxu0 %v1673_v5  ;;  %v1726_v56 = vld [vmem:[%s2837_s3 + $0x258] sm:$0xff]  ;;  %v1688_v58 = vld [vmem:[%s2837_s3 + $0x128] sm:$0xff]  ;;  %v1705_v1 = vld [vmem:[%s2837_s3 + $0x1b0] sm:$0xff] }
  0x6e   : > { %1830 = vmatpush.msra.mxu1 %v1672_v7  ;;  %1831 = vmatpush.msra.mxu2 %v1672_v7  ;;  %v1725_v59 = vld [vmem:[%s2837_s3 + $0x250] sm:$0xff]  ;;  %v492_v6 = vld [vmem:[%s2837_s3 + $0x28] sm:$0xff]  ;;  %v1687_v60 = vld [vmem:[%s2837_s3 + $0x120] sm:$0xff] }
  0x6f   : > { %1832 = vmatpush.msra.mxu3 %v1672_v7  ;;  %546 = vmatpush.msra.mxu0 %v1672_v7  ;;  %v1704_v61 = vld [vmem:[%s2837_s3 + $0x1a8] sm:$0xff]  ;;  %v491_v63 = vld [vmem:[%s2837_s3 + $0x20] sm:$0xff]  ;;  %v1686_v3 = vld [vmem:[%s2837_s3 + $0x118] sm:$0xff] }
  0x70   : > { %1833 = vmatpush.msra.mxu1 %v1671_v8  ;;  %1834 = vmatpush.msra.mxu2 %v1671_v8  ;;  %v1724_v62 = vld [vmem:[%s2837_s3 + $0x248] sm:$0xff]  ;;  %v1703_v4 = vld [vmem:[%s2837_s3 + $0x1a0] sm:$0xff]  ;;  %v490_v7 = vld [vmem:[%s2837_s3 + $0x18] sm:$0xff] }
  0x71   : > { %1835 = vmatpush.msra.mxu3 %v1671_v8  ;;  %547 = vmatpush.msra.mxu0 %v1671_v8  ;;  %v2258_v0 = vld [vmem:[#allocation2 + $0x69] sm:$0xff]  ;;  %v2260_v2 = vld [vmem:[#allocation2 + $0x41] sm:$0xff]  ;;  %v505_v8 = vld [vmem:[#allocation2 + $0x11] sm:$0xff] }
  0x72   : > { %1836 = vmatpush.msra.mxu1 %v1670_v9  ;;  %1837 = vmatpush.msra.mxu2 %v1670_v9  ;;  %v1723_v5 = vld [vmem:[%s2837_s3 + $0x240] sm:$0xff] }
  0x73   : > { %1838 = vmatpush.msra.mxu3 %v1670_v9  ;;  %548 = vmatpush.msra.mxu0 %v1670_v9  ;;  %v2276_v9 = vld [vmem:[#allocation2 + $0x91] sm:$0xff] }
  0x74   : > { %1839 = vmatpush.msra.mxu1 %v1669_v10  ;;  %1840 = vmatpush.msra.mxu2 %v1669_v10 }
  0x75   : > { %1841 = vmatpush.msra.mxu3 %v1669_v10  ;;  %549 = vmatpush.msra.mxu0 %v1669_v10  ;;  %v1685_v10 = vld [vmem:[%s2837_s3 + $0x110] sm:$0xff] }
  0x76   : > { %1842 = vmatpush.msra.mxu1 %v1668_v11  ;;  %1843 = vmatpush.msra.mxu2 %v1668_v11 }
  0x77   : > { %1844 = vmatpush.msra.mxu3 %v1668_v11  ;;  %550 = vmatpush.msra.mxu0 %v1668_v11  ;;  %v1702_v11 = vld [vmem:[%s2837_s3 + $0x198] sm:$0xff] }
  0x78   : > { %1845 = vmatpush.msra.mxu1 %v1667_v12  ;;  %1846 = vmatpush.msra.mxu2 %v1667_v12 }
  0x79   : > { %564 = vmatmul.f32.vlgmr.msra.gmra.mxu1 %v2105_v13  ;;  %576 = vmatmul.f32.vlgmr.msra.gmra.mxu2 %v2107_v14 }
  0x7a   : > { %699 = vmatpush.msrb.mxu2 %v1698_v15  ;;  %1847 = vmatpush.msra.mxu3 %v1667_v12  ;;  %v489_v15 = vld [vmem:[%s2837_s3 + $0x10] sm:$0xff] }
  0x7b   : > { %601 = vmatpush.msrb.mxu1 %v502_v16  ;;  %588 = vmatmul.f32.vlgmr.msra.gmra.mxu3 %v2115_v17  ;;  %v1684_v16 = vld [vmem:[%s2837_s3 + $0x108] sm:$0xff] }
  0x7c   : > { %700 = vmatpush.msrb.mxu2 %v1697_v18  ;;  %813 = vmatpush.msrb.mxu3 %v1714_v19  ;;  %v1701_v18 = vld [vmem:[%s2837_s3 + $0x190] sm:$0xff] }
  0x7d   : > { %602 = vmatpush.msrb.mxu1 %v501_v20  ;;  %551 = vmatpush.msra.mxu0 %v1667_v12  ;;  %v1722_v12 = vld [vmem:[%s2837_s3 + $0x238] sm:$0xff]  ;;  %v1721_v19 = vld [vmem:[%s2837_s3 + $0x230] sm:$0xff]  ;;  %v488_v20 = vld [vmem:[%s2837_s3 + $0x8] sm:$0xff] }
  0x7e   : > { %701 = vmatpush.msrb.mxu2 %v1696_v21  ;;  %814 = vmatpush.msrb.mxu3 %v1713_v22  ;;  %v1683_v21 = vld [vmem:[%s2837_s3 + $0x100] sm:$0xff]  ;;  %v1700_v22 = vld [vmem:[%s2837_s3 + $0x188] sm:$0xff] }
  0x7f   : > { %603 = vmatpush.msrb.mxu1 %v500_v23  ;;  %552 = vmatmul.f32.vlgmr.msra.gmra.mxu0 %v503_v24  ;;  %v1720_v23 = vld [vmem:[%s2837_s3 + $0x228] sm:$0xff]  ;;  %v487_v24 = vld [vmem:[%s2837_s3] sm:$0xff] }
  0x80   : > { %702 = vmatpush.msrb.mxu2 %v1695_v25  ;;  %815 = vmatpush.msrb.mxu3 %v1712_v26  ;;  %v666_v25 = vld [vmem:[#allocation2 + $0x2] sm:$0xff] }
  0x81   : > { %604 = vmatpush.msrb.mxu1 %v499_v27  ;;  %579 = vmatmul.f32.gmra.mxu2 %v2147_v28  ;;  %v471_v26 = vld [vmem:[#allocation2] sm:$0xff] }
  0x82   : > { %567 = vmatmul.f32.gmra.mxu1 %v2149_v29  ;;  %703 = vmatpush.msrb.mxu2 %v1694_v30  ;;  %v1699_v27 = vld [vmem:[%s2837_s3 + $0x180] sm:$0xff] }
  0x83   : > { %816 = vmatpush.msrb.mxu3 %v1711_v31  ;;  %605 = vmatpush.msrb.mxu1 %v498_v32  ;;  %v1719_v30 = vld [vmem:[%s2837_s3 + $0x220] sm:$0xff]  ;;  %v1762_v31 = vld [vmem:[%s2837_s3 + $0x378] sm:$0xff] }
  0x84   : > { %591 = vmatmul.f32.gmra.mxu3 %v2161_v33  ;;  %704 = vmatpush.msrb.mxu2 %v1693_v34  ;;  %v506_v32 = vld [vmem:[#allocation2 + $0x19] sm:$0xff]  ;;  %v2324_v34 = vld [vmem:[#allocation2 + $0x28] sm:$0xff] }
  0x85   : > { %817 = vmatpush.msrb.mxu3 %v1710_v35  ;;  %927 = vmatpush.msrb.mxu0 %v1730_v36  ;;  %v1718_v35 = vld [vmem:[%s2837_s3 + $0x218] sm:$0xff] }
  0x86   : > { %606 = vmatpush.msrb.mxu1 %v497_v37  ;;  %705 = vmatpush.msrb.mxu2 %v1692_v38  ;;  %v1778_v36 = vld [vmem:[%s2837_s3 + $0x3f8] sm:$0xff]  ;;  %v1761_v38 = vld [vmem:[%s2837_s3 + $0x370] sm:$0xff] }
  0x87   : > { %818 = vmatpush.msrb.mxu3 %v1709_v39  ;;  %928 = vmatpush.msrb.mxu0 %v1729_v40  ;;  %v1746_v37 = vld [vmem:[%s2837_s3 + $0x2f8] sm:$0xff]  ;;  %v1717_v39 = vld [vmem:[%s2837_s3 + $0x210] sm:$0xff] }
  0x88   : > { %607 = vmatpush.msrb.mxu1 %v496_v41  ;;  %706 = vmatpush.msrb.mxu2 %v1691_v42  ;;  %v1777_v40 = vld [vmem:[%s2837_s3 + $0x3f0] sm:$0xff]  ;;  %v1760_v42 = vld [vmem:[%s2837_s3 + $0x368] sm:$0xff] }
  0x89   : > { %819 = vmatpush.msrb.mxu3 %v1708_v43  ;;  %929 = vmatpush.msrb.mxu0 %v1728_v44  ;;  %v1745_v41 = vld [vmem:[%s2837_s3 + $0x2f0] sm:$0xff]  ;;  %v1716_v43 = vld [vmem:[%s2837_s3 + $0x208] sm:$0xff] }
  0x8a   : > { %608 = vmatpush.msrb.mxu1 %v495_v45  ;;  %582 = vmatmul.f32.gmra.mxu2 %v2201_v46  ;;  %v667_v44 = vld [vmem:[#allocation2 + $0xa] sm:$0xff] }
  0x8b   : > { %570 = vmatmul.f32.gmra.mxu1 %v2203_v47  ;;  %707 = vmatpush.msrb.mxu2 %v1690_v48  ;;  %v472_v45 = vld [vmem:[#allocation2 + $0x8] sm:$0xff] }
  0x8c   : > { %820 = vmatpush.msrb.mxu3 %v1707_v49  ;;  %930 = vmatpush.msrb.mxu0 %v1727_v50  ;;  %v1776_v48 = vld [vmem:[%s2837_s3 + $0x3e8] sm:$0xff]  ;;  %v1715_v49 = vld [vmem:[%s2837_s3 + $0x200] sm:$0xff] }
  0x8d   : > { %609 = vmatpush.msrb.mxu1 %v494_v51  ;;  %555 = vmatmul.f32.gmra.mxu0 %v504_v52  ;;  %v1744_v50 = vld [vmem:[%s2837_s3 + $0x2e8] sm:$0xff]  ;;  %v2363_v51 = vld [vmem:[#allocation2 + $0x30] sm:$0xff]  ;;  %v1794_v52 = vld [vmem:[%s2837_s3 + $0x478] sm:$0xff] }
  0x8e   : > { %594 = vmatmul.f32.gmra.mxu3 %v2219_v53  ;;  %708 = vmatpush.msrb.mxu2 %v1689_v54  ;;  %v1759_v54 = vld [vmem:[%s2837_s3 + $0x360] sm:$0xff] }
  0x8f   : > { %821 = vmatpush.msrb.mxu3 %v1706_v55  ;;  %931 = vmatpush.msrb.mxu0 %v1726_v56  ;;  %v1775_v55 = vld [vmem:[%s2837_s3 + $0x3e0] sm:$0xff] }
  0x90   : > { %610 = vmatpush.msrb.mxu1 %v493_v57  ;;  %709 = vmatpush.msrb.mxu2 %v1688_v58  ;;  %v1743_v56 = vld [vmem:[%s2837_s3 + $0x2e0] sm:$0xff]  ;;  %v1793_v57 = vld [vmem:[%s2837_s3 + $0x470] sm:$0xff]  ;;  %v1758_v58 = vld [vmem:[%s2837_s3 + $0x358] sm:$0xff] }
  0x91   : > { %822 = vmatpush.msrb.mxu3 %v1705_v1  ;;  %932 = vmatpush.msrb.mxu0 %v1725_v59  ;;  %v1774_v1 = vld [vmem:[%s2837_s3 + $0x3d8] sm:$0xff] }
  0x92   : > { %611 = vmatpush.msrb.mxu1 %v492_v6  ;;  %710 = vmatpush.msrb.mxu2 %v1687_v60  ;;  %v1742_v59 = vld [vmem:[%s2837_s3 + $0x2d8] sm:$0xff]  ;;  %v473_v60 = vld [vmem:[#allocation2 + $0x10] sm:$0xff] }
  0x93   : > { %823 = vmatpush.msrb.mxu3 %v1704_v61  ;;  %933 = vmatpush.msrb.mxu0 %v1724_v62  ;;  %v668_v6 = vld [vmem:[#allocation2 + $0x12] sm:$0xff]  ;;  %v1791_v62 = vld [vmem:[%s2837_s3 + $0x460] sm:$0xff] }
  0x94   : > { %612 = vmatpush.msrb.mxu1 %v491_v63  ;;  %585 = vmatmul.f32.gmra.mxu2 %v2258_v0  ;;  %v1757_v61 = vld [vmem:[%s2837_s3 + $0x350] sm:$0xff] }
  0x95   : > { %573 = vmatmul.f32.gmra.mxu1 %v2260_v2  ;;  %711 = vmatpush.msrb.mxu2 %v1686_v3  ;;  %v1773_v63 = vld [vmem:[%s2837_s3 + $0x3d0] sm:$0xff]  ;;  %v2403_v3 = vld [vmem:[#allocation2 + $0x38] sm:$0xff] }
  0x96   : > { %824 = vmatpush.msrb.mxu3 %v1703_v4  ;;  %934 = vmatpush.msrb.mxu0 %v1723_v5  ;;  %v1790_v4 = vld [vmem:[%s2837_s3 + $0x458] sm:$0xff]  ;;  %v1741_v5 = vld [vmem:[%s2837_s3 + $0x2d0] sm:$0xff] }
  0x97   : > { %613 = vmatpush.msrb.mxu1 %v490_v7  ;;  %558 = vmatmul.f32.gmra.mxu0 %v505_v8  ;;  %v1756_v7 = vld [vmem:[%s2837_s3 + $0x348] sm:$0xff] }
  0x98   : > { %597 = vmatmul.f32.gmra.mxu3 %v2276_v9  ;;  %712 = vmatpush.msrb.mxu2 %v1685_v10  ;;  %v1772_v8 = vld [vmem:[%s2837_s3 + $0x3c8] sm:$0xff]  ;;  %v1789_v10 = vld [vmem:[%s2837_s3 + $0x450] sm:$0xff] }
  0x99   : > { %825 = vmatpush.msrb.mxu3 %v1702_v11  ;;  %935 = vmatpush.msrb.mxu0 %v1722_v12  ;;  %v1740_v11 = vld [vmem:[%s2837_s3 + $0x2c8] sm:$0xff]  ;;  %v669_v12 = vld [vmem:[#allocation2 + $0x1a] sm:$0xff] }
  0x9a   : > { %614 = vmatpush.msrb.mxu1 %v489_v15  ;;  %713 = vmatpush.msrb.mxu2 %v1684_v16  ;;  %v474_v15 = vld [vmem:[#allocation2 + $0x18] sm:$0xff]  ;;  %v1755_v16 = vld [vmem:[%s2837_s3 + $0x340] sm:$0xff] }
  0x9b   : > { %826 = vmatpush.msrb.mxu3 %v1701_v18  ;;  %936 = vmatpush.msrb.mxu0 %v1721_v19  ;;  %v1771_v18 = vld [vmem:[%s2837_s3 + $0x3c0] sm:$0xff]  ;;  %v1788_v19 = vld [vmem:[%s2837_s3 + $0x448] sm:$0xff] }
  0x9c   : > { %615 = vmatpush.msrb.mxu1 %v488_v20  ;;  %714 = vmatpush.msrb.mxu2 %v1683_v21  ;;  %v1739_v20 = vld [vmem:[%s2837_s3 + $0x2c0] sm:$0xff]  ;;  %v2438_v21 = vld [vmem:[#allocation2 + $0x2a] sm:$0xff] }
  0x9d   : > { %827 = vmatpush.msrb.mxu3 %v1700_v22  ;;  %937 = vmatpush.msrb.mxu0 %v1720_v23  ;;  %v1754_v22 = vld [vmem:[%s2837_s3 + $0x338] sm:$0xff] }
  0x9e   : > { %616 = vmatpush.msrb.mxu1 %v487_v24  ;;  %715 = vmatmul.f32.vlgmr.msrb.gmra.mxu2 %v666_v25  ;;  %v1770_v23 = vld [vmem:[%s2837_s3 + $0x3b8] sm:$0xff]  ;;  %v1787_v24 = vld [vmem:[%s2837_s3 + $0x440] sm:$0xff] }
  0x9f   : > { %617 = vmatmul.f32.vlgmr.msrb.gmra.mxu1 %v471_v26  ;;  %828 = vmatpush.msrb.mxu3 %v1699_v27  ;;  %v1738_v25 = vld [vmem:[%s2837_s3 + $0x2b8] sm:$0xff]  ;;  %v1753_v27 = vld [vmem:[%s2837_s3 + $0x330] sm:$0xff] }
  0xa0   : > { %938 = vmatpush.msrb.mxu0 %v1719_v30  ;;  %1156 = vmatpush.msra.mxu2 %v1762_v31  ;;  %v2458_v26 = vld [vmem:[#allocation2 + $0x32] sm:$0xff] }
  0xa1   : > { %561 = vmatmul.f32.gmra.mxu0 %v506_v32  ;;  %829 = vmatmul.f32.vlgmr.msrb.gmra.mxu3 %v2324_v34  ;;  %v1769_v30 = vld [vmem:[%s2837_s3 + $0x3b0] sm:$0xff]  ;;  %v1786_v31 = vld [vmem:[%s2837_s3 + $0x438] sm:$0xff] }
  0xa2   : > { %939 = vmatpush.msrb.mxu0 %v1718_v35  ;;  %1270 = vmatpush.msra.mxu3 %v1778_v36  ;;  %v1737_v32 = vld [vmem:[%s2837_s3 + $0x2b0] sm:$0xff]  ;;  %v2481_v35 = vld [vmem:[#allocation2 + $0x60] sm:$0xff]  ;;  %v1752_v36 = vld [vmem:[%s2837_s3 + $0x328] sm:$0xff] }
  0xa3   : > { %1041 = vmatpush.msra.mxu1 %v1746_v37  ;;  %1157 = vmatpush.msra.mxu2 %v1761_v38  ;;  %v1768_v37 = vld [vmem:[%s2837_s3 + $0x3a8] sm:$0xff]  ;;  %v1785_v38 = vld [vmem:[%s2837_s3 + $0x430] sm:$0xff] }
  0xa4   : > { %940 = vmatpush.msrb.mxu0 %v1717_v39  ;;  %1271 = vmatpush.msra.mxu3 %v1777_v40  ;;  %v1736_v39 = vld [vmem:[%s2837_s3 + $0x2a8] sm:$0xff] }
  0xa5   : > { %1042 = vmatpush.msra.mxu1 %v1745_v41  ;;  %1158 = vmatpush.msra.mxu2 %v1760_v42  ;;  %v2498_v40 = vld [vmem:[#allocation2 + $0x42] sm:$0xff] }
  0xa6   : > { %941 = vmatpush.msrb.mxu0 %v1716_v43  ;;  %718 = vmatmul.f32.gmra.mxu2 %v667_v44  ;;  %v2501_v41 = vld [vmem:[#allocation2 + $0x68] sm:$0xff]  ;;  %v1751_v42 = vld [vmem:[%s2837_s3 + $0x320] sm:$0xff] }
  0xa7   : > { %620 = vmatmul.f32.gmra.mxu1 %v472_v45  ;;  %1272 = vmatpush.msra.mxu3 %v1776_v48  ;;  %v1767_v43 = vld [vmem:[%s2837_s3 + $0x3a0] sm:$0xff]  ;;  %v1784_v44 = vld [vmem:[%s2837_s3 + $0x428] sm:$0xff]  ;;  %v2517_v48 = vld [vmem:[#allocation2 + $0x52] sm:$0xff] }
  0xa8   : > { %942 = vmatpush.msrb.mxu0 %v1715_v49  ;;  %1043 = vmatpush.msra.mxu1 %v1744_v50  ;;  %v1735_v45 = vld [vmem:[%s2837_s3 + $0x2a0] sm:$0xff]  ;;  %v2520_v49 = vld [vmem:[#allocation2 + $0x78] sm:$0xff] }
  0xa9   : > { %832 = vmatmul.f32.gmra.mxu3 %v2363_v51  ;;  %943 = vmatmul.f32.vlgmr.msrb.gmra.mxu0 %v2105_v13  ;;  %v1792_v13 = vld [vmem:[%s2837_s3 + $0x468] sm:$0xff]  ;;  %v1750_v50 = vld [vmem:[%s2837_s3 + $0x318] sm:$0xff] }
  0xaa   : > { %1384 = vmatpush.msra.mxu0 %v1794_v52  ;;  %1159 = vmatpush.msra.mxu2 %v1759_v54  ;;  %v1783_v52 = vld [vmem:[%s2837_s3 + $0x420] sm:$0xff]  ;;  %v1734_v54 = vld [vmem:[%s2837_s3 + $0x298] sm:$0xff] }
  0xab   : > { %1273 = vmatpush.msra.mxu3 %v1775_v55  ;;  %1044 = vmatpush.msra.mxu1 %v1743_v56  ;;  %v2537_v55 = vld [vmem:[#allocation2 + $0x5a] sm:$0xff] }
  0xac   : > { %1385 = vmatpush.msra.mxu0 %v1793_v57  ;;  %1160 = vmatpush.msra.mxu2 %v1758_v58  ;;  %v2540_v56 = vld [vmem:[#allocation2 + $0x80] sm:$0xff]  ;;  %v1749_v57 = vld [vmem:[%s2837_s3 + $0x310] sm:$0xff] }
  0xad   : > { %1274 = vmatpush.msra.mxu3 %v1774_v1  ;;  %1045 = vmatpush.msra.mxu1 %v1742_v59  ;;  %v1765_v58 = vld [vmem:[%s2837_s3 + $0x390] sm:$0xff]  ;;  %v1782_v1 = vld [vmem:[%s2837_s3 + $0x418] sm:$0xff] }
  0xae   : > { %721 = vmatmul.f32.gmra.mxu2 %v668_v6  ;;  %1386 = vmatpush.msra.mxu0 %v1792_v13  ;;  %v1733_v59 = vld [vmem:[%s2837_s3 + $0x290] sm:$0xff]  ;;  %v2557_v6 = vld [vmem:[#allocation2 + $0x62] sm:$0xff] }
  0xaf   : > { %623 = vmatmul.f32.gmra.mxu1 %v473_v60  ;;  %1161 = vmatpush.msra.mxu2 %v1757_v61  ;;  %v2560_v13 = vld [vmem:[#allocation2 + $0x88] sm:$0xff] }
  0xb0   : > { %1387 = vmatpush.msra.mxu0 %v1791_v62  ;;  %1275 = vmatpush.msra.mxu3 %v1773_v63  ;;  %v1748_v60 = vld [vmem:[%s2837_s3 + $0x308] sm:$0xff]  ;;  %v1781_v62 = vld [vmem:[%s2837_s3 + $0x410] sm:$0xff] }
  0xb1   : > { %835 = vmatmul.f32.gmra.mxu3 %v2403_v3  ;;  %946 = vmatmul.f32.gmra.mxu0 %v2149_v29  ;;  %v783_v29 = vld [vmem:[#allocation2 + $0x40] sm:$0xff]  ;;  %v1764_v61 = vld [vmem:[%s2837_s3 + $0x388] sm:$0xff] }
  0xb2   : > { %1388 = vmatpush.msra.mxu0 %v1790_v4  ;;  %1046 = vmatpush.msra.mxu1 %v1741_v5  ;;  %v1732_v63 = vld [vmem:[%s2837_s3 + $0x288] sm:$0xff]  ;;  %v2580_v4 = vld [vmem:[#allocation2 + $0x90] sm:$0xff] }
  0xb3   : > { %1162 = vmatpush.msra.mxu2 %v1756_v7  ;;  %1276 = vmatpush.msra.mxu3 %v1772_v8  ;;  %v1747_v7 = vld [vmem:[%s2837_s3 + $0x300] sm:$0xff] }
  0xb4   : > { %1389 = vmatpush.msra.mxu0 %v1789_v10  ;;  %1047 = vmatpush.msra.mxu1 %v1740_v11  ;;  %v1763_v8 = vld [vmem:[%s2837_s3 + $0x380] sm:$0xff]  ;;  %v1780_v10 = vld [vmem:[%s2837_s3 + $0x408] sm:$0xff] }
  0xb5   : > { %1163 = vmatpush.msra.mxu2 %v1755_v16  ;;  %1277 = vmatpush.msra.mxu3 %v1771_v18  ;;  %v1731_v11 = vld [vmem:[%s2837_s3 + $0x280] sm:$0xff] }
  0xb6   : > { %724 = vmatmul.f32.gmra.mxu2 %v669_v12  ;;  %1390 = vmatpush.msra.mxu0 %v1788_v19  ;;  %v2599_v12 = vld [vmem:[#allocation2 + $0x7a] sm:$0xff] }
  0xb7   : > { %626 = vmatmul.f32.gmra.mxu1 %v474_v15  ;;  %1164 = vmatpush.msra.mxu2 %v1754_v22  ;;  %v2616_v22 = vld [vmem:[#allocation2 + $0x82] sm:$0xff] }
  0xb8   : > { %1048 = vmatpush.msra.mxu1 %v1739_v20  ;;  %1278 = vmatpush.msra.mxu3 %v1770_v23  ;;  %v1779_v20 = vld [vmem:[%s2837_s3 + $0x400] sm:$0xff] }
  0xb9   : > { %838 = vmatmul.f32.gmra.mxu3 %v783_v29  ;;  %949 = vmatmul.f32.gmra.mxu0 %v2203_v47  ;;  %v2441_v47 = vld [vmem:[#allocation2 + $0x50] sm:$0xff] }
  0xba   : > { %1391 = vmatpush.msra.mxu0 %v1787_v24  ;;  %1049 = vmatpush.msra.mxu1 %v1738_v25  ;;  %v2621_v24 = vld [vmem:[#allocation2 + $0xa8] sm:$0xff] }
  0xbb   : > { %1165 = vmatpush.msra.mxu2 %v1753_v27  ;;  %1279 = vmatpush.msra.mxu3 %v1769_v30  ;;  %v2623_v25 = vld [vmem:[#allocation2 + $0xa1] sm:$0xff] }
  0xbc   : > { %1392 = vmatpush.msra.mxu0 %v1786_v31  ;;  %1050 = vmatpush.msra.mxu1 %v1737_v32  ;;  %v2632_v32 = vld [vmem:[#allocation2 + $0x8a] sm:$0xff] }
  0xbd   : > { %1166 = vmatpush.msra.mxu2 %v1752_v36  ;;  %1280 = vmatpush.msra.mxu3 %v1768_v37  ;;  %v2637_v37 = vld [vmem:[#allocation2 + $0xb0] sm:$0xff] }
  0xbe   : > { %727 = vmatmul.f32.gmra.mxu2 %v2438_v21  ;;  %1393 = vmatpush.msra.mxu0 %v1785_v38  ;;  %v2639_v38 = vld [vmem:[#allocation2 + $0xa9] sm:$0xff] }
  0xbf   : > { %629 = vmatmul.f32.gmra.mxu1 %v2324_v34  ;;  %v2478_v34 = vld [vmem:[#allocation2 + $0x3a] sm:$0xff]  ;;  %1167 = vmatpush.msra.mxu2 %v1751_v42 }
  0xc0   : > { %1051 = vmatpush.msra.mxu1 %v1736_v39  ;;  %1281 = vmatpush.msra.mxu3 %v1767_v43  ;;  %v2648_v43 = vld [vmem:[#allocation2 + $0x92] sm:$0xff] }
  0xc1   : > { %841 = vmatmul.f32.gmra.mxu3 %v2441_v47  ;;  %952 = vmatmul.f32.gmra.mxu0 %v2260_v2  ;;  %v2461_v2 = vld [vmem:[#allocation2 + $0x58] sm:$0xff] }
  0xc2   : > { %1394 = vmatpush.msra.mxu0 %v1784_v44  ;;  %1052 = vmatpush.msra.mxu1 %v1735_v45  ;;  %v2651_v45 = vld [vmem:[#allocation2 + $0xb8] sm:$0xff] }
  0xc3   : > { %1168 = vmatpush.msra.mxu2 %v1750_v50  ;;  %v2653_v50 = vld [vmem:[#allocation2 + $0xb1] sm:$0xff] }
  0xc4   : > { %1395 = vmatpush.msra.mxu0 %v1783_v52  ;;  %1053 = vmatpush.msra.mxu1 %v1734_v54 }
  0xc5   : > { %1169 = vmatpush.msra.mxu2 %v1749_v57 }
  0xc6   : > { %730 = vmatmul.f32.gmra.mxu2 %v2458_v26  ;;  %1396 = vmatpush.msra.mxu0 %v1782_v1 }
  0xc7   : > { %632 = vmatmul.f32.gmra.mxu1 %v2363_v51  ;;  %v1766_v51 = vld [vmem:[%s2837_s3 + $0x398] sm:$0xff]  ;;  %1170 = vmatpush.msra.mxu2 %v1748_v60 }
  0xc8   : > { %1282 = vmatpush.msra.mxu3 %v1766_v51  ;;  %1054 = vmatpush.msra.mxu1 %v1733_v59 }
  0xc9   : > { %844 = vmatmul.f32.gmra.mxu3 %v2461_v2  ;;  %955 = vmatmul.f32.gmra.mxu0 %v2107_v14 }
  0xca   : > { %1283 = vmatpush.msra.mxu3 %v1765_v58  ;;  %1397 = vmatpush.msra.mxu0 %v1781_v62  ;;  %v2663_v58 = vld [vmem:[#allocation2 + $0xb9] sm:$0xff] }
  0xcb   : > { %1055 = vmatpush.msra.mxu1 %v1732_v63  ;;  %1171 = vmatpush.msra.mxu2 %v1747_v7 }
  0xcc   : > { %1284 = vmatpush.msra.mxu3 %v1764_v61  ;;  %1398 = vmatpush.msra.mxu0 %v1780_v10 }
  0xcd   : > { %1056 = vmatpush.msra.mxu1 %v1731_v11 }
  0xce   : > { %733 = vmatmul.f32.gmra.mxu2 %v2478_v34  ;;  %1285 = vmatpush.msra.mxu3 %v1763_v8 }
  0xcf   : > { %635 = vmatmul.f32.gmra.mxu1 %v2403_v3  ;;  %v2577_v3 = vld [vmem:[#allocation2 + $0x6a] sm:$0xff]  ;;  %1399 = vmatpush.msra.mxu0 %v1779_v20 }
  0xd1   : > { %847 = vmatmul.f32.gmra.mxu3 %v2481_v35  ;;  %958 = vmatmul.f32.gmra.mxu0 %v2147_v28 }
  0xd6   : > { %736 = vmatmul.f32.gmra.mxu2 %v2498_v40 }
  0xd7   : > { %638 = vmatmul.f32.gmra.mxu1 %v783_v29  ;;  %v2604_v29 = vld [vmem:[#allocation2 + $0xa0] sm:$0xff] }
  0xd9   : > { %850 = vmatmul.f32.gmra.mxu3 %v2501_v41  ;;  %961 = vmatmul.f32.gmra.mxu0 %v2201_v46 }
  0xde   : > { %739 = vmatmul.f32.gmra.mxu2 %v2517_v48 }
  0xdf   : > { %641 = vmatmul.f32.gmra.mxu1 %v2441_v47 }
  0xe1   : > { %853 = vmatmul.f32.gmra.mxu3 %v2520_v49  ;;  %964 = vmatmul.f32.gmra.mxu0 %v2258_v0 }
  0xe6   : > { %742 = vmatmul.f32.gmra.mxu2 %v2537_v55 }
  0xe7   : > { %644 = vmatmul.f32.gmra.mxu1 %v2461_v2 }
  0xe9   : > { %856 = vmatmul.f32.gmra.mxu3 %v2540_v56  ;;  %967 = vmatmul.f32.gmra.mxu0 %v2115_v17 }
  0xee   : > { %745 = vmatmul.f32.gmra.mxu2 %v2557_v6 }
  0xef   : > { %647 = vmatmul.f32.gmra.mxu1 %v2481_v35 }
  0xf1   : > { %859 = vmatmul.f32.gmra.mxu3 %v2560_v13  ;;  %970 = vmatmul.f32.gmra.mxu0 %v2161_v33 }
  0xf6   : > { %748 = vmatmul.f32.gmra.mxu2 %v2577_v3  ;;  %v2582_v5 = vpop.f32.mrf.mxu1 }
  0xf7   : > { %650 = vmatmul.f32.gmra.mxu1 %v2501_v41 }
  0xf9   : > { %862 = vmatmul.f32.gmra.mxu3 %v2580_v4  ;;  %973 = vmatmul.f32.gmra.mxu0 %v2219_v53 }
  0xfc   : > { %v2601_v15 = vpop.f32.mrf.mxu2  ;;  %v553_v19 = vpop.f32.mrf.mxu0 }
  0xfe   : > { %751 = vmatmul.f32.gmra.mxu2 %v2599_v12  ;;  %v2606_v16 = vpop.f32.mrf.mxu3 }
  0xff   : > { %653 = vmatmul.f32.gmra.mxu1 %v2520_v49  ;;  %v2609_v18 = vpop.f32.mrf.mxu1 }
 0x101   : > { %865 = vmatmul.f32.gmra.mxu3 %v2604_v29  ;;  %976 = vmatmul.f32.gmra.mxu0 %v2276_v9 }
 0x104   : > { %v2618_v23 = vpop.f32.mrf.mxu2 }
 0x106   : > { %754 = vmatmul.f32.gmra.mxu2 %v2616_v22 }
 0x107   : > { %656 = vmatmul.f32.gmra.mxu1 %v2540_v56  ;;  %v2626_v27 = vpop.f32.mrf.mxu3 }
 0x108   : > { %v2628_v30 = vpop.f32.mrf.mxu1 }
 0x109   : > { %868 = vmatmul.f32.gmra.mxu3 %v2621_v24  ;;  %979 = vmatmul.f32.gmra.mxu0 %v2623_v25 }
 0x10a   : > { %v556_v31 = vpop.f32.mrf.mxu0 }
 0x10d   : > { %v2634_v36 = vpop.f32.mrf.mxu2 }
 0x10e   : > { %757 = vmatmul.f32.gmra.mxu2 %v2632_v32 }
 0x10f   : > { %659 = vmatmul.f32.gmra.mxu1 %v2560_v13 }
 0x111   : > { %871 = vmatmul.f32.gmra.mxu3 %v2637_v37  ;;  %982 = vmatmul.f32.gmra.mxu0 %v2639_v38  ;;  %v2644_v39 = vpop.f32.mrf.mxu3 }
 0x112   : > { %v2646_v42 = vpop.f32.mrf.mxu1 }
 0x114   : > { %v559_v44 = vpop.f32.mrf.mxu0 }
 0x116   : > { %760 = vmatmul.f32.gmra.mxu2 %v2648_v43 }
 0x117   : > { %662 = vmatmul.f32.gmra.mxu1 %v2580_v4  ;;  %v2656_v51 = vpop.f32.mrf.mxu2 }
 0x119   : > { %874 = vmatmul.f32.gmra.mxu3 %v2651_v45  ;;  %985 = vmatmul.f32.gmra.mxu0 %v2653_v50 }
 0x11b   : > { %v2660_v52 = vpop.f32.mrf.mxu3 }
 0x11c   : > { %v618_v54 = vpop.f32.mrf.mxu1 }
 0x11d   : > { %v619_v1 = vadd.f32 %v618_v54, %v553_v19 }
 0x11e   : > { %v562_v57 = vpop.f32.mrf.mxu0  ;;  %1172 = vmatmul.f32.vlgmr.msra.gmra.mxu2 %v2441_v47 }
 0x11f   : > { %1057 = vmatmul.f32.vlgmr.msra.gmra.mxu1 %v2438_v21 }
 0x121   : > { %988 = vmatmul.f32.gmra.mxu0 %v2663_v58  ;;  %1286 = vmatmul.f32.vlgmr.msra.gmra.mxu3 %v2107_v14  ;;  %v716_v59 = vpop.f32.mrf.mxu2 }
 0x122   : > { %v764_v60 = vadd.f32 %v716_v59, %v619_v1 }
 0x124   : > { %v621_v61 = vpop.f32.mrf.mxu1  ;;  %v830_v62 = vpop.f32.mrf.mxu3 }
 0x125   : > { %v2668_v63 = vadd.f32 %v830_v62, %v764_v60  ;;  %v622_v47 = vadd.f32 %v621_v61, %v556_v31 }
 0x126   : > { %v2670_v7 = vpop.f32.mrf.mxu0  ;;  %1175 = vmatmul.f32.gmra.mxu2 %v2461_v2 }
 0x127   : > { %1060 = vmatmul.f32.gmra.mxu1 %v2458_v26 }
 0x129   : > { %1289 = vmatmul.f32.gmra.mxu3 %v2147_v28  ;;  %1400 = vmatmul.f32.vlgmr.msra.gmra.mxu0 %v2517_v48  ;;  %v719_v21 = vpop.f32.mrf.mxu2 }
 0x12a   : > { %v765_v8 = vadd.f32 %v719_v21, %v622_v47 }
 0x12c   : > { %v624_v14 = vpop.f32.mrf.mxu1  ;;  %v833_v10 = vpop.f32.mrf.mxu3 }
 0x12d   : > { %v2676_v11 = vadd.f32 %v833_v10, %v765_v8  ;;  %v625_v2 = vadd.f32 %v624_v14, %v559_v44 }
 0x12e   : > { %v2678_v19 = vpop.f32.mrf.mxu0  ;;  %1178 = vmatmul.f32.gmra.mxu2 %v2481_v35 }
 0x12f   : > { %1063 = vmatmul.f32.gmra.mxu1 %v2478_v34 }
 0x131   : > { %1292 = vmatmul.f32.gmra.mxu3 %v2201_v46  ;;  %1403 = vmatmul.f32.gmra.mxu0 %v2537_v55  ;;  %v722_v28 = vpop.f32.mrf.mxu2 }
 0x132   : > { %v766_v26 = vadd.f32 %v722_v28, %v625_v2 }
 0x134   : > { %v627_v20 = vpop.f32.mrf.mxu1  ;;  %v836_v31 = vpop.f32.mrf.mxu3 }
 0x135   : > { %v2684_v54 = vadd.f32 %v836_v31, %v766_v26  ;;  %v628_v35 = vadd.f32 %v627_v20, %v562_v57 }
 0x136   : > { %v2686_v1 = vpop.f32.mrf.mxu0  ;;  %1181 = vmatmul.f32.gmra.mxu2 %v2501_v41 }
 0x137   : > { %1066 = vmatmul.f32.gmra.mxu1 %v2498_v40 }
 0x139   : > { %1295 = vmatmul.f32.gmra.mxu3 %v2258_v0  ;;  %1406 = vmatmul.f32.gmra.mxu0 %v2557_v6  ;;  %v725_v46 = vpop.f32.mrf.mxu2 }
 0x13a   : > { %v767_v34 = vadd.f32 %v725_v46, %v628_v35 }
 0x13c   : > { %v630_v44 = vpop.f32.mrf.mxu1  ;;  %v839_v59 = vpop.f32.mrf.mxu3 }
 0x13d   : > { %v2692_v60 = vadd.f32 %v839_v59, %v767_v34  ;;  %v631_v41 = vadd.f32 %v630_v44, %v2582_v5  ;;  %v1359_v59 = vld [vmem:[#allocation2 + $0xa2] sm:$0xff] }
 0x13e   : > { %v2694_v61 = vpop.f32.mrf.mxu0  ;;  %1184 = vmatmul.f32.gmra.mxu2 %v2520_v49 }
 0x13f   : > { %1069 = vmatmul.f32.gmra.mxu1 %v2517_v48 }
 0x141   : > { %1298 = vmatmul.f32.gmra.mxu3 %v2115_v17  ;;  %1409 = vmatmul.f32.gmra.mxu0 %v2577_v3  ;;  %v728_v0 = vpop.f32.mrf.mxu2 }
 0x142   : > { %v768_v40 = vadd.f32 %v728_v0, %v631_v41 }
 0x144   : > { %v633_v57 = vpop.f32.mrf.mxu1  ;;  %v842_v62 = vpop.f32.mrf.mxu3 }
 0x145   : > { %v2701_v47 = vadd.f32 %v842_v62, %v768_v40  ;;  %v634_v48 = vadd.f32 %v633_v57, %v2609_v18  ;;  %v1360_v62 = vld [vmem:[#allocation2 + $0xaa] sm:$0xff] }
 0x146   : > { %v2703_v21 = vpop.f32.mrf.mxu0  ;;  %1187 = vmatmul.f32.gmra.mxu2 %v2540_v56 }
 0x147   : > { %1072 = vmatmul.f32.gmra.mxu1 %v2537_v55 }
 0x149   : > { %1301 = vmatmul.f32.gmra.mxu3 %v2161_v33  ;;  %1412 = vmatmul.f32.gmra.mxu0 %v2599_v12  ;;  %v731_v17 = vpop.f32.mrf.mxu2 }
 0x14a   : > { %v769_v49 = vadd.f32 %v731_v17, %v634_v48 }
 0x14c   : > { %v636_v5 = vpop.f32.mrf.mxu1  ;;  %v845_v8 = vpop.f32.mrf.mxu3 }
 0x14d   : > { %v2710_v14 = vadd.f32 %v845_v8, %v769_v49  ;;  %v637_v55 = vadd.f32 %v636_v5, %v2628_v30  ;;  %v1361_v8 = vld [vmem:[#allocation2 + $0xb2] sm:$0xff] }
 0x14e   : > { %v2712_v10 = vpop.f32.mrf.mxu0  ;;  %1190 = vmatmul.f32.gmra.mxu2 %v2560_v13 }
 0x14f   : > { %1075 = vmatmul.f32.gmra.mxu1 %v2557_v6 }
 0x151   : > { %1304 = vmatmul.f32.gmra.mxu3 %v2219_v53  ;;  %1415 = vmatmul.f32.gmra.mxu0 %v2616_v22  ;;  %v734_v33 = vpop.f32.mrf.mxu2 }
 0x152   : > { %v770_v56 = vadd.f32 %v734_v33, %v637_v55  ;;  %v1135_v55 = vld [vmem:[#allocation2 + $0xc8] sm:$0xff] }
 0x154   : > { %v639_v18 = vpop.f32.mrf.mxu1  ;;  %v848_v2 = vpop.f32.mrf.mxu3 }
 0x155   : > { %v2719_v28 = vadd.f32 %v848_v2, %v770_v56  ;;  %v640_v6 = vadd.f32 %v639_v18, %v2646_v42 }
 0x156   : > { %v2721_v26 = vpop.f32.mrf.mxu0  ;;  %1193 = vmatmul.f32.gmra.mxu2 %v2580_v4 }
 0x157   : > { %1078 = vmatmul.f32.gmra.mxu1 %v2577_v3 }
 0x159   : > { %1307 = vmatmul.f32.gmra.mxu3 %v2276_v9  ;;  %1418 = vmatmul.f32.gmra.mxu0 %v2632_v32  ;;  %v737_v53 = vpop.f32.mrf.mxu2 }
 0x15a   : > { %v771_v13 = vadd.f32 %v737_v53, %v640_v6  ;;  %v1249_v6 = vld [vmem:[#allocation2 + $0xc9] sm:$0xff] }
 0x15c   : > { %v642_v30 = vpop.f32.mrf.mxu1  ;;  %v851_v20 = vpop.f32.mrf.mxu3 }
 0x15d   : > { %v2728_v31 = vadd.f32 %v851_v20, %v771_v13  ;;  %v643_v3 = vadd.f32 %v642_v30, %v2601_v15  ;;  %v1136_v13 = vld [vmem:[#allocation2 + $0xd0] sm:$0xff] }
 0x15e   : > { %v2730_v35 = vpop.f32.mrf.mxu0  ;;  %1196 = vmatmul.f32.gmra.mxu2 %v2604_v29 }
 0x15f   : > { %1081 = vmatmul.f32.gmra.mxu1 %v2599_v12 }
 0x161   : > { %1310 = vmatmul.f32.gmra.mxu3 %v2623_v25  ;;  %1421 = vmatmul.f32.gmra.mxu0 %v2648_v43  ;;  %v740_v9 = vpop.f32.mrf.mxu2 }
 0x162   : > { %v772_v4 = vadd.f32 %v740_v9, %v643_v3 }
 0x164   : > { %v645_v42 = vpop.f32.mrf.mxu1  ;;  %v854_v46 = vpop.f32.mrf.mxu3 }
 0x165   : > { %v886_v34 = vadd.f32 %v854_v46, %v772_v4  ;;  %v646_v12 = vadd.f32 %v645_v42, %v2618_v23  ;;  %v1250_v4 = vld [vmem:[#allocation2 + $0xd1] sm:$0xff] }
 0x166   : > { %v968_v44 = vpop.f32.mrf.mxu0  ;;  %1199 = vmatmul.f32.gmra.mxu2 %v2621_v24  ;;  %v1363_v42 = vld [vmem:[#allocation2 + $0xca] sm:$0xff] }
 0x167   : > { %v2738_v41 = vadd.f32 %v968_v44, %v886_v34  ;;  %1084 = vmatmul.f32.gmra.mxu1 %v2616_v22 }
 0x169   : > { %1313 = vmatmul.f32.gmra.mxu3 %v2639_v38  ;;  %1424 = vmatmul.f32.gmra.mxu0 %v1359_v59  ;;  %v743_v15 = vpop.f32.mrf.mxu2 }
 0x16a   : > { %v773_v29 = vadd.f32 %v743_v15, %v646_v12 }
 0x16c   : > { %v648_v25 = vpop.f32.mrf.mxu1  ;;  %v857_v0 = vpop.f32.mrf.mxu3 }
 0x16d   : > { %v887_v40 = vadd.f32 %v857_v0, %v773_v29  ;;  %v649_v22 = vadd.f32 %v648_v25, %v2634_v36  ;;  %v1251_v0 = vld [vmem:[#allocation2 + $0xd9] sm:$0xff] }
 0x16e   : > { %v971_v57 = vpop.f32.mrf.mxu0  ;;  %1202 = vmatmul.f32.gmra.mxu2 %v2637_v37 }
 0x16f   : > { %v2744_v24 = vadd.f32 %v971_v57, %v887_v40  ;;  %1087 = vmatmul.f32.gmra.mxu1 %v2632_v32  ;;  %v1364_v40 = vld [vmem:[#allocation2 + $0xd2] sm:$0xff] }
 0x171   : > { %1316 = vmatmul.f32.gmra.mxu3 %v2653_v50  ;;  %1427 = vmatmul.f32.gmra.mxu0 %v1360_v62  ;;  %v746_v23 = vpop.f32.mrf.mxu2 }
 0x172   : > { %v774_v38 = vadd.f32 %v746_v23, %v649_v22  ;;  %v1138_v23 = vld [vmem:[#allocation2 + $0xe0] sm:$0xff] }
 0x174   : > { %v651_v48 = vpop.f32.mrf.mxu1  ;;  %v860_v17 = vpop.f32.mrf.mxu3 }
 0x175   : > { %v888_v49 = vadd.f32 %v860_v17, %v774_v38  ;;  %v652_v32 = vadd.f32 %v651_v48, %v2656_v51 }
 0x176   : > { %v974_v5 = vpop.f32.mrf.mxu0  ;;  %1205 = vmatmul.f32.gmra.mxu2 %v2651_v45  ;;  %v1362_v45 = vld [vmem:[#allocation2 + $0xba] sm:$0xff] }
 0x177   : > { %v2750_v37 = vadd.f32 %v974_v5, %v888_v49  ;;  %1090 = vmatmul.f32.gmra.mxu1 %v2648_v43  ;;  %v1252_v5 = vld [vmem:[#allocation2 + $0xe1] sm:$0xff] }
 0x179   : > { %1319 = vmatmul.f32.gmra.mxu3 %v2663_v58  ;;  %1430 = vmatmul.f32.gmra.mxu0 %v1361_v8  ;;  %v749_v36 = vpop.f32.mrf.mxu2 }
 0x17a   : > { %v775_v50 = vadd.f32 %v749_v36, %v652_v32  ;;  %v1365_v32 = vld [vmem:[#allocation2 + $0xda] sm:$0xff] }
 0x17c   : > { %v654_v33 = vpop.f32.mrf.mxu1  ;;  %v863_v56 = vpop.f32.mrf.mxu3 }
 0x17d   : > { %v889_v18 = vadd.f32 %v863_v56, %v775_v50  ;;  %v655_v43 = vadd.f32 %v654_v33, %v2606_v16 }
 0x17e   : > { %v977_v2 = vpop.f32.mrf.mxu0  ;;  %1208 = vmatmul.f32.gmra.mxu2 %v1135_v55 }
 0x17f   : > { %v2755_v53 = vadd.f32 %v977_v2, %v889_v18  ;;  %1093 = vmatmul.f32.gmra.mxu1 %v1359_v59  ;;  %v1137_v59 = vld [vmem:[#allocation2 + $0xd8] sm:$0xff]  ;;  %v992_v18 = vadd.f32 %v2670_v7, %v2668_v63  ;;  %v993_v63 = vadd.f32 %v2678_v19, %v2676_v11 }
 0x181   : > { %1322 = vmatmul.f32.gmra.mxu3 %v1249_v6  ;;  %1433 = vmatmul.f32.gmra.mxu0 %v1362_v45  ;;  %v752_v51 = vpop.f32.mrf.mxu2  ;;  %v1366_v6 = vld [vmem:[#allocation2 + $0xe2] sm:$0xff] }
 0x182   : > { %v776_v58 = vadd.f32 %v752_v51, %v655_v43 }
 0x184   : > { %v657_v30 = vpop.f32.mrf.mxu1  ;;  %v866_v20 = vpop.f32.mrf.mxu3 }
 0x185   : > { %v890_v3 = vadd.f32 %v866_v20, %v776_v58  ;;  %v658_v34 = vadd.f32 %v657_v30, %v2626_v27  ;;  %v2774_v20 = vld [vmem:[%s2838_s4] ss:$0 sm:$0xff] }
 0x186   : > { %v980_v9 = vpop.f32.mrf.mxu0  ;;  %1211 = vmatmul.f32.gmra.mxu2 %v1136_v13 }
 0x187   : > { %v2758_v46 = vadd.f32 %v980_v9, %v890_v3  ;;  %1096 = vmatmul.f32.gmra.mxu1 %v1360_v62 }
 0x189   : > { %1325 = vmatmul.f32.gmra.mxu3 %v1250_v4  ;;  %1436 = vmatmul.f32.gmra.mxu0 %v1363_v42  ;;  %v755_v16 = vpop.f32.mrf.mxu2 }
 0x18a   : > { %v777_v44 = vadd.f32 %v755_v16, %v658_v34 }
 0x18c   : > { %v660_v12 = vpop.f32.mrf.mxu1  ;;  %v869_v15 = vpop.f32.mrf.mxu3 }
 0x18d   : > { %v891_v29 = vadd.f32 %v869_v15, %v777_v44  ;;  %v661_v22 = vadd.f32 %v660_v12, %v2644_v39  ;;  %v994_v12 = vadd.f32 %v2686_v1, %v2684_v54 }
 0x18e   : > { %v983_v25 = vpop.f32.mrf.mxu0  ;;  %1214 = vmatmul.f32.gmra.mxu2 %v1137_v59 }
 0x18f   : > { %v2761_v57 = vadd.f32 %v983_v25, %v891_v29  ;;  %1099 = vmatmul.f32.gmra.mxu1 %v1361_v8 }
 0x191   : > { %1328 = vmatmul.f32.gmra.mxu3 %v1251_v0  ;;  %1439 = vmatmul.f32.gmra.mxu0 %v1364_v40  ;;  %v758_v27 = vpop.f32.mrf.mxu2 }
 0x192   : > { %v778_v62 = vadd.f32 %v758_v27, %v661_v22 }
 0x194   : > { %v663_v38 = vpop.f32.mrf.mxu1  ;;  %v872_v48 = vpop.f32.mrf.mxu3 }
 0x195   : > { %v892_v17 = vadd.f32 %v872_v48, %v778_v62  ;;  %v664_v50 = vadd.f32 %v663_v38, %v2660_v52 }
 0x196   : > { %v986_v49 = vpop.f32.mrf.mxu0  ;;  %1217 = vmatmul.f32.gmra.mxu2 %v1138_v23 }
 0x197   : > { %v2764_v36 = vadd.f32 %v986_v49, %v892_v17  ;;  %1102 = vmatmul.f32.gmra.mxu1 %v1362_v45  ;;  %v995_v17 = vadd.f32 %v2694_v61, %v2692_v60 }
 0x199   : > { %1331 = vmatmul.f32.gmra.mxu3 %v1252_v5  ;;  %1442 = vmatmul.f32.gmra.mxu0 %v1365_v32  ;;  %v761_v39 = vpop.f32.mrf.mxu2 }
 0x19a   : > { %v779_v8 = vadd.f32 %v761_v39, %v664_v50 }
 0x19c   : > { %v875_v55 = vpop.f32.mrf.mxu3  ;;  %v1058_v33 = vpop.f32.mrf.mxu1 }
 0x19d   : > { %v893_v56 = vadd.f32 %v875_v55, %v779_v8  ;;  %v1106_v51 = vadd.f32 %v1058_v33, %v992_v18 }
 0x19e   : > { %v989_v2 = vpop.f32.mrf.mxu0 }
 0x19f   : > { %v2769_v43 = vadd.f32 %v989_v2, %v893_v56  ;;  %v996_v2 = vadd.f32 %v2703_v21, %v2701_v47 }
 0x1a1   : > { %1445 = vmatmul.f32.gmra.mxu0 %v1366_v6  ;;  %v1173_v45 = vpop.f32.mrf.mxu2 }
 0x1a2   : > { %v1221_v58 = vadd.f32 %v1173_v45, %v1106_v51 }
 0x1a4   : > { %v1061_v52 = vpop.f32.mrf.mxu1  ;;  %v1287_v13 = vpop.f32.mrf.mxu3 }
 0x1a5   : > { %v1335_v30 = vadd.f32 %v1287_v13, %v1221_v58  ;;  %v1107_v9 = vadd.f32 %v1061_v52, %v993_v63 }
 0x1a6   : > { %v1401_v7 = vpop.f32.mrf.mxu0 }
 0x1a7   : > { %v1449_v3 = vadd.f32 %v1401_v7, %v1335_v30 }
 0x1a9   : > { %v1469_v4 = vadd.f32 %v2774_v20, %v1449_v3  ;;  %v1176_v42 = vpop.f32.mrf.mxu2 }
 0x1aa   : > { %v1222_v34 = vadd.f32 %v1176_v42, %v1107_v9  ;;  %v997_v9 = vadd.f32 %v2712_v10, %v2710_v14 }
 0x1ab   : > { %1485 = vst [vmem:[%s1936_s10] sm:$0xff] %v1469_v4  ;;  %v1522_v40 = vmul.f32 %v1469_v4, %v1469_v4 }
 0x1ac   : > { %v1064_v16 = vpop.f32.mrf.mxu1  ;;  %v1290_v44 = vpop.f32.mrf.mxu3 }
 0x1ad   : > { %v1336_v59 = vadd.f32 %v1290_v44, %v1222_v34  ;;  %v1108_v25 = vadd.f32 %v1064_v16, %v994_v12 }
 0x1ae   : > { %v1404_v15 = vpop.f32.mrf.mxu0 }
 0x1af   : > { %v1450_v29 = vadd.f32 %v1404_v15, %v1336_v59 }
 0x1b1   : > { %v1470_v11 = vadd.f32 %v2774_v20, %v1450_v29  ;;  %v1179_v19 = vpop.f32.mrf.mxu2 }
 0x1b2   : > { %v1223_v0 = vadd.f32 %v1179_v19, %v1108_v25 }
 0x1b3   : > { %1486 = vst [vmem:[%s1936_s10 + $0x8] sm:$0xff] %v1470_v11  ;;  %v1501_v22 = vadd.f32 %v1470_v11, %v1469_v4  ;;  %v1523_v27 = vmul.f32 %v1470_v11, %v1470_v11  ;;  %v998_v11 = vadd.f32 %v2721_v26, %v2719_v28 }
 0x1b4   : > { %v1067_v62 = vpop.f32.mrf.mxu1  ;;  %v1293_v23 = vpop.f32.mrf.mxu3 }
 0x1b5   : > { %v1538_v38 = vadd.f32 %v1523_v27, %v1522_v40  ;;  %v1337_v48 = vadd.f32 %v1293_v23, %v1223_v0  ;;  %v1109_v49 = vadd.f32 %v1067_v62, %v995_v17 }
 0x1b6   : > { %v1407_v54 = vpop.f32.mrf.mxu0 }
 0x1b7   : > { %v1451_v1 = vadd.f32 %v1407_v54, %v1337_v48  ;;  %v999_v54 = vadd.f32 %v2730_v35, %v2728_v31 }
 0x1b9   : > { %v1471_v5 = vadd.f32 %v2774_v20, %v1451_v1  ;;  %v1182_v32 = vpop.f32.mrf.mxu2 }
 0x1ba   : > { %v1224_v50 = vadd.f32 %v1182_v32, %v1109_v49 }
 0x1bb   : > { %1487 = vst [vmem:[%s1936_s10 + $0x10] sm:$0xff] %v1471_v5  ;;  %v1502_v39 = vadd.f32 %v1501_v22, %v1471_v5  ;;  %v1524_v8 = vmul.f32 %v1471_v5, %v1471_v5 }
 0x1bc   : > { %v1070_v55 = vpop.f32.mrf.mxu1  ;;  %v1296_v33 = vpop.f32.mrf.mxu3 }
 0x1bd   : > { %v1539_v56 = vadd.f32 %v1538_v38, %v1524_v8  ;;  %v1338_v18 = vadd.f32 %v1296_v33, %v1224_v50  ;;  %v1110_v61 = vadd.f32 %v1070_v55, %v996_v2 }
 0x1be   : > { %v1410_v6 = vpop.f32.mrf.mxu0 }
 0x1bf   : > { %v1452_v60 = vadd.f32 %v1410_v6, %v1338_v18 }
 0x1c1   : > { %v1472_v51 = vadd.f32 %v2774_v20, %v1452_v60  ;;  %v1185_v45 = vpop.f32.mrf.mxu2 }
 0x1c2   : > { %v1225_v58 = vadd.f32 %v1185_v45, %v1110_v61 }
 0x1c3   : > { %1488 = vst [vmem:[%s1936_s10 + $0x18] sm:$0xff] %v1472_v51  ;;  %v1503_v52 = vadd.f32 %v1502_v39, %v1472_v51  ;;  %v1525_v13 = vmul.f32 %v1472_v51, %v1472_v51 }
 0x1c4   : > { %v1073_v30 = vpop.f32.mrf.mxu1  ;;  %v1299_v63 = vpop.f32.mrf.mxu3 }
 0x1c5   : > { %v1540_v7 = vadd.f32 %v1539_v56, %v1525_v13  ;;  %v1339_v3 = vadd.f32 %v1299_v63, %v1225_v58  ;;  %v1111_v21 = vadd.f32 %v1073_v30, %v997_v9 }
 0x1c6   : > { %v1413_v4 = vpop.f32.mrf.mxu0 }
 0x1c7   : > { %v1453_v47 = vadd.f32 %v1413_v4, %v1339_v3 }
 0x1c9   : > { %v1473_v42 = vadd.f32 %v2774_v20, %v1453_v47  ;;  %v1188_v34 = vpop.f32.mrf.mxu2 }
 0x1ca   : > { %v1226_v16 = vadd.f32 %v1188_v34, %v1111_v21 }
 0x1cb   : > { %1489 = vst [vmem:[%s1936_s10 + $0x20] sm:$0xff] %v1473_v42  ;;  %v1504_v44 = vadd.f32 %v1503_v52, %v1473_v42  ;;  %v1526_v59 = vmul.f32 %v1473_v42, %v1473_v42 }
 0x1cc   : > { %v1076_v12 = vpop.f32.mrf.mxu1  ;;  %v1302_v15 = vpop.f32.mrf.mxu3 }
 0x1cd   : > { %v1541_v29 = vadd.f32 %v1540_v7, %v1526_v59  ;;  %v1340_v25 = vadd.f32 %v1302_v15, %v1226_v16  ;;  %v1112_v10 = vadd.f32 %v1076_v12, %v998_v11 }
 0x1ce   : > { %v1416_v19 = vpop.f32.mrf.mxu0 }
 0x1cf   : > { %v1454_v14 = vadd.f32 %v1416_v19, %v1340_v25 }
 0x1d1   : > { %v1474_v0 = vadd.f32 %v2774_v20, %v1454_v14  ;;  %v1191_v40 = vpop.f32.mrf.mxu2 }
 0x1d2   : > { %v1227_v22 = vadd.f32 %v1191_v40, %v1112_v10 }
 0x1d3   : > { %1490 = vst [vmem:[%s1936_s10 + $0x28] sm:$0xff] %v1474_v0  ;;  %v1505_v27 = vadd.f32 %v1504_v44, %v1474_v0  ;;  %v1527_v62 = vmul.f32 %v1474_v0, %v1474_v0 }
 0x1d4   : > { %v1079_v23 = vpop.f32.mrf.mxu1  ;;  %v1305_v38 = vpop.f32.mrf.mxu3 }
 0x1d5   : > { %v1542_v48 = vadd.f32 %v1541_v29, %v1527_v62  ;;  %v1341_v17 = vadd.f32 %v1305_v38, %v1227_v22  ;;  %v1113_v26 = vadd.f32 %v1079_v23, %v999_v54 }
 0x1d6   : > { %v1419_v1 = vpop.f32.mrf.mxu0 }
 0x1d7   : > { %v1455_v28 = vadd.f32 %v1419_v1, %v1341_v17 }
 0x1d9   : > { %v1475_v49 = vadd.f32 %v2774_v20, %v1455_v28  ;;  %v1194_v5 = vpop.f32.mrf.mxu2 }
 0x1da   : > { %v1228_v32 = vadd.f32 %v1194_v5, %v1113_v26 }
 0x1db   : > { %1491 = vst [vmem:[%s1936_s10 + $0x30] sm:$0xff] %v1475_v49  ;;  %v1506_v50 = vadd.f32 %v1505_v27, %v1475_v49  ;;  %v1528_v39 = vmul.f32 %v1475_v49, %v1475_v49 }
 0x1dc   : > { %v1082_v8 = vpop.f32.mrf.mxu1  ;;  %v1308_v55 = vpop.f32.mrf.mxu3 }
 0x1dd   : > { %v1543_v33 = vadd.f32 %v1542_v48, %v1528_v39  ;;  %v1342_v56 = vadd.f32 %v1308_v55, %v1228_v32  ;;  %v1114_v6 = vadd.f32 %v1082_v8, %v2738_v41 }
 0x1de   : > { %v1422_v18 = vpop.f32.mrf.mxu0 }
 0x1df   : > { %v1456_v2 = vadd.f32 %v1422_v18, %v1342_v56 }
 0x1e1   : > { %v1476_v31 = vadd.f32 %v2774_v20, %v1456_v2  ;;  %v1197_v35 = vpop.f32.mrf.mxu2 }
 0x1e2   : > { %v1229_v60 = vadd.f32 %v1197_v35, %v1114_v6 }
 0x1e3   : > { %1492 = vst [vmem:[%s1936_s10 + $0x38] sm:$0xff] %v1476_v31  ;;  %v1507_v61 = vadd.f32 %v1506_v50, %v1476_v31  ;;  %v1529_v51 = vmul.f32 %v1476_v31, %v1476_v31 }
 0x1e4   : > { %v1085_v45 = vpop.f32.mrf.mxu1  ;;  %v1311_v58 = vpop.f32.mrf.mxu3 }
 0x1e5   : > { %v1544_v52 = vadd.f32 %v1543_v33, %v1529_v51  ;;  %v1343_v13 = vadd.f32 %v1311_v58, %v1229_v60  ;;  %v1115_v7 = vadd.f32 %v1085_v45, %v2744_v24 }
 0x1e6   : > { %v1425_v30 = vpop.f32.mrf.mxu0 }
 0x1e7   : > { %v1457_v63 = vadd.f32 %v1425_v30, %v1343_v13 }
 0x1e9   : > { %v1477_v3 = vadd.f32 %v2774_v20, %v1457_v63  ;;  %v1200_v41 = vpop.f32.mrf.mxu2 }
 0x1ea   : > { %v1230_v9 = vadd.f32 %v1200_v41, %v1115_v7 }
 0x1eb   : > { %1493 = vst [vmem:[%s1936_s10 + $0x40] sm:$0xff] %v1477_v3  ;;  %v1508_v4 = vadd.f32 %v1507_v61, %v1477_v3  ;;  %v1530_v47 = vmul.f32 %v1477_v3, %v1477_v3 }
 0x1ec   : > { %v1088_v21 = vpop.f32.mrf.mxu1  ;;  %v1314_v42 = vpop.f32.mrf.mxu3 }
 0x1ed   : > { %v1545_v34 = vadd.f32 %v1544_v52, %v1530_v47  ;;  %v1344_v16 = vadd.f32 %v1314_v42, %v1230_v9  ;;  %v1116_v12 = vadd.f32 %v1088_v21, %v2750_v37 }
 0x1ee   : > { %v1428_v44 = vpop.f32.mrf.mxu0 }
 0x1ef   : > { %v1458_v59 = vadd.f32 %v1428_v44, %v1344_v16 }
 0x1f1   : > { %v1478_v15 = vadd.f32 %v2774_v20, %v1458_v59  ;;  %v1203_v24 = vpop.f32.mrf.mxu2 }
 0x1f2   : > { %v1231_v29 = vadd.f32 %v1203_v24, %v1116_v12 }
 0x1f3   : > { %1494 = vst [vmem:[%s1936_s10 + $0x48] sm:$0xff] %v1478_v15  ;;  %v1509_v25 = vadd.f32 %v1508_v4, %v1478_v15  ;;  %v1531_v11 = vmul.f32 %v1478_v15, %v1478_v15 }
 0x1f4   : > { %v1091_v19 = vpop.f32.mrf.mxu1  ;;  %v1317_v14 = vpop.f32.mrf.mxu3 }
 0x1f5   : > { %v1546_v10 = vadd.f32 %v1545_v34, %v1531_v11  ;;  %v1345_v0 = vadd.f32 %v1317_v14, %v1231_v29  ;;  %v1117_v27 = vadd.f32 %v1091_v19, %v2755_v53 }
 0x1f6   : > { %v1431_v40 = vpop.f32.mrf.mxu0 }
 0x1f7   : > { %v1459_v22 = vadd.f32 %v1431_v40, %v1345_v0 }
 0x1f9   : > { %v1479_v62 = vadd.f32 %v2774_v20, %v1459_v22  ;;  %v1206_v37 = vpop.f32.mrf.mxu2 }
 0x1fa   : > { %v1232_v23 = vadd.f32 %v1206_v37, %v1117_v27 }
 0x1fb   : > { %1495 = vst [vmem:[%s1936_s10 + $0x50] sm:$0xff] %v1479_v62  ;;  %v1510_v38 = vadd.f32 %v1509_v25, %v1479_v62  ;;  %v1532_v48 = vmul.f32 %v1479_v62, %v1479_v62 }
 0x1fc   : > { %v1094_v17 = vpop.f32.mrf.mxu1  ;;  %v1320_v54 = vpop.f32.mrf.mxu3 }
 0x1fd   : > { %v1547_v1 = vadd.f32 %v1546_v10, %v1532_v48  ;;  %v1346_v28 = vadd.f32 %v1320_v54, %v1232_v23  ;;  %v1118_v5 = vadd.f32 %v1094_v17, %v2758_v46 }
 0x1fe   : > { %v1434_v26 = vpop.f32.mrf.mxu0 }
 0x1ff   : > { %v1460_v49 = vadd.f32 %v1434_v26, %v1346_v28 }
 0x201   : > { %v1480_v32 = vadd.f32 %v2774_v20, %v1460_v49  ;;  %v1209_v53 = vpop.f32.mrf.mxu2 }
 0x202   : > { %v1233_v50 = vadd.f32 %v1209_v53, %v1118_v5 }
 0x203   : > { %1496 = vst [vmem:[%s1936_s10 + $0x58] sm:$0xff] %v1480_v32  ;;  %v1511_v39 = vadd.f32 %v1510_v38, %v1480_v32  ;;  %v1533_v8 = vmul.f32 %v1480_v32, %v1480_v32 }
 0x204   : > { %v1097_v55 = vpop.f32.mrf.mxu1  ;;  %v1323_v33 = vpop.f32.mrf.mxu3 }
 0x205   : > { %v1548_v56 = vadd.f32 %v1547_v1, %v1533_v8  ;;  %v1347_v18 = vadd.f32 %v1323_v33, %v1233_v50  ;;  %v1119_v31 = vadd.f32 %v1097_v55, %v2761_v57 }
 0x206   : > { %v1437_v2 = vpop.f32.mrf.mxu0 }
 0x207   : > { %v1461_v6 = vadd.f32 %v1437_v2, %v1347_v18 }
 0x209   : > { %v1481_v35 = vadd.f32 %v2774_v20, %v1461_v6  ;;  %v1212_v46 = vpop.f32.mrf.mxu2 }
 0x20a   : > { %v1234_v60 = vadd.f32 %v1212_v46, %v1119_v31 }
 0x20b   : > { %1497 = vst [vmem:[%s1936_s10 + $0x60] sm:$0xff] %v1481_v35  ;;  %v1512_v61 = vadd.f32 %v1511_v39, %v1481_v35  ;;  %v1534_v51 = vmul.f32 %v1481_v35, %v1481_v35 }
 0x20c   : > { %v1100_v45 = vpop.f32.mrf.mxu1  ;;  %v1326_v58 = vpop.f32.mrf.mxu3 }
 0x20d   : > { %v1549_v52 = vadd.f32 %v1548_v56, %v1534_v51  ;;  %v1348_v13 = vadd.f32 %v1326_v58, %v1234_v60  ;;  %v1120_v7 = vadd.f32 %v1100_v45, %v2764_v36 }
 0x20e   : > { %v1440_v30 = vpop.f32.mrf.mxu0 }
 0x20f   : > { %v1462_v63 = vadd.f32 %v1440_v30, %v1348_v13 }
 0x211   : > { %v1482_v3 = vadd.f32 %v2774_v20, %v1462_v63  ;;  %v1215_v57 = vpop.f32.mrf.mxu2 }
 0x212   : > { %v1235_v41 = vadd.f32 %v1215_v57, %v1120_v7 }
 0x213   : > { %1498 = vst [vmem:[%s1936_s10 + $0x68] sm:$0xff] %v1482_v3  ;;  %v1513_v9 = vadd.f32 %v1512_v61, %v1482_v3  ;;  %v1535_v4 = vmul.f32 %v1482_v3, %v1482_v3 }
 0x214   : > { %v1329_v47 = vpop.f32.mrf.mxu3  ;;  %v1103_v42 = vpop.f32.mrf.mxu1 }
 0x215   : > { %v1550_v21 = vadd.f32 %v1549_v52, %v1535_v4  ;;  %v1349_v34 = vadd.f32 %v1329_v47, %v1235_v41  ;;  %v1121_v59 = vadd.f32 %v1103_v42, %v2769_v43 }
 0x216   : > { %v1443_v16 = vpop.f32.mrf.mxu0 }
 0x217   : > { %v1463_v44 = vadd.f32 %v1443_v16, %v1349_v34 }
 0x219   : > { %v1483_v12 = vadd.f32 %v2774_v20, %v1463_v44  ;;  %v1218_v36 = vpop.f32.mrf.mxu2 }
 0x21a   : > { %v1236_v15 = vadd.f32 %v1218_v36, %v1121_v59 }
 0x21b   : > { %1499 = vst [vmem:[%s1936_s10 + $0x70] sm:$0xff] %v1483_v12  ;;  %v1514_v24 = vadd.f32 %v1513_v9, %v1483_v12  ;;  %v1536_v29 = vmul.f32 %v1483_v12, %v1483_v12 }
 0x21c   : > { %v1332_v25 = vpop.f32.mrf.mxu3 }
 0x21d   : > { %v1551_v11 = vadd.f32 %v1550_v21, %v1536_v29  ;;  %v1350_v19 = vadd.f32 %v1332_v25, %v1236_v15 }
 0x21e   : > { %v1446_v14 = vpop.f32.mrf.mxu0 }
 0x21f   : > { %v1464_v10 = vadd.f32 %v1446_v14, %v1350_v19 }
 0x221   : > { %v1484_v0 = vadd.f32 %v2774_v20, %v1464_v10 }
 0x223   : > { %1500 = vst [vmem:[%s1936_s10 + $0x78] sm:$0xff] %v1484_v0  ;;  %v1515_v40 = vadd.f32 %v1514_v24, %v1484_v0  ;;  %v1537_v22 = vmul.f32 %v1484_v0, %v1484_v0 }
 0x225   : > { %v1516_v27 = vrot.slane %v1515_v40, 4  ;;  %v1552_v43 = vadd.f32 %v1551_v11, %v1537_v22 }
 0x227   : > { %v1517_v62 = vadd.f32 %v1516_v27, %v1515_v40  ;;  %v1553_v37 = vrot.slane %v1552_v43, 4 }
 0x229   : > { %v1518_v23 = vrot.slane %v1517_v62, 2  ;;  %v1554_v38 = vadd.f32 %v1553_v37, %v1552_v43 }
 0x22b   : > { %v1519_v48 = vadd.f32 %v1518_v23, %v1517_v62  ;;  %v1555_v17 = vrot.slane %v1554_v38, 2 }
 0x22d   : > { %v1520_v54 = vrot.slane %v1519_v48, 1  ;;  %v1556_v1 = vadd.f32 %v1555_v17, %v1554_v38 }
 0x22f   : > { %v1557_v28 = vrot.slane %v1556_v1, 1  ;;  %v1521_v26 = vadd.f32 %v1520_v54, %v1519_v48 }
 0x231   : > { %v1558_v49 = vadd.f32 %v1557_v28, %v1556_v1 }
 0x233   : > { %v1560_v5 = vsel %vm1559_vm8, %v1521_v26, %v1558_v49 }
 0x234   : > { %1561 = vst [vmem:[%s1930_s7] sm:$0x3] %v1560_v5 }
 0x235 PF: > { %s17_s21 = sadd.s32 1, %s1866_s21  }
 0x236   : > { %p14_p7 = scmp.ge.s32.totalorder %s17_s21, 10  }
 0x238   :  { %16 = sbr.rel (!%p14_p7) target bundleno = 1 (0x1), region = 101 }

// kernel: generator_big_forward.13
= control target key start
LH: loop header
LB: loop body
LE: loop exit
PB: predicated region body
PF: predicated region fallthrough
CT: control target
= control target key end

     0   :  { %s1986_s21 = smov 0   ;;  %s2964_s0 = inlined_call_operand.vmem [shape: f32[32,32,128], index: 0, kind: input, shape index: {}]   ;;  %s2965_s1 = inlined_call_operand.vmem [shape: f32[1,128], index: 1, kind: input, shape index: {}]   ;;  %s2966_s2 = inlined_call_operand.vmem [shape: f32[1,128], index: 2, kind: input, shape index: {}]   ;;  %s2967_s3 = inlined_call_operand.vmem [shape: f32[3,3,128,6], index: 3, kind: input, shape index: {}]   ;;  %s2968_s4 = inlined_call_operand.vmem [shape: f32[1,6], index: 4, kind: input, shape index: {}]   ;;  %s2969_s5 = inlined_call_operand.vmem [shape: f32[32,32,6], index: 5, kind: output, shape index: {0}]   ;;  %s2970_s6 = inlined_call_operand.vmem [shape: f32[8,2,6], index: 6, kind: output, shape index: {1}]  }
   0x1 LB: > { %s1992_s22 = sadd.s32 4294967295, %s1948_s21   ;;  %p1700_p0 = scmp.ge.s32.totalorder %s1948_s21, 1  ;;  %s1948_s21 = sphi %s1986_s21, %s17_s21  }
   0x2   : > { %p205_p1 = scmp.lt.s32.totalorder %s1948_s21, 9 }
   0x4   : > { %p206_p2 = pnand %p1700_p0, %p205_p1 }
   0x5   : > { %s1997_s23 = sshll.u32 (!%p206_p2), %s1992_s22, 2  ;;  %p242_p3 = scmp.lt.s32.totalorder (!%p206_p2), %s1992_s22, 7 }
   0x6   : > { %209 = sbr.rel (%p206_p2) target bundleno = 573 (0x23d), region = 40  ;;  %p236_p4 = scmp.lt.s32.totalorder (!%p206_p2), %s1997_s23, 31 }
   0x7   : > { %s1848_s27 = sshll.u32 (!%p206_p2), %s1992_s22, 7  ;;  %p1707_p5 = scmp.le.s32.totalorder (!%p206_p2), %s1992_s22, 0 }
   0x8   : > { %s2025_s13 = scalar_lea.vmem (!%p206_p2), %s2964_s0, %s1848_s27 }
   0xb   : > { %v1950_v0 = vmov 0.0   ;;  %s243_s24 = scalar_select %p242_p3, %s1992_s22, 7  ;;  %v2032_v1 = vld [vmem:[%s2965_s1] ss:$0 sm:$0xff]  ;;  %v282_v3 = vld [vmem:[%s2025_s13 + $0x8] sm:$0xff]  ;;  %v283_v4 = vld [vmem:[%s2025_s13 + $0x10] sm:$0xff] }
   0xc   : > { %254 = vst [vmem:[#allocation2 + $0x28] sm:$0xff] %v1950_v0  ;;  %s237_s25 = scalar_select %p236_p4, %s1997_s23, 31  ;;  %v281_v2 = vld [vmem:[%s2025_s13] sm:$0xff]  ;;  %v301_v7 = vmul.f32 %v2032_v1, %v282_v3  ;;  %v284_v8 = vld [vmem:[%s2025_s13 + $0x18] sm:$0xff]  ;;  %v302_v9 = vmul.f32 %v2032_v1, %v283_v4  ;;  %v286_v13 = vld [vmem:[%s2025_s13 + $0x28] sm:$0xff] }
   0xd   : > { %249 = vst [vmem:[#allocation2] sm:$0xff] %v1950_v0  ;;  %s1704_s26 = sshll.u32 %s243_s24, 1  ;;  %v300_v5 = vmul.f32 %v2032_v1, %v281_v2  ;;  %v2045_v6 = vld [vmem:[%s2966_s2] ss:$0 sm:$0xff]  ;;  %v303_v12 = vmul.f32 %v2032_v1, %v284_v8  ;;  %v287_v14 = vld [vmem:[%s2025_s13 + $0x30] sm:$0xff]  ;;  %v288_v17 = vld [vmem:[%s2025_s13 + $0x38] sm:$0xff]  ;;  %v305_v19 = vmul.f32 %v2032_v1, %v286_v13 }
   0xe   : > { %250 = vst [vmem:[#allocation2 + $0x8] sm:$0xff] %v1950_v0  ;;  %s1847_s28 = sshll.u32 %s237_s25, 5  ;;  %s2012_s7 = scalar_lea.vmem %s2970_s6, %s1704_s26  ;;  %v285_v10 = vld [vmem:[%s2025_s13 + $0x20] sm:$0xff]  ;;  %v320_v15 = vadd.f32 %v2045_v6, %v301_v7  ;;  %v321_v18 = vadd.f32 %v2045_v6, %v302_v9  ;;  %v306_v20 = vmul.f32 %v2032_v1, %v287_v14  ;;  %v307_v24 = vmul.f32 %v2032_v1, %v288_v17  ;;  %v290_v25 = vld [vmem:[%s2025_s13 + $0x48] sm:$0xff]  ;;  %v291_v28 = vld [vmem:[%s2025_s13 + $0x50] sm:$0xff] }
   0xf   : > { %251 = vst [vmem:[#allocation2 + $0x10] sm:$0xff] %v1950_v0  ;;  %s2018_s10 = scalar_lea.vmem %s2969_s5, %s1847_s28  ;;  %v319_v11 = vadd.f32 %v2045_v6, %v300_v5  ;;  %v304_v16 = vmul.f32 %v2032_v1, %v285_v10  ;;  %v289_v21 = vld [vmem:[%s2025_s13 + $0x40] sm:$0xff]  ;;  %v322_v23 = vadd.f32 %v2045_v6, %v303_v12  ;;  %v292_v31 = vld [vmem:[%s2025_s13 + $0x58] sm:$0xff]  ;;  %v324_v32 = vadd.f32 %v2045_v6, %v305_v19  ;;  %v294_v40 = vld [vmem:[%s2025_s13 + $0x68] sm:$0xff]  ;;  %s1708_s18 = sadd.s32 (!%p1707_p5), 4294967295, %s1997_s23 }
  0x10   : > { %252 = vst [vmem:[#allocation2 + $0x18] sm:$0xff] %v1950_v0  ;;  %v352_v26 = vmul.f32 0.2, %v320_v15  ;;  %vm336_vm1 = vcmp.ge.f32.partialorder %v320_v15, 0.0  ;;  %v353_v29 = vmul.f32 0.2, %v321_v18  ;;  %v308_v30 = vmul.f32 %v2032_v1, %v289_v21 }
  0x11   : > { %253 = vst [vmem:[#allocation2 + $0x20] sm:$0x3] %v1950_v0  ;;  %v351_v22 = vmul.f32 0.2, %v319_v11  ;;  %vm335_vm0 = vcmp.ge.f32.partialorder %v319_v11, 0.0  ;;  %v323_v27 = vadd.f32 %v2045_v6, %v304_v16  ;;  %vm337_vm2 = vcmp.ge.f32.partialorder %v321_v18, 0.0 }
  0x12   : > { %255 = vst [vmem:[#allocation2 + $0x30] sm:$0xff] %v1950_v0  ;;  %v325_v33 = vadd.f32 %v2045_v6, %v306_v20  ;;  %v309_v34 = vmul.f32 %v2032_v1, %v290_v25  ;;  %v293_v35 = vld [vmem:[%s2025_s13 + $0x60] sm:$0xff]  ;;  %v354_v37 = vmul.f32 0.2, %v322_v23  ;;  %v326_v38 = vadd.f32 %v2045_v6, %v307_v24  ;;  %v295_v43 = vld [vmem:[%s2025_s13 + $0x70] sm:$0xff]  ;;  %v296_v48 = vld [vmem:[%s2025_s13 + $0x78] sm:$0xff] }
  0x13   : > { %256 = vst [vmem:[#allocation2 + $0x38] sm:$0xff] %v1950_v0  ;;  %v367_v36 = vsel %vm335_vm0, %v319_v11, %v351_v22  ;;  %v310_v39 = vmul.f32 %v2032_v1, %v291_v28  ;;  %v368_v41 = vsel %vm336_vm1, %v320_v15, %v352_v26  ;;  %vm338_vm3 = vcmp.ge.f32.partialorder %v322_v23, 0.0  ;;  %s1709_s19 = sshll.u32 (!%p1707_p5), %s1708_s18, 5 }
  0x14   : > { %257 = vst [vmem:[#allocation2 + $0x40] sm:$0xff] %v1950_v0  ;;  %vm339_vm4 = vcmp.ge.f32.partialorder %v323_v27, 0.0  ;;  %v311_v42 = vmul.f32 %v2032_v1, %v292_v31  ;;  %v369_v44 = vsel %vm337_vm2, %v321_v18, %v353_v29  ;;  %v355_v45 = vmul.f32 0.2, %v323_v27  ;;  %s406_s25 = scalar_lea.vmem (!%p1707_p5), %s2964_s0, %s1709_s19 }
  0x15   : > { %258 = vst [vmem:[#allocation2 + $0x48] sm:$0x3] %v1950_v0  ;;  %v327_v46 = vadd.f32 %v2045_v6, %v308_v30  ;;  %v312_v47 = vmul.f32 %v2032_v1, %v293_v35  ;;  %vm340_vm5 = vcmp.ge.f32.partialorder %v324_v32, 0.0  ;;  %v356_v49 = vmul.f32 0.2, %v324_v32 }
  0x16   : > { %259 = vst [vmem:[#allocation2 + $0x50] sm:$0xff] %v1950_v0  ;;  %v328_v50 = vadd.f32 %v2045_v6, %v309_v34  ;;  %v313_v51 = vmul.f32 %v2032_v1, %v294_v40  ;;  %v370_v52 = vsel %vm338_vm3, %v322_v23, %v354_v37  ;;  %v357_v53 = vmul.f32 0.2, %v325_v33 }
  0x17   : > { %260 = vst [vmem:[#allocation2 + $0x58] sm:$0xff] %v1950_v0  ;;  %v329_v54 = vadd.f32 %v2045_v6, %v310_v39  ;;  %v314_v55 = vmul.f32 %v2032_v1, %v295_v43  ;;  %vm341_vm6 = vcmp.ge.f32.partialorder %v325_v33, 0.0  ;;  %v358_v56 = vmul.f32 0.2, %v326_v38 }
  0x18   : > { %261 = vst [vmem:[#allocation2 + $0x60] sm:$0xff] %v1950_v0  ;;  %v330_v57 = vadd.f32 %v2045_v6, %v311_v42  ;;  %v315_v58 = vmul.f32 %v2032_v1, %v296_v48  ;;  %v371_v59 = vsel %vm339_vm4, %v323_v27, %v355_v45  ;;  %vm342_vm7 = vcmp.ge.f32.partialorder %v326_v38, 0.0 }
  0x19   : > { %262 = vst [vmem:[#allocation2 + $0x68] sm:$0xff] %v1950_v0  ;;  %v359_v60 = vmul.f32 0.2, %v327_v46  ;;  %v331_v61 = vadd.f32 %v2045_v6, %v312_v47  ;;  %v372_v62 = vsel %vm340_vm5, %v324_v32, %v356_v49  ;;  %vm343_vm8 = vcmp.ge.f32.partialorder %v327_v46, 0.0 }
  0x1a   : > { %263 = vst [vmem:[#allocation2 + $0x70] sm:$0x3] %v1950_v0  ;;  %v360_v63 = vmul.f32 0.2, %v328_v50  ;;  %v373_v2 = vsel %vm341_vm6, %v325_v33, %v357_v53  ;;  %vm344_vm9 = vcmp.ge.f32.partialorder %v328_v50, 0.0  ;;  %v333_v4 = vadd.f32 %v2045_v6, %v314_v55 }
  0x1b   : > { %264 = vst [vmem:[#allocation2 + $0x78] sm:$0xff] %v1950_v0  ;;  %v361_v3 = vmul.f32 0.2, %v329_v54  ;;  %v374_v5 = vsel %vm342_vm7, %v326_v38, %v358_v56  ;;  %vm345_vm10 = vcmp.ge.f32.partialorder %v329_v54, 0.0  ;;  %v362_v7 = vmul.f32 0.2, %v330_v57 }
  0x1c   : > { %265 = vst [vmem:[#allocation2 + $0x80] sm:$0xff] %v1950_v0  ;;  %v334_v8 = vadd.f32 %v2045_v6, %v315_v58  ;;  %v375_v9 = vsel %vm343_vm8, %v327_v46, %v359_v60  ;;  %vm346_vm11 = vcmp.ge.f32.partialorder %v330_v57, 0.0  ;;  %v363_v10 = vmul.f32 0.2, %v331_v61 }
  0x1d   : > { %266 = vst [vmem:[#allocation2 + $0x88] sm:$0xff] %v1950_v0  ;;  %v376_v11 = vsel %vm344_vm9, %v328_v50, %v360_v63  ;;  %vm347_vm12 = vcmp.ge.f32.partialorder %v331_v61, 0.0  ;;  %v377_v13 = vsel %vm345_vm10, %v329_v54, %v361_v3  ;;  %v365_v14 = vmul.f32 0.2, %v333_v4 }
  0x1e   : > { %267 = vst [vmem:[#allocation2 + $0x90] sm:$0xff] %v1950_v0  ;;  %v378_v15 = vsel %vm346_vm11, %v330_v57, %v362_v7  ;;  %vm349_vm14 = vcmp.ge.f32.partialorder %v333_v4, 0.0  ;;  %v366_v16 = vmul.f32 0.2, %v334_v8  ;;  %v379_v17 = vsel %vm347_vm12, %v331_v61, %v363_v10 }
  0x1f   : > { %268 = vst [vmem:[#allocation2 + $0x98] sm:$0x3] %v1950_v0  ;;  %vm350_vm15 = vcmp.ge.f32.partialorder %v334_v8, 0.0  ;;  %v381_v19 = vsel %vm349_vm14, %v333_v4, %v365_v14 }
  0x20   : > { %269 = vst [vmem:[#allocation2 + $0xa0] sm:$0xff] %v1950_v0  ;;  %v382_v20 = vsel %vm350_vm15, %v334_v8, %v366_v16 }
  0x21   : > { %270 = vst [vmem:[#allocation2 + $0xa8] sm:$0xff] %v1950_v0 }
  0x22   : > { %271 = vst [vmem:[#allocation2 + $0xb0] sm:$0xff] %v1950_v0 }
  0x23   : > { %272 = vst [vmem:[#allocation2 + $0xb8] sm:$0xff] %v1950_v0 }
  0x24   : > { %273 = vst [vmem:[#allocation2 + $0xc0] sm:$0x3] %v1950_v0 }
  0x25   : > { %274 = vst [vmem:[#allocation2 + $0xc8] sm:$0xff] %v1950_v0 }
  0x26   : > { %275 = vst [vmem:[#allocation2 + $0xd0] sm:$0xff] %v1950_v0 }
  0x27   : > { %276 = vst [vmem:[#allocation2 + $0xd8] sm:$0xff] %v1950_v0 }
  0x28   : > { %277 = vst [vmem:[#allocation2 + $0xe0] sm:$0xff] %v1950_v0 }
  0x29   : > { %278 = vst [vmem:[#allocation2 + $0xe8] sm:$0x3] %v1950_v0  ;;  %v332_v0 = vadd.f32 %v2045_v6, %v313_v51 }
  0x2a   : > { %384 = vst [vmem:[#allocation2 + $0x29] sm:$0xff] %v367_v36 }
  0x2b   : > { %385 = vst [vmem:[#allocation2 + $0x31] sm:$0xff] %v368_v41  ;;  %v364_v12 = vmul.f32 0.2, %v332_v0  ;;  %vm348_vm13 = vcmp.ge.f32.partialorder %v332_v0, 0.0 }
  0x2c   : > { %386 = vst [vmem:[#allocation2 + $0x39] sm:$0xff] %v369_v44 }
  0x2d   : > { %387 = vst [vmem:[#allocation2 + $0x41] sm:$0xff] %v370_v52  ;;  %v380_v18 = vsel %vm348_vm13, %v332_v0, %v364_v12 }
  0x2e   : > { %388 = vst [vmem:[#allocation2 + $0x51] sm:$0xff] %v371_v59 }
  0x2f   : > { %389 = vst [vmem:[#allocation2 + $0x59] sm:$0xff] %v372_v62 }
  0x30   : > { %390 = vst [vmem:[#allocation2 + $0x61] sm:$0xff] %v373_v2 }
  0x31   : > { %391 = vst [vmem:[#allocation2 + $0x69] sm:$0xff] %v374_v5 }
  0x32   : > { %392 = vst [vmem:[#allocation2 + $0x79] sm:$0xff] %v375_v9 }
  0x33   : > { %393 = vst [vmem:[#allocation2 + $0x81] sm:$0xff] %v376_v11 }
  0x34   : > { %394 = vst [vmem:[#allocation2 + $0x89] sm:$0xff] %v377_v13 }
  0x35   : > { %395 = vst [vmem:[#allocation2 + $0x91] sm:$0xff] %v378_v15  ;;  %403 = sbr.rel (%p1707_p5) target bundleno = 70 (0x46), region = 44 }
  0x36   : > { %396 = vst [vmem:[#allocation2 + $0xa1] sm:$0xff] %v379_v17 }
  0x37   : > { %397 = vst [vmem:[#allocation2 + $0xa9] sm:$0xff] %v380_v18 }
  0x38   : > { %398 = vst [vmem:[#allocation2 + $0xb1] sm:$0xff] %v381_v19 }
  0x39   : > { %399 = vst [vmem:[#allocation2 + $0xb9] sm:$0xff] %v382_v20 }
  0x3a   : > { %v407_v21 = vld [vmem:[%s406_s25] sm:$0xff]  ;;  %v408_v22 = vld [vmem:[%s406_s25 + $0x8] sm:$0xff]  ;;  %v409_v23 = vld [vmem:[%s406_s25 + $0x10] sm:$0xff] }
  0x3b   : > { %v411_v24 = vmul.f32 %v2032_v1, %v407_v21  ;;  %v412_v25 = vmul.f32 %v2032_v1, %v408_v22  ;;  %v413_v26 = vmul.f32 %v2032_v1, %v409_v23  ;;  %v410_v27 = vld [vmem:[%s406_s25 + $0x18] sm:$0xff] }
  0x3c   : > { %v414_v28 = vmul.f32 %v2032_v1, %v410_v27 }
  0x3d   : > { %v415_v29 = vadd.f32 %v2045_v6, %v411_v24  ;;  %v416_v30 = vadd.f32 %v2045_v6, %v412_v25  ;;  %v417_v31 = vadd.f32 %v2045_v6, %v413_v26 }
  0x3e   : > { %v418_v32 = vadd.f32 %v2045_v6, %v414_v28 }
  0x3f   : > { %vm419_vm0 = vcmp.ge.f32.partialorder %v415_v29, 0.0  ;;  %v423_v33 = vmul.f32 0.2, %v415_v29  ;;  %vm420_vm1 = vcmp.ge.f32.partialorder %v416_v30, 0.0  ;;  %v424_v34 = vmul.f32 0.2, %v416_v30 }
  0x40   : > { %vm421_vm2 = vcmp.ge.f32.partialorder %v417_v31, 0.0  ;;  %v425_v35 = vmul.f32 0.2, %v417_v31  ;;  %vm422_vm3 = vcmp.ge.f32.partialorder %v418_v32, 0.0  ;;  %v426_v36 = vmul.f32 0.2, %v418_v32 }
  0x41   : > { %v427_v37 = vsel %vm419_vm0, %v415_v29, %v423_v33  ;;  %v428_v38 = vsel %vm420_vm1, %v416_v30, %v424_v34 }
  0x42   : > { %431 = vst [vmem:[#allocation2 + $0x1] sm:$0xff] %v427_v37  ;;  %v429_v39 = vsel %vm421_vm2, %v417_v31, %v425_v35  ;;  %v430_v40 = vsel %vm422_vm3, %v418_v32, %v426_v36 }
  0x43   : > { %432 = vst [vmem:[#allocation2 + $0x9] sm:$0xff] %v428_v38 }
  0x44   : > { %433 = vst [vmem:[#allocation2 + $0x11] sm:$0xff] %v429_v39 }
  0x45   : > { %434 = vst [vmem:[#allocation2 + $0x19] sm:$0xff] %v430_v40 }
  0x46 PF: > { %p1710_p6 = scmp.ge.s32.totalorder %s1992_s22, 7 }
  0x48   : > { %438 = sbr.rel (%p1710_p6) target bundleno = 89 (0x59), region = 48 }
  0x4d   : > { %v1713_v41 = vld [vmem:[%s2025_s13 + $0x80] sm:$0xff]  ;;  %v1714_v42 = vld [vmem:[%s2025_s13 + $0x88] sm:$0xff]  ;;  %v1715_v43 = vld [vmem:[%s2025_s13 + $0x90] sm:$0xff] }
  0x4e   : > { %v446_v44 = vmul.f32 %v2032_v1, %v1713_v41  ;;  %v447_v45 = vmul.f32 %v2032_v1, %v1714_v42  ;;  %v448_v46 = vmul.f32 %v2032_v1, %v1715_v43  ;;  %v1716_v47 = vld [vmem:[%s2025_s13 + $0x98] sm:$0xff] }
  0x4f   : > { %v449_v48 = vmul.f32 %v2032_v1, %v1716_v47 }
  0x50   : > { %v450_v49 = vadd.f32 %v2045_v6, %v446_v44  ;;  %v451_v50 = vadd.f32 %v2045_v6, %v447_v45  ;;  %v452_v51 = vadd.f32 %v2045_v6, %v448_v46 }
  0x51   : > { %v453_v52 = vadd.f32 %v2045_v6, %v449_v48 }
  0x52   : > { %vm454_vm4 = vcmp.ge.f32.partialorder %v450_v49, 0.0  ;;  %v458_v53 = vmul.f32 0.2, %v450_v49  ;;  %vm455_vm5 = vcmp.ge.f32.partialorder %v451_v50, 0.0  ;;  %v459_v54 = vmul.f32 0.2, %v451_v50 }
  0x53   : > { %vm456_vm6 = vcmp.ge.f32.partialorder %v452_v51, 0.0  ;;  %v460_v55 = vmul.f32 0.2, %v452_v51  ;;  %vm457_vm7 = vcmp.ge.f32.partialorder %v453_v52, 0.0  ;;  %v461_v56 = vmul.f32 0.2, %v453_v52 }
  0x54   : > { %v462_v57 = vsel %vm454_vm4, %v450_v49, %v458_v53  ;;  %v463_v58 = vsel %vm455_vm5, %v451_v50, %v459_v54 }
  0x55   : > { %467 = vst [vmem:[#allocation2 + $0xc9] sm:$0xff] %v462_v57  ;;  %v464_v1 = vsel %vm456_vm6, %v452_v51, %v460_v55  ;;  %v465_v59 = vsel %vm457_vm7, %v453_v52, %v461_v56 }
  0x56   : > { %468 = vst [vmem:[#allocation2 + $0xd1] sm:$0xff] %v463_v58 }
  0x57   : > { %469 = vst [vmem:[#allocation2 + $0xd9] sm:$0xff] %v464_v1 }
  0x58   : > { %470 = vst [vmem:[#allocation2 + $0xe1] sm:$0xff] %v465_v59 }
  0x59 PF: > { %v1732_v6 = vld [vmem:[%s2967_s3 + $0xf8] sm:$0xff]  ;;  %v1731_v60 = vld [vmem:[%s2967_s3 + $0xf0] sm:$0xff]  ;;  %v1730_v61 = vld [vmem:[%s2967_s3 + $0xe8] sm:$0xff]  ;;  %vm1501_vm8 = vcmask 48128   ;;  %vm1608_vm9 = vcmask 1040384   ;;  %vm1610_vm10 = vcmask 41984  }
  0x5a   : > { %1850 = vmatpush.msra.mxu1 %v1732_v6  ;;  %1851 = vmatpush.msra.mxu2 %v1732_v6  ;;  %v1729_v62 = vld [vmem:[%s2967_s3 + $0xe0] sm:$0xff]  ;;  %v1728_v63 = vld [vmem:[%s2967_s3 + $0xd8] sm:$0xff]  ;;  %v1727_v0 = vld [vmem:[%s2967_s3 + $0xd0] sm:$0xff] }
  0x5b   : > { %1852 = vmatpush.msra.mxu3 %v1732_v6  ;;  %536 = vmatpush.msra.mxu0 %v1732_v6  ;;  %v1726_v2 = vld [vmem:[%s2967_s3 + $0xc8] sm:$0xff]  ;;  %v1725_v3 = vld [vmem:[%s2967_s3 + $0xc0] sm:$0xff]  ;;  %v1724_v4 = vld [vmem:[%s2967_s3 + $0xb8] sm:$0xff] }
  0x5c   : > { %1853 = vmatpush.msra.mxu1 %v1731_v60  ;;  %1854 = vmatpush.msra.mxu2 %v1731_v60  ;;  %v1723_v5 = vld [vmem:[%s2967_s3 + $0xb0] sm:$0xff]  ;;  %v1722_v7 = vld [vmem:[%s2967_s3 + $0xa8] sm:$0xff]  ;;  %v1721_v8 = vld [vmem:[%s2967_s3 + $0xa0] sm:$0xff] }
  0x5d   : > { %1855 = vmatpush.msra.mxu3 %v1731_v60  ;;  %537 = vmatpush.msra.mxu0 %v1731_v60  ;;  %v1720_v9 = vld [vmem:[%s2967_s3 + $0x98] sm:$0xff]  ;;  %v1719_v10 = vld [vmem:[%s2967_s3 + $0x90] sm:$0xff]  ;;  %v1718_v11 = vld [vmem:[%s2967_s3 + $0x88] sm:$0xff] }
  0x5e   : > { %1856 = vmatpush.msra.mxu1 %v1730_v61  ;;  %1857 = vmatpush.msra.mxu2 %v1730_v61  ;;  %v1717_v12 = vld [vmem:[%s2967_s3 + $0x80] sm:$0xff]  ;;  %v2187_v13 = vld [vmem:[#allocation2 + $0x29] sm:$0xff]  ;;  %v2189_v14 = vld [vmem:[#allocation2 + $0x51] sm:$0xff] }
  0x5f   : > { %1858 = vmatpush.msra.mxu3 %v1730_v61  ;;  %538 = vmatpush.msra.mxu0 %v1730_v61  ;;  %v1748_v15 = vld [vmem:[%s2967_s3 + $0x178] sm:$0xff]  ;;  %v1747_v18 = vld [vmem:[%s2967_s3 + $0x170] sm:$0xff]  ;;  %v1746_v21 = vld [vmem:[%s2967_s3 + $0x168] sm:$0xff] }
  0x60   : > { %1859 = vmatpush.msra.mxu1 %v1729_v62  ;;  %1860 = vmatpush.msra.mxu2 %v1729_v62  ;;  %v502_v16 = vld [vmem:[%s2967_s3 + $0x78] sm:$0xff]  ;;  %v501_v20 = vld [vmem:[%s2967_s3 + $0x70] sm:$0xff]  ;;  %v500_v23 = vld [vmem:[%s2967_s3 + $0x68] sm:$0xff] }
  0x61   : > { %1861 = vmatpush.msra.mxu3 %v1729_v62  ;;  %539 = vmatpush.msra.mxu0 %v1729_v62  ;;  %v2197_v17 = vld [vmem:[#allocation2 + $0x79] sm:$0xff]  ;;  %v1763_v22 = vld [vmem:[%s2967_s3 + $0x1f0] sm:$0xff]  ;;  %v503_v24 = vld [vmem:[#allocation2 + $0x1] sm:$0xff] }
  0x62   : > { %1862 = vmatpush.msra.mxu1 %v1728_v63  ;;  %1863 = vmatpush.msra.mxu2 %v1728_v63  ;;  %v1764_v19 = vld [vmem:[%s2967_s3 + $0x1f8] sm:$0xff]  ;;  %v1745_v25 = vld [vmem:[%s2967_s3 + $0x160] sm:$0xff]  ;;  %v1762_v26 = vld [vmem:[%s2967_s3 + $0x1e8] sm:$0xff] }
  0x63   : > { %1864 = vmatpush.msra.mxu3 %v1728_v63  ;;  %540 = vmatpush.msra.mxu0 %v1728_v63  ;;  %v499_v27 = vld [vmem:[%s2967_s3 + $0x60] sm:$0xff]  ;;  %v2231_v29 = vld [vmem:[#allocation2 + $0x31] sm:$0xff]  ;;  %v1742_v38 = vld [vmem:[%s2967_s3 + $0x148] sm:$0xff] }
  0x64   : > { %1865 = vmatpush.msra.mxu1 %v1727_v0  ;;  %1866 = vmatpush.msra.mxu2 %v1727_v0  ;;  %v2229_v28 = vld [vmem:[#allocation2 + $0x59] sm:$0xff]  ;;  %v2243_v33 = vld [vmem:[#allocation2 + $0x81] sm:$0xff]  ;;  %v1743_v34 = vld [vmem:[%s2967_s3 + $0x150] sm:$0xff] }
  0x65   : > { %1867 = vmatpush.msra.mxu3 %v1727_v0  ;;  %541 = vmatpush.msra.mxu0 %v1727_v0  ;;  %v1744_v30 = vld [vmem:[%s2967_s3 + $0x158] sm:$0xff]  ;;  %v1761_v31 = vld [vmem:[%s2967_s3 + $0x1e0] sm:$0xff]  ;;  %v497_v37 = vld [vmem:[%s2967_s3 + $0x50] sm:$0xff] }
  0x66   : > { %1868 = vmatpush.msra.mxu1 %v1726_v2  ;;  %1869 = vmatpush.msra.mxu2 %v1726_v2  ;;  %v498_v32 = vld [vmem:[%s2967_s3 + $0x58] sm:$0xff]  ;;  %v1759_v39 = vld [vmem:[%s2967_s3 + $0x1d0] sm:$0xff]  ;;  %v496_v41 = vld [vmem:[%s2967_s3 + $0x48] sm:$0xff] }
  0x67   : > { %1870 = vmatpush.msra.mxu3 %v1726_v2  ;;  %542 = vmatpush.msra.mxu0 %v1726_v2  ;;  %v1760_v35 = vld [vmem:[%s2967_s3 + $0x1d8] sm:$0xff]  ;;  %v1779_v40 = vld [vmem:[%s2967_s3 + $0x270] sm:$0xff]  ;;  %v1741_v42 = vld [vmem:[%s2967_s3 + $0x140] sm:$0xff] }
  0x68   : > { %1871 = vmatpush.msra.mxu1 %v1725_v3  ;;  %1872 = vmatpush.msra.mxu2 %v1725_v3  ;;  %v1780_v36 = vld [vmem:[%s2967_s3 + $0x278] sm:$0xff]  ;;  %v1758_v43 = vld [vmem:[%s2967_s3 + $0x1c8] sm:$0xff]  ;;  %v495_v45 = vld [vmem:[%s2967_s3 + $0x40] sm:$0xff] }
  0x69   : > { %1873 = vmatpush.msra.mxu3 %v1725_v3  ;;  %543 = vmatpush.msra.mxu0 %v1725_v3  ;;  %v1778_v44 = vld [vmem:[%s2967_s3 + $0x268] sm:$0xff]  ;;  %v2285_v47 = vld [vmem:[#allocation2 + $0x39] sm:$0xff]  ;;  %v1739_v54 = vld [vmem:[%s2967_s3 + $0x130] sm:$0xff] }
  0x6a   : > { %1874 = vmatpush.msra.mxu1 %v1724_v4  ;;  %1875 = vmatpush.msra.mxu2 %v1724_v4  ;;  %v2283_v46 = vld [vmem:[#allocation2 + $0x61] sm:$0xff]  ;;  %v1740_v48 = vld [vmem:[%s2967_s3 + $0x138] sm:$0xff]  ;;  %v504_v52 = vld [vmem:[#allocation2 + $0x9] sm:$0xff] }
  0x6b   : > { %1876 = vmatpush.msra.mxu3 %v1724_v4  ;;  %544 = vmatpush.msra.mxu0 %v1724_v4  ;;  %v1757_v49 = vld [vmem:[%s2967_s3 + $0x1c0] sm:$0xff]  ;;  %v494_v51 = vld [vmem:[%s2967_s3 + $0x38] sm:$0xff]  ;;  %v2301_v53 = vld [vmem:[#allocation2 + $0x89] sm:$0xff] }
  0x6c   : > { %1877 = vmatpush.msra.mxu1 %v1723_v5  ;;  %1878 = vmatpush.msra.mxu2 %v1723_v5  ;;  %v1777_v50 = vld [vmem:[%s2967_s3 + $0x260] sm:$0xff]  ;;  %v1756_v55 = vld [vmem:[%s2967_s3 + $0x1b8] sm:$0xff]  ;;  %v493_v57 = vld [vmem:[%s2967_s3 + $0x30] sm:$0xff] }
  0x6d   : > { %1879 = vmatpush.msra.mxu3 %v1723_v5  ;;  %545 = vmatpush.msra.mxu0 %v1723_v5  ;;  %v1776_v56 = vld [vmem:[%s2967_s3 + $0x258] sm:$0xff]  ;;  %v1738_v58 = vld [vmem:[%s2967_s3 + $0x128] sm:$0xff]  ;;  %v1755_v1 = vld [vmem:[%s2967_s3 + $0x1b0] sm:$0xff] }
  0x6e   : > { %1880 = vmatpush.msra.mxu1 %v1722_v7  ;;  %1881 = vmatpush.msra.mxu2 %v1722_v7  ;;  %v1775_v59 = vld [vmem:[%s2967_s3 + $0x250] sm:$0xff]  ;;  %v492_v6 = vld [vmem:[%s2967_s3 + $0x28] sm:$0xff]  ;;  %v1737_v60 = vld [vmem:[%s2967_s3 + $0x120] sm:$0xff] }
  0x6f   : > { %1882 = vmatpush.msra.mxu3 %v1722_v7  ;;  %546 = vmatpush.msra.mxu0 %v1722_v7  ;;  %v1754_v61 = vld [vmem:[%s2967_s3 + $0x1a8] sm:$0xff]  ;;  %v491_v63 = vld [vmem:[%s2967_s3 + $0x20] sm:$0xff]  ;;  %v1736_v3 = vld [vmem:[%s2967_s3 + $0x118] sm:$0xff] }
  0x70   : > { %1883 = vmatpush.msra.mxu1 %v1721_v8  ;;  %1884 = vmatpush.msra.mxu2 %v1721_v8  ;;  %v1774_v62 = vld [vmem:[%s2967_s3 + $0x248] sm:$0xff]  ;;  %v1753_v4 = vld [vmem:[%s2967_s3 + $0x1a0] sm:$0xff]  ;;  %v490_v7 = vld [vmem:[%s2967_s3 + $0x18] sm:$0xff] }
  0x71   : > { %1885 = vmatpush.msra.mxu3 %v1721_v8  ;;  %547 = vmatpush.msra.mxu0 %v1721_v8  ;;  %v2340_v0 = vld [vmem:[#allocation2 + $0x69] sm:$0xff]  ;;  %v2342_v2 = vld [vmem:[#allocation2 + $0x41] sm:$0xff]  ;;  %v505_v8 = vld [vmem:[#allocation2 + $0x11] sm:$0xff] }
  0x72   : > { %1886 = vmatpush.msra.mxu1 %v1720_v9  ;;  %1887 = vmatpush.msra.mxu2 %v1720_v9  ;;  %v1773_v5 = vld [vmem:[%s2967_s3 + $0x240] sm:$0xff] }
  0x73   : > { %1888 = vmatpush.msra.mxu3 %v1720_v9  ;;  %548 = vmatpush.msra.mxu0 %v1720_v9  ;;  %v2358_v9 = vld [vmem:[#allocation2 + $0x91] sm:$0xff] }
  0x74   : > { %1889 = vmatpush.msra.mxu1 %v1719_v10  ;;  %1890 = vmatpush.msra.mxu2 %v1719_v10 }
  0x75   : > { %1891 = vmatpush.msra.mxu3 %v1719_v10  ;;  %549 = vmatpush.msra.mxu0 %v1719_v10  ;;  %v1735_v10 = vld [vmem:[%s2967_s3 + $0x110] sm:$0xff] }
  0x76   : > { %1892 = vmatpush.msra.mxu1 %v1718_v11  ;;  %1893 = vmatpush.msra.mxu2 %v1718_v11 }
  0x77   : > { %1894 = vmatpush.msra.mxu3 %v1718_v11  ;;  %550 = vmatpush.msra.mxu0 %v1718_v11  ;;  %v1752_v11 = vld [vmem:[%s2967_s3 + $0x198] sm:$0xff] }
  0x78   : > { %1895 = vmatpush.msra.mxu1 %v1717_v12  ;;  %1896 = vmatpush.msra.mxu2 %v1717_v12 }
  0x79   : > { %564 = vmatmul.f32.vlgmr.msra.gmra.mxu1 %v2187_v13  ;;  %576 = vmatmul.f32.vlgmr.msra.gmra.mxu2 %v2189_v14 }
  0x7a   : > { %699 = vmatpush.msrb.mxu2 %v1748_v15  ;;  %1897 = vmatpush.msra.mxu3 %v1717_v12  ;;  %v489_v15 = vld [vmem:[%s2967_s3 + $0x10] sm:$0xff] }
  0x7b   : > { %601 = vmatpush.msrb.mxu1 %v502_v16  ;;  %588 = vmatmul.f32.vlgmr.msra.gmra.mxu3 %v2197_v17  ;;  %v1734_v16 = vld [vmem:[%s2967_s3 + $0x108] sm:$0xff] }
  0x7c   : > { %700 = vmatpush.msrb.mxu2 %v1747_v18  ;;  %813 = vmatpush.msrb.mxu3 %v1764_v19  ;;  %v1751_v18 = vld [vmem:[%s2967_s3 + $0x190] sm:$0xff] }
  0x7d   : > { %602 = vmatpush.msrb.mxu1 %v501_v20  ;;  %551 = vmatpush.msra.mxu0 %v1717_v12  ;;  %v1772_v12 = vld [vmem:[%s2967_s3 + $0x238] sm:$0xff]  ;;  %v1771_v19 = vld [vmem:[%s2967_s3 + $0x230] sm:$0xff]  ;;  %v488_v20 = vld [vmem:[%s2967_s3 + $0x8] sm:$0xff] }
  0x7e   : > { %701 = vmatpush.msrb.mxu2 %v1746_v21  ;;  %814 = vmatpush.msrb.mxu3 %v1763_v22  ;;  %v1733_v21 = vld [vmem:[%s2967_s3 + $0x100] sm:$0xff]  ;;  %v1750_v22 = vld [vmem:[%s2967_s3 + $0x188] sm:$0xff] }
  0x7f   : > { %603 = vmatpush.msrb.mxu1 %v500_v23  ;;  %552 = vmatmul.f32.vlgmr.msra.gmra.mxu0 %v503_v24  ;;  %v1770_v23 = vld [vmem:[%s2967_s3 + $0x228] sm:$0xff]  ;;  %v487_v24 = vld [vmem:[%s2967_s3] sm:$0xff] }
  0x80   : > { %702 = vmatpush.msrb.mxu2 %v1745_v25  ;;  %815 = vmatpush.msrb.mxu3 %v1762_v26  ;;  %v666_v25 = vld [vmem:[#allocation2 + $0x2] sm:$0xff] }
  0x81   : > { %604 = vmatpush.msrb.mxu1 %v499_v27  ;;  %579 = vmatmul.f32.gmra.mxu2 %v2229_v28  ;;  %v471_v26 = vld [vmem:[#allocation2] sm:$0xff] }
  0x82   : > { %567 = vmatmul.f32.gmra.mxu1 %v2231_v29  ;;  %703 = vmatpush.msrb.mxu2 %v1744_v30  ;;  %v1749_v27 = vld [vmem:[%s2967_s3 + $0x180] sm:$0xff] }
  0x83   : > { %816 = vmatpush.msrb.mxu3 %v1761_v31  ;;  %605 = vmatpush.msrb.mxu1 %v498_v32  ;;  %v1769_v30 = vld [vmem:[%s2967_s3 + $0x220] sm:$0xff]  ;;  %v1812_v31 = vld [vmem:[%s2967_s3 + $0x378] sm:$0xff] }
  0x84   : > { %591 = vmatmul.f32.gmra.mxu3 %v2243_v33  ;;  %704 = vmatpush.msrb.mxu2 %v1743_v34  ;;  %v506_v32 = vld [vmem:[#allocation2 + $0x19] sm:$0xff]  ;;  %v2406_v34 = vld [vmem:[#allocation2 + $0x28] sm:$0xff] }
  0x85   : > { %817 = vmatpush.msrb.mxu3 %v1760_v35  ;;  %927 = vmatpush.msrb.mxu0 %v1780_v36  ;;  %v1768_v35 = vld [vmem:[%s2967_s3 + $0x218] sm:$0xff] }
  0x86   : > { %606 = vmatpush.msrb.mxu1 %v497_v37  ;;  %705 = vmatpush.msrb.mxu2 %v1742_v38  ;;  %v1828_v36 = vld [vmem:[%s2967_s3 + $0x3f8] sm:$0xff]  ;;  %v1811_v38 = vld [vmem:[%s2967_s3 + $0x370] sm:$0xff] }
  0x87   : > { %818 = vmatpush.msrb.mxu3 %v1759_v39  ;;  %928 = vmatpush.msrb.mxu0 %v1779_v40  ;;  %v1796_v37 = vld [vmem:[%s2967_s3 + $0x2f8] sm:$0xff]  ;;  %v1767_v39 = vld [vmem:[%s2967_s3 + $0x210] sm:$0xff] }
  0x88   : > { %607 = vmatpush.msrb.mxu1 %v496_v41  ;;  %706 = vmatpush.msrb.mxu2 %v1741_v42  ;;  %v1827_v40 = vld [vmem:[%s2967_s3 + $0x3f0] sm:$0xff]  ;;  %v1810_v42 = vld [vmem:[%s2967_s3 + $0x368] sm:$0xff] }
  0x89   : > { %819 = vmatpush.msrb.mxu3 %v1758_v43  ;;  %929 = vmatpush.msrb.mxu0 %v1778_v44  ;;  %v1795_v41 = vld [vmem:[%s2967_s3 + $0x2f0] sm:$0xff]  ;;  %v1766_v43 = vld [vmem:[%s2967_s3 + $0x208] sm:$0xff] }
  0x8a   : > { %608 = vmatpush.msrb.mxu1 %v495_v45  ;;  %582 = vmatmul.f32.gmra.mxu2 %v2283_v46  ;;  %v667_v44 = vld [vmem:[#allocation2 + $0xa] sm:$0xff] }
  0x8b   : > { %570 = vmatmul.f32.gmra.mxu1 %v2285_v47  ;;  %707 = vmatpush.msrb.mxu2 %v1740_v48  ;;  %v472_v45 = vld [vmem:[#allocation2 + $0x8] sm:$0xff] }
  0x8c   : > { %820 = vmatpush.msrb.mxu3 %v1757_v49  ;;  %930 = vmatpush.msrb.mxu0 %v1777_v50  ;;  %v1826_v48 = vld [vmem:[%s2967_s3 + $0x3e8] sm:$0xff]  ;;  %v1765_v49 = vld [vmem:[%s2967_s3 + $0x200] sm:$0xff] }
  0x8d   : > { %609 = vmatpush.msrb.mxu1 %v494_v51  ;;  %555 = vmatmul.f32.gmra.mxu0 %v504_v52  ;;  %v1794_v50 = vld [vmem:[%s2967_s3 + $0x2e8] sm:$0xff]  ;;  %v2445_v51 = vld [vmem:[#allocation2 + $0x30] sm:$0xff]  ;;  %v1844_v52 = vld [vmem:[%s2967_s3 + $0x478] sm:$0xff] }
  0x8e   : > { %594 = vmatmul.f32.gmra.mxu3 %v2301_v53  ;;  %708 = vmatpush.msrb.mxu2 %v1739_v54  ;;  %v1809_v54 = vld [vmem:[%s2967_s3 + $0x360] sm:$0xff] }
  0x8f   : > { %821 = vmatpush.msrb.mxu3 %v1756_v55  ;;  %931 = vmatpush.msrb.mxu0 %v1776_v56  ;;  %v1825_v55 = vld [vmem:[%s2967_s3 + $0x3e0] sm:$0xff] }
  0x90   : > { %610 = vmatpush.msrb.mxu1 %v493_v57  ;;  %709 = vmatpush.msrb.mxu2 %v1738_v58  ;;  %v1793_v56 = vld [vmem:[%s2967_s3 + $0x2e0] sm:$0xff]  ;;  %v1843_v57 = vld [vmem:[%s2967_s3 + $0x470] sm:$0xff]  ;;  %v1808_v58 = vld [vmem:[%s2967_s3 + $0x358] sm:$0xff] }
  0x91   : > { %822 = vmatpush.msrb.mxu3 %v1755_v1  ;;  %932 = vmatpush.msrb.mxu0 %v1775_v59  ;;  %v1824_v1 = vld [vmem:[%s2967_s3 + $0x3d8] sm:$0xff] }
  0x92   : > { %611 = vmatpush.msrb.mxu1 %v492_v6  ;;  %710 = vmatpush.msrb.mxu2 %v1737_v60  ;;  %v1792_v59 = vld [vmem:[%s2967_s3 + $0x2d8] sm:$0xff]  ;;  %v473_v60 = vld [vmem:[#allocation2 + $0x10] sm:$0xff] }
  0x93   : > { %823 = vmatpush.msrb.mxu3 %v1754_v61  ;;  %933 = vmatpush.msrb.mxu0 %v1774_v62  ;;  %v668_v6 = vld [vmem:[#allocation2 + $0x12] sm:$0xff]  ;;  %v1841_v62 = vld [vmem:[%s2967_s3 + $0x460] sm:$0xff] }
  0x94   : > { %612 = vmatpush.msrb.mxu1 %v491_v63  ;;  %585 = vmatmul.f32.gmra.mxu2 %v2340_v0  ;;  %v1807_v61 = vld [vmem:[%s2967_s3 + $0x350] sm:$0xff] }
  0x95   : > { %573 = vmatmul.f32.gmra.mxu1 %v2342_v2  ;;  %711 = vmatpush.msrb.mxu2 %v1736_v3  ;;  %v1823_v63 = vld [vmem:[%s2967_s3 + $0x3d0] sm:$0xff]  ;;  %v2485_v3 = vld [vmem:[#allocation2 + $0x38] sm:$0xff] }
  0x96   : > { %824 = vmatpush.msrb.mxu3 %v1753_v4  ;;  %934 = vmatpush.msrb.mxu0 %v1773_v5  ;;  %v1840_v4 = vld [vmem:[%s2967_s3 + $0x458] sm:$0xff]  ;;  %v1791_v5 = vld [vmem:[%s2967_s3 + $0x2d0] sm:$0xff] }
  0x97   : > { %613 = vmatpush.msrb.mxu1 %v490_v7  ;;  %558 = vmatmul.f32.gmra.mxu0 %v505_v8  ;;  %v1806_v7 = vld [vmem:[%s2967_s3 + $0x348] sm:$0xff] }
  0x98   : > { %597 = vmatmul.f32.gmra.mxu3 %v2358_v9  ;;  %712 = vmatpush.msrb.mxu2 %v1735_v10  ;;  %v1822_v8 = vld [vmem:[%s2967_s3 + $0x3c8] sm:$0xff]  ;;  %v1839_v10 = vld [vmem:[%s2967_s3 + $0x450] sm:$0xff] }
  0x99   : > { %825 = vmatpush.msrb.mxu3 %v1752_v11  ;;  %935 = vmatpush.msrb.mxu0 %v1772_v12  ;;  %v1790_v11 = vld [vmem:[%s2967_s3 + $0x2c8] sm:$0xff]  ;;  %v669_v12 = vld [vmem:[#allocation2 + $0x1a] sm:$0xff] }
  0x9a   : > { %614 = vmatpush.msrb.mxu1 %v489_v15  ;;  %713 = vmatpush.msrb.mxu2 %v1734_v16  ;;  %v474_v15 = vld [vmem:[#allocation2 + $0x18] sm:$0xff]  ;;  %v1805_v16 = vld [vmem:[%s2967_s3 + $0x340] sm:$0xff] }
  0x9b   : > { %826 = vmatpush.msrb.mxu3 %v1751_v18  ;;  %936 = vmatpush.msrb.mxu0 %v1771_v19  ;;  %v1821_v18 = vld [vmem:[%s2967_s3 + $0x3c0] sm:$0xff]  ;;  %v1838_v19 = vld [vmem:[%s2967_s3 + $0x448] sm:$0xff] }
  0x9c   : > { %615 = vmatpush.msrb.mxu1 %v488_v20  ;;  %714 = vmatpush.msrb.mxu2 %v1733_v21  ;;  %v1789_v20 = vld [vmem:[%s2967_s3 + $0x2c0] sm:$0xff]  ;;  %v2520_v21 = vld [vmem:[#allocation2 + $0x2a] sm:$0xff] }
  0x9d   : > { %827 = vmatpush.msrb.mxu3 %v1750_v22  ;;  %937 = vmatpush.msrb.mxu0 %v1770_v23  ;;  %v1804_v22 = vld [vmem:[%s2967_s3 + $0x338] sm:$0xff] }
  0x9e   : > { %616 = vmatpush.msrb.mxu1 %v487_v24  ;;  %715 = vmatmul.f32.vlgmr.msrb.gmra.mxu2 %v666_v25  ;;  %v1820_v23 = vld [vmem:[%s2967_s3 + $0x3b8] sm:$0xff]  ;;  %v1837_v24 = vld [vmem:[%s2967_s3 + $0x440] sm:$0xff] }
  0x9f   : > { %617 = vmatmul.f32.vlgmr.msrb.gmra.mxu1 %v471_v26  ;;  %828 = vmatpush.msrb.mxu3 %v1749_v27  ;;  %v1788_v25 = vld [vmem:[%s2967_s3 + $0x2b8] sm:$0xff]  ;;  %v1803_v27 = vld [vmem:[%s2967_s3 + $0x330] sm:$0xff] }
  0xa0   : > { %938 = vmatpush.msrb.mxu0 %v1769_v30  ;;  %1156 = vmatpush.msra.mxu2 %v1812_v31  ;;  %v2540_v26 = vld [vmem:[#allocation2 + $0x32] sm:$0xff] }
  0xa1   : > { %561 = vmatmul.f32.gmra.mxu0 %v506_v32  ;;  %829 = vmatmul.f32.vlgmr.msrb.gmra.mxu3 %v2406_v34  ;;  %v1819_v30 = vld [vmem:[%s2967_s3 + $0x3b0] sm:$0xff]  ;;  %v1836_v31 = vld [vmem:[%s2967_s3 + $0x438] sm:$0xff] }
  0xa2   : > { %939 = vmatpush.msrb.mxu0 %v1768_v35  ;;  %1270 = vmatpush.msra.mxu3 %v1828_v36  ;;  %v1787_v32 = vld [vmem:[%s2967_s3 + $0x2b0] sm:$0xff]  ;;  %v2563_v35 = vld [vmem:[#allocation2 + $0x60] sm:$0xff]  ;;  %v1802_v36 = vld [vmem:[%s2967_s3 + $0x328] sm:$0xff] }
  0xa3   : > { %1041 = vmatpush.msra.mxu1 %v1796_v37  ;;  %1157 = vmatpush.msra.mxu2 %v1811_v38  ;;  %v1818_v37 = vld [vmem:[%s2967_s3 + $0x3a8] sm:$0xff]  ;;  %v1835_v38 = vld [vmem:[%s2967_s3 + $0x430] sm:$0xff] }
  0xa4   : > { %940 = vmatpush.msrb.mxu0 %v1767_v39  ;;  %1271 = vmatpush.msra.mxu3 %v1827_v40  ;;  %v1786_v39 = vld [vmem:[%s2967_s3 + $0x2a8] sm:$0xff] }
  0xa5   : > { %1042 = vmatpush.msra.mxu1 %v1795_v41  ;;  %1158 = vmatpush.msra.mxu2 %v1810_v42  ;;  %v2580_v40 = vld [vmem:[#allocation2 + $0x42] sm:$0xff] }
  0xa6   : > { %941 = vmatpush.msrb.mxu0 %v1766_v43  ;;  %718 = vmatmul.f32.gmra.mxu2 %v667_v44  ;;  %v2583_v41 = vld [vmem:[#allocation2 + $0x68] sm:$0xff]  ;;  %v1801_v42 = vld [vmem:[%s2967_s3 + $0x320] sm:$0xff] }
  0xa7   : > { %620 = vmatmul.f32.gmra.mxu1 %v472_v45  ;;  %1272 = vmatpush.msra.mxu3 %v1826_v48  ;;  %v1817_v43 = vld [vmem:[%s2967_s3 + $0x3a0] sm:$0xff]  ;;  %v1834_v44 = vld [vmem:[%s2967_s3 + $0x428] sm:$0xff]  ;;  %v2599_v48 = vld [vmem:[#allocation2 + $0x52] sm:$0xff] }
  0xa8   : > { %942 = vmatpush.msrb.mxu0 %v1765_v49  ;;  %1043 = vmatpush.msra.mxu1 %v1794_v50  ;;  %v1785_v45 = vld [vmem:[%s2967_s3 + $0x2a0] sm:$0xff]  ;;  %v2602_v49 = vld [vmem:[#allocation2 + $0x78] sm:$0xff] }
  0xa9   : > { %832 = vmatmul.f32.gmra.mxu3 %v2445_v51  ;;  %943 = vmatmul.f32.vlgmr.msrb.gmra.mxu0 %v2187_v13  ;;  %v1842_v13 = vld [vmem:[%s2967_s3 + $0x468] sm:$0xff]  ;;  %v1800_v50 = vld [vmem:[%s2967_s3 + $0x318] sm:$0xff] }
  0xaa   : > { %1384 = vmatpush.msra.mxu0 %v1844_v52  ;;  %1159 = vmatpush.msra.mxu2 %v1809_v54  ;;  %v1833_v52 = vld [vmem:[%s2967_s3 + $0x420] sm:$0xff]  ;;  %v1784_v54 = vld [vmem:[%s2967_s3 + $0x298] sm:$0xff] }
  0xab   : > { %1273 = vmatpush.msra.mxu3 %v1825_v55  ;;  %1044 = vmatpush.msra.mxu1 %v1793_v56  ;;  %v2619_v55 = vld [vmem:[#allocation2 + $0x5a] sm:$0xff] }
  0xac   : > { %1385 = vmatpush.msra.mxu0 %v1843_v57  ;;  %1160 = vmatpush.msra.mxu2 %v1808_v58  ;;  %v2622_v56 = vld [vmem:[#allocation2 + $0x80] sm:$0xff]  ;;  %v1799_v57 = vld [vmem:[%s2967_s3 + $0x310] sm:$0xff] }
  0xad   : > { %1274 = vmatpush.msra.mxu3 %v1824_v1  ;;  %1045 = vmatpush.msra.mxu1 %v1792_v59  ;;  %v1815_v58 = vld [vmem:[%s2967_s3 + $0x390] sm:$0xff]  ;;  %v1832_v1 = vld [vmem:[%s2967_s3 + $0x418] sm:$0xff] }
  0xae   : > { %721 = vmatmul.f32.gmra.mxu2 %v668_v6  ;;  %1386 = vmatpush.msra.mxu0 %v1842_v13  ;;  %v1783_v59 = vld [vmem:[%s2967_s3 + $0x290] sm:$0xff]  ;;  %v2639_v6 = vld [vmem:[#allocation2 + $0x62] sm:$0xff] }
  0xaf   : > { %623 = vmatmul.f32.gmra.mxu1 %v473_v60  ;;  %1161 = vmatpush.msra.mxu2 %v1807_v61  ;;  %v2642_v13 = vld [vmem:[#allocation2 + $0x88] sm:$0xff] }
  0xb0   : > { %1387 = vmatpush.msra.mxu0 %v1841_v62  ;;  %1275 = vmatpush.msra.mxu3 %v1823_v63  ;;  %v1798_v60 = vld [vmem:[%s2967_s3 + $0x308] sm:$0xff]  ;;  %v1831_v62 = vld [vmem:[%s2967_s3 + $0x410] sm:$0xff] }
  0xb1   : > { %835 = vmatmul.f32.gmra.mxu3 %v2485_v3  ;;  %946 = vmatmul.f32.gmra.mxu0 %v2231_v29  ;;  %v783_v29 = vld [vmem:[#allocation2 + $0x40] sm:$0xff]  ;;  %v1814_v61 = vld [vmem:[%s2967_s3 + $0x388] sm:$0xff] }
  0xb2   : > { %1388 = vmatpush.msra.mxu0 %v1840_v4  ;;  %1046 = vmatpush.msra.mxu1 %v1791_v5  ;;  %v1782_v63 = vld [vmem:[%s2967_s3 + $0x288] sm:$0xff]  ;;  %v2662_v4 = vld [vmem:[#allocation2 + $0x90] sm:$0xff] }
  0xb3   : > { %1162 = vmatpush.msra.mxu2 %v1806_v7  ;;  %1276 = vmatpush.msra.mxu3 %v1822_v8  ;;  %v1797_v7 = vld [vmem:[%s2967_s3 + $0x300] sm:$0xff] }
  0xb4   : > { %1389 = vmatpush.msra.mxu0 %v1839_v10  ;;  %1047 = vmatpush.msra.mxu1 %v1790_v11  ;;  %v1813_v8 = vld [vmem:[%s2967_s3 + $0x380] sm:$0xff]  ;;  %v1830_v10 = vld [vmem:[%s2967_s3 + $0x408] sm:$0xff] }
  0xb5   : > { %1163 = vmatpush.msra.mxu2 %v1805_v16  ;;  %1277 = vmatpush.msra.mxu3 %v1821_v18  ;;  %v1781_v11 = vld [vmem:[%s2967_s3 + $0x280] sm:$0xff] }
  0xb6   : > { %724 = vmatmul.f32.gmra.mxu2 %v669_v12  ;;  %1390 = vmatpush.msra.mxu0 %v1838_v19  ;;  %v2681_v12 = vld [vmem:[#allocation2 + $0x7a] sm:$0xff] }
  0xb7   : > { %626 = vmatmul.f32.gmra.mxu1 %v474_v15  ;;  %1164 = vmatpush.msra.mxu2 %v1804_v22  ;;  %v2698_v22 = vld [vmem:[#allocation2 + $0x82] sm:$0xff] }
  0xb8   : > { %1048 = vmatpush.msra.mxu1 %v1789_v20  ;;  %1278 = vmatpush.msra.mxu3 %v1820_v23  ;;  %v1829_v20 = vld [vmem:[%s2967_s3 + $0x400] sm:$0xff] }
  0xb9   : > { %838 = vmatmul.f32.gmra.mxu3 %v783_v29  ;;  %949 = vmatmul.f32.gmra.mxu0 %v2285_v47  ;;  %v2523_v47 = vld [vmem:[#allocation2 + $0x50] sm:$0xff] }
  0xba   : > { %1391 = vmatpush.msra.mxu0 %v1837_v24  ;;  %1049 = vmatpush.msra.mxu1 %v1788_v25  ;;  %v2703_v24 = vld [vmem:[#allocation2 + $0xa8] sm:$0xff] }
  0xbb   : > { %1165 = vmatpush.msra.mxu2 %v1803_v27  ;;  %1279 = vmatpush.msra.mxu3 %v1819_v30  ;;  %v2705_v25 = vld [vmem:[#allocation2 + $0xa1] sm:$0xff] }
  0xbc   : > { %1392 = vmatpush.msra.mxu0 %v1836_v31  ;;  %1050 = vmatpush.msra.mxu1 %v1787_v32  ;;  %v2714_v32 = vld [vmem:[#allocation2 + $0x8a] sm:$0xff] }
  0xbd   : > { %1166 = vmatpush.msra.mxu2 %v1802_v36  ;;  %1280 = vmatpush.msra.mxu3 %v1818_v37  ;;  %v2719_v37 = vld [vmem:[#allocation2 + $0xb0] sm:$0xff] }
  0xbe   : > { %727 = vmatmul.f32.gmra.mxu2 %v2520_v21  ;;  %1393 = vmatpush.msra.mxu0 %v1835_v38  ;;  %v2721_v38 = vld [vmem:[#allocation2 + $0xa9] sm:$0xff] }
  0xbf   : > { %629 = vmatmul.f32.gmra.mxu1 %v2406_v34  ;;  %v2560_v34 = vld [vmem:[#allocation2 + $0x3a] sm:$0xff]  ;;  %1167 = vmatpush.msra.mxu2 %v1801_v42 }
  0xc0   : > { %1051 = vmatpush.msra.mxu1 %v1786_v39  ;;  %1281 = vmatpush.msra.mxu3 %v1817_v43  ;;  %v2730_v43 = vld [vmem:[#allocation2 + $0x92] sm:$0xff] }
  0xc1   : > { %841 = vmatmul.f32.gmra.mxu3 %v2523_v47  ;;  %952 = vmatmul.f32.gmra.mxu0 %v2342_v2  ;;  %v2543_v2 = vld [vmem:[#allocation2 + $0x58] sm:$0xff] }
  0xc2   : > { %1394 = vmatpush.msra.mxu0 %v1834_v44  ;;  %1052 = vmatpush.msra.mxu1 %v1785_v45  ;;  %v2733_v45 = vld [vmem:[#allocation2 + $0xb8] sm:$0xff] }
  0xc3   : > { %1168 = vmatpush.msra.mxu2 %v1800_v50  ;;  %v2735_v50 = vld [vmem:[#allocation2 + $0xb1] sm:$0xff] }
  0xc4   : > { %1395 = vmatpush.msra.mxu0 %v1833_v52  ;;  %1053 = vmatpush.msra.mxu1 %v1784_v54 }
  0xc5   : > { %1169 = vmatpush.msra.mxu2 %v1799_v57 }
  0xc6   : > { %730 = vmatmul.f32.gmra.mxu2 %v2540_v26  ;;  %1396 = vmatpush.msra.mxu0 %v1832_v1 }
  0xc7   : > { %632 = vmatmul.f32.gmra.mxu1 %v2445_v51  ;;  %v1816_v51 = vld [vmem:[%s2967_s3 + $0x398] sm:$0xff]  ;;  %1170 = vmatpush.msra.mxu2 %v1798_v60 }
  0xc8   : > { %1282 = vmatpush.msra.mxu3 %v1816_v51  ;;  %1054 = vmatpush.msra.mxu1 %v1783_v59 }
  0xc9   : > { %844 = vmatmul.f32.gmra.mxu3 %v2543_v2  ;;  %955 = vmatmul.f32.gmra.mxu0 %v2189_v14 }
  0xca   : > { %1283 = vmatpush.msra.mxu3 %v1815_v58  ;;  %1397 = vmatpush.msra.mxu0 %v1831_v62  ;;  %v2745_v58 = vld [vmem:[#allocation2 + $0xb9] sm:$0xff] }
  0xcb   : > { %1055 = vmatpush.msra.mxu1 %v1782_v63  ;;  %1171 = vmatpush.msra.mxu2 %v1797_v7 }
  0xcc   : > { %1284 = vmatpush.msra.mxu3 %v1814_v61  ;;  %1398 = vmatpush.msra.mxu0 %v1830_v10 }
  0xcd   : > { %1056 = vmatpush.msra.mxu1 %v1781_v11 }
  0xce   : > { %733 = vmatmul.f32.gmra.mxu2 %v2560_v34  ;;  %1285 = vmatpush.msra.mxu3 %v1813_v8 }
  0xcf   : > { %635 = vmatmul.f32.gmra.mxu1 %v2485_v3  ;;  %v2659_v3 = vld [vmem:[#allocation2 + $0x6a] sm:$0xff]  ;;  %1399 = vmatpush.msra.mxu0 %v1829_v20 }
  0xd1   : > { %847 = vmatmul.f32.gmra.mxu3 %v2563_v35  ;;  %958 = vmatmul.f32.gmra.mxu0 %v2229_v28 }
  0xd6   : > { %736 = vmatmul.f32.gmra.mxu2 %v2580_v40 }
  0xd7   : > { %638 = vmatmul.f32.gmra.mxu1 %v783_v29  ;;  %v2686_v29 = vld [vmem:[#allocation2 + $0xa0] sm:$0xff] }
  0xd9   : > { %850 = vmatmul.f32.gmra.mxu3 %v2583_v41  ;;  %961 = vmatmul.f32.gmra.mxu0 %v2283_v46 }
  0xde   : > { %739 = vmatmul.f32.gmra.mxu2 %v2599_v48 }
  0xdf   : > { %641 = vmatmul.f32.gmra.mxu1 %v2523_v47 }
  0xe1   : > { %853 = vmatmul.f32.gmra.mxu3 %v2602_v49  ;;  %964 = vmatmul.f32.gmra.mxu0 %v2340_v0 }
  0xe6   : > { %742 = vmatmul.f32.gmra.mxu2 %v2619_v55 }
  0xe7   : > { %644 = vmatmul.f32.gmra.mxu1 %v2543_v2 }
  0xe9   : > { %856 = vmatmul.f32.gmra.mxu3 %v2622_v56  ;;  %967 = vmatmul.f32.gmra.mxu0 %v2197_v17 }
  0xee   : > { %745 = vmatmul.f32.gmra.mxu2 %v2639_v6 }
  0xef   : > { %647 = vmatmul.f32.gmra.mxu1 %v2563_v35 }
  0xf1   : > { %859 = vmatmul.f32.gmra.mxu3 %v2642_v13  ;;  %970 = vmatmul.f32.gmra.mxu0 %v2243_v33 }
  0xf6   : > { %748 = vmatmul.f32.gmra.mxu2 %v2659_v3  ;;  %v2664_v5 = vpop.f32.mrf.mxu1 }
  0xf7   : > { %650 = vmatmul.f32.gmra.mxu1 %v2583_v41 }
  0xf9   : > { %862 = vmatmul.f32.gmra.mxu3 %v2662_v4  ;;  %973 = vmatmul.f32.gmra.mxu0 %v2301_v53 }
  0xfc   : > { %v2683_v15 = vpop.f32.mrf.mxu2  ;;  %v553_v19 = vpop.f32.mrf.mxu0 }
  0xfe   : > { %751 = vmatmul.f32.gmra.mxu2 %v2681_v12  ;;  %v2688_v16 = vpop.f32.mrf.mxu3 }
  0xff   : > { %653 = vmatmul.f32.gmra.mxu1 %v2602_v49  ;;  %v2691_v18 = vpop.f32.mrf.mxu1 }
 0x101   : > { %865 = vmatmul.f32.gmra.mxu3 %v2686_v29  ;;  %976 = vmatmul.f32.gmra.mxu0 %v2358_v9 }
 0x104   : > { %v2700_v23 = vpop.f32.mrf.mxu2 }
 0x106   : > { %754 = vmatmul.f32.gmra.mxu2 %v2698_v22 }
 0x107   : > { %656 = vmatmul.f32.gmra.mxu1 %v2622_v56  ;;  %v2708_v27 = vpop.f32.mrf.mxu3 }
 0x108   : > { %v2710_v30 = vpop.f32.mrf.mxu1 }
 0x109   : > { %868 = vmatmul.f32.gmra.mxu3 %v2703_v24  ;;  %979 = vmatmul.f32.gmra.mxu0 %v2705_v25 }
 0x10a   : > { %v556_v31 = vpop.f32.mrf.mxu0 }
 0x10d   : > { %v2716_v36 = vpop.f32.mrf.mxu2 }
 0x10e   : > { %757 = vmatmul.f32.gmra.mxu2 %v2714_v32 }
 0x10f   : > { %659 = vmatmul.f32.gmra.mxu1 %v2642_v13 }
 0x111   : > { %871 = vmatmul.f32.gmra.mxu3 %v2719_v37  ;;  %982 = vmatmul.f32.gmra.mxu0 %v2721_v38  ;;  %v2726_v39 = vpop.f32.mrf.mxu3 }
 0x112   : > { %v2728_v42 = vpop.f32.mrf.mxu1 }
 0x114   : > { %v559_v44 = vpop.f32.mrf.mxu0 }
 0x116   : > { %760 = vmatmul.f32.gmra.mxu2 %v2730_v43 }
 0x117   : > { %662 = vmatmul.f32.gmra.mxu1 %v2662_v4  ;;  %v2738_v51 = vpop.f32.mrf.mxu2 }
 0x119   : > { %874 = vmatmul.f32.gmra.mxu3 %v2733_v45  ;;  %985 = vmatmul.f32.gmra.mxu0 %v2735_v50 }
 0x11b   : > { %v2742_v52 = vpop.f32.mrf.mxu3 }
 0x11c   : > { %v618_v54 = vpop.f32.mrf.mxu1 }
 0x11d   : > { %v619_v1 = vadd.f32 %v618_v54, %v553_v19 }
 0x11e   : > { %v562_v57 = vpop.f32.mrf.mxu0  ;;  %1172 = vmatmul.f32.vlgmr.msra.gmra.mxu2 %v2523_v47 }
 0x11f   : > { %1057 = vmatmul.f32.vlgmr.msra.gmra.mxu1 %v2520_v21 }
 0x121   : > { %988 = vmatmul.f32.gmra.mxu0 %v2745_v58  ;;  %1286 = vmatmul.f32.vlgmr.msra.gmra.mxu3 %v2189_v14  ;;  %v716_v59 = vpop.f32.mrf.mxu2 }
 0x122   : > { %v764_v60 = vadd.f32 %v716_v59, %v619_v1 }
 0x124   : > { %v621_v61 = vpop.f32.mrf.mxu1  ;;  %v830_v62 = vpop.f32.mrf.mxu3 }
 0x125   : > { %v2750_v63 = vadd.f32 %v830_v62, %v764_v60  ;;  %v622_v47 = vadd.f32 %v621_v61, %v556_v31 }
 0x126   : > { %v2752_v7 = vpop.f32.mrf.mxu0  ;;  %1175 = vmatmul.f32.gmra.mxu2 %v2543_v2 }
 0x127   : > { %1060 = vmatmul.f32.gmra.mxu1 %v2540_v26 }
 0x129   : > { %1289 = vmatmul.f32.gmra.mxu3 %v2229_v28  ;;  %1400 = vmatmul.f32.vlgmr.msra.gmra.mxu0 %v2599_v48  ;;  %v719_v21 = vpop.f32.mrf.mxu2 }
 0x12a   : > { %v765_v8 = vadd.f32 %v719_v21, %v622_v47 }
 0x12c   : > { %v624_v14 = vpop.f32.mrf.mxu1  ;;  %v833_v10 = vpop.f32.mrf.mxu3 }
 0x12d   : > { %v2758_v11 = vadd.f32 %v833_v10, %v765_v8  ;;  %v625_v2 = vadd.f32 %v624_v14, %v559_v44 }
 0x12e   : > { %v2760_v19 = vpop.f32.mrf.mxu0  ;;  %1178 = vmatmul.f32.gmra.mxu2 %v2563_v35 }
 0x12f   : > { %1063 = vmatmul.f32.gmra.mxu1 %v2560_v34 }
 0x131   : > { %1292 = vmatmul.f32.gmra.mxu3 %v2283_v46  ;;  %1403 = vmatmul.f32.gmra.mxu0 %v2619_v55  ;;  %v722_v28 = vpop.f32.mrf.mxu2 }
 0x132   : > { %v766_v26 = vadd.f32 %v722_v28, %v625_v2 }
 0x134   : > { %v627_v20 = vpop.f32.mrf.mxu1  ;;  %v836_v31 = vpop.f32.mrf.mxu3 }
 0x135   : > { %v2766_v54 = vadd.f32 %v836_v31, %v766_v26  ;;  %v628_v35 = vadd.f32 %v627_v20, %v562_v57 }
 0x136   : > { %v2768_v1 = vpop.f32.mrf.mxu0  ;;  %1181 = vmatmul.f32.gmra.mxu2 %v2583_v41 }
 0x137   : > { %1066 = vmatmul.f32.gmra.mxu1 %v2580_v40 }
 0x139   : > { %1295 = vmatmul.f32.gmra.mxu3 %v2340_v0  ;;  %1406 = vmatmul.f32.gmra.mxu0 %v2639_v6  ;;  %v725_v46 = vpop.f32.mrf.mxu2 }
 0x13a   : > { %v767_v34 = vadd.f32 %v725_v46, %v628_v35 }
 0x13c   : > { %v630_v44 = vpop.f32.mrf.mxu1  ;;  %v839_v59 = vpop.f32.mrf.mxu3 }
 0x13d   : > { %v2774_v60 = vadd.f32 %v839_v59, %v767_v34  ;;  %v631_v41 = vadd.f32 %v630_v44, %v2664_v5  ;;  %v1359_v59 = vld [vmem:[#allocation2 + $0xa2] sm:$0xff] }
 0x13e   : > { %v2776_v61 = vpop.f32.mrf.mxu0  ;;  %1184 = vmatmul.f32.gmra.mxu2 %v2602_v49 }
 0x13f   : > { %1069 = vmatmul.f32.gmra.mxu1 %v2599_v48 }
 0x141   : > { %1298 = vmatmul.f32.gmra.mxu3 %v2197_v17  ;;  %1409 = vmatmul.f32.gmra.mxu0 %v2659_v3  ;;  %v728_v0 = vpop.f32.mrf.mxu2 }
 0x142   : > { %v768_v40 = vadd.f32 %v728_v0, %v631_v41 }
 0x144   : > { %v633_v57 = vpop.f32.mrf.mxu1  ;;  %v842_v62 = vpop.f32.mrf.mxu3 }
 0x145   : > { %v2783_v47 = vadd.f32 %v842_v62, %v768_v40  ;;  %v634_v48 = vadd.f32 %v633_v57, %v2691_v18  ;;  %v1360_v62 = vld [vmem:[#allocation2 + $0xaa] sm:$0xff] }
 0x146   : > { %v2785_v21 = vpop.f32.mrf.mxu0  ;;  %1187 = vmatmul.f32.gmra.mxu2 %v2622_v56 }
 0x147   : > { %1072 = vmatmul.f32.gmra.mxu1 %v2619_v55 }
 0x149   : > { %1301 = vmatmul.f32.gmra.mxu3 %v2243_v33  ;;  %1412 = vmatmul.f32.gmra.mxu0 %v2681_v12  ;;  %v731_v17 = vpop.f32.mrf.mxu2 }
 0x14a   : > { %v769_v49 = vadd.f32 %v731_v17, %v634_v48 }
 0x14c   : > { %v636_v5 = vpop.f32.mrf.mxu1  ;;  %v845_v8 = vpop.f32.mrf.mxu3 }
 0x14d   : > { %v2792_v14 = vadd.f32 %v845_v8, %v769_v49  ;;  %v637_v55 = vadd.f32 %v636_v5, %v2710_v30  ;;  %v1361_v8 = vld [vmem:[#allocation2 + $0xb2] sm:$0xff] }
 0x14e   : > { %v2794_v10 = vpop.f32.mrf.mxu0  ;;  %1190 = vmatmul.f32.gmra.mxu2 %v2642_v13 }
 0x14f   : > { %1075 = vmatmul.f32.gmra.mxu1 %v2639_v6 }
 0x151   : > { %1304 = vmatmul.f32.gmra.mxu3 %v2301_v53  ;;  %1415 = vmatmul.f32.gmra.mxu0 %v2698_v22  ;;  %v734_v33 = vpop.f32.mrf.mxu2 }
 0x152   : > { %v770_v56 = vadd.f32 %v734_v33, %v637_v55  ;;  %v1135_v55 = vld [vmem:[#allocation2 + $0xc8] sm:$0xff] }
 0x154   : > { %v639_v18 = vpop.f32.mrf.mxu1  ;;  %v848_v2 = vpop.f32.mrf.mxu3 }
 0x155   : > { %v2801_v28 = vadd.f32 %v848_v2, %v770_v56  ;;  %v640_v6 = vadd.f32 %v639_v18, %v2728_v42 }
 0x156   : > { %v2803_v26 = vpop.f32.mrf.mxu0  ;;  %1193 = vmatmul.f32.gmra.mxu2 %v2662_v4 }
 0x157   : > { %1078 = vmatmul.f32.gmra.mxu1 %v2659_v3 }
 0x159   : > { %1307 = vmatmul.f32.gmra.mxu3 %v2358_v9  ;;  %1418 = vmatmul.f32.gmra.mxu0 %v2714_v32  ;;  %v737_v53 = vpop.f32.mrf.mxu2 }
 0x15a   : > { %v771_v13 = vadd.f32 %v737_v53, %v640_v6  ;;  %v1249_v6 = vld [vmem:[#allocation2 + $0xc9] sm:$0xff] }
 0x15c   : > { %v642_v30 = vpop.f32.mrf.mxu1  ;;  %v851_v20 = vpop.f32.mrf.mxu3 }
 0x15d   : > { %v2810_v31 = vadd.f32 %v851_v20, %v771_v13  ;;  %v643_v3 = vadd.f32 %v642_v30, %v2683_v15  ;;  %v1136_v13 = vld [vmem:[#allocation2 + $0xd0] sm:$0xff] }
 0x15e   : > { %v2812_v35 = vpop.f32.mrf.mxu0  ;;  %1196 = vmatmul.f32.gmra.mxu2 %v2686_v29 }
 0x15f   : > { %1081 = vmatmul.f32.gmra.mxu1 %v2681_v12 }
 0x161   : > { %1310 = vmatmul.f32.gmra.mxu3 %v2705_v25  ;;  %1421 = vmatmul.f32.gmra.mxu0 %v2730_v43  ;;  %v740_v9 = vpop.f32.mrf.mxu2 }
 0x162   : > { %v772_v4 = vadd.f32 %v740_v9, %v643_v3 }
 0x164   : > { %v645_v42 = vpop.f32.mrf.mxu1  ;;  %v854_v46 = vpop.f32.mrf.mxu3 }
 0x165   : > { %v886_v34 = vadd.f32 %v854_v46, %v772_v4  ;;  %v646_v12 = vadd.f32 %v645_v42, %v2700_v23  ;;  %v1250_v4 = vld [vmem:[#allocation2 + $0xd1] sm:$0xff] }
 0x166   : > { %v968_v44 = vpop.f32.mrf.mxu0  ;;  %1199 = vmatmul.f32.gmra.mxu2 %v2703_v24  ;;  %v1363_v42 = vld [vmem:[#allocation2 + $0xca] sm:$0xff] }
 0x167   : > { %v2820_v41 = vadd.f32 %v968_v44, %v886_v34  ;;  %1084 = vmatmul.f32.gmra.mxu1 %v2698_v22 }
 0x169   : > { %1313 = vmatmul.f32.gmra.mxu3 %v2721_v38  ;;  %1424 = vmatmul.f32.gmra.mxu0 %v1359_v59  ;;  %v743_v15 = vpop.f32.mrf.mxu2 }
 0x16a   : > { %v773_v29 = vadd.f32 %v743_v15, %v646_v12 }
 0x16c   : > { %v648_v25 = vpop.f32.mrf.mxu1  ;;  %v857_v0 = vpop.f32.mrf.mxu3 }
 0x16d   : > { %v887_v40 = vadd.f32 %v857_v0, %v773_v29  ;;  %v649_v22 = vadd.f32 %v648_v25, %v2716_v36  ;;  %v1251_v0 = vld [vmem:[#allocation2 + $0xd9] sm:$0xff] }
 0x16e   : > { %v971_v57 = vpop.f32.mrf.mxu0  ;;  %1202 = vmatmul.f32.gmra.mxu2 %v2719_v37 }
 0x16f   : > { %v2826_v24 = vadd.f32 %v971_v57, %v887_v40  ;;  %1087 = vmatmul.f32.gmra.mxu1 %v2714_v32  ;;  %v1364_v40 = vld [vmem:[#allocation2 + $0xd2] sm:$0xff] }
 0x171   : > { %1316 = vmatmul.f32.gmra.mxu3 %v2735_v50  ;;  %1427 = vmatmul.f32.gmra.mxu0 %v1360_v62  ;;  %v746_v23 = vpop.f32.mrf.mxu2 }
 0x172   : > { %v774_v38 = vadd.f32 %v746_v23, %v649_v22  ;;  %v1138_v23 = vld [vmem:[#allocation2 + $0xe0] sm:$0xff] }
 0x174   : > { %v651_v48 = vpop.f32.mrf.mxu1  ;;  %v860_v17 = vpop.f32.mrf.mxu3 }
 0x175   : > { %v888_v49 = vadd.f32 %v860_v17, %v774_v38  ;;  %v652_v32 = vadd.f32 %v651_v48, %v2738_v51 }
 0x176   : > { %v974_v5 = vpop.f32.mrf.mxu0  ;;  %1205 = vmatmul.f32.gmra.mxu2 %v2733_v45  ;;  %v1362_v45 = vld [vmem:[#allocation2 + $0xba] sm:$0xff] }
 0x177   : > { %v2832_v37 = vadd.f32 %v974_v5, %v888_v49  ;;  %1090 = vmatmul.f32.gmra.mxu1 %v2730_v43  ;;  %v1252_v5 = vld [vmem:[#allocation2 + $0xe1] sm:$0xff] }
 0x179   : > { %1319 = vmatmul.f32.gmra.mxu3 %v2745_v58  ;;  %1430 = vmatmul.f32.gmra.mxu0 %v1361_v8  ;;  %v749_v36 = vpop.f32.mrf.mxu2 }
 0x17a   : > { %v775_v50 = vadd.f32 %v749_v36, %v652_v32  ;;  %v1365_v32 = vld [vmem:[#allocation2 + $0xda] sm:$0xff] }
 0x17c   : > { %v654_v33 = vpop.f32.mrf.mxu1  ;;  %v863_v56 = vpop.f32.mrf.mxu3 }
 0x17d   : > { %v889_v18 = vadd.f32 %v863_v56, %v775_v50  ;;  %v655_v43 = vadd.f32 %v654_v33, %v2688_v16 }
 0x17e   : > { %v977_v2 = vpop.f32.mrf.mxu0  ;;  %1208 = vmatmul.f32.gmra.mxu2 %v1135_v55 }
 0x17f   : > { %v2837_v53 = vadd.f32 %v977_v2, %v889_v18  ;;  %1093 = vmatmul.f32.gmra.mxu1 %v1359_v59  ;;  %v1137_v59 = vld [vmem:[#allocation2 + $0xd8] sm:$0xff]  ;;  %v992_v18 = vadd.f32 %v2752_v7, %v2750_v63 }
 0x181   : > { %1322 = vmatmul.f32.gmra.mxu3 %v1249_v6  ;;  %1433 = vmatmul.f32.gmra.mxu0 %v1362_v45  ;;  %v752_v51 = vpop.f32.mrf.mxu2  ;;  %v1366_v6 = vld [vmem:[#allocation2 + $0xe2] sm:$0xff] }
 0x182   : > { %v776_v58 = vadd.f32 %v752_v51, %v655_v43 }
 0x184   : > { %v657_v30 = vpop.f32.mrf.mxu1  ;;  %v866_v20 = vpop.f32.mrf.mxu3 }
 0x185   : > { %v890_v3 = vadd.f32 %v866_v20, %v776_v58  ;;  %v658_v34 = vadd.f32 %v657_v30, %v2708_v27  ;;  %v2856_v20 = vld [vmem:[%s2968_s4] ss:$0 sm:$0xff] }
 0x186   : > { %v980_v9 = vpop.f32.mrf.mxu0  ;;  %1211 = vmatmul.f32.gmra.mxu2 %v1136_v13 }
 0x187   : > { %v2840_v46 = vadd.f32 %v980_v9, %v890_v3  ;;  %1096 = vmatmul.f32.gmra.mxu1 %v1360_v62  ;;  %v993_v3 = vadd.f32 %v2760_v19, %v2758_v11 }
 0x189   : > { %1325 = vmatmul.f32.gmra.mxu3 %v1250_v4  ;;  %1436 = vmatmul.f32.gmra.mxu0 %v1363_v42  ;;  %v755_v16 = vpop.f32.mrf.mxu2 }
 0x18a   : > { %v777_v44 = vadd.f32 %v755_v16, %v658_v34 }
 0x18c   : > { %v660_v12 = vpop.f32.mrf.mxu1  ;;  %v869_v15 = vpop.f32.mrf.mxu3 }
 0x18d   : > { %v891_v29 = vadd.f32 %v869_v15, %v777_v44  ;;  %v661_v22 = vadd.f32 %v660_v12, %v2726_v39  ;;  %v994_v12 = vadd.f32 %v2768_v1, %v2766_v54 }
 0x18e   : > { %v983_v25 = vpop.f32.mrf.mxu0  ;;  %1214 = vmatmul.f32.gmra.mxu2 %v1137_v59 }
 0x18f   : > { %v2843_v57 = vadd.f32 %v983_v25, %v891_v29  ;;  %1099 = vmatmul.f32.gmra.mxu1 %v1361_v8 }
 0x191   : > { %1328 = vmatmul.f32.gmra.mxu3 %v1251_v0  ;;  %1439 = vmatmul.f32.gmra.mxu0 %v1364_v40  ;;  %v758_v27 = vpop.f32.mrf.mxu2 }
 0x192   : > { %v778_v62 = vadd.f32 %v758_v27, %v661_v22 }
 0x194   : > { %v663_v38 = vpop.f32.mrf.mxu1  ;;  %v872_v48 = vpop.f32.mrf.mxu3 }
 0x195   : > { %v892_v17 = vadd.f32 %v872_v48, %v778_v62  ;;  %v664_v50 = vadd.f32 %v663_v38, %v2742_v52 }
 0x196   : > { %v986_v49 = vpop.f32.mrf.mxu0  ;;  %1217 = vmatmul.f32.gmra.mxu2 %v1138_v23  ;;  %v995_v23 = vadd.f32 %v2776_v61, %v2774_v60 }
 0x197   : > { %v2846_v36 = vadd.f32 %v986_v49, %v892_v17  ;;  %1102 = vmatmul.f32.gmra.mxu1 %v1362_v45 }
 0x199   : > { %1331 = vmatmul.f32.gmra.mxu3 %v1252_v5  ;;  %1442 = vmatmul.f32.gmra.mxu0 %v1365_v32  ;;  %v761_v39 = vpop.f32.mrf.mxu2 }
 0x19a   : > { %v779_v8 = vadd.f32 %v761_v39, %v664_v50 }
 0x19c   : > { %v875_v55 = vpop.f32.mrf.mxu3  ;;  %v1058_v33 = vpop.f32.mrf.mxu1 }
 0x19d   : > { %v893_v56 = vadd.f32 %v875_v55, %v779_v8  ;;  %v1106_v51 = vadd.f32 %v1058_v33, %v992_v18 }
 0x19e   : > { %v989_v2 = vpop.f32.mrf.mxu0 }
 0x19f   : > { %v2851_v43 = vadd.f32 %v989_v2, %v893_v56 }
 0x1a1   : > { %1445 = vmatmul.f32.gmra.mxu0 %v1366_v6  ;;  %v1173_v58 = vpop.f32.mrf.mxu2  ;;  %v996_v6 = vadd.f32 %v2785_v21, %v2783_v47 }
 0x1a2   : > { %v1221_v45 = vadd.f32 %v1173_v58, %v1106_v51 }
 0x1a4   : > { %v1061_v13 = vpop.f32.mrf.mxu1  ;;  %v1287_v52 = vpop.f32.mrf.mxu3 }
 0x1a5   : > { %v1335_v30 = vadd.f32 %v1287_v52, %v1221_v45  ;;  %v1107_v9 = vadd.f32 %v1061_v13, %v993_v3 }
 0x1a6   : > { %v1401_v63 = vpop.f32.mrf.mxu0 }
 0x1a7   : > { %v1449_v7 = vadd.f32 %v1401_v63, %v1335_v30 }
 0x1a9   : > { %v1469_v4 = vadd.f32 %v2856_v20, %v1449_v7  ;;  %v1176_v42 = vpop.f32.mrf.mxu2 }
 0x1aa   : > { %v1222_v34 = vadd.f32 %v1176_v42, %v1107_v9 }
 0x1ab   : > { %1910 = vtanh.f32 %v1469_v4 }
 0x1ac   : > { %v1064_v16 = vpop.f32.mrf.mxu1  ;;  %v1290_v44 = vpop.f32.mrf.mxu3 }
 0x1ad   : > { %v1336_v59 = vadd.f32 %v1290_v44, %v1222_v34  ;;  %v1108_v25 = vadd.f32 %v1064_v16, %v994_v12  ;;  %v997_v16 = vadd.f32 %v2794_v10, %v2792_v14 }
 0x1ae   : > { %v1404_v15 = vpop.f32.mrf.mxu0 }
 0x1af   : > { %v1450_v29 = vadd.f32 %v1404_v15, %v1336_v59 }
 0x1b1   : > { %v1911_v11 = vpop.eup %1910  ;;  %v1470_v19 = vadd.f32 %v2856_v20, %v1450_v29  ;;  %v1179_v0 = vpop.f32.mrf.mxu2 }
 0x1b2   : > { %1502 = vst.msk [vmem:[%s2018_s10] sm:$0xff] %vm1501_vm8, %v1911_v11  ;;  %v1223_v40 = vadd.f32 %v1179_v0, %v1108_v25  ;;  %v1555_v38 = vmul.f32 %v1911_v11, %v1911_v11  ;;  %v1518_v32 = vsel %vm1501_vm8, %v1911_v11, 0.0 }
 0x1b3   : > { %1912 = vtanh.f32 %v1470_v19 }
 0x1b4   : > { %v1067_v22 = vpop.f32.mrf.mxu1  ;;  %v1293_v27 = vpop.f32.mrf.mxu3  ;;  %v1571_v60 = vsel %vm1501_vm8, %v1555_v38, 0.0 }
 0x1b5   : > { %v1337_v62 = vadd.f32 %v1293_v27, %v1223_v40  ;;  %v1109_v48 = vadd.f32 %v1067_v22, %v995_v23  ;;  %v998_v23 = vadd.f32 %v2803_v26, %v2801_v28 }
 0x1b6   : > { %v1407_v54 = vpop.f32.mrf.mxu0 }
 0x1b7   : > { %v1451_v1 = vadd.f32 %v1407_v54, %v1337_v62 }
 0x1b9   : > { %v1913_v17 = vpop.eup %1912  ;;  %v1471_v49 = vadd.f32 %v2856_v20, %v1451_v1  ;;  %v1182_v5 = vpop.f32.mrf.mxu2 }
 0x1ba   : > { %1503 = vst.msk [vmem:[%s2018_s10 + $0x8] sm:$0xff] %vm1501_vm8, %v1913_v17  ;;  %v1519_v50 = vsel %vm1501_vm8, %v1913_v17, 0.0  ;;  %v1556_v39 = vmul.f32 %v1913_v17, %v1913_v17  ;;  %v1224_v8 = vadd.f32 %v1182_v5, %v1109_v48 }
 0x1bb   : > { %v1520_v55 = vadd.f32 %v1519_v50, %v1518_v32  ;;  %1914 = vtanh.f32 %v1471_v49 }
 0x1bc   : > { %v1572_v61 = vsel %vm1501_vm8, %v1556_v39, 0.0  ;;  %v1070_v33 = vpop.f32.mrf.mxu1  ;;  %v1296_v56 = vpop.f32.mrf.mxu3 }
 0x1bd   : > { %v1573_v18 = vadd.f32 %v1572_v61, %v1571_v60  ;;  %v1338_v2 = vadd.f32 %v1296_v56, %v1224_v8  ;;  %v1110_v45 = vadd.f32 %v1070_v33, %v996_v6  ;;  %v999_v61 = vadd.f32 %v2812_v35, %v2810_v31 }
 0x1be   : > { %v1410_v51 = vpop.f32.mrf.mxu0 }
 0x1bf   : > { %v1452_v58 = vadd.f32 %v1410_v51, %v1338_v2 }
 0x1c1   : > { %v1915_v13 = vpop.eup %1914  ;;  %v1472_v52 = vadd.f32 %v2856_v20, %v1452_v58  ;;  %v1185_v30 = vpop.f32.mrf.mxu2 }
 0x1c2   : > { %1504 = vst.msk [vmem:[%s2018_s10 + $0x10] sm:$0xff] %vm1501_vm8, %v1915_v13  ;;  %v1521_v3 = vsel %vm1501_vm8, %v1915_v13, 0.0  ;;  %v1557_v63 = vmul.f32 %v1915_v13, %v1915_v13  ;;  %v1225_v7 = vadd.f32 %v1185_v30, %v1110_v45 }
 0x1c3   : > { %v1522_v9 = vadd.f32 %v1521_v3, %v1520_v55  ;;  %1916 = vtanh.f32 %v1472_v52 }
 0x1c4   : > { %v1574_v4 = vsel %vm1501_vm8, %v1557_v63, 0.0  ;;  %v1073_v42 = vpop.f32.mrf.mxu1  ;;  %v1299_v47 = vpop.f32.mrf.mxu3 }
 0x1c5   : > { %v1575_v21 = vadd.f32 %v1574_v4, %v1573_v18  ;;  %v1339_v34 = vadd.f32 %v1299_v47, %v1225_v7  ;;  %v1111_v12 = vadd.f32 %v1073_v42, %v997_v16 }
 0x1c6   : > { %v1413_v44 = vpop.f32.mrf.mxu0 }
 0x1c7   : > { %v1453_v59 = vadd.f32 %v1413_v44, %v1339_v34 }
 0x1c9   : > { %v1917_v15 = vpop.eup %1916  ;;  %v1473_v29 = vadd.f32 %v2856_v20, %v1453_v59  ;;  %v1188_v25 = vpop.f32.mrf.mxu2 }
 0x1ca   : > { %1505 = vst.msk [vmem:[%s2018_s10 + $0x18] sm:$0xff] %vm1501_vm8, %v1917_v15  ;;  %v1523_v11 = vsel %vm1501_vm8, %v1917_v15, 0.0  ;;  %v1558_v19 = vmul.f32 %v1917_v15, %v1917_v15  ;;  %v1226_v0 = vadd.f32 %v1188_v25, %v1111_v12 }
 0x1cb   : > { %v1524_v40 = vadd.f32 %v1523_v11, %v1522_v9  ;;  %1918 = vtanh.f32 %v1473_v29 }
 0x1cc   : > { %v1576_v22 = vsel %vm1501_vm8, %v1558_v19, 0.0  ;;  %v1076_v27 = vpop.f32.mrf.mxu1  ;;  %v1302_v14 = vpop.f32.mrf.mxu3 }
 0x1cd   : > { %v1577_v10 = vadd.f32 %v1576_v22, %v1575_v21  ;;  %v1340_v62 = vadd.f32 %v1302_v14, %v1226_v0  ;;  %v1112_v38 = vadd.f32 %v1076_v27, %v998_v23 }
 0x1ce   : > { %v1416_v54 = vpop.f32.mrf.mxu0 }
 0x1cf   : > { %v1454_v1 = vadd.f32 %v1416_v54, %v1340_v62 }
 0x1d1   : > { %v1919_v48 = vpop.eup %1918  ;;  %v1474_v17 = vadd.f32 %v2856_v20, %v1454_v1  ;;  %v1191_v49 = vpop.f32.mrf.mxu2 }
 0x1d2   : > { %1506 = vst.msk [vmem:[%s2018_s10 + $0x20] sm:$0xff] %vm1501_vm8, %v1919_v48  ;;  %v1525_v5 = vsel %vm1501_vm8, %v1919_v48, 0.0  ;;  %v1559_v32 = vmul.f32 %v1919_v48, %v1919_v48  ;;  %v1227_v50 = vadd.f32 %v1191_v49, %v1112_v38 }
 0x1d3   : > { %v1526_v39 = vadd.f32 %v1525_v5, %v1524_v40  ;;  %1920 = vtanh.f32 %v1474_v17 }
 0x1d4   : > { %v1578_v8 = vsel %vm1501_vm8, %v1559_v32, 0.0  ;;  %v1079_v55 = vpop.f32.mrf.mxu1  ;;  %v1305_v28 = vpop.f32.mrf.mxu3 }
 0x1d5   : > { %v1579_v26 = vadd.f32 %v1578_v8, %v1577_v10  ;;  %v1341_v60 = vadd.f32 %v1305_v28, %v1227_v50  ;;  %v1113_v18 = vadd.f32 %v1079_v55, %v999_v61 }
 0x1d6   : > { %v1419_v33 = vpop.f32.mrf.mxu0 }
 0x1d7   : > { %v1455_v56 = vadd.f32 %v1419_v33, %v1341_v60 }
 0x1d9   : > { %v1921_v2 = vpop.eup %1920  ;;  %v1475_v6 = vadd.f32 %v2856_v20, %v1455_v56  ;;  %v1194_v51 = vpop.f32.mrf.mxu2 }
 0x1da   : > { %1507 = vst.msk [vmem:[%s2018_s10 + $0x28] sm:$0xff] %vm1501_vm8, %v1921_v2  ;;  %v1527_v58 = vsel %vm1501_vm8, %v1921_v2, 0.0  ;;  %v1560_v45 = vmul.f32 %v1921_v2, %v1921_v2  ;;  %v1228_v13 = vadd.f32 %v1194_v51, %v1113_v18 }
 0x1db   : > { %v1528_v52 = vadd.f32 %v1527_v58, %v1526_v39  ;;  %1922 = vtanh.f32 %v1475_v6 }
 0x1dc   : > { %v1580_v30 = vsel %vm1501_vm8, %v1560_v45, 0.0  ;;  %v1082_v3 = vpop.f32.mrf.mxu1  ;;  %v1308_v31 = vpop.f32.mrf.mxu3 }
 0x1dd   : > { %v1581_v35 = vadd.f32 %v1580_v30, %v1579_v26  ;;  %v1342_v63 = vadd.f32 %v1308_v31, %v1228_v13  ;;  %v1114_v4 = vadd.f32 %v1082_v3, %v2820_v41 }
 0x1de   : > { %v1422_v7 = vpop.f32.mrf.mxu0 }
 0x1df   : > { %v1456_v9 = vadd.f32 %v1422_v7, %v1342_v63 }
 0x1e1   : > { %v1923_v42 = vpop.eup %1922  ;;  %v1476_v47 = vadd.f32 %v2856_v20, %v1456_v9  ;;  %v1197_v21 = vpop.f32.mrf.mxu2 }
 0x1e2   : > { %1508 = vst.msk [vmem:[%s2018_s10 + $0x30] sm:$0xff] %vm1501_vm8, %v1923_v42  ;;  %v1529_v34 = vsel %vm1501_vm8, %v1923_v42, 0.0  ;;  %v1561_v16 = vmul.f32 %v1923_v42, %v1923_v42  ;;  %v1229_v44 = vadd.f32 %v1197_v21, %v1114_v4 }
 0x1e3   : > { %v1530_v59 = vadd.f32 %v1529_v34, %v1528_v52  ;;  %1924 = vtanh.f32 %v1476_v47 }
 0x1e4   : > { %v1582_v12 = vsel %vm1501_vm8, %v1561_v16, 0.0  ;;  %v1085_v15 = vpop.f32.mrf.mxu1  ;;  %v1311_v29 = vpop.f32.mrf.mxu3 }
 0x1e5   : > { %v1583_v25 = vadd.f32 %v1582_v12, %v1581_v35  ;;  %v1343_v11 = vadd.f32 %v1311_v29, %v1229_v44  ;;  %v1115_v0 = vadd.f32 %v1085_v15, %v2826_v24 }
 0x1e6   : > { %v1425_v41 = vpop.f32.mrf.mxu0 }
 0x1e7   : > { %v1457_v19 = vadd.f32 %v1425_v41, %v1343_v11 }
 0x1e9   : > { %v1925_v40 = vpop.eup %1924  ;;  %v1477_v22 = vadd.f32 %v2856_v20, %v1457_v19  ;;  %v1200_v27 = vpop.f32.mrf.mxu2 }
 0x1ea   : > { %1509 = vst.msk [vmem:[%s2018_s10 + $0x38] sm:$0xff] %vm1501_vm8, %v1925_v40  ;;  %v1531_v14 = vsel %vm1501_vm8, %v1925_v40, 0.0  ;;  %v1562_v10 = vmul.f32 %v1925_v40, %v1925_v40  ;;  %v1230_v62 = vadd.f32 %v1200_v27, %v1115_v0 }
 0x1eb   : > { %v1532_v23 = vadd.f32 %v1531_v14, %v1530_v59  ;;  %1926 = vtanh.f32 %v1477_v22 }
 0x1ec   : > { %v1584_v54 = vsel %vm1501_vm8, %v1562_v10, 0.0  ;;  %v1088_v1 = vpop.f32.mrf.mxu1  ;;  %v1314_v38 = vpop.f32.mrf.mxu3 }
 0x1ed   : > { %v1585_v48 = vadd.f32 %v1584_v54, %v1583_v25  ;;  %v1344_v17 = vadd.f32 %v1314_v38, %v1230_v62  ;;  %v1116_v5 = vadd.f32 %v1088_v1, %v2832_v37 }
 0x1ee   : > { %v1428_v24 = vpop.f32.mrf.mxu0 }
 0x1ef   : > { %v1458_v49 = vadd.f32 %v1428_v24, %v1344_v17 }
 0x1f1   : > { %v1927_v32 = vpop.eup %1926  ;;  %v1478_v50 = vadd.f32 %v2856_v20, %v1458_v49  ;;  %v1203_v39 = vpop.f32.mrf.mxu2 }
 0x1f2   : > { %1510 = vst.msk [vmem:[%s2018_s10 + $0x40] sm:$0xff] %vm1501_vm8, %v1927_v32  ;;  %v1533_v8 = vsel %vm1501_vm8, %v1927_v32, 0.0  ;;  %v1563_v55 = vmul.f32 %v1927_v32, %v1927_v32  ;;  %v1231_v28 = vadd.f32 %v1203_v39, %v1116_v5 }
 0x1f3   : > { %v1534_v26 = vadd.f32 %v1533_v8, %v1532_v23  ;;  %1928 = vtanh.f32 %v1478_v50 }
 0x1f4   : > { %v1586_v60 = vsel %vm1501_vm8, %v1563_v55, 0.0  ;;  %v1091_v61 = vpop.f32.mrf.mxu1  ;;  %v1317_v33 = vpop.f32.mrf.mxu3 }
 0x1f5   : > { %v1587_v56 = vadd.f32 %v1586_v60, %v1585_v48  ;;  %v1345_v18 = vadd.f32 %v1317_v33, %v1231_v28  ;;  %v1117_v6 = vadd.f32 %v1091_v61, %v2837_v53 }
 0x1f6   : > { %v1431_v37 = vpop.f32.mrf.mxu0 }
 0x1f7   : > { %v1459_v2 = vadd.f32 %v1431_v37, %v1345_v18 }
 0x1f9   : > { %v1929_v51 = vpop.eup %1928  ;;  %v1479_v58 = vadd.f32 %v2856_v20, %v1459_v2  ;;  %v1206_v45 = vpop.f32.mrf.mxu2 }
 0x1fa   : > { %1511 = vst.msk [vmem:[%s2018_s10 + $0x48] sm:$0xff] %vm1501_vm8, %v1929_v51  ;;  %v1535_v13 = vsel %vm1501_vm8, %v1929_v51, 0.0  ;;  %v1564_v52 = vmul.f32 %v1929_v51, %v1929_v51  ;;  %v1232_v30 = vadd.f32 %v1206_v45, %v1117_v6 }
 0x1fb   : > { %v1536_v3 = vadd.f32 %v1535_v13, %v1534_v26  ;;  %1930 = vtanh.f32 %v1479_v58 }
 0x1fc   : > { %v1588_v31 = vsel %vm1501_vm8, %v1564_v52, 0.0  ;;  %v1094_v35 = vpop.f32.mrf.mxu1  ;;  %v1320_v63 = vpop.f32.mrf.mxu3 }
 0x1fd   : > { %v1589_v7 = vadd.f32 %v1588_v31, %v1587_v56  ;;  %v1346_v9 = vadd.f32 %v1320_v63, %v1232_v30  ;;  %v1118_v42 = vadd.f32 %v1094_v35, %v2840_v46 }
 0x1fe   : > { %v1434_v53 = vpop.f32.mrf.mxu0 }
 0x1ff   : > { %v1460_v4 = vadd.f32 %v1434_v53, %v1346_v9 }
 0x201   : > { %v1931_v47 = vpop.eup %1930  ;;  %v1480_v21 = vadd.f32 %v2856_v20, %v1460_v4  ;;  %v1209_v34 = vpop.f32.mrf.mxu2 }
 0x202   : > { %1512 = vst.msk [vmem:[%s2018_s10 + $0x50] sm:$0xff] %vm1501_vm8, %v1931_v47  ;;  %v1537_v16 = vsel %vm1501_vm8, %v1931_v47, 0.0  ;;  %v1565_v44 = vmul.f32 %v1931_v47, %v1931_v47  ;;  %v1233_v59 = vadd.f32 %v1209_v34, %v1118_v42 }
 0x203   : > { %v1538_v12 = vadd.f32 %v1537_v16, %v1536_v3  ;;  %1932 = vtanh.f32 %v1480_v21 }
 0x204   : > { %v1590_v15 = vsel %vm1501_vm8, %v1565_v44, 0.0  ;;  %v1097_v29 = vpop.f32.mrf.mxu1  ;;  %v1323_v25 = vpop.f32.mrf.mxu3 }
 0x205   : > { %v1591_v11 = vadd.f32 %v1590_v15, %v1589_v7  ;;  %v1347_v41 = vadd.f32 %v1323_v25, %v1233_v59  ;;  %v1119_v0 = vadd.f32 %v1097_v29, %v2843_v57 }
 0x206   : > { %v1437_v46 = vpop.f32.mrf.mxu0 }
 0x207   : > { %v1461_v19 = vadd.f32 %v1437_v46, %v1347_v41 }
 0x209   : > { %v1933_v40 = vpop.eup %1932  ;;  %v1481_v22 = vadd.f32 %v2856_v20, %v1461_v19  ;;  %v1212_v27 = vpop.f32.mrf.mxu2 }
 0x20a   : > { %1513 = vst.msk [vmem:[%s2018_s10 + $0x58] sm:$0xff] %vm1501_vm8, %v1933_v40  ;;  %v1539_v14 = vsel %vm1501_vm8, %v1933_v40, 0.0  ;;  %v1566_v10 = vmul.f32 %v1933_v40, %v1933_v40  ;;  %v1234_v62 = vadd.f32 %v1212_v27, %v1119_v0 }
 0x20b   : > { %v1540_v23 = vadd.f32 %v1539_v14, %v1538_v12  ;;  %1934 = vtanh.f32 %v1481_v22 }
 0x20c   : > { %v1592_v54 = vsel %vm1501_vm8, %v1566_v10, 0.0  ;;  %v1100_v1 = vpop.f32.mrf.mxu1  ;;  %v1326_v38 = vpop.f32.mrf.mxu3 }
 0x20d   : > { %v1593_v48 = vadd.f32 %v1592_v54, %v1591_v11  ;;  %v1348_v17 = vadd.f32 %v1326_v38, %v1234_v62  ;;  %v1120_v49 = vadd.f32 %v1100_v1, %v2846_v36 }
 0x20e   : > { %v1440_v57 = vpop.f32.mrf.mxu0 }
 0x20f   : > { %v1462_v24 = vadd.f32 %v1440_v57, %v1348_v17 }
 0x211   : > { %v1935_v5 = vpop.eup %1934  ;;  %v1482_v32 = vadd.f32 %v2856_v20, %v1462_v24  ;;  %v1215_v50 = vpop.f32.mrf.mxu2 }
 0x212   : > { %1514 = vst.msk [vmem:[%s2018_s10 + $0x60] sm:$0xff] %vm1501_vm8, %v1935_v5  ;;  %v1541_v39 = vsel %vm1501_vm8, %v1935_v5, 0.0  ;;  %v1567_v8 = vmul.f32 %v1935_v5, %v1935_v5  ;;  %v1235_v55 = vadd.f32 %v1215_v50, %v1120_v49 }
 0x213   : > { %v1542_v28 = vadd.f32 %v1541_v39, %v1540_v23  ;;  %1936 = vtanh.f32 %v1482_v32 }
 0x214   : > { %v1594_v26 = vsel %vm1501_vm8, %v1567_v8, 0.0  ;;  %v1329_v60 = vpop.f32.mrf.mxu3  ;;  %v1103_v33 = vpop.f32.mrf.mxu1 }
 0x215   : > { %v1595_v61 = vadd.f32 %v1594_v26, %v1593_v48  ;;  %v1349_v56 = vadd.f32 %v1329_v60, %v1235_v55  ;;  %v1121_v37 = vadd.f32 %v1103_v33, %v2851_v43 }
 0x216   : > { %v1443_v36 = vpop.f32.mrf.mxu0 }
 0x217   : > { %v1463_v18 = vadd.f32 %v1443_v36, %v1349_v56 }
 0x219   : > { %v1937_v2 = vpop.eup %1936  ;;  %v1483_v6 = vadd.f32 %v2856_v20, %v1463_v18  ;;  %v1218_v51 = vpop.f32.mrf.mxu2 }
 0x21a   : > { %1515 = vst.msk [vmem:[%s2018_s10 + $0x68] sm:$0xff] %vm1501_vm8, %v1937_v2  ;;  %v1543_v58 = vsel %vm1501_vm8, %v1937_v2, 0.0  ;;  %v1568_v45 = vmul.f32 %v1937_v2, %v1937_v2  ;;  %v1236_v13 = vadd.f32 %v1218_v51, %v1121_v37 }
 0x21b   : > { %v1544_v52 = vadd.f32 %v1543_v58, %v1542_v28  ;;  %1938 = vtanh.f32 %v1483_v6 }
 0x21c   : > { %v1596_v30 = vsel %vm1501_vm8, %v1568_v45, 0.0  ;;  %v1332_v3 = vpop.f32.mrf.mxu3 }
 0x21d   : > { %v1597_v31 = vadd.f32 %v1596_v30, %v1595_v61  ;;  %v1350_v35 = vadd.f32 %v1332_v3, %v1236_v13 }
 0x21e   : > { %v1446_v43 = vpop.f32.mrf.mxu0 }
 0x21f   : > { %v1464_v63 = vadd.f32 %v1446_v43, %v1350_v35 }
 0x221   : > { %v1939_v7 = vpop.eup %1938  ;;  %v1484_v9 = vadd.f32 %v2856_v20, %v1464_v63 }
 0x222   : > { %1516 = vst.msk [vmem:[%s2018_s10 + $0x70] sm:$0xff] %vm1501_vm8, %v1939_v7  ;;  %v1545_v53 = vsel %vm1501_vm8, %v1939_v7, 0.0  ;;  %v1569_v4 = vmul.f32 %v1939_v7, %v1939_v7 }
 0x223   : > { %v1546_v42 = vadd.f32 %v1545_v53, %v1544_v52  ;;  %1940 = vtanh.f32 %v1484_v9 }
 0x224   : > { %v1598_v47 = vsel %vm1501_vm8, %v1569_v4, 0.0 }
 0x225   : > { %v1599_v21 = vadd.f32 %v1598_v47, %v1597_v31 }
 0x229   : > { %v1941_v34 = vpop.eup %1940 }
 0x22a   : > { %1517 = vst.msk [vmem:[%s2018_s10 + $0x78] sm:$0xff] %vm1501_vm8, %v1941_v34  ;;  %v1547_v16 = vsel %vm1501_vm8, %v1941_v34, 0.0  ;;  %v1570_v44 = vmul.f32 %v1941_v34, %v1941_v34 }
 0x22b   : > { %v1548_v59 = vadd.f32 %v1547_v16, %v1546_v42 }
 0x22c   : > { %v1600_v12 = vsel %vm1501_vm8, %v1570_v44, 0.0 }
 0x22d   : > { %v1549_v20 = vrot.slane %v1548_v59, 4  ;;  %v1601_v15 = vadd.f32 %v1600_v12, %v1599_v21 }
 0x22f   : > { %v1550_v29 = vadd.f32 %v1549_v20, %v1548_v59  ;;  %v1602_v25 = vrot.slane %v1601_v15, 4 }
 0x231   : > { %v1551_v11 = vrot.slane %v1550_v29, 2  ;;  %v1603_v41 = vadd.f32 %v1602_v25, %v1601_v15 }
 0x233   : > { %v1552_v46 = vadd.f32 %v1551_v11, %v1550_v29  ;;  %v1604_v19 = vrot.slane %v1603_v41, 2 }
 0x235   : > { %v1553_v0 = vrot.slane %v1552_v46, 1  ;;  %v1605_v40 = vadd.f32 %v1604_v19, %v1603_v41 }
 0x237   : > { %v1606_v22 = vrot.slane %v1605_v40, 1  ;;  %v1554_v27 = vadd.f32 %v1553_v0, %v1552_v46 }
 0x239   : > { %v1607_v14 = vadd.f32 %v1606_v22, %v1605_v40 }
 0x23b   : > { %v1609_v10 = vsel %vm1608_vm9, %v1554_v27, %v1607_v14 }
 0x23c   : > { %1611 = vst.msk [vmem:[%s2012_s7] sm:$0x3] %vm1610_vm10, %v1609_v10 }
 0x23d PF: > { %s17_s21 = sadd.s32 1, %s1948_s21  }
 0x23e   : > { %p14_p7 = scmp.ge.s32.totalorder %s17_s21, 10  }
 0x240   :  { %16 = sbr.rel (!%p14_p7) target bundleno = 1 (0x1), region = 101 }

</bundles_post_ra>
